<compile_context>
chip_gen: v6e
topology: v6e:2x2x1
jax: 0.10.0
libtpu: 0.0.40
codegen_flags: <defaults>
</compile_context>

<pallas_src>
import jax
import jax.numpy as jnp
from jax.experimental import pallas as pl
from jax.experimental.pallas import tpu as pltpu

LANE = 128
COMPUTE_DTYPE = jnp.float32   # use jnp.bfloat16 on v6e / v7x for large, memory-bound batches


# ------------------------------- helpers ----------------------------------- #

def _round_up(n, m):
    return ((n + m - 1) // m) * m


def _pad2d(x, rows, cols):
    r, c = x.shape
    return jnp.pad(x, ((0, rows - r), (0, cols - c)))


# ----------------------------- Pallas kernel ------------------------------- #

def value_net_kernel(x_ref, w1_ref, b1_ref, w2_ref, b2_ref, w3_ref, b3_ref,
                     w4_ref, b4_ref, o_ref):
    # Layer 1: conv (folded to a dense GEMM) + bias + ReLU.  f32 accumulate, f32 epilogue.
    a = jnp.dot(x_ref[...], w1_ref[...], preferred_element_type=jnp.float32)
    a = jnp.maximum(a + b1_ref[...], 0.0)
    # Layer 2: cnn_fc + ReLU
    a = jnp.dot(a.astype(w2_ref.dtype), w2_ref[...], preferred_element_type=jnp.float32)
    a = jnp.maximum(a + b2_ref[...], 0.0)
    # Layer 3: mlp hidden + ReLU
    a = jnp.dot(a.astype(w3_ref.dtype), w3_ref[...], preferred_element_type=jnp.float32)
    a = jnp.maximum(a + b3_ref[...], 0.0)
    # Layer 4: mlp out (no activation)
    y = jnp.dot(a.astype(w4_ref.dtype), w4_ref[...], preferred_element_type=jnp.float32)
    o_ref[...] = (y + b4_ref[...]).astype(o_ref.dtype)


# --------------------------- parameter helpers ------------------------------ #

def init_linear(key, fan_in, fan_out):
    kw, kb = jax.random.split(key)
    bound = 1.0 / (fan_in ** 0.5)
    w = jax.random.uniform(kw, (fan_in, fan_out), jnp.float32, -bound, bound)
    b = jax.random.uniform(kb, (fan_out,), jnp.float32, -bound, bound)
    return w, b


def init_conv(key, out_c, in_c, k):
    kw, kb = jax.random.split(key)
    fan_in = in_c * k * k
    bound = 1.0 / (fan_in ** 0.5)
    w = jax.random.uniform(kw, (out_c, in_c, k, k), jnp.float32, -bound, bound)
    b = jax.random.uniform(kb, (out_c,), jnp.float32, -bound, bound)
    return w, b


def init_value_network(key, state_shape, hidden_dims, conv_layers):
    C, H, W = state_shape
    (filters, ksize), = conv_layers
    k0, k1, k2, k3 = jax.random.split(key, 4)
    Ho, Wo = H - ksize + 1, W - ksize + 1
    return {
        "conv": init_conv(k0, filters, C, ksize),
        "cnn_fc": init_linear(k1, filters * Ho * Wo, hidden_dims[0]),
        "mlp_h0": init_linear(k2, hidden_dims[0], hidden_dims[0]),
        "mlp_out": init_linear(k3, hidden_dims[0], 1),
    }


def pack_params(params, state_shape, compute_dtype=jnp.float32):
    """Fold the conv into a dense operator matrix and zero-pad every feature dim to a
    multiple of the 128-lane width.  Pure layout/weight plumbing (no in-kernel cost)."""
    C, H, W = state_shape
    conv_w, conv_b = params["conv"]                 # (O, C, KH, KW), (O,)
    O, _, KH, KW = conv_w.shape
    Ho, Wo = H - KH + 1, W - KW + 1

    # Dense conv operator:  M[(c,r,s), (o,i,j)] = w[o,c,r-i,s-j] where valid, else 0.
    # Row order matches x.reshape(-1, C*H*W) (NCHW); column order matches PyTorch's
    # flatten of the (B, O, Ho, Wo) conv output, so cnn_fc's weight is used unmodified.
    e_h = (jnp.arange(H)[:, None, None]
           == (jnp.arange(Ho)[None, :, None] + jnp.arange(KH)[None, None, :])
           ).astype(conv_w.dtype)
    e_w = (jnp.arange(W)[:, None, None]
           == (jnp.arange(Wo)[None, :, None] + jnp.arange(KW)[None, None, :])
           ).astype(conv_w.dtype)
    w1 = jnp.einsum("ockl,rik,sjl->crsoij", conv_w, e_h, e_w)
    w1 = w1.reshape(C * H * W, O * Ho * Wo)
    b1 = jnp.repeat(conv_b, Ho * Wo)

    w2, b2 = params["cnn_fc"]
    w3, b3 = params["mlp_h0"]
    w4, b4 = params["mlp_out"]

    k1 = _round_up(C * H * W, LANE)
    n1 = _round_up(O * Ho * Wo, LANE)
    n2 = _round_up(w2.shape[1], LANE)
    n3 = _round_up(w3.shape[1], LANE)
    n4 = _round_up(w4.shape[1], LANE)

    return {
        "w1": _pad2d(w1, k1, n1).astype(compute_dtype),
        "b1": _pad2d(b1.reshape(1, -1), 1, n1).astype(jnp.float32),
        "w2": _pad2d(w2, n1, n2).astype(compute_dtype),
        "b2": _pad2d(b2.reshape(1, -1), 1, n2).astype(jnp.float32),
        "w3": _pad2d(w3, n2, n3).astype(compute_dtype),
        "b3": _pad2d(b3.reshape(1, -1), 1, n3).astype(jnp.float32),
        "w4": _pad2d(w4, n3, n4).astype(compute_dtype),
        "b4": _pad2d(b4.reshape(1, -1), 1, n4).astype(jnp.float32),
        "out_dim": int(w4.shape[1]),
    }


# ----------------------------- forward pass --------------------------------- #

def value_network_forward(s, packed, state_shape, *, tile_b=256):
    C, H, W = state_shape
    x = s.reshape(-1, C * H * W)                     # torch.reshape(s, (-1, *state_shape)) + flatten
    B = x.shape[0]

    k1, n1 = packed["w1"].shape
    n2 = packed["w2"].shape[1]
    n3 = packed["w3"].shape[1]
    n4 = packed["w4"].shape[1]

    x = x.astype(packed["w1"].dtype)
    if x.shape[1] != k1:                             # pad feature dim to a lane multiple
        x = jnp.pad(x, ((0, 0), (0, k1 - x.shape[1])))

    # Bounded batch tile (decouples VMEM from batch size; 8-row sublane alignment).
    tile_b = min(tile_b, _round_up(B, 8))
    b_pad = _round_up(B, tile_b)
    if b_pad != B:
        x = jnp.pad(x, ((0, b_pad - B), (0, 0)))

    itemsize = jnp.dtype(packed["w1"].dtype).itemsize
    cost = pl.CostEstimate(
        flops=2 * b_pad * (k1 * n1 + n1 * n2 + n2 * n3 + n3 * n4),
        transcendentals=0,
        bytes_accessed=int(b_pad * k1 * itemsize
                           + (k1 * n1 + n1 * n2 + n2 * n3 + n3 * n4) * itemsize
                           + b_pad * n4 * 4),
    )

    out = pl.pallas_call(
        value_net_kernel,
        out_shape=jax.ShapeDtypeStruct((b_pad, n4), jnp.float32),
        grid=(b_pad // tile_b,),
        in_specs=[
            pl.BlockSpec((tile_b, k1), lambda i: (i, 0)),   # activations: tiled over batch
            pl.BlockSpec((k1, n1), lambda i: (0, 0)),        # weights/biases: constant index
            pl.BlockSpec((1, n1), lambda i: (0, 0)),         #  -> VMEM-resident across tiles
            pl.BlockSpec((n1, n2), lambda i: (0, 0)),
            pl.BlockSpec((1, n2), lambda i: (0, 0)),
            pl.BlockSpec((n2, n3), lambda i: (0, 0)),
            pl.BlockSpec((1, n3), lambda i: (0, 0)),
            pl.BlockSpec((n3, n4), lambda i: (0, 0)),
            pl.BlockSpec((1, n4), lambda i: (0, 0)),
        ],
        out_specs=pl.BlockSpec((tile_b, n4), lambda i: (i, 0)),
        compiler_params=pltpu.CompilerParams(
            dimension_semantics=("parallel",),
            vmem_limit_bytes=48 * 1024 * 1024,
        ),
        cost_estimate=cost,
    )(x, packed["w1"], packed["b1"], packed["w2"], packed["b2"],
      packed["w3"], packed["b3"], packed["w4"], packed["b4"])

    # Only the final HBM store is narrow: slice padded lanes / padded batch rows away.
    return out[:B, :packed["out_dim"]]


# ------------------------- pure-JAX reference ------------------------------- #

def value_network_reference(s, params, state_shape):
    C, H, W = state_shape
    s = s.reshape(-1, C, H, W)
    conv_w, conv_b = params["conv"]
    y = jax.lax.conv_general_dilated(
        s, conv_w, window_strides=(1, 1), padding="VALID",
        dimension_numbers=("NCHW", "OIHW", "NCHW"))
    y = jax.nn.relu(y + conv_b[None, :, None, None])
    flat = y.reshape(y.shape[0], -1)
    x = jax.nn.relu(flat @ params["cnn_fc"][0] + params["cnn_fc"][1])
    x = jax.nn.relu(x @ params["mlp_h0"][0] + params["mlp_h0"][1])
    x = x @ params["mlp_out"][0] + params["mlp_out"][1]
    return x


# --------------------------------- main -------------------------------------- #

if __name__ == "__main__":
    state_shape = (4, 16, 16)      # (C, H, W)
    hidden_dims = (32,)
    conv_layers = ((8, 3),)
    batch = 2

    key = jax.random.PRNGKey(0)
    k_params, k_input = jax.random.split(key)
    params = init_value_network(k_params, state_shape, hidden_dims, conv_layers)
    s = jax.random.normal(k_input, (batch, *state_shape), dtype=jnp.float32)

    packed = pack_params(params, state_shape, compute_dtype=COMPUTE_DTYPE)
    out = jax.block_until_ready(value_network_forward(s, packed, state_shape))
    ref = jax.block_until_ready(value_network_reference(s, params, state_shape))

    assert out.shape == (batch, 1), out.shape
    tol = 1e-4 if COMPUTE_DTYPE == jnp.float32 else 2e-2
    assert jnp.allclose(out, ref, atol=tol, rtol=tol), (out, ref)
    print("KERNEL_OK")
</pallas_src>

<mosaic_0001>
module attributes {stable_mosaic.version = 11 : i64} {
  func.func @value_net_kernel(%arg0: i32, %arg1: memref<8x1024xf32, #tpu.memory_space<vmem>>, %arg2: memref<1024x1664xf32, #tpu.memory_space<vmem>>, %arg3: memref<1x1664xf32, #tpu.memory_space<vmem>>, %arg4: memref<1664x128xf32, #tpu.memory_space<vmem>>, %arg5: memref<1x128xf32, #tpu.memory_space<vmem>>, %arg6: memref<128x128xf32, #tpu.memory_space<vmem>>, %arg7: memref<1x128xf32, #tpu.memory_space<vmem>>, %arg8: memref<128x128xf32, #tpu.memory_space<vmem>>, %arg9: memref<1x128xf32, #tpu.memory_space<vmem>>, %arg10: memref<8x128xf32, #tpu.memory_space<vmem>>) attributes {dimension_semantics = [#tpu.dimension_semantics<parallel>], iteration_bounds = array<i64: 1>, scalar_prefetch = 0 : i64, scratch_operands = 0 : i64, tpu.core_type = #tpu.core_type<tc>, window_params = [{transform_indices = @transform_0, window_bounds = array<i64: 8, 1024>}, {pipeline_mode = #tpu.pipeline_mode<synchronous>, transform_indices = @transform_1, window_bounds = array<i64: 1024, 1664>}, {pipeline_mode = #tpu.pipeline_mode<synchronous>, transform_indices = @transform_2, window_bounds = array<i64: 1, 1664>}, {pipeline_mode = #tpu.pipeline_mode<synchronous>, transform_indices = @transform_3, window_bounds = array<i64: 1664, 128>}, {pipeline_mode = #tpu.pipeline_mode<synchronous>, transform_indices = @transform_4, window_bounds = array<i64: 1, 128>}, {pipeline_mode = #tpu.pipeline_mode<synchronous>, transform_indices = @transform_5, window_bounds = array<i64: 128, 128>}, {pipeline_mode = #tpu.pipeline_mode<synchronous>, transform_indices = @transform_6, window_bounds = array<i64: 1, 128>}, {pipeline_mode = #tpu.pipeline_mode<synchronous>, transform_indices = @transform_7, window_bounds = array<i64: 128, 128>}, {pipeline_mode = #tpu.pipeline_mode<synchronous>, transform_indices = @transform_8, window_bounds = array<i64: 1, 128>}, {transform_indices = @transform_9, window_bounds = array<i64: 8, 128>}]} {
    %c0 = arith.constant 0 : index
    %c0_0 = arith.constant 0 : index
    %0 = vector.load %arg1[%c0, %c0_0] : memref<8x1024xf32, #tpu.memory_space<vmem>>, vector<8x1024xf32>
    %c0_1 = arith.constant 0 : index
    %c0_2 = arith.constant 0 : index
    %1 = vector.load %arg2[%c0_1, %c0_2] : memref<1024x1664xf32, #tpu.memory_space<vmem>>, vector<1024x1664xf32>
    %cst = arith.constant dense<0.000000e+00> : vector<8x1664xf32>
    %2 = tpu.matmul %0, %1, %cst {dimension_numbers = #tpu.dot_dimension_numbers<[1], [0], [0], [1], [0, 0, 1, 1], [], []>} : vector<8x1024xf32>, vector<1024x1664xf32>, vector<8x1664xf32> -> vector<8x1664xf32>
    %c0_3 = arith.constant 0 : index
    %c0_4 = arith.constant 0 : index
    %3 = vector.load %arg3[%c0_3, %c0_4] : memref<1x1664xf32, #tpu.memory_space<vmem>>, vector<1x1664xf32>
    %4 = vector.broadcast %3 : vector<1x1664xf32> to vector<8x1664xf32>
    %5 = arith.addf %2, %4 : vector<8x1664xf32>
    %cst_5 = arith.constant 0.000000e+00 : f32
    %6 = vector.broadcast %cst_5 : f32 to vector<8x1664xf32>
    %7 = arith.maximumf %5, %6 : vector<8x1664xf32>
    %c0_6 = arith.constant 0 : index
    %c0_7 = arith.constant 0 : index
    %8 = vector.load %arg4[%c0_6, %c0_7] : memref<1664x128xf32, #tpu.memory_space<vmem>>, vector<1664x128xf32>
    %cst_8 = arith.constant dense<0.000000e+00> : vector<8x128xf32>
    %9 = tpu.matmul %7, %8, %cst_8 {dimension_numbers = #tpu.dot_dimension_numbers<[1], [0], [0], [1], [0, 0, 1, 1], [], []>} : vector<8x1664xf32>, vector<1664x128xf32>, vector<8x128xf32> -> vector<8x128xf32>
    %c0_9 = arith.constant 0 : index
    %c0_10 = arith.constant 0 : index
    %10 = vector.load %arg5[%c0_9, %c0_10] : memref<1x128xf32, #tpu.memory_space<vmem>>, vector<1x128xf32>
    %11 = vector.broadcast %10 : vector<1x128xf32> to vector<8x128xf32>
    %12 = arith.addf %9, %11 : vector<8x128xf32>
    %cst_11 = arith.constant 0.000000e+00 : f32
    %13 = vector.broadcast %cst_11 : f32 to vector<8x128xf32>
    %14 = arith.maximumf %12, %13 : vector<8x128xf32>
    %c0_12 = arith.constant 0 : index
    %c0_13 = arith.constant 0 : index
    %15 = vector.load %arg6[%c0_12, %c0_13] : memref<128x128xf32, #tpu.memory_space<vmem>>, vector<128x128xf32>
    %cst_14 = arith.constant dense<0.000000e+00> : vector<8x128xf32>
    %16 = tpu.matmul %14, %15, %cst_14 {dimension_numbers = #tpu.dot_dimension_numbers<[1], [0], [0], [1], [0, 0, 1, 1], [], []>} : vector<8x128xf32>, vector<128x128xf32>, vector<8x128xf32> -> vector<8x128xf32>
    %c0_15 = arith.constant 0 : index
    %c0_16 = arith.constant 0 : index
    %17 = vector.load %arg7[%c0_15, %c0_16] : memref<1x128xf32, #tpu.memory_space<vmem>>, vector<1x128xf32>
    %18 = vector.broadcast %17 : vector<1x128xf32> to vector<8x128xf32>
    %19 = arith.addf %16, %18 : vector<8x128xf32>
    %cst_17 = arith.constant 0.000000e+00 : f32
    %20 = vector.broadcast %cst_17 : f32 to vector<8x128xf32>
    %21 = arith.maximumf %19, %20 : vector<8x128xf32>
    %c0_18 = arith.constant 0 : index
    %c0_19 = arith.constant 0 : index
    %22 = vector.load %arg8[%c0_18, %c0_19] : memref<128x128xf32, #tpu.memory_space<vmem>>, vector<128x128xf32>
    %cst_20 = arith.constant dense<0.000000e+00> : vector<8x128xf32>
    %23 = tpu.matmul %21, %22, %cst_20 {dimension_numbers = #tpu.dot_dimension_numbers<[1], [0], [0], [1], [0, 0, 1, 1], [], []>} : vector<8x128xf32>, vector<128x128xf32>, vector<8x128xf32> -> vector<8x128xf32>
    %c0_21 = arith.constant 0 : index
    %c0_22 = arith.constant 0 : index
    %24 = vector.load %arg9[%c0_21, %c0_22] : memref<1x128xf32, #tpu.memory_space<vmem>>, vector<1x128xf32>
    %25 = vector.broadcast %24 : vector<1x128xf32> to vector<8x128xf32>
    %26 = arith.addf %23, %25 : vector<8x128xf32>
    %c0_23 = arith.constant 0 : index
    %c0_24 = arith.constant 0 : index
    %27 = vector.load %arg10[%c0_23, %c0_24] : memref<8x128xf32, #tpu.memory_space<vmem>>, vector<8x128xf32>
    tpu.vector_store %arg10[%c0_23, %c0_24], %26 {strides = array<i32>} : memref<8x128xf32, #tpu.memory_space<vmem>>, vector<8x128xf32>,
    return
  }
  func.func @transform_0(%arg0: i32) -> (i32, i32) {
    %c0_i32 = arith.constant 0 : i32
    %c0_i32_0 = arith.constant 0 : i32
    return %arg0, %c0_i32 : i32, i32
  }
  func.func @transform_1(%arg0: i32) -> (i32, i32) {
    %c0_i32 = arith.constant 0 : i32
    %c0_i32_0 = arith.constant 0 : i32
    %c0_i32_1 = arith.constant 0 : i32
    return %c0_i32, %c0_i32_0 : i32, i32
  }
  func.func @transform_2(%arg0: i32) -> (i32, i32) {
    %c0_i32 = arith.constant 0 : i32
    %c0_i32_0 = arith.constant 0 : i32
    %c0_i32_1 = arith.constant 0 : i32
    return %c0_i32, %c0_i32_0 : i32, i32
  }
  func.func @transform_3(%arg0: i32) -> (i32, i32) {
    %c0_i32 = arith.constant 0 : i32
    %c0_i32_0 = arith.constant 0 : i32
    %c0_i32_1 = arith.constant 0 : i32
    return %c0_i32, %c0_i32_0 : i32, i32
  }
  func.func @transform_4(%arg0: i32) -> (i32, i32) {
    %c0_i32 = arith.constant 0 : i32
    %c0_i32_0 = arith.constant 0 : i32
    %c0_i32_1 = arith.constant 0 : i32
    return %c0_i32, %c0_i32_0 : i32, i32
  }
  func.func @transform_5(%arg0: i32) -> (i32, i32) {
    %c0_i32 = arith.constant 0 : i32
    %c0_i32_0 = arith.constant 0 : i32
    %c0_i32_1 = arith.constant 0 : i32
    return %c0_i32, %c0_i32_0 : i32, i32
  }
  func.func @transform_6(%arg0: i32) -> (i32, i32) {
    %c0_i32 = arith.constant 0 : i32
    %c0_i32_0 = arith.constant 0 : i32
    %c0_i32_1 = arith.constant 0 : i32
    return %c0_i32, %c0_i32_0 : i32, i32
  }
  func.func @transform_7(%arg0: i32) -> (i32, i32) {
    %c0_i32 = arith.constant 0 : i32
    %c0_i32_0 = arith.constant 0 : i32
    %c0_i32_1 = arith.constant 0 : i32
    return %c0_i32, %c0_i32_0 : i32, i32
  }
  func.func @transform_8(%arg0: i32) -> (i32, i32) {
    %c0_i32 = arith.constant 0 : i32
    %c0_i32_0 = arith.constant 0 : i32
    %c0_i32_1 = arith.constant 0 : i32
    return %c0_i32, %c0_i32_0 : i32, i32
  }
  func.func @transform_9(%arg0: i32) -> (i32, i32) {
    %c0_i32 = arith.constant 0 : i32
    %c0_i32_0 = arith.constant 0 : i32
    return %arg0, %c0_i32 : i32, i32
  }
}

</mosaic_0001>

<bundles_post_ra>
// kernel: tpu_custom_call.1
= control target key start
LH: loop header
LB: loop body
LE: loop exit
PB: predicated region body
PF: predicated region fallthrough
CT: control target
= control target key end

     0   :  { %14 = vsyncpa [#allocation3], 0  ;;  %s5886_s0 = inlined_call_operand.hbm [shape: f32[8,1024], index: 0, kind: input, shape index: {}]   ;;  %s5887_s1 = inlined_call_operand.hbm [shape: f32[1024,1664], index: 1, kind: input, shape index: {}]   ;;  %s5888_s2 = inlined_call_operand.hbm [shape: f32[1,1664], index: 2, kind: input, shape index: {}]   ;;  %s5889_s3 = inlined_call_operand.hbm [shape: f32[1664,128], index: 3, kind: input, shape index: {}]   ;;  %s5890_s4 = inlined_call_operand.hbm [shape: f32[1,128], index: 4, kind: input, shape index: {}]   ;;  %s5891_s5 = inlined_call_operand.hbm [shape: f32[128,128], index: 5, kind: input, shape index: {}]   ;;  %s5892_s6 = inlined_call_operand.hbm [shape: f32[1,128], index: 6, kind: input, shape index: {}]   ;;  %s5893_s7 = inlined_call_operand.hbm [shape: f32[128,128], index: 7, kind: input, shape index: {}]   ;;  %s5894_s8 = inlined_call_operand.hbm [shape: f32[1,128], index: 8, kind: input, shape index: {}]   ;;  %s5895_s9 = inlined_call_operand.hbm [shape: f32[8,128], index: 9, kind: output, shape index: {}]  }
   0x1   :  { %15 = vsyncpa [#allocation6], 0 }
   0x2   :  { %16 = vsyncpa [#allocation9], 0 }
   0x3   :  { %17 = vsyncpa [#allocation12], 0 }
   0x4   :  { %18 = vsyncpa [#allocation15], 0 }
   0x5   :  { %19 = vsyncpa [#allocation4], 0  ;;  %s5573_s30 = smov [#allocation5]  }
   0x6   :  { %s35_s10 = sshll.u32 %s5573_s30, 4  ;;  %s36_s10 = int_to_ptr.vmem [resolvable:$true] %s35_s10 }
   0x7   :  { %s5369_s11 = scalar_lea.vmem %s36_s10, 212992  ;;  %p5374_p1 = scmp.lt.s32.totalorder %s36_s10, %s36_s10 }
   0x8   :  { %p5370_p0 = scmp.ne.s32.totalorder %s36_s10, %s5369_s11  ;;  %p5375_p2 = scmp.lt.s32.totalorder %s5369_s11, %s5369_s11 }
   0xa   :  { %p5376_p3 = por %p5375_p2, %p5374_p1 }
   0xc   :  { %p5377_p4 = pnand %p5376_p3, %p5370_p0 }
   0xe   :  { %5380 = shalt.err (!%p5377_p4)
}
   0xf   :  { %s5574_s12 = smov 1664   ;;  %s5575_s13 = smov 104  }
  0x10   :  { %41 = dma.hbm_to_vmem [thread:$0]  %s5887_s1, 212992, %s36_s10, [#allocation6], %s5574_s12, %s5574_s12, %s5575_s13  }
  0x11   :  { %s5576_s16 = smov [#allocation8]  }
  0x12   :  { %s57_s17 = sshll.u32 %s5576_s16, 4  ;;  %s58_s17 = int_to_ptr.vmem [resolvable:$true] %s57_s17 }
  0x13   :  { %s5389_s18 = scalar_lea.vmem %s58_s17, 26624  ;;  %p5394_p6 = scmp.lt.s32.totalorder %s58_s17, %s58_s17 }
  0x14   :  { %p5390_p5 = scmp.ne.s32.totalorder %s58_s17, %s5389_s18  ;;  %p5395_p7 = scmp.lt.s32.totalorder %s5389_s18, %s5389_s18 }
  0x16   :  { %p5396_p8 = por %p5395_p7, %p5394_p6 }
  0x18   :  { %p5397_p9 = pnand %p5396_p8, %p5390_p5 }
  0x1a   :  { %5400 = shalt.err (!%p5397_p9)
}
  0x1b   :  { %s5577_s19 = smov 128   ;;  %s5578_s20 = smov 8  }
  0x1c   :  { %63 = dma.hbm_to_vmem [thread:$0]  %s5889_s3, 26624, %s58_s17, [#allocation9], %s5577_s19, %s5577_s19, %s5578_s20  }
  0x1d   :  { %s5579_s23 = smov [#allocation11]   ;;  %s5580_s25 = smov [#allocation14]  }
  0x1e   :  { %s79_s24 = sshll.u32 %s5579_s23, 4  ;;  %s101_s1 = sshll.u32 %s5580_s25, 4  ;;  %s80_s24 = int_to_ptr.vmem [resolvable:$true] %s79_s24  ;;  %s102_s1 = int_to_ptr.vmem [resolvable:$true] %s101_s1 }
  0x1f   :  { %s5409_s26 = scalar_lea.vmem %s80_s24, 2048  ;;  %p5414_p11 = scmp.lt.s32.totalorder %s80_s24, %s80_s24 }
  0x20   :  { %p5410_p10 = scmp.ne.s32.totalorder %s80_s24, %s5409_s26  ;;  %p5415_p12 = scmp.lt.s32.totalorder %s5409_s26, %s5409_s26 }
  0x22   :  { %p5416_p13 = por %p5415_p12, %p5414_p11 }
  0x24   :  { %p5417_p0 = pnand %p5416_p13, %p5410_p10 }
  0x26   :  { %5420 = shalt.err (!%p5417_p0)
}
  0x27   :  { %85 = dma.hbm_to_vmem [thread:$0]  %s5891_s5, 2048, %s80_s24, [#allocation12], %s5577_s19, %s5577_s19, %s5578_s20  }
  0x28   :  { %s5429_s29 = scalar_lea.vmem %s102_s1, 2048  ;;  %p5434_p2 = scmp.lt.s32.totalorder %s102_s1, %s102_s1 }
  0x29   :  { %p5430_p1 = scmp.ne.s32.totalorder %s102_s1, %s5429_s29  ;;  %p5435_p3 = scmp.lt.s32.totalorder %s5429_s29, %s5429_s29 }
  0x2b   :  { %p5436_p4 = por %p5435_p3, %p5434_p2 }
  0x2d   :  { %p5437_p5 = pnand %p5436_p4, %p5430_p1 }
  0x2f   :  { %5440 = shalt.err (!%p5437_p5)
}
  0x30   :  { %107 = dma.hbm_to_vmem [thread:$0]  %s5893_s7, 2048, %s102_s1, [#allocation15], %s5577_s19, %s5577_s19, %s5578_s20  }
  0x31   :  { %s5581_s10 = smov [#allocation2]   ;;  %s5582_s12 = smov [#allocation7]  }
  0x32   :  { %s26_s11 = sshll.u32 %s5581_s10, 4  ;;  %s48_s13 = sshll.u32 %s5582_s12, 4  ;;  %s27_s11 = int_to_ptr.vmem [resolvable:$true] %s26_s11  ;;  %s49_s13 = int_to_ptr.vmem [resolvable:$true] %s48_s13 }
  0x33   :  { %s5449_s14 = scalar_lea.vmem %s27_s11, 1024  ;;  %p5454_p7 = scmp.lt.s32.totalorder %s27_s11, %s27_s11 }
  0x34   :  { %p5450_p6 = scmp.ne.s32.totalorder %s27_s11, %s5449_s14  ;;  %p5455_p8 = scmp.lt.s32.totalorder %s5449_s14, %s5449_s14 }
  0x36   :  { %p5456_p9 = por %p5455_p8, %p5454_p7 }
  0x38   :  { %p5457_p10 = pnand %p5456_p9, %p5450_p6 }
  0x3a   :  { %5460 = shalt.err (!%p5457_p10)
}
  0x3b   :  { %29 = dma.hbm_to_vmem [thread:$0]  %s5886_s0, 1024, %s27_s11, [#allocation3]  }
  0x3c   :  { %s5469_s16 = scalar_lea.vmem %s49_s13, 208  ;;  %s5473_s7 = scalar_lea.vmem %s49_s13, 224 }
  0x3d   :  { %p5470_p11 = scmp.ne.s32.totalorder %s49_s13, %s5469_s16  ;;  %p5474_p12 = scmp.lt.s32.totalorder %s49_s13, %s49_s13 }
  0x3e   :  { %p5475_p13 = scmp.lt.s32.totalorder %s5473_s7, %s5469_s16 }
  0x40   :  { %p5476_p0 = por %p5475_p13, %p5474_p12 }
  0x42   :  { %p5477_p1 = pnand %p5476_p0, %p5470_p11 }
  0x44   :  { %5480 = shalt.err (!%p5477_p1)
}
  0x45   :  { %51 = dma.hbm_to_vmem [thread:$0]  %s5888_s2, 208, %s49_s13, [#allocation6]  }
  0x46   :  { %s5583_s19 = smov [#allocation10]   ;;  %s5584_s21 = smov [#allocation13]  }
  0x47   :  { %s70_s20 = sshll.u32 %s5583_s19, 4  ;;  %s92_s22 = sshll.u32 %s5584_s21, 4  ;;  %s71_s20 = int_to_ptr.vmem [resolvable:$true] %s70_s20  ;;  %s93_s22 = int_to_ptr.vmem [resolvable:$true] %s92_s22 }
  0x48   :  { %s5489_s23 = scalar_lea.vmem %s71_s20, 16  ;;  %s5493_s0 = scalar_lea.vmem %s71_s20, 32 }
  0x49   :  { %p5490_p2 = scmp.ne.s32.totalorder %s71_s20, %s5489_s23  ;;  %p5494_p3 = scmp.lt.s32.totalorder %s71_s20, %s71_s20 }
  0x4a   :  { %p5495_p4 = scmp.lt.s32.totalorder %s5493_s0, %s5489_s23 }
  0x4c   :  { %p5496_p5 = por %p5495_p4, %p5494_p3 }
  0x4e   :  { %p5497_p6 = pnand %p5496_p5, %p5490_p2 }
  0x50   :  { %5500 = shalt.err (!%p5497_p6)
}
  0x51   :  { %73 = dma.hbm_to_vmem [thread:$0]  %s5890_s4, 16, %s71_s20, [#allocation9]  }
  0x52   :  { %s5509_s1 = scalar_lea.vmem %s93_s22, 16  ;;  %s5513_s2 = scalar_lea.vmem %s93_s22, 32 }
  0x53   :  { %p5510_p7 = scmp.ne.s32.totalorder %s93_s22, %s5509_s1  ;;  %p5514_p8 = scmp.lt.s32.totalorder %s93_s22, %s93_s22 }
  0x54   :  { %p5515_p9 = scmp.lt.s32.totalorder %s5513_s2, %s5509_s1 }
  0x56   :  { %p5516_p10 = por %p5515_p9, %p5514_p8 }
  0x58   :  { %p5517_p11 = pnand %p5516_p10, %p5510_p7 }
  0x5a   :  { %5520 = shalt.err (!%p5517_p11)
}
  0x5b   :  { %95 = dma.hbm_to_vmem [thread:$0]  %s5892_s6, 16, %s93_s22, [#allocation12]  }
  0x5c   :  { %s5585_s28 = smov [#allocation16]  }
  0x5d   :  { %s114_s29 = sshll.u32 %s5585_s28, 4  ;;  %s115_s29 = int_to_ptr.vmem [resolvable:$true] %s114_s29 }
  0x5e   :  { %s5529_s3 = scalar_lea.vmem %s115_s29, 16  ;;  %s5533_s30 = scalar_lea.vmem %s115_s29, 32 }
  0x5f   :  { %p5530_p12 = scmp.ne.s32.totalorder %s115_s29, %s5529_s3  ;;  %p5534_p13 = scmp.lt.s32.totalorder %s115_s29, %s115_s29 }
  0x60   :  { %p5535_p0 = scmp.lt.s32.totalorder %s5533_s30, %s5529_s3 }
  0x62   :  { %p5536_p1 = por %p5535_p0, %p5534_p13 }
  0x64   :  { %p5537_p2 = pnand %p5536_p1, %p5530_p12 }
  0x66   :  { %5540 = shalt.err (!%p5537_p2)
}
  0x67   :  { %117 = dma.hbm_to_vmem [thread:$0]  %s5894_s8, 16, %s115_s29, [#allocation15]  }
  0x68   :  { %5561 = dma.done.wait [#allocation3], 1024  }
  0x69   :  { %5562 = vsyncadd [#allocation3], 4294966272 }
  0x6a   :  { %5563 = dma.done.wait [#allocation6], 213200  }
  0x6b   :  { %5564 = vsyncadd [#allocation6], 4294754096 }
  0x6c   :  { %5565 = dma.done.wait [#allocation9], 26640  }
  0x6d   :  { %5566 = vsyncadd [#allocation9], 4294940656 }
  0x6e   :  { %5567 = dma.done.wait [#allocation12], 2064  }
  0x6f   :  { %5568 = vsyncadd [#allocation12], 4294965232 }
  0x70   :  { %5569 = dma.done.wait [#allocation15], 2064  }
  0x71   :  { %5570 = vsyncadd [#allocation15], 4294965232  ;;  %v349_v0 = vld [vmem:[#allocation5 + $0x620] sm:$0xff]  ;;  %v348_v2 = vld [vmem:[#allocation5 + $0x618] sm:$0xff]  ;;  %vm5587_vm0 = vmmov 0   ;;  %s5588_s6 = smov [#allocation17]  }
  0x72   :  { %v765_v1 = vld [vmem:[#allocation5 + $0x1320] sm:$0xff]  ;;  %1886 = vmatprep.subr.mxu0 %v349_v0  ;;  %v764_v3 = vld [vmem:[#allocation5 + $0x1318] sm:$0xff]  ;;  %v335_v6 = vld [vmem:[#allocation5 + $0x5b0] sm:$0xff]  ;;  %s4783_s8 = sshll.u32 %s5588_s6, 4  ;;  %s4784_s8 = int_to_ptr.vmem [resolvable:$true] %s4783_s8 }
  0x73   :  { %1957 = vmatprep.subr.mxu1 %v765_v1  ;;  %v336_v4 = vld [vmem:[#allocation5 + $0x5b8] sm:$0xff]  ;;  %1887 = vmatpush1.msra.mxu0 %v348_v2  ;;  %v751_v7 = vld [vmem:[#allocation5 + $0x12b0] sm:$0xff]  ;;  %v322_v10 = vld [vmem:[#allocation5 + $0x548] sm:$0xff]  ;;  %s5541_s11 = scalar_lea.vmem %s4784_s8, 128  ;;  %p5546_p4 = scmp.lt.s32.totalorder %s4784_s8, %s4784_s8 }
  0x74   :  { %v752_v5 = vld [vmem:[#allocation5 + $0x12b8] sm:$0xff]  ;;  %1958 = vmatpush1.msra.mxu1 %v764_v3  ;;  %v323_v8 = vld [vmem:[#allocation5 + $0x550] sm:$0xff]  ;;  %1888 = vmatprep.subr.mxu0 %v336_v4  ;;  %v738_v11 = vld [vmem:[#allocation5 + $0x1248] sm:$0xff]  ;;  %p5542_p3 = scmp.ne.s32.totalorder %s4784_s8, %s5541_s11  ;;  %p5547_p5 = scmp.lt.s32.totalorder %s5541_s11, %s5541_s11 }
  0x75   :  { %1959 = vmatprep.subr.mxu1 %v752_v5  ;;  %v739_v9 = vld [vmem:[#allocation5 + $0x1250] sm:$0xff]  ;;  %1889 = vmatpush1.msra.mxu0 %v335_v6  ;;  %v310_v12 = vld [vmem:[#allocation5 + $0x4e8] sm:$0xff]  ;;  %v309_v14 = vld [vmem:[#allocation5 + $0x4e0] sm:$0xff] }
  0x76   :  { %1960 = vmatpush1.msra.mxu1 %v751_v7  ;;  %v726_v13 = vld [vmem:[#allocation5 + $0x11e8] sm:$0xff]  ;;  %1890 = vmatprep.subr.mxu0 %v323_v8  ;;  %v725_v15 = vld [vmem:[#allocation5 + $0x11e0] sm:$0xff]  ;;  %v296_v18 = vld [vmem:[#allocation5 + $0x478] sm:$0xff]  ;;  %p5548_p6 = por %p5547_p5, %p5546_p4 }
  0x77   :  { %1961 = vmatprep.subr.mxu1 %v739_v9  ;;  %1891 = vmatpush1.msra.mxu0 %v322_v10  ;;  %v297_v16 = vld [vmem:[#allocation5 + $0x480] sm:$0xff]  ;;  %v712_v19 = vld [vmem:[#allocation5 + $0x1178] sm:$0xff]  ;;  %v283_v22 = vld [vmem:[#allocation5 + $0x410] sm:$0xff] }
  0x78   :  { %1962 = vmatpush1.msra.mxu1 %v738_v11  ;;  %v713_v17 = vld [vmem:[#allocation5 + $0x1180] sm:$0xff]  ;;  %1892 = vmatprep.subr.mxu0 %v310_v12  ;;  %v284_v20 = vld [vmem:[#allocation5 + $0x418] sm:$0xff]  ;;  %v699_v23 = vld [vmem:[#allocation5 + $0x1110] sm:$0xff]  ;;  %p5549_p7 = pnand %p5548_p6, %p5542_p3 }
  0x79   :  { %1963 = vmatprep.subr.mxu1 %v726_v13  ;;  %1893 = vmatpush1.msra.mxu0 %v309_v14  ;;  %v700_v21 = vld [vmem:[#allocation5 + $0x1118] sm:$0xff]  ;;  %v271_v24 = vld [vmem:[#allocation5 + $0x3b0] sm:$0xff]  ;;  %v270_v26 = vld [vmem:[#allocation5 + $0x3a8] sm:$0xff] }
  0x7a   :  { %1964 = vmatpush1.msra.mxu1 %v725_v15  ;;  %1894 = vmatprep.subr.mxu0 %v297_v16  ;;  %v687_v25 = vld [vmem:[#allocation5 + $0x10b0] sm:$0xff]  ;;  %v686_v27 = vld [vmem:[#allocation5 + $0x10a8] sm:$0xff]  ;;  %v257_v30 = vld [vmem:[#allocation5 + $0x340] sm:$0xff] }
  0x7b   :  { %1965 = vmatprep.subr.mxu1 %v713_v17  ;;  %1895 = vmatpush1.msra.mxu0 %v296_v18  ;;  %v258_v28 = vld [vmem:[#allocation5 + $0x348] sm:$0xff]  ;;  %v673_v31 = vld [vmem:[#allocation5 + $0x1040] sm:$0xff]  ;;  %v244_v34 = vld [vmem:[#allocation5 + $0x2d8] sm:$0xff] }
  0x7c   :  { %1966 = vmatpush1.msra.mxu1 %v712_v19  ;;  %1896 = vmatprep.subr.mxu0 %v284_v20  ;;  %v674_v29 = vld [vmem:[#allocation5 + $0x1048] sm:$0xff]  ;;  %v245_v32 = vld [vmem:[#allocation5 + $0x2e0] sm:$0xff]  ;;  %v660_v35 = vld [vmem:[#allocation5 + $0xfd8] sm:$0xff] }
  0x7d   :  { %1967 = vmatprep.subr.mxu1 %v700_v21  ;;  %1897 = vmatpush1.msra.mxu0 %v283_v22  ;;  %v661_v33 = vld [vmem:[#allocation5 + $0xfe0] sm:$0xff]  ;;  %v232_v36 = vld [vmem:[#allocation5 + $0x278] sm:$0xff]  ;;  %v231_v38 = vld [vmem:[#allocation5 + $0x270] sm:$0xff] }
  0x7e   :  { %1968 = vmatpush1.msra.mxu1 %v699_v23  ;;  %1898 = vmatprep.subr.mxu0 %v271_v24  ;;  %v648_v37 = vld [vmem:[#allocation5 + $0xf78] sm:$0xff]  ;;  %v647_v39 = vld [vmem:[#allocation5 + $0xf70] sm:$0xff]  ;;  %v218_v42 = vld [vmem:[#allocation5 + $0x208] sm:$0xff] }
  0x7f   :  { %1969 = vmatprep.subr.mxu1 %v687_v25  ;;  %1899 = vmatpush1.msra.mxu0 %v270_v26  ;;  %v219_v40 = vld [vmem:[#allocation5 + $0x210] sm:$0xff]  ;;  %v634_v43 = vld [vmem:[#allocation5 + $0xf08] sm:$0xff]  ;;  %v205_v46 = vld [vmem:[#allocation5 + $0x1a0] sm:$0xff] }
  0x80   :  { %1970 = vmatpush1.msra.mxu1 %v686_v27  ;;  %1900 = vmatprep.subr.mxu0 %v258_v28  ;;  %v635_v41 = vld [vmem:[#allocation5 + $0xf10] sm:$0xff]  ;;  %v206_v44 = vld [vmem:[#allocation5 + $0x1a8] sm:$0xff]  ;;  %v621_v47 = vld [vmem:[#allocation5 + $0xea0] sm:$0xff] }
  0x81   :  { %1971 = vmatprep.subr.mxu1 %v674_v29  ;;  %1901 = vmatpush1.msra.mxu0 %v257_v30  ;;  %v622_v45 = vld [vmem:[#allocation5 + $0xea8] sm:$0xff]  ;;  %v193_v48 = vld [vmem:[#allocation5 + $0x140] sm:$0xff]  ;;  %v192_v50 = vld [vmem:[#allocation5 + $0x138] sm:$0xff] }
  0x82   :  { %1972 = vmatpush1.msra.mxu1 %v673_v31  ;;  %1902 = vmatprep.subr.mxu0 %v245_v32  ;;  %v609_v49 = vld [vmem:[#allocation5 + $0xe40] sm:$0xff]  ;;  %v608_v51 = vld [vmem:[#allocation5 + $0xe38] sm:$0xff]  ;;  %v179_v54 = vld [vmem:[#allocation5 + $0xd0] sm:$0xff] }
  0x83   :  { %1973 = vmatprep.subr.mxu1 %v661_v33  ;;  %1903 = vmatpush1.msra.mxu0 %v244_v34  ;;  %v180_v52 = vld [vmem:[#allocation5 + $0xd8] sm:$0xff]  ;;  %v595_v55 = vld [vmem:[#allocation5 + $0xdd0] sm:$0xff]  ;;  %v166_v58 = vld [vmem:[#allocation5 + $0x68] sm:$0xff] }
  0x84   :  { %1974 = vmatpush1.msra.mxu1 %v660_v35  ;;  %1904 = vmatprep.subr.mxu0 %v232_v36  ;;  %v596_v53 = vld [vmem:[#allocation5 + $0xdd8] sm:$0xff]  ;;  %v167_v56 = vld [vmem:[#allocation5 + $0x70] sm:$0xff]  ;;  %v582_v59 = vld [vmem:[#allocation5 + $0xd68] sm:$0xff] }
  0x85   :  { %1975 = vmatprep.subr.mxu1 %v648_v37  ;;  %1905 = vmatpush1.msra.mxu0 %v231_v38  ;;  %v583_v57 = vld [vmem:[#allocation5 + $0xd70] sm:$0xff]  ;;  %v154_v60 = vld [vmem:[#allocation5 + $0x8] sm:$0xff]  ;;  %v153_v62 = vld [vmem:[#allocation5] sm:$0xff] }
  0x86   :  { %1976 = vmatpush1.msra.mxu1 %v647_v39  ;;  %1906 = vmatprep.subr.mxu0 %v219_v40  ;;  %v570_v61 = vld [vmem:[#allocation5 + $0xd08] sm:$0xff]  ;;  %v569_v63 = vld [vmem:[#allocation5 + $0xd00] sm:$0xff]  ;;  %v556_v2 = vld [vmem:[#allocation5 + $0xc98] sm:$0xff] }
  0x87   :  { %1977 = vmatprep.subr.mxu1 %v635_v41  ;;  %1907 = vmatpush1.msra.mxu0 %v218_v42  ;;  %v557_v0 = vld [vmem:[#allocation5 + $0xca0] sm:$0xff]  ;;  %v972_v3 = vld [vmem:[#allocation5 + $0x1998] sm:$0xff]  ;;  %v543_v6 = vld [vmem:[#allocation5 + $0xc30] sm:$0xff] }
  0x88   :  { %1978 = vmatpush1.msra.mxu1 %v634_v43  ;;  %1908 = vmatprep.subr.mxu0 %v206_v44  ;;  %v973_v1 = vld [vmem:[#allocation5 + $0x19a0] sm:$0xff]  ;;  %v544_v4 = vld [vmem:[#allocation5 + $0xc38] sm:$0xff]  ;;  %v959_v7 = vld [vmem:[#allocation5 + $0x1930] sm:$0xff] }
  0x89   :  { %1979 = vmatprep.subr.mxu1 %v622_v45  ;;  %1909 = vmatpush1.msra.mxu0 %v205_v46  ;;  %v960_v5 = vld [vmem:[#allocation5 + $0x1938] sm:$0xff]  ;;  %v531_v8 = vld [vmem:[#allocation5 + $0xbd0] sm:$0xff]  ;;  %v530_v10 = vld [vmem:[#allocation5 + $0xbc8] sm:$0xff] }
  0x8a   :  { %1980 = vmatpush1.msra.mxu1 %v621_v47  ;;  %1910 = vmatprep.subr.mxu0 %v193_v48  ;;  %v947_v9 = vld [vmem:[#allocation5 + $0x18d0] sm:$0xff]  ;;  %v946_v11 = vld [vmem:[#allocation5 + $0x18c8] sm:$0xff]  ;;  %v517_v14 = vld [vmem:[#allocation5 + $0xb60] sm:$0xff] }
  0x8b   :  { %1981 = vmatprep.subr.mxu1 %v609_v49  ;;  %1911 = vmatpush1.msra.mxu0 %v192_v50  ;;  %v518_v12 = vld [vmem:[#allocation5 + $0xb68] sm:$0xff]  ;;  %v933_v15 = vld [vmem:[#allocation5 + $0x1860] sm:$0xff]  ;;  %v504_v18 = vld [vmem:[#allocation5 + $0xaf8] sm:$0xff] }
  0x8c   :  { %1982 = vmatpush1.msra.mxu1 %v608_v51  ;;  %1912 = vmatprep.subr.mxu0 %v180_v52  ;;  %v934_v13 = vld [vmem:[#allocation5 + $0x1868] sm:$0xff]  ;;  %v505_v16 = vld [vmem:[#allocation5 + $0xb00] sm:$0xff]  ;;  %v920_v19 = vld [vmem:[#allocation5 + $0x17f8] sm:$0xff] }
  0x8d   :  { %1983 = vmatprep.subr.mxu1 %v596_v53  ;;  %1913 = vmatpush1.msra.mxu0 %v179_v54  ;;  %v921_v17 = vld [vmem:[#allocation5 + $0x1800] sm:$0xff]  ;;  %v492_v20 = vld [vmem:[#allocation5 + $0xa98] sm:$0xff]  ;;  %v491_v22 = vld [vmem:[#allocation5 + $0xa90] sm:$0xff] }
  0x8e   :  { %1984 = vmatpush1.msra.mxu1 %v595_v55  ;;  %1914 = vmatprep.subr.mxu0 %v167_v56  ;;  %v908_v21 = vld [vmem:[#allocation5 + $0x1798] sm:$0xff]  ;;  %v907_v23 = vld [vmem:[#allocation5 + $0x1790] sm:$0xff]  ;;  %v478_v26 = vld [vmem:[#allocation5 + $0xa28] sm:$0xff] }
  0x8f   :  { %1985 = vmatprep.subr.mxu1 %v583_v57  ;;  %1915 = vmatpush1.msra.mxu0 %v166_v58  ;;  %v479_v24 = vld [vmem:[#allocation5 + $0xa30] sm:$0xff]  ;;  %v894_v27 = vld [vmem:[#allocation5 + $0x1728] sm:$0xff]  ;;  %v465_v30 = vld [vmem:[#allocation5 + $0x9c0] sm:$0xff] }
  0x90   :  { %1986 = vmatpush1.msra.mxu1 %v582_v59  ;;  %1916 = vmatprep.subr.mxu0 %v154_v60  ;;  %v895_v25 = vld [vmem:[#allocation5 + $0x1730] sm:$0xff]  ;;  %v466_v28 = vld [vmem:[#allocation5 + $0x9c8] sm:$0xff]  ;;  %v881_v31 = vld [vmem:[#allocation5 + $0x16c0] sm:$0xff] }
  0x91   :  { %1987 = vmatprep.subr.mxu1 %v570_v61  ;;  %1917 = vmatpush1.msra.mxu0 %v153_v62  ;;  %v882_v29 = vld [vmem:[#allocation5 + $0x16c8] sm:$0xff]  ;;  %v453_v32 = vld [vmem:[#allocation5 + $0x960] sm:$0xff]  ;;  %v452_v34 = vld [vmem:[#allocation5 + $0x958] sm:$0xff] }
  0x92   :  { %1988 = vmatpush1.msra.mxu1 %v569_v63  ;;  %1918 = vmatprep.subr.mxu0 %v557_v0  ;;  %v869_v33 = vld [vmem:[#allocation5 + $0x1660] sm:$0xff]  ;;  %v868_v35 = vld [vmem:[#allocation5 + $0x1658] sm:$0xff]  ;;  %v439_v38 = vld [vmem:[#allocation5 + $0x8f0] sm:$0xff] }
  0x93   :  { %1989 = vmatprep.subr.mxu1 %v973_v1  ;;  %1919 = vmatpush2.msra.mxu0 %v556_v2  ;;  %v440_v36 = vld [vmem:[#allocation5 + $0x8f8] sm:$0xff]  ;;  %v855_v39 = vld [vmem:[#allocation5 + $0x15f0] sm:$0xff]  ;;  %v426_v42 = vld [vmem:[#allocation5 + $0x888] sm:$0xff] }
  0x94   :  { %1990 = vmatpush2.msra.mxu1 %v972_v3  ;;  %1920 = vmatprep.subr.mxu0 %v544_v4  ;;  %v856_v37 = vld [vmem:[#allocation5 + $0x15f8] sm:$0xff]  ;;  %v427_v40 = vld [vmem:[#allocation5 + $0x890] sm:$0xff]  ;;  %v842_v43 = vld [vmem:[#allocation5 + $0x1588] sm:$0xff] }
  0x95   :  { %1991 = vmatprep.subr.mxu1 %v960_v5  ;;  %1921 = vmatpush2.msra.mxu0 %v543_v6  ;;  %v843_v41 = vld [vmem:[#allocation5 + $0x1590] sm:$0xff]  ;;  %v414_v44 = vld [vmem:[#allocation5 + $0x828] sm:$0xff]  ;;  %v413_v46 = vld [vmem:[#allocation5 + $0x820] sm:$0xff] }
  0x96   :  { %1992 = vmatpush2.msra.mxu1 %v959_v7  ;;  %1922 = vmatprep.subr.mxu0 %v531_v8  ;;  %v830_v45 = vld [vmem:[#allocation5 + $0x1528] sm:$0xff]  ;;  %v829_v47 = vld [vmem:[#allocation5 + $0x1520] sm:$0xff]  ;;  %v400_v50 = vld [vmem:[#allocation5 + $0x7b8] sm:$0xff] }
  0x97   :  { %1993 = vmatprep.subr.mxu1 %v947_v9  ;;  %1923 = vmatpush2.msra.mxu0 %v530_v10  ;;  %v401_v48 = vld [vmem:[#allocation5 + $0x7c0] sm:$0xff]  ;;  %v816_v51 = vld [vmem:[#allocation5 + $0x14b8] sm:$0xff]  ;;  %v387_v54 = vld [vmem:[#allocation5 + $0x750] sm:$0xff] }
  0x98   :  { %1994 = vmatpush2.msra.mxu1 %v946_v11  ;;  %1924 = vmatprep.subr.mxu0 %v518_v12  ;;  %v817_v49 = vld [vmem:[#allocation5 + $0x14c0] sm:$0xff]  ;;  %v388_v52 = vld [vmem:[#allocation5 + $0x758] sm:$0xff]  ;;  %v803_v55 = vld [vmem:[#allocation5 + $0x1450] sm:$0xff] }
  0x99   :  { %1995 = vmatprep.subr.mxu1 %v934_v13  ;;  %1925 = vmatpush2.msra.mxu0 %v517_v14  ;;  %v804_v53 = vld [vmem:[#allocation5 + $0x1458] sm:$0xff]  ;;  %v375_v56 = vld [vmem:[#allocation5 + $0x6f0] sm:$0xff]  ;;  %v374_v58 = vld [vmem:[#allocation5 + $0x6e8] sm:$0xff] }
  0x9a   :  { %1996 = vmatpush2.msra.mxu1 %v933_v15  ;;  %1926 = vmatprep.subr.mxu0 %v505_v16  ;;  %v791_v57 = vld [vmem:[#allocation5 + $0x13f0] sm:$0xff]  ;;  %v790_v59 = vld [vmem:[#allocation5 + $0x13e8] sm:$0xff]  ;;  %v361_v62 = vld [vmem:[#allocation5 + $0x680] sm:$0xff] }
  0x9b   :  { %1997 = vmatprep.subr.mxu1 %v921_v17  ;;  %1927 = vmatpush2.msra.mxu0 %v504_v18  ;;  %v362_v60 = vld [vmem:[#allocation5 + $0x688] sm:$0xff]  ;;  %v777_v0 = vld [vmem:[#allocation5 + $0x1380] sm:$0xff]  ;;  %v148_v2 = vld [vmem:[#allocation2 + $0x18] sm:$0xff] }
  0x9c   :  { %1998 = vmatpush2.msra.mxu1 %v920_v19  ;;  %1928 = vmatprep.subr.mxu0 %v492_v20  ;;  %v778_v61 = vld [vmem:[#allocation5 + $0x1388] sm:$0xff]  ;;  %v145_v1 = vld [vmem:[#allocation2] sm:$0xff]  ;;  %v147_v5 = vld [vmem:[#allocation2 + $0x10] sm:$0xff] }
  0x9d   :  { %1999 = vmatprep.subr.mxu1 %v908_v21  ;;  %1929 = vmatpush2.msra.mxu0 %v491_v22  ;;  %v146_v63 = vld [vmem:[#allocation2 + $0x8] sm:$0xff]  ;;  %v1181_v3 = vld [vmem:[#allocation5 + $0x2020] sm:$0xff]  ;;  %v1180_v6 = vld [vmem:[#allocation5 + $0x2018] sm:$0xff] }
  0x9e   :  { %2000 = vmatpush2.msra.mxu1 %v907_v23  ;;  %1930 = vmatprep.subr.mxu0 %v479_v24  ;;  %v1597_v4 = vld [vmem:[#allocation5 + $0x2d20] sm:$0xff]  ;;  %v1596_v7 = vld [vmem:[#allocation5 + $0x2d18] sm:$0xff]  ;;  %v1167_v10 = vld [vmem:[#allocation5 + $0x1fb0] sm:$0xff] }
  0x9f   :  { %2001 = vmatprep.subr.mxu1 %v895_v25  ;;  %1931 = vmatpush2.msra.mxu0 %v478_v26  ;;  %v1168_v8 = vld [vmem:[#allocation5 + $0x1fb8] sm:$0xff]  ;;  %v1583_v11 = vld [vmem:[#allocation5 + $0x2cb0] sm:$0xff]  ;;  %v1154_v14 = vld [vmem:[#allocation5 + $0x1f48] sm:$0xff] }
  0xa0   :  { %2002 = vmatpush2.msra.mxu1 %v894_v27  ;;  %1932 = vmatprep.subr.mxu0 %v466_v28  ;;  %v1584_v9 = vld [vmem:[#allocation5 + $0x2cb8] sm:$0xff]  ;;  %v1155_v12 = vld [vmem:[#allocation5 + $0x1f50] sm:$0xff]  ;;  %v1570_v15 = vld [vmem:[#allocation5 + $0x2c48] sm:$0xff] }
  0xa1   :  { %2003 = vmatprep.subr.mxu1 %v882_v29  ;;  %1933 = vmatpush2.msra.mxu0 %v465_v30  ;;  %v1571_v13 = vld [vmem:[#allocation5 + $0x2c50] sm:$0xff]  ;;  %v1142_v16 = vld [vmem:[#allocation5 + $0x1ee8] sm:$0xff]  ;;  %v1141_v18 = vld [vmem:[#allocation5 + $0x1ee0] sm:$0xff] }
  0xa2   :  { %2004 = vmatpush2.msra.mxu1 %v881_v31  ;;  %1934 = vmatprep.subr.mxu0 %v453_v32  ;;  %v1558_v17 = vld [vmem:[#allocation5 + $0x2be8] sm:$0xff]  ;;  %v1557_v19 = vld [vmem:[#allocation5 + $0x2be0] sm:$0xff]  ;;  %v1128_v22 = vld [vmem:[#allocation5 + $0x1e78] sm:$0xff] }
  0xa3   :  { %2005 = vmatprep.subr.mxu1 %v869_v33  ;;  %1935 = vmatpush2.msra.mxu0 %v452_v34  ;;  %v1129_v20 = vld [vmem:[#allocation5 + $0x1e80] sm:$0xff]  ;;  %v1544_v23 = vld [vmem:[#allocation5 + $0x2b78] sm:$0xff]  ;;  %v1115_v26 = vld [vmem:[#allocation5 + $0x1e10] sm:$0xff] }
  0xa4   :  { %2006 = vmatpush2.msra.mxu1 %v868_v35  ;;  %1936 = vmatprep.subr.mxu0 %v440_v36  ;;  %v1545_v21 = vld [vmem:[#allocation5 + $0x2b80] sm:$0xff]  ;;  %v1116_v24 = vld [vmem:[#allocation5 + $0x1e18] sm:$0xff]  ;;  %v1531_v27 = vld [vmem:[#allocation5 + $0x2b10] sm:$0xff] }
  0xa5   :  { %2007 = vmatprep.subr.mxu1 %v856_v37  ;;  %1937 = vmatpush2.msra.mxu0 %v439_v38  ;;  %v1532_v25 = vld [vmem:[#allocation5 + $0x2b18] sm:$0xff]  ;;  %v1103_v28 = vld [vmem:[#allocation5 + $0x1db0] sm:$0xff]  ;;  %v1102_v30 = vld [vmem:[#allocation5 + $0x1da8] sm:$0xff] }
  0xa6   :  { %2008 = vmatpush2.msra.mxu1 %v855_v39  ;;  %1938 = vmatprep.subr.mxu0 %v427_v40  ;;  %v1519_v29 = vld [vmem:[#allocation5 + $0x2ab0] sm:$0xff]  ;;  %v1518_v31 = vld [vmem:[#allocation5 + $0x2aa8] sm:$0xff]  ;;  %v1089_v34 = vld [vmem:[#allocation5 + $0x1d40] sm:$0xff] }
  0xa7   :  { %2009 = vmatprep.subr.mxu1 %v843_v41  ;;  %1939 = vmatpush2.msra.mxu0 %v426_v42  ;;  %v1090_v32 = vld [vmem:[#allocation5 + $0x1d48] sm:$0xff]  ;;  %v1505_v35 = vld [vmem:[#allocation5 + $0x2a40] sm:$0xff]  ;;  %v1076_v38 = vld [vmem:[#allocation5 + $0x1cd8] sm:$0xff] }
  0xa8   :  { %2010 = vmatpush2.msra.mxu1 %v842_v43  ;;  %1940 = vmatprep.subr.mxu0 %v414_v44  ;;  %v1506_v33 = vld [vmem:[#allocation5 + $0x2a48] sm:$0xff]  ;;  %v1077_v36 = vld [vmem:[#allocation5 + $0x1ce0] sm:$0xff]  ;;  %v1492_v39 = vld [vmem:[#allocation5 + $0x29d8] sm:$0xff] }
  0xa9   :  { %2011 = vmatprep.subr.mxu1 %v830_v45  ;;  %1941 = vmatpush2.msra.mxu0 %v413_v46  ;;  %v1493_v37 = vld [vmem:[#allocation5 + $0x29e0] sm:$0xff]  ;;  %v1064_v40 = vld [vmem:[#allocation5 + $0x1c78] sm:$0xff]  ;;  %v1063_v42 = vld [vmem:[#allocation5 + $0x1c70] sm:$0xff] }
  0xaa   :  { %2012 = vmatpush2.msra.mxu1 %v829_v47  ;;  %1942 = vmatprep.subr.mxu0 %v401_v48  ;;  %v1480_v41 = vld [vmem:[#allocation5 + $0x2978] sm:$0xff]  ;;  %v1479_v43 = vld [vmem:[#allocation5 + $0x2970] sm:$0xff]  ;;  %v1050_v46 = vld [vmem:[#allocation5 + $0x1c08] sm:$0xff] }
  0xab   :  { %2013 = vmatprep.subr.mxu1 %v817_v49  ;;  %1943 = vmatpush2.msra.mxu0 %v400_v50  ;;  %v1051_v44 = vld [vmem:[#allocation5 + $0x1c10] sm:$0xff]  ;;  %v1466_v47 = vld [vmem:[#allocation5 + $0x2908] sm:$0xff]  ;;  %v1037_v50 = vld [vmem:[#allocation5 + $0x1ba0] sm:$0xff] }
  0xac   :  { %2014 = vmatpush2.msra.mxu1 %v816_v51  ;;  %1944 = vmatprep.subr.mxu0 %v388_v52  ;;  %v1467_v45 = vld [vmem:[#allocation5 + $0x2910] sm:$0xff]  ;;  %v1038_v48 = vld [vmem:[#allocation5 + $0x1ba8] sm:$0xff]  ;;  %v1453_v51 = vld [vmem:[#allocation5 + $0x28a0] sm:$0xff] }
  0xad   :  { %2015 = vmatprep.subr.mxu1 %v804_v53  ;;  %1945 = vmatpush2.msra.mxu0 %v387_v54  ;;  %v1454_v49 = vld [vmem:[#allocation5 + $0x28a8] sm:$0xff]  ;;  %v1025_v52 = vld [vmem:[#allocation5 + $0x1b40] sm:$0xff]  ;;  %v1024_v54 = vld [vmem:[#allocation5 + $0x1b38] sm:$0xff] }
  0xae   :  { %2016 = vmatpush2.msra.mxu1 %v803_v55  ;;  %1946 = vmatprep.subr.mxu0 %v375_v56  ;;  %v1441_v53 = vld [vmem:[#allocation5 + $0x2840] sm:$0xff]  ;;  %v1440_v55 = vld [vmem:[#allocation5 + $0x2838] sm:$0xff] }
  0xaf   :  { %2017 = vmatprep.subr.mxu1 %v791_v57  ;;  %1947 = vmatpush2.msra.mxu0 %v374_v58  ;;  %v1012_v56 = vld [vmem:[#allocation5 + $0x1ad8] sm:$0xff]  ;;  %v1011_v58 = vld [vmem:[#allocation5 + $0x1ad0] sm:$0xff] }
  0xb0   :  { %2018 = vmatpush2.msra.mxu1 %v790_v59  ;;  %1948 = vmatprep.subr.mxu0 %v362_v60  ;;  %v1428_v57 = vld [vmem:[#allocation5 + $0x27d8] sm:$0xff]  ;;  %v1427_v59 = vld [vmem:[#allocation5 + $0x27d0] sm:$0xff] }
  0xb1   :  { %2019 = vmatprep.subr.mxu1 %v778_v61  ;;  %1949 = vmatpush2.msra.mxu0 %v361_v62  ;;  %v999_v60 = vld [vmem:[#allocation5 + $0x1a70] sm:$0xff]  ;;  %v998_v62 = vld [vmem:[#allocation5 + $0x1a68] sm:$0xff] }
  0xb2   :  { %1950 = vmatprep.mubr.f32.mxu0 %v146_v63  ;;  %2020 = vmatpush2.msra.mxu1 %v777_v0  ;;  %v1415_v61 = vld [vmem:[#allocation5 + $0x2770] sm:$0xff]  ;;  %v1414_v63 = vld [vmem:[#allocation5 + $0x2768] sm:$0xff] }
  0xb3   :  { %1951 = vmatmul.mubr.f32.vlgmr.msra.gmra.mxu0 %v145_v1  ;;  %2021 = vmatprep.mubr.f32.mxu1 %v148_v2  ;;  %v986_v0 = vld [vmem:[#allocation5 + $0x1a08] sm:$0xff]  ;;  %v985_v2 = vld [vmem:[#allocation5 + $0x1a00] sm:$0xff] }
  0xb4   :  { %2028 = vmatprep.subr.mxu0 %v1181_v3  ;;  %2099 = vmatprep.subr.mxu1 %v1597_v4  ;;  %v1402_v1 = vld [vmem:[#allocation5 + $0x2708] sm:$0xff]  ;;  %v1401_v3 = vld [vmem:[#allocation5 + $0x2700] sm:$0xff] }
  0xb5   :  { %2022 = vmatmul.mubr.f32.vlgmr.msra.gmra.mxu1 %v147_v5  ;;  %2029 = vmatpush1.msra.mxu0 %v1180_v6  ;;  %v1389_v4 = vld [vmem:[#allocation5 + $0x26a0] sm:$0xff]  ;;  %v1388_v6 = vld [vmem:[#allocation5 + $0x2698] sm:$0xff] }
  0xb6   :  { %2100 = vmatpush1.msra.mxu1 %v1596_v7  ;;  %2030 = vmatprep.subr.mxu0 %v1168_v8  ;;  %v1805_v5 = vld [vmem:[#allocation5 + $0x33a0] sm:$0xff]  ;;  %v1804_v7 = vld [vmem:[#allocation5 + $0x3398] sm:$0xff] }
  0xb7   :  { %2101 = vmatprep.subr.mxu1 %v1584_v9  ;;  %2031 = vmatpush1.msra.mxu0 %v1167_v10  ;;  %v1376_v8 = vld [vmem:[#allocation5 + $0x2638] sm:$0xff]  ;;  %v1375_v10 = vld [vmem:[#allocation5 + $0x2630] sm:$0xff] }
  0xb8   :  { %2102 = vmatpush1.msra.mxu1 %v1583_v11  ;;  %2032 = vmatprep.subr.mxu0 %v1155_v12  ;;  %v1792_v9 = vld [vmem:[#allocation5 + $0x3338] sm:$0xff]  ;;  %v1791_v11 = vld [vmem:[#allocation5 + $0x3330] sm:$0xff] }
  0xb9   :  { %2103 = vmatprep.subr.mxu1 %v1571_v13  ;;  %2033 = vmatpush1.msra.mxu0 %v1154_v14  ;;  %v1363_v12 = vld [vmem:[#allocation5 + $0x25d0] sm:$0xff]  ;;  %v1362_v14 = vld [vmem:[#allocation5 + $0x25c8] sm:$0xff] }
  0xba   :  { %2104 = vmatpush1.msra.mxu1 %v1570_v15  ;;  %2034 = vmatprep.subr.mxu0 %v1142_v16  ;;  %v1779_v13 = vld [vmem:[#allocation5 + $0x32d0] sm:$0xff]  ;;  %v1778_v15 = vld [vmem:[#allocation5 + $0x32c8] sm:$0xff] }
  0xbb   :  { %2105 = vmatprep.subr.mxu1 %v1558_v17  ;;  %2035 = vmatpush1.msra.mxu0 %v1141_v18  ;;  %v1350_v16 = vld [vmem:[#allocation5 + $0x2568] sm:$0xff]  ;;  %v1349_v18 = vld [vmem:[#allocation5 + $0x2560] sm:$0xff] }
  0xbc   :  { %2106 = vmatpush1.msra.mxu1 %v1557_v19  ;;  %2036 = vmatprep.subr.mxu0 %v1129_v20  ;;  %v1766_v17 = vld [vmem:[#allocation5 + $0x3268] sm:$0xff]  ;;  %v1765_v19 = vld [vmem:[#allocation5 + $0x3260] sm:$0xff] }
  0xbd   :  { %2107 = vmatprep.subr.mxu1 %v1545_v21  ;;  %2037 = vmatpush1.msra.mxu0 %v1128_v22  ;;  %v1337_v20 = vld [vmem:[#allocation5 + $0x2500] sm:$0xff]  ;;  %v1336_v22 = vld [vmem:[#allocation5 + $0x24f8] sm:$0xff] }
  0xbe   :  { %2108 = vmatpush1.msra.mxu1 %v1544_v23  ;;  %2038 = vmatprep.subr.mxu0 %v1116_v24  ;;  %v1753_v21 = vld [vmem:[#allocation5 + $0x3200] sm:$0xff]  ;;  %v1752_v23 = vld [vmem:[#allocation5 + $0x31f8] sm:$0xff] }
  0xbf   :  { %2109 = vmatprep.subr.mxu1 %v1532_v25  ;;  %2039 = vmatpush1.msra.mxu0 %v1115_v26  ;;  %v1324_v24 = vld [vmem:[#allocation5 + $0x2498] sm:$0xff]  ;;  %v1323_v26 = vld [vmem:[#allocation5 + $0x2490] sm:$0xff] }
  0xc0   :  { %2110 = vmatpush1.msra.mxu1 %v1531_v27  ;;  %2040 = vmatprep.subr.mxu0 %v1103_v28  ;;  %v1740_v25 = vld [vmem:[#allocation5 + $0x3198] sm:$0xff]  ;;  %v1739_v27 = vld [vmem:[#allocation5 + $0x3190] sm:$0xff] }
  0xc1   :  { %2111 = vmatprep.subr.mxu1 %v1519_v29  ;;  %2041 = vmatpush1.msra.mxu0 %v1102_v30  ;;  %v1311_v28 = vld [vmem:[#allocation5 + $0x2430] sm:$0xff]  ;;  %v1310_v30 = vld [vmem:[#allocation5 + $0x2428] sm:$0xff] }
  0xc2   :  { %2112 = vmatpush1.msra.mxu1 %v1518_v31  ;;  %2042 = vmatprep.subr.mxu0 %v1090_v32  ;;  %v1727_v29 = vld [vmem:[#allocation5 + $0x3130] sm:$0xff]  ;;  %v1726_v31 = vld [vmem:[#allocation5 + $0x3128] sm:$0xff] }
  0xc3   :  { %2113 = vmatprep.subr.mxu1 %v1506_v33  ;;  %2043 = vmatpush1.msra.mxu0 %v1089_v34  ;;  %v1298_v32 = vld [vmem:[#allocation5 + $0x23c8] sm:$0xff]  ;;  %v1297_v34 = vld [vmem:[#allocation5 + $0x23c0] sm:$0xff] }
  0xc4   :  { %2114 = vmatpush1.msra.mxu1 %v1505_v35  ;;  %2044 = vmatprep.subr.mxu0 %v1077_v36  ;;  %v1714_v33 = vld [vmem:[#allocation5 + $0x30c8] sm:$0xff]  ;;  %v1713_v35 = vld [vmem:[#allocation5 + $0x30c0] sm:$0xff] }
  0xc5   :  { %2115 = vmatprep.subr.mxu1 %v1493_v37  ;;  %2045 = vmatpush1.msra.mxu0 %v1076_v38  ;;  %v1285_v36 = vld [vmem:[#allocation5 + $0x2360] sm:$0xff]  ;;  %v1284_v38 = vld [vmem:[#allocation5 + $0x2358] sm:$0xff] }
  0xc6   :  { %2116 = vmatpush1.msra.mxu1 %v1492_v39  ;;  %2046 = vmatprep.subr.mxu0 %v1064_v40  ;;  %v1701_v37 = vld [vmem:[#allocation5 + $0x3060] sm:$0xff]  ;;  %v1700_v39 = vld [vmem:[#allocation5 + $0x3058] sm:$0xff] }
  0xc7   :  { %2117 = vmatprep.subr.mxu1 %v1480_v41  ;;  %2047 = vmatpush1.msra.mxu0 %v1063_v42  ;;  %v1272_v40 = vld [vmem:[#allocation5 + $0x22f8] sm:$0xff]  ;;  %v1271_v42 = vld [vmem:[#allocation5 + $0x22f0] sm:$0xff] }
  0xc8   :  { %2118 = vmatpush1.msra.mxu1 %v1479_v43  ;;  %2048 = vmatprep.subr.mxu0 %v1051_v44  ;;  %v1688_v41 = vld [vmem:[#allocation5 + $0x2ff8] sm:$0xff]  ;;  %v1687_v43 = vld [vmem:[#allocation5 + $0x2ff0] sm:$0xff] }
  0xc9   :  { %2119 = vmatprep.subr.mxu1 %v1467_v45  ;;  %2049 = vmatpush1.msra.mxu0 %v1050_v46  ;;  %v1259_v44 = vld [vmem:[#allocation5 + $0x2290] sm:$0xff]  ;;  %v1258_v46 = vld [vmem:[#allocation5 + $0x2288] sm:$0xff] }
  0xca   :  { %2120 = vmatpush1.msra.mxu1 %v1466_v47  ;;  %2050 = vmatprep.subr.mxu0 %v1038_v48  ;;  %v1675_v45 = vld [vmem:[#allocation5 + $0x2f90] sm:$0xff]  ;;  %v1674_v47 = vld [vmem:[#allocation5 + $0x2f88] sm:$0xff] }
  0xcb   :  { %2121 = vmatprep.subr.mxu1 %v1454_v49  ;;  %2051 = vmatpush1.msra.mxu0 %v1037_v50  ;;  %v1246_v48 = vld [vmem:[#allocation5 + $0x2228] sm:$0xff]  ;;  %v1245_v50 = vld [vmem:[#allocation5 + $0x2220] sm:$0xff] }
  0xcc   :  { %2122 = vmatpush1.msra.mxu1 %v1453_v51  ;;  %2052 = vmatprep.subr.mxu0 %v1025_v52  ;;  %v1662_v49 = vld [vmem:[#allocation5 + $0x2f28] sm:$0xff]  ;;  %v1661_v51 = vld [vmem:[#allocation5 + $0x2f20] sm:$0xff] }
  0xcd   :  { %2123 = vmatprep.subr.mxu1 %v1441_v53  ;;  %2053 = vmatpush1.msra.mxu0 %v1024_v54  ;;  %v1233_v52 = vld [vmem:[#allocation5 + $0x21c0] sm:$0xff]  ;;  %v1232_v54 = vld [vmem:[#allocation5 + $0x21b8] sm:$0xff] }
  0xce   :  { %2124 = vmatpush1.msra.mxu1 %v1440_v55  ;;  %2054 = vmatprep.subr.mxu0 %v1012_v56  ;;  %v1649_v53 = vld [vmem:[#allocation5 + $0x2ec0] sm:$0xff]  ;;  %v1648_v55 = vld [vmem:[#allocation5 + $0x2eb8] sm:$0xff] }
  0xcf   :  { %2125 = vmatprep.subr.mxu1 %v1428_v57  ;;  %2055 = vmatpush1.msra.mxu0 %v1011_v58  ;;  %v1220_v56 = vld [vmem:[#allocation5 + $0x2158] sm:$0xff]  ;;  %v1219_v58 = vld [vmem:[#allocation5 + $0x2150] sm:$0xff] }
  0xd0   :  { %2126 = vmatpush1.msra.mxu1 %v1427_v59  ;;  %2056 = vmatprep.subr.mxu0 %v999_v60  ;;  %v1636_v57 = vld [vmem:[#allocation5 + $0x2e58] sm:$0xff]  ;;  %v1635_v59 = vld [vmem:[#allocation5 + $0x2e50] sm:$0xff] }
  0xd1   :  { %2127 = vmatprep.subr.mxu1 %v1415_v61  ;;  %2057 = vmatpush1.msra.mxu0 %v998_v62  ;;  %v1207_v60 = vld [vmem:[#allocation5 + $0x20f0] sm:$0xff]  ;;  %v1206_v62 = vld [vmem:[#allocation5 + $0x20e8] sm:$0xff] }
  0xd2   :  { %2128 = vmatpush1.msra.mxu1 %v1414_v63  ;;  %2058 = vmatprep.subr.mxu0 %v986_v0  ;;  %v1623_v61 = vld [vmem:[#allocation5 + $0x2df0] sm:$0xff]  ;;  %v1622_v63 = vld [vmem:[#allocation5 + $0x2de8] sm:$0xff] }
  0xd3   :  { %2129 = vmatprep.subr.mxu1 %v1402_v1  ;;  %2059 = vmatpush1.msra.mxu0 %v985_v2  ;;  %v1194_v0 = vld [vmem:[#allocation5 + $0x2088] sm:$0xff]  ;;  %v1193_v2 = vld [vmem:[#allocation5 + $0x2080] sm:$0xff] }
  0xd4   :  { %2130 = vmatpush1.msra.mxu1 %v1401_v3  ;;  %2060 = vmatprep.subr.mxu0 %v1389_v4  ;;  %v1610_v1 = vld [vmem:[#allocation5 + $0x2d88] sm:$0xff]  ;;  %v1609_v4 = vld [vmem:[#allocation5 + $0x2d80] sm:$0xff] }
  0xd5   :  { %2131 = vmatprep.subr.mxu1 %v1805_v5  ;;  %2061 = vmatpush2.msra.mxu0 %v1388_v6  ;;  %v150_v3 = vld [vmem:[#allocation2 + $0x28] sm:$0xff]  ;;  %v149_v5 = vld [vmem:[#allocation2 + $0x20] sm:$0xff]  ;;  %v152_v6 = vld [vmem:[#allocation2 + $0x38] sm:$0xff] }
  0xd6   :  { %2132 = vmatpush2.msra.mxu1 %v1804_v7  ;;  %2062 = vmatprep.subr.mxu0 %v1376_v8  ;;  %v351_v7 = vld [vmem:[#allocation5 + $0x630] sm:$0xff] }
  0xd7   :  { %2133 = vmatprep.subr.mxu1 %v1792_v9  ;;  %2063 = vmatpush2.msra.mxu0 %v1375_v10  ;;  %v767_v8 = vld [vmem:[#allocation5 + $0x1330] sm:$0xff]  ;;  %v350_v10 = vld [vmem:[#allocation5 + $0x628] sm:$0xff] }
  0xd8   :  { %2134 = vmatpush2.msra.mxu1 %v1791_v11  ;;  %2064 = vmatprep.subr.mxu0 %v1363_v12  ;;  %v151_v9 = vld [vmem:[#allocation2 + $0x30] sm:$0xff]  ;;  %v766_v11 = vld [vmem:[#allocation5 + $0x1328] sm:$0xff] }
  0xd9   :  { %2135 = vmatprep.subr.mxu1 %v1779_v13  ;;  %2065 = vmatpush2.msra.mxu0 %v1362_v14  ;;  %v338_v12 = vld [vmem:[#allocation5 + $0x5c8] sm:$0xff]  ;;  %v337_v14 = vld [vmem:[#allocation5 + $0x5c0] sm:$0xff] }
  0xda   :  { %2136 = vmatpush2.msra.mxu1 %v1778_v15  ;;  %2066 = vmatprep.subr.mxu0 %v1350_v16  ;;  %v754_v13 = vld [vmem:[#allocation5 + $0x12c8] sm:$0xff]  ;;  %v753_v15 = vld [vmem:[#allocation5 + $0x12c0] sm:$0xff] }
  0xdb   :  { %2137 = vmatprep.subr.mxu1 %v1766_v17  ;;  %2067 = vmatpush2.msra.mxu0 %v1349_v18  ;;  %v325_v16 = vld [vmem:[#allocation5 + $0x560] sm:$0xff]  ;;  %v324_v18 = vld [vmem:[#allocation5 + $0x558] sm:$0xff] }
  0xdc   :  { %2138 = vmatpush2.msra.mxu1 %v1765_v19  ;;  %2068 = vmatprep.subr.mxu0 %v1337_v20  ;;  %v741_v17 = vld [vmem:[#allocation5 + $0x1260] sm:$0xff]  ;;  %v740_v19 = vld [vmem:[#allocation5 + $0x1258] sm:$0xff] }
  0xdd   :  { %2139 = vmatprep.subr.mxu1 %v1753_v21  ;;  %2069 = vmatpush2.msra.mxu0 %v1336_v22  ;;  %v312_v20 = vld [vmem:[#allocation5 + $0x4f8] sm:$0xff]  ;;  %v311_v22 = vld [vmem:[#allocation5 + $0x4f0] sm:$0xff] }
  0xde   :  { %2140 = vmatpush2.msra.mxu1 %v1752_v23  ;;  %2070 = vmatprep.subr.mxu0 %v1324_v24  ;;  %v728_v21 = vld [vmem:[#allocation5 + $0x11f8] sm:$0xff]  ;;  %v727_v23 = vld [vmem:[#allocation5 + $0x11f0] sm:$0xff] }
  0xdf   :  { %2141 = vmatprep.subr.mxu1 %v1740_v25  ;;  %2071 = vmatpush2.msra.mxu0 %v1323_v26  ;;  %v299_v24 = vld [vmem:[#allocation5 + $0x490] sm:$0xff]  ;;  %v298_v26 = vld [vmem:[#allocation5 + $0x488] sm:$0xff] }
  0xe0   :  { %2142 = vmatpush2.msra.mxu1 %v1739_v27  ;;  %2072 = vmatprep.subr.mxu0 %v1311_v28  ;;  %v715_v25 = vld [vmem:[#allocation5 + $0x1190] sm:$0xff]  ;;  %v714_v27 = vld [vmem:[#allocation5 + $0x1188] sm:$0xff] }
  0xe1   :  { %2143 = vmatprep.subr.mxu1 %v1727_v29  ;;  %2073 = vmatpush2.msra.mxu0 %v1310_v30  ;;  %v286_v28 = vld [vmem:[#allocation5 + $0x428] sm:$0xff]  ;;  %v285_v30 = vld [vmem:[#allocation5 + $0x420] sm:$0xff] }
  0xe2   :  { %2144 = vmatpush2.msra.mxu1 %v1726_v31  ;;  %2074 = vmatprep.subr.mxu0 %v1298_v32  ;;  %v702_v29 = vld [vmem:[#allocation5 + $0x1128] sm:$0xff]  ;;  %v701_v31 = vld [vmem:[#allocation5 + $0x1120] sm:$0xff] }
  0xe3   :  { %2145 = vmatprep.subr.mxu1 %v1714_v33  ;;  %2075 = vmatpush2.msra.mxu0 %v1297_v34  ;;  %v273_v32 = vld [vmem:[#allocation5 + $0x3c0] sm:$0xff]  ;;  %v272_v34 = vld [vmem:[#allocation5 + $0x3b8] sm:$0xff] }
  0xe4   :  { %2146 = vmatpush2.msra.mxu1 %v1713_v35  ;;  %2076 = vmatprep.subr.mxu0 %v1285_v36  ;;  %v689_v33 = vld [vmem:[#allocation5 + $0x10c0] sm:$0xff]  ;;  %v688_v35 = vld [vmem:[#allocation5 + $0x10b8] sm:$0xff] }
  0xe5   :  { %2147 = vmatprep.subr.mxu1 %v1701_v37  ;;  %2077 = vmatpush2.msra.mxu0 %v1284_v38  ;;  %v260_v36 = vld [vmem:[#allocation5 + $0x358] sm:$0xff]  ;;  %v259_v38 = vld [vmem:[#allocation5 + $0x350] sm:$0xff] }
  0xe6   :  { %2148 = vmatpush2.msra.mxu1 %v1700_v39  ;;  %2078 = vmatprep.subr.mxu0 %v1272_v40  ;;  %v676_v37 = vld [vmem:[#allocation5 + $0x1058] sm:$0xff]  ;;  %v675_v39 = vld [vmem:[#allocation5 + $0x1050] sm:$0xff] }
  0xe7   :  { %2149 = vmatprep.subr.mxu1 %v1688_v41  ;;  %2079 = vmatpush2.msra.mxu0 %v1271_v42  ;;  %v247_v40 = vld [vmem:[#allocation5 + $0x2f0] sm:$0xff]  ;;  %v246_v42 = vld [vmem:[#allocation5 + $0x2e8] sm:$0xff] }
  0xe8   :  { %2150 = vmatpush2.msra.mxu1 %v1687_v43  ;;  %2080 = vmatprep.subr.mxu0 %v1259_v44  ;;  %v663_v41 = vld [vmem:[#allocation5 + $0xff0] sm:$0xff]  ;;  %v662_v43 = vld [vmem:[#allocation5 + $0xfe8] sm:$0xff] }
  0xe9   :  { %2151 = vmatprep.subr.mxu1 %v1675_v45  ;;  %2081 = vmatpush2.msra.mxu0 %v1258_v46  ;;  %v234_v44 = vld [vmem:[#allocation5 + $0x288] sm:$0xff]  ;;  %v233_v46 = vld [vmem:[#allocation5 + $0x280] sm:$0xff] }
  0xea   :  { %2152 = vmatpush2.msra.mxu1 %v1674_v47  ;;  %2082 = vmatprep.subr.mxu0 %v1246_v48  ;;  %v650_v45 = vld [vmem:[#allocation5 + $0xf88] sm:$0xff]  ;;  %v649_v47 = vld [vmem:[#allocation5 + $0xf80] sm:$0xff] }
  0xeb   :  { %2153 = vmatprep.subr.mxu1 %v1662_v49  ;;  %2083 = vmatpush2.msra.mxu0 %v1245_v50  ;;  %v221_v48 = vld [vmem:[#allocation5 + $0x220] sm:$0xff]  ;;  %v220_v50 = vld [vmem:[#allocation5 + $0x218] sm:$0xff] }
  0xec   :  { %2154 = vmatpush2.msra.mxu1 %v1661_v51  ;;  %2084 = vmatprep.subr.mxu0 %v1233_v52  ;;  %v637_v49 = vld [vmem:[#allocation5 + $0xf20] sm:$0xff]  ;;  %v636_v51 = vld [vmem:[#allocation5 + $0xf18] sm:$0xff] }
  0xed   :  { %2155 = vmatprep.subr.mxu1 %v1649_v53  ;;  %2085 = vmatpush2.msra.mxu0 %v1232_v54  ;;  %v208_v52 = vld [vmem:[#allocation5 + $0x1b8] sm:$0xff]  ;;  %v207_v54 = vld [vmem:[#allocation5 + $0x1b0] sm:$0xff] }
  0xee   :  { %2156 = vmatpush2.msra.mxu1 %v1648_v55  ;;  %2086 = vmatprep.subr.mxu0 %v1220_v56  ;;  %v624_v53 = vld [vmem:[#allocation5 + $0xeb8] sm:$0xff]  ;;  %v623_v55 = vld [vmem:[#allocation5 + $0xeb0] sm:$0xff] }
  0xef   :  { %2157 = vmatprep.subr.mxu1 %v1636_v57  ;;  %2087 = vmatpush2.msra.mxu0 %v1219_v58  ;;  %v195_v56 = vld [vmem:[#allocation5 + $0x150] sm:$0xff]  ;;  %v194_v58 = vld [vmem:[#allocation5 + $0x148] sm:$0xff] }
  0xf0   :  { %2158 = vmatpush2.msra.mxu1 %v1635_v59  ;;  %2088 = vmatprep.subr.mxu0 %v1207_v60  ;;  %v611_v57 = vld [vmem:[#allocation5 + $0xe50] sm:$0xff]  ;;  %v610_v59 = vld [vmem:[#allocation5 + $0xe48] sm:$0xff] }
  0xf1   :  { %2159 = vmatprep.subr.mxu1 %v1623_v61  ;;  %2089 = vmatpush2.msra.mxu0 %v1206_v62  ;;  %v182_v60 = vld [vmem:[#allocation5 + $0xe8] sm:$0xff]  ;;  %v181_v62 = vld [vmem:[#allocation5 + $0xe0] sm:$0xff] }
  0xf2   :  { %2160 = vmatpush2.msra.mxu1 %v1622_v63  ;;  %2090 = vmatprep.subr.mxu0 %v1194_v0  ;;  %v598_v61 = vld [vmem:[#allocation5 + $0xde8] sm:$0xff]  ;;  %v597_v63 = vld [vmem:[#allocation5 + $0xde0] sm:$0xff] }
  0xf3   :  { %2161 = vmatprep.subr.mxu1 %v1610_v1  ;;  %2091 = vmatpush2.msra.mxu0 %v1193_v2  ;;  %v169_v0 = vld [vmem:[#allocation5 + $0x80] sm:$0xff]  ;;  %v168_v2 = vld [vmem:[#allocation5 + $0x78] sm:$0xff] }
  0xf4   :  { %2092 = vmatprep.mubr.f32.mxu0 %v150_v3  ;;  %2162 = vmatpush2.msra.mxu1 %v1609_v4  ;;  %v585_v1 = vld [vmem:[#allocation5 + $0xd80] sm:$0xff]  ;;  %v584_v3 = vld [vmem:[#allocation5 + $0xd78] sm:$0xff] }
  0xf5   :  { %2093 = vmatmul.mubr.f32.vlgmr.msra.gmra.mxu0 %v149_v5  ;;  %2163 = vmatprep.mubr.f32.mxu1 %v152_v6  ;;  %v156_v4 = vld [vmem:[#allocation5 + $0x18] sm:$0xff]  ;;  %v155_v6 = vld [vmem:[#allocation5 + $0x10] sm:$0xff] }
  0xf6   :  { %2170 = vmatprep.subr.mxu0 %v351_v7  ;;  %2241 = vmatprep.subr.mxu1 %v767_v8  ;;  %v572_v5 = vld [vmem:[#allocation5 + $0xd18] sm:$0xff]  ;;  %v571_v7 = vld [vmem:[#allocation5 + $0xd10] sm:$0xff] }
  0xf7   :  { %2164 = vmatmul.mubr.f32.vlgmr.msra.gmra.mxu1 %v151_v9  ;;  %2171 = vmatpush1.msra.mxu0 %v350_v10  ;;  %v559_v8 = vld [vmem:[#allocation5 + $0xcb0] sm:$0xff]  ;;  %v558_v10 = vld [vmem:[#allocation5 + $0xca8] sm:$0xff] }
  0xf8   :  { %2242 = vmatpush1.msra.mxu1 %v766_v11  ;;  %2172 = vmatprep.subr.mxu0 %v338_v12  ;;  %v975_v9 = vld [vmem:[#allocation5 + $0x19b0] sm:$0xff]  ;;  %v974_v11 = vld [vmem:[#allocation5 + $0x19a8] sm:$0xff] }
  0xf9   :  { %2243 = vmatprep.subr.mxu1 %v754_v13  ;;  %2173 = vmatpush1.msra.mxu0 %v337_v14  ;;  %v546_v12 = vld [vmem:[#allocation5 + $0xc48] sm:$0xff]  ;;  %v545_v14 = vld [vmem:[#allocation5 + $0xc40] sm:$0xff] }
  0xfa   :  { %2244 = vmatpush1.msra.mxu1 %v753_v15  ;;  %2174 = vmatprep.subr.mxu0 %v325_v16  ;;  %v962_v13 = vld [vmem:[#allocation5 + $0x1948] sm:$0xff]  ;;  %v961_v15 = vld [vmem:[#allocation5 + $0x1940] sm:$0xff] }
  0xfb   :  { %2245 = vmatprep.subr.mxu1 %v741_v17  ;;  %2175 = vmatpush1.msra.mxu0 %v324_v18  ;;  %v533_v16 = vld [vmem:[#allocation5 + $0xbe0] sm:$0xff]  ;;  %v532_v18 = vld [vmem:[#allocation5 + $0xbd8] sm:$0xff] }
  0xfc   :  { %2246 = vmatpush1.msra.mxu1 %v740_v19  ;;  %2176 = vmatprep.subr.mxu0 %v312_v20  ;;  %v949_v17 = vld [vmem:[#allocation5 + $0x18e0] sm:$0xff]  ;;  %v948_v19 = vld [vmem:[#allocation5 + $0x18d8] sm:$0xff] }
  0xfd   :  { %2247 = vmatprep.subr.mxu1 %v728_v21  ;;  %2177 = vmatpush1.msra.mxu0 %v311_v22  ;;  %v520_v20 = vld [vmem:[#allocation5 + $0xb78] sm:$0xff]  ;;  %v519_v22 = vld [vmem:[#allocation5 + $0xb70] sm:$0xff] }
  0xfe   :  { %2248 = vmatpush1.msra.mxu1 %v727_v23  ;;  %2178 = vmatprep.subr.mxu0 %v299_v24  ;;  %v936_v21 = vld [vmem:[#allocation5 + $0x1878] sm:$0xff]  ;;  %v935_v23 = vld [vmem:[#allocation5 + $0x1870] sm:$0xff] }
  0xff   :  { %2249 = vmatprep.subr.mxu1 %v715_v25  ;;  %2179 = vmatpush1.msra.mxu0 %v298_v26  ;;  %v507_v24 = vld [vmem:[#allocation5 + $0xb10] sm:$0xff]  ;;  %v506_v26 = vld [vmem:[#allocation5 + $0xb08] sm:$0xff] }
 0x100   :  { %2250 = vmatpush1.msra.mxu1 %v714_v27  ;;  %2180 = vmatprep.subr.mxu0 %v286_v28  ;;  %v923_v25 = vld [vmem:[#allocation5 + $0x1810] sm:$0xff]  ;;  %v922_v27 = vld [vmem:[#allocation5 + $0x1808] sm:$0xff] }
 0x101   :  { %2251 = vmatprep.subr.mxu1 %v702_v29  ;;  %2181 = vmatpush1.msra.mxu0 %v285_v30  ;;  %v494_v28 = vld [vmem:[#allocation5 + $0xaa8] sm:$0xff]  ;;  %v493_v30 = vld [vmem:[#allocation5 + $0xaa0] sm:$0xff] }
 0x102   :  { %2252 = vmatpush1.msra.mxu1 %v701_v31  ;;  %2182 = vmatprep.subr.mxu0 %v273_v32  ;;  %v910_v29 = vld [vmem:[#allocation5 + $0x17a8] sm:$0xff]  ;;  %v909_v31 = vld [vmem:[#allocation5 + $0x17a0] sm:$0xff] }
 0x103   :  { %2253 = vmatprep.subr.mxu1 %v689_v33  ;;  %2183 = vmatpush1.msra.mxu0 %v272_v34  ;;  %v481_v32 = vld [vmem:[#allocation5 + $0xa40] sm:$0xff]  ;;  %v480_v34 = vld [vmem:[#allocation5 + $0xa38] sm:$0xff] }
 0x104   :  { %2254 = vmatpush1.msra.mxu1 %v688_v35  ;;  %2184 = vmatprep.subr.mxu0 %v260_v36  ;;  %v897_v33 = vld [vmem:[#allocation5 + $0x1740] sm:$0xff]  ;;  %v896_v35 = vld [vmem:[#allocation5 + $0x1738] sm:$0xff] }
 0x105   :  { %2255 = vmatprep.subr.mxu1 %v676_v37  ;;  %2185 = vmatpush1.msra.mxu0 %v259_v38  ;;  %v468_v36 = vld [vmem:[#allocation5 + $0x9d8] sm:$0xff]  ;;  %v467_v38 = vld [vmem:[#allocation5 + $0x9d0] sm:$0xff] }
 0x106   :  { %2256 = vmatpush1.msra.mxu1 %v675_v39  ;;  %2186 = vmatprep.subr.mxu0 %v247_v40  ;;  %v884_v37 = vld [vmem:[#allocation5 + $0x16d8] sm:$0xff]  ;;  %v883_v39 = vld [vmem:[#allocation5 + $0x16d0] sm:$0xff] }
 0x107   :  { %2257 = vmatprep.subr.mxu1 %v663_v41  ;;  %2187 = vmatpush1.msra.mxu0 %v246_v42  ;;  %v455_v40 = vld [vmem:[#allocation5 + $0x970] sm:$0xff]  ;;  %v454_v42 = vld [vmem:[#allocation5 + $0x968] sm:$0xff] }
 0x108   :  { %2258 = vmatpush1.msra.mxu1 %v662_v43  ;;  %2188 = vmatprep.subr.mxu0 %v234_v44  ;;  %v871_v41 = vld [vmem:[#allocation5 + $0x1670] sm:$0xff]  ;;  %v870_v43 = vld [vmem:[#allocation5 + $0x1668] sm:$0xff] }
 0x109   :  { %2259 = vmatprep.subr.mxu1 %v650_v45  ;;  %2189 = vmatpush1.msra.mxu0 %v233_v46  ;;  %v442_v44 = vld [vmem:[#allocation5 + $0x908] sm:$0xff]  ;;  %v441_v46 = vld [vmem:[#allocation5 + $0x900] sm:$0xff] }
 0x10a   :  { %2260 = vmatpush1.msra.mxu1 %v649_v47  ;;  %2190 = vmatprep.subr.mxu0 %v221_v48  ;;  %v858_v45 = vld [vmem:[#allocation5 + $0x1608] sm:$0xff]  ;;  %v857_v47 = vld [vmem:[#allocation5 + $0x1600] sm:$0xff] }
 0x10b   :  { %2261 = vmatprep.subr.mxu1 %v637_v49  ;;  %2191 = vmatpush1.msra.mxu0 %v220_v50  ;;  %v429_v48 = vld [vmem:[#allocation5 + $0x8a0] sm:$0xff]  ;;  %v428_v50 = vld [vmem:[#allocation5 + $0x898] sm:$0xff] }
 0x10c   :  { %2262 = vmatpush1.msra.mxu1 %v636_v51  ;;  %2192 = vmatprep.subr.mxu0 %v208_v52  ;;  %v845_v49 = vld [vmem:[#allocation5 + $0x15a0] sm:$0xff]  ;;  %v844_v51 = vld [vmem:[#allocation5 + $0x1598] sm:$0xff] }
 0x10d   :  { %2263 = vmatprep.subr.mxu1 %v624_v53  ;;  %2193 = vmatpush1.msra.mxu0 %v207_v54  ;;  %v416_v52 = vld [vmem:[#allocation5 + $0x838] sm:$0xff]  ;;  %v415_v54 = vld [vmem:[#allocation5 + $0x830] sm:$0xff] }
 0x10e   :  { %2264 = vmatpush1.msra.mxu1 %v623_v55  ;;  %2194 = vmatprep.subr.mxu0 %v195_v56  ;;  %v832_v53 = vld [vmem:[#allocation5 + $0x1538] sm:$0xff]  ;;  %v831_v55 = vld [vmem:[#allocation5 + $0x1530] sm:$0xff] }
 0x10f   :  { %2265 = vmatprep.subr.mxu1 %v611_v57  ;;  %2195 = vmatpush1.msra.mxu0 %v194_v58  ;;  %v403_v56 = vld [vmem:[#allocation5 + $0x7d0] sm:$0xff]  ;;  %v402_v58 = vld [vmem:[#allocation5 + $0x7c8] sm:$0xff] }
 0x110   :  { %2266 = vmatpush1.msra.mxu1 %v610_v59  ;;  %2196 = vmatprep.subr.mxu0 %v182_v60  ;;  %v819_v57 = vld [vmem:[#allocation5 + $0x14d0] sm:$0xff]  ;;  %v818_v59 = vld [vmem:[#allocation5 + $0x14c8] sm:$0xff] }
 0x111   :  { %2267 = vmatprep.subr.mxu1 %v598_v61  ;;  %2197 = vmatpush1.msra.mxu0 %v181_v62  ;;  %v390_v60 = vld [vmem:[#allocation5 + $0x768] sm:$0xff]  ;;  %v389_v62 = vld [vmem:[#allocation5 + $0x760] sm:$0xff] }
 0x112   :  { %2268 = vmatpush1.msra.mxu1 %v597_v63  ;;  %2198 = vmatprep.subr.mxu0 %v169_v0  ;;  %v806_v61 = vld [vmem:[#allocation5 + $0x1468] sm:$0xff]  ;;  %v805_v63 = vld [vmem:[#allocation5 + $0x1460] sm:$0xff] }
 0x113   :  { %2269 = vmatprep.subr.mxu1 %v585_v1  ;;  %2199 = vmatpush1.msra.mxu0 %v168_v2  ;;  %v377_v0 = vld [vmem:[#allocation5 + $0x700] sm:$0xff]  ;;  %v376_v2 = vld [vmem:[#allocation5 + $0x6f8] sm:$0xff] }
 0x114   :  { %2270 = vmatpush1.msra.mxu1 %v584_v3  ;;  %2200 = vmatprep.subr.mxu0 %v156_v4  ;;  %v793_v1 = vld [vmem:[#allocation5 + $0x1400] sm:$0xff]  ;;  %v792_v3 = vld [vmem:[#allocation5 + $0x13f8] sm:$0xff] }
 0x115   :  { %2271 = vmatprep.subr.mxu1 %v572_v5  ;;  %2201 = vmatpush1.msra.mxu0 %v155_v6  ;;  %v364_v4 = vld [vmem:[#allocation5 + $0x698] sm:$0xff]  ;;  %v363_v6 = vld [vmem:[#allocation5 + $0x690] sm:$0xff] }
 0x116   :  { %2272 = vmatpush1.msra.mxu1 %v571_v7  ;;  %2202 = vmatprep.subr.mxu0 %v559_v8  ;;  %v780_v5 = vld [vmem:[#allocation5 + $0x1398] sm:$0xff]  ;;  %v779_v7 = vld [vmem:[#allocation5 + $0x1390] sm:$0xff] }
 0x117   :  { %2273 = vmatprep.subr.mxu1 %v975_v9  ;;  %2203 = vmatpush2.msra.mxu0 %v558_v10  ;;  %v1183_v8 = vld [vmem:[#allocation5 + $0x2030] sm:$0xff]  ;;  %v5321_v9 = vld [vmem:[#allocation2 + $0x8] sm:$0xff] }
 0x118   :  { %2274 = vmatpush2.msra.mxu1 %v974_v11  ;;  %2204 = vmatprep.subr.mxu0 %v546_v12  ;;  %v1599_v10 = vld [vmem:[#allocation5 + $0x2d30] sm:$0xff]  ;;  %v5322_v11 = vld [vmem:[#allocation2] sm:$0xff]  ;;  %v1182_v12 = vld [vmem:[#allocation5 + $0x2028] sm:$0xff] }
 0x119   :  { %2275 = vmatprep.subr.mxu1 %v962_v13  ;;  %2205 = vmatpush2.msra.mxu0 %v545_v14  ;;  %v1598_v13 = vld [vmem:[#allocation5 + $0x2d28] sm:$0xff]  ;;  %v5323_v14 = vld [vmem:[#allocation2 + $0x18] sm:$0xff] }
 0x11a   :  { %2276 = vmatpush2.msra.mxu1 %v961_v15  ;;  %2206 = vmatprep.subr.mxu0 %v533_v16  ;;  %v1170_v15 = vld [vmem:[#allocation5 + $0x1fc8] sm:$0xff] }
 0x11b   :  { %2277 = vmatprep.subr.mxu1 %v949_v17  ;;  %2207 = vmatpush2.msra.mxu0 %v532_v18  ;;  %v1586_v16 = vld [vmem:[#allocation5 + $0x2cc8] sm:$0xff]  ;;  %v5324_v17 = vld [vmem:[#allocation2 + $0x10] sm:$0xff]  ;;  %v1169_v18 = vld [vmem:[#allocation5 + $0x1fc0] sm:$0xff] }
 0x11c   :  { %2278 = vmatpush2.msra.mxu1 %v948_v19  ;;  %2208 = vmatprep.subr.mxu0 %v520_v20  ;;  %v1585_v19 = vld [vmem:[#allocation5 + $0x2cc0] sm:$0xff] }
 0x11d   :  { %2279 = vmatprep.subr.mxu1 %v936_v21  ;;  %2209 = vmatpush2.msra.mxu0 %v519_v22  ;;  %v1157_v20 = vld [vmem:[#allocation5 + $0x1f60] sm:$0xff]  ;;  %v1156_v22 = vld [vmem:[#allocation5 + $0x1f58] sm:$0xff] }
 0x11e   :  { %2280 = vmatpush2.msra.mxu1 %v935_v23  ;;  %2210 = vmatprep.subr.mxu0 %v507_v24  ;;  %v1573_v21 = vld [vmem:[#allocation5 + $0x2c60] sm:$0xff]  ;;  %v1572_v23 = vld [vmem:[#allocation5 + $0x2c58] sm:$0xff] }
 0x11f   :  { %2281 = vmatprep.subr.mxu1 %v923_v25  ;;  %2211 = vmatpush2.msra.mxu0 %v506_v26  ;;  %v1144_v24 = vld [vmem:[#allocation5 + $0x1ef8] sm:$0xff]  ;;  %v1143_v26 = vld [vmem:[#allocation5 + $0x1ef0] sm:$0xff] }
 0x120   :  { %2282 = vmatpush2.msra.mxu1 %v922_v27  ;;  %2212 = vmatprep.subr.mxu0 %v494_v28  ;;  %v1560_v25 = vld [vmem:[#allocation5 + $0x2bf8] sm:$0xff]  ;;  %v1559_v27 = vld [vmem:[#allocation5 + $0x2bf0] sm:$0xff] }
 0x121   :  { %2283 = vmatprep.subr.mxu1 %v910_v29  ;;  %2213 = vmatpush2.msra.mxu0 %v493_v30  ;;  %v1131_v28 = vld [vmem:[#allocation5 + $0x1e90] sm:$0xff]  ;;  %v1130_v30 = vld [vmem:[#allocation5 + $0x1e88] sm:$0xff] }
 0x122   :  { %2284 = vmatpush2.msra.mxu1 %v909_v31  ;;  %2214 = vmatprep.subr.mxu0 %v481_v32  ;;  %v1547_v29 = vld [vmem:[#allocation5 + $0x2b90] sm:$0xff]  ;;  %v1546_v31 = vld [vmem:[#allocation5 + $0x2b88] sm:$0xff] }
 0x123   :  { %2285 = vmatprep.subr.mxu1 %v897_v33  ;;  %2215 = vmatpush2.msra.mxu0 %v480_v34  ;;  %v1118_v32 = vld [vmem:[#allocation5 + $0x1e28] sm:$0xff]  ;;  %v1117_v34 = vld [vmem:[#allocation5 + $0x1e20] sm:$0xff] }
 0x124   :  { %2286 = vmatpush2.msra.mxu1 %v896_v35  ;;  %2216 = vmatprep.subr.mxu0 %v468_v36  ;;  %v1534_v33 = vld [vmem:[#allocation5 + $0x2b28] sm:$0xff]  ;;  %v1533_v35 = vld [vmem:[#allocation5 + $0x2b20] sm:$0xff] }
 0x125   :  { %2287 = vmatprep.subr.mxu1 %v884_v37  ;;  %2217 = vmatpush2.msra.mxu0 %v467_v38  ;;  %v1105_v36 = vld [vmem:[#allocation5 + $0x1dc0] sm:$0xff]  ;;  %v1104_v38 = vld [vmem:[#allocation5 + $0x1db8] sm:$0xff] }
 0x126   :  { %2288 = vmatpush2.msra.mxu1 %v883_v39  ;;  %2218 = vmatprep.subr.mxu0 %v455_v40  ;;  %v1521_v37 = vld [vmem:[#allocation5 + $0x2ac0] sm:$0xff]  ;;  %v1520_v39 = vld [vmem:[#allocation5 + $0x2ab8] sm:$0xff] }
 0x127   :  { %2289 = vmatprep.subr.mxu1 %v871_v41  ;;  %2219 = vmatpush2.msra.mxu0 %v454_v42  ;;  %v1092_v40 = vld [vmem:[#allocation5 + $0x1d58] sm:$0xff]  ;;  %v1091_v42 = vld [vmem:[#allocation5 + $0x1d50] sm:$0xff] }
 0x128   :  { %2290 = vmatpush2.msra.mxu1 %v870_v43  ;;  %2220 = vmatprep.subr.mxu0 %v442_v44  ;;  %v1508_v41 = vld [vmem:[#allocation5 + $0x2a58] sm:$0xff]  ;;  %v1507_v43 = vld [vmem:[#allocation5 + $0x2a50] sm:$0xff] }
 0x129   :  { %2291 = vmatprep.subr.mxu1 %v858_v45  ;;  %2221 = vmatpush2.msra.mxu0 %v441_v46  ;;  %v1079_v44 = vld [vmem:[#allocation5 + $0x1cf0] sm:$0xff]  ;;  %v1078_v46 = vld [vmem:[#allocation5 + $0x1ce8] sm:$0xff] }
 0x12a   :  { %2292 = vmatpush2.msra.mxu1 %v857_v47  ;;  %2222 = vmatprep.subr.mxu0 %v429_v48  ;;  %v1495_v45 = vld [vmem:[#allocation5 + $0x29f0] sm:$0xff]  ;;  %v1494_v47 = vld [vmem:[#allocation5 + $0x29e8] sm:$0xff] }
 0x12b   :  { %2293 = vmatprep.subr.mxu1 %v845_v49  ;;  %2223 = vmatpush2.msra.mxu0 %v428_v50  ;;  %v1066_v48 = vld [vmem:[#allocation5 + $0x1c88] sm:$0xff]  ;;  %v1065_v50 = vld [vmem:[#allocation5 + $0x1c80] sm:$0xff] }
 0x12c   :  { %2294 = vmatpush2.msra.mxu1 %v844_v51  ;;  %2224 = vmatprep.subr.mxu0 %v416_v52  ;;  %v1482_v49 = vld [vmem:[#allocation5 + $0x2988] sm:$0xff]  ;;  %v1481_v51 = vld [vmem:[#allocation5 + $0x2980] sm:$0xff] }
 0x12d   :  { %2295 = vmatprep.subr.mxu1 %v832_v53  ;;  %2225 = vmatpush2.msra.mxu0 %v415_v54  ;;  %v1053_v52 = vld [vmem:[#allocation5 + $0x1c20] sm:$0xff]  ;;  %v1052_v54 = vld [vmem:[#allocation5 + $0x1c18] sm:$0xff] }
 0x12e   :  { %2296 = vmatpush2.msra.mxu1 %v831_v55  ;;  %2226 = vmatprep.subr.mxu0 %v403_v56  ;;  %v1469_v53 = vld [vmem:[#allocation5 + $0x2920] sm:$0xff]  ;;  %v1468_v55 = vld [vmem:[#allocation5 + $0x2918] sm:$0xff] }
 0x12f   :  { %2297 = vmatprep.subr.mxu1 %v819_v57  ;;  %2227 = vmatpush2.msra.mxu0 %v402_v58  ;;  %v1040_v56 = vld [vmem:[#allocation5 + $0x1bb8] sm:$0xff]  ;;  %v1039_v58 = vld [vmem:[#allocation5 + $0x1bb0] sm:$0xff] }
 0x130   :  { %2298 = vmatpush2.msra.mxu1 %v818_v59  ;;  %2228 = vmatprep.subr.mxu0 %v390_v60  ;;  %v1456_v57 = vld [vmem:[#allocation5 + $0x28b8] sm:$0xff]  ;;  %v1455_v59 = vld [vmem:[#allocation5 + $0x28b0] sm:$0xff] }
 0x131   :  { %2299 = vmatprep.subr.mxu1 %v806_v61  ;;  %2229 = vmatpush2.msra.mxu0 %v389_v62  ;;  %v1027_v60 = vld [vmem:[#allocation5 + $0x1b50] sm:$0xff]  ;;  %v1026_v62 = vld [vmem:[#allocation5 + $0x1b48] sm:$0xff] }
 0x132   :  { %2300 = vmatpush2.msra.mxu1 %v805_v63  ;;  %2230 = vmatprep.subr.mxu0 %v377_v0  ;;  %v1443_v61 = vld [vmem:[#allocation5 + $0x2850] sm:$0xff]  ;;  %v1442_v63 = vld [vmem:[#allocation5 + $0x2848] sm:$0xff] }
 0x133   :  { %2301 = vmatprep.subr.mxu1 %v793_v1  ;;  %2231 = vmatpush2.msra.mxu0 %v376_v2  ;;  %v1014_v0 = vld [vmem:[#allocation5 + $0x1ae8] sm:$0xff]  ;;  %v1013_v2 = vld [vmem:[#allocation5 + $0x1ae0] sm:$0xff] }
 0x134   :  { %2302 = vmatpush2.msra.mxu1 %v792_v3  ;;  %2232 = vmatprep.subr.mxu0 %v364_v4  ;;  %v1430_v1 = vld [vmem:[#allocation5 + $0x27e8] sm:$0xff]  ;;  %v1429_v3 = vld [vmem:[#allocation5 + $0x27e0] sm:$0xff] }
 0x135   :  { %2303 = vmatprep.subr.mxu1 %v780_v5  ;;  %2233 = vmatpush2.msra.mxu0 %v363_v6  ;;  %v1001_v4 = vld [vmem:[#allocation5 + $0x1a80] sm:$0xff]  ;;  %v1000_v6 = vld [vmem:[#allocation5 + $0x1a78] sm:$0xff] }
 0x136   :  { %2234 = vmatprep.mubr.f32.mxu0 %v5321_v9  ;;  %2304 = vmatpush2.msra.mxu1 %v779_v7  ;;  %v1417_v5 = vld [vmem:[#allocation5 + $0x2780] sm:$0xff]  ;;  %v1416_v7 = vld [vmem:[#allocation5 + $0x2778] sm:$0xff] }
 0x137   :  { %2235 = vmatmul.mubr.f32.vlgmr.msra.gmra.mxu0 %v5322_v11  ;;  %2305 = vmatprep.mubr.f32.mxu1 %v5323_v14  ;;  %v1404_v9 = vld [vmem:[#allocation5 + $0x2718] sm:$0xff]  ;;  %v1403_v11 = vld [vmem:[#allocation5 + $0x2710] sm:$0xff]  ;;  %v1390_v14 = vld [vmem:[#allocation5 + $0x26a8] sm:$0xff] }
 0x138   :  { %2312 = vmatprep.subr.mxu0 %v1183_v8  ;;  %2383 = vmatprep.subr.mxu1 %v1599_v10  ;;  %v988_v8 = vld [vmem:[#allocation5 + $0x1a18] sm:$0xff]  ;;  %v987_v10 = vld [vmem:[#allocation5 + $0x1a10] sm:$0xff] }
 0x139   :  { %2306 = vmatmul.mubr.f32.vlgmr.msra.gmra.mxu1 %v5324_v17  ;;  %2313 = vmatpush1.msra.mxu0 %v1182_v12  ;;  %v1391_v12 = vld [vmem:[#allocation5 + $0x26b0] sm:$0xff]  ;;  %v1794_v17 = vld [vmem:[#allocation5 + $0x3348] sm:$0xff] }
 0x13a   :  { %2384 = vmatpush1.msra.mxu1 %v1598_v13  ;;  %2314 = vmatprep.subr.mxu0 %v1170_v15  ;;  %v1807_v13 = vld [vmem:[#allocation5 + $0x33b0] sm:$0xff]  ;;  %v1806_v15 = vld [vmem:[#allocation5 + $0x33a8] sm:$0xff] }
 0x13b   :  { %2385 = vmatprep.subr.mxu1 %v1586_v16  ;;  %2315 = vmatpush1.msra.mxu0 %v1169_v18  ;;  %v1378_v16 = vld [vmem:[#allocation5 + $0x2648] sm:$0xff]  ;;  %v1377_v18 = vld [vmem:[#allocation5 + $0x2640] sm:$0xff] }
 0x13c   :  { %2386 = vmatpush1.msra.mxu1 %v1585_v19  ;;  %2316 = vmatprep.subr.mxu0 %v1157_v20  ;;  %v1793_v19 = vld [vmem:[#allocation5 + $0x3340] sm:$0xff] }
 0x13d   :  { %2387 = vmatprep.subr.mxu1 %v1573_v21  ;;  %2317 = vmatpush1.msra.mxu0 %v1156_v22  ;;  %v1365_v20 = vld [vmem:[#allocation5 + $0x25e0] sm:$0xff]  ;;  %v1364_v22 = vld [vmem:[#allocation5 + $0x25d8] sm:$0xff] }
 0x13e   :  { %2388 = vmatpush1.msra.mxu1 %v1572_v23  ;;  %2318 = vmatprep.subr.mxu0 %v1144_v24  ;;  %v1781_v21 = vld [vmem:[#allocation5 + $0x32e0] sm:$0xff]  ;;  %v1780_v23 = vld [vmem:[#allocation5 + $0x32d8] sm:$0xff] }
 0x13f   :  { %2389 = vmatprep.subr.mxu1 %v1560_v25  ;;  %2319 = vmatpush1.msra.mxu0 %v1143_v26  ;;  %v1352_v24 = vld [vmem:[#allocation5 + $0x2578] sm:$0xff]  ;;  %v1351_v26 = vld [vmem:[#allocation5 + $0x2570] sm:$0xff] }
 0x140   :  { %2390 = vmatpush1.msra.mxu1 %v1559_v27  ;;  %2320 = vmatprep.subr.mxu0 %v1131_v28  ;;  %v1768_v25 = vld [vmem:[#allocation5 + $0x3278] sm:$0xff]  ;;  %v1767_v27 = vld [vmem:[#allocation5 + $0x3270] sm:$0xff] }
 0x141   :  { %2391 = vmatprep.subr.mxu1 %v1547_v29  ;;  %2321 = vmatpush1.msra.mxu0 %v1130_v30  ;;  %v1339_v28 = vld [vmem:[#allocation5 + $0x2510] sm:$0xff]  ;;  %v1338_v30 = vld [vmem:[#allocation5 + $0x2508] sm:$0xff] }
 0x142   :  { %2392 = vmatpush1.msra.mxu1 %v1546_v31  ;;  %2322 = vmatprep.subr.mxu0 %v1118_v32  ;;  %v1755_v29 = vld [vmem:[#allocation5 + $0x3210] sm:$0xff]  ;;  %v1754_v31 = vld [vmem:[#allocation5 + $0x3208] sm:$0xff] }
 0x143   :  { %2393 = vmatprep.subr.mxu1 %v1534_v33  ;;  %2323 = vmatpush1.msra.mxu0 %v1117_v34  ;;  %v1326_v32 = vld [vmem:[#allocation5 + $0x24a8] sm:$0xff]  ;;  %v1325_v34 = vld [vmem:[#allocation5 + $0x24a0] sm:$0xff] }
 0x144   :  { %2394 = vmatpush1.msra.mxu1 %v1533_v35  ;;  %2324 = vmatprep.subr.mxu0 %v1105_v36  ;;  %v1742_v33 = vld [vmem:[#allocation5 + $0x31a8] sm:$0xff]  ;;  %v1741_v35 = vld [vmem:[#allocation5 + $0x31a0] sm:$0xff] }
 0x145   :  { %2395 = vmatprep.subr.mxu1 %v1521_v37  ;;  %2325 = vmatpush1.msra.mxu0 %v1104_v38  ;;  %v1313_v36 = vld [vmem:[#allocation5 + $0x2440] sm:$0xff]  ;;  %v1312_v38 = vld [vmem:[#allocation5 + $0x2438] sm:$0xff] }
 0x146   :  { %2396 = vmatpush1.msra.mxu1 %v1520_v39  ;;  %2326 = vmatprep.subr.mxu0 %v1092_v40  ;;  %v1729_v37 = vld [vmem:[#allocation5 + $0x3140] sm:$0xff]  ;;  %v1728_v39 = vld [vmem:[#allocation5 + $0x3138] sm:$0xff] }
 0x147   :  { %2397 = vmatprep.subr.mxu1 %v1508_v41  ;;  %2327 = vmatpush1.msra.mxu0 %v1091_v42  ;;  %v1300_v40 = vld [vmem:[#allocation5 + $0x23d8] sm:$0xff]  ;;  %v1299_v42 = vld [vmem:[#allocation5 + $0x23d0] sm:$0xff] }
 0x148   :  { %2398 = vmatpush1.msra.mxu1 %v1507_v43  ;;  %2328 = vmatprep.subr.mxu0 %v1079_v44  ;;  %v1716_v41 = vld [vmem:[#allocation5 + $0x30d8] sm:$0xff]  ;;  %v1715_v43 = vld [vmem:[#allocation5 + $0x30d0] sm:$0xff] }
 0x149   :  { %2399 = vmatprep.subr.mxu1 %v1495_v45  ;;  %2329 = vmatpush1.msra.mxu0 %v1078_v46  ;;  %v1287_v44 = vld [vmem:[#allocation5 + $0x2370] sm:$0xff]  ;;  %v1286_v46 = vld [vmem:[#allocation5 + $0x2368] sm:$0xff] }
 0x14a   :  { %2400 = vmatpush1.msra.mxu1 %v1494_v47  ;;  %2330 = vmatprep.subr.mxu0 %v1066_v48  ;;  %v1703_v45 = vld [vmem:[#allocation5 + $0x3070] sm:$0xff]  ;;  %v1702_v47 = vld [vmem:[#allocation5 + $0x3068] sm:$0xff] }
 0x14b   :  { %2401 = vmatprep.subr.mxu1 %v1482_v49  ;;  %2331 = vmatpush1.msra.mxu0 %v1065_v50  ;;  %v1274_v48 = vld [vmem:[#allocation5 + $0x2308] sm:$0xff]  ;;  %v1273_v50 = vld [vmem:[#allocation5 + $0x2300] sm:$0xff] }
 0x14c   :  { %2402 = vmatpush1.msra.mxu1 %v1481_v51  ;;  %2332 = vmatprep.subr.mxu0 %v1053_v52  ;;  %v1690_v49 = vld [vmem:[#allocation5 + $0x3008] sm:$0xff]  ;;  %v1689_v51 = vld [vmem:[#allocation5 + $0x3000] sm:$0xff] }
 0x14d   :  { %2403 = vmatprep.subr.mxu1 %v1469_v53  ;;  %2333 = vmatpush1.msra.mxu0 %v1052_v54  ;;  %v1261_v52 = vld [vmem:[#allocation5 + $0x22a0] sm:$0xff]  ;;  %v1260_v54 = vld [vmem:[#allocation5 + $0x2298] sm:$0xff] }
 0x14e   :  { %2404 = vmatpush1.msra.mxu1 %v1468_v55  ;;  %2334 = vmatprep.subr.mxu0 %v1040_v56  ;;  %v1677_v53 = vld [vmem:[#allocation5 + $0x2fa0] sm:$0xff]  ;;  %v1676_v55 = vld [vmem:[#allocation5 + $0x2f98] sm:$0xff] }
 0x14f   :  { %2405 = vmatprep.subr.mxu1 %v1456_v57  ;;  %2335 = vmatpush1.msra.mxu0 %v1039_v58  ;;  %v1248_v56 = vld [vmem:[#allocation5 + $0x2238] sm:$0xff]  ;;  %v1247_v58 = vld [vmem:[#allocation5 + $0x2230] sm:$0xff] }
 0x150   :  { %2406 = vmatpush1.msra.mxu1 %v1455_v59  ;;  %2336 = vmatprep.subr.mxu0 %v1027_v60  ;;  %v1664_v57 = vld [vmem:[#allocation5 + $0x2f38] sm:$0xff]  ;;  %v1663_v59 = vld [vmem:[#allocation5 + $0x2f30] sm:$0xff] }
 0x151   :  { %2407 = vmatprep.subr.mxu1 %v1443_v61  ;;  %2337 = vmatpush1.msra.mxu0 %v1026_v62  ;;  %v1235_v60 = vld [vmem:[#allocation5 + $0x21d0] sm:$0xff]  ;;  %v1234_v62 = vld [vmem:[#allocation5 + $0x21c8] sm:$0xff] }
 0x152   :  { %2408 = vmatpush1.msra.mxu1 %v1442_v63  ;;  %2338 = vmatprep.subr.mxu0 %v1014_v0  ;;  %v1651_v61 = vld [vmem:[#allocation5 + $0x2ed0] sm:$0xff]  ;;  %v1650_v63 = vld [vmem:[#allocation5 + $0x2ec8] sm:$0xff] }
 0x153   :  { %2409 = vmatprep.subr.mxu1 %v1430_v1  ;;  %2339 = vmatpush1.msra.mxu0 %v1013_v2  ;;  %v1222_v0 = vld [vmem:[#allocation5 + $0x2168] sm:$0xff]  ;;  %v1221_v2 = vld [vmem:[#allocation5 + $0x2160] sm:$0xff] }
 0x154   :  { %2410 = vmatpush1.msra.mxu1 %v1429_v3  ;;  %2340 = vmatprep.subr.mxu0 %v1001_v4  ;;  %v1638_v1 = vld [vmem:[#allocation5 + $0x2e68] sm:$0xff]  ;;  %v1637_v3 = vld [vmem:[#allocation5 + $0x2e60] sm:$0xff] }
 0x155   :  { %2411 = vmatprep.subr.mxu1 %v1417_v5  ;;  %2341 = vmatpush1.msra.mxu0 %v1000_v6  ;;  %v1209_v4 = vld [vmem:[#allocation5 + $0x2100] sm:$0xff]  ;;  %v1208_v6 = vld [vmem:[#allocation5 + $0x20f8] sm:$0xff] }
 0x156   :  { %2412 = vmatpush1.msra.mxu1 %v1416_v7  ;;  %2342 = vmatprep.subr.mxu0 %v988_v8  ;;  %v1625_v5 = vld [vmem:[#allocation5 + $0x2e00] sm:$0xff]  ;;  %v1624_v7 = vld [vmem:[#allocation5 + $0x2df8] sm:$0xff] }
 0x157   :  { %2413 = vmatprep.subr.mxu1 %v1404_v9  ;;  %2343 = vmatpush1.msra.mxu0 %v987_v10  ;;  %v1196_v8 = vld [vmem:[#allocation5 + $0x2098] sm:$0xff]  ;;  %v1195_v10 = vld [vmem:[#allocation5 + $0x2090] sm:$0xff] }
 0x158   :  { %2414 = vmatpush1.msra.mxu1 %v1403_v11  ;;  %2344 = vmatprep.subr.mxu0 %v1391_v12  ;;  %v1612_v9 = vld [vmem:[#allocation5 + $0x2d98] sm:$0xff]  ;;  %v1611_v11 = vld [vmem:[#allocation5 + $0x2d90] sm:$0xff]  ;;  %v353_v12 = vld [vmem:[#allocation5 + $0x640] sm:$0xff] }
 0x159   :  { %2415 = vmatprep.subr.mxu1 %v1807_v13  ;;  %2345 = vmatpush2.msra.mxu0 %v1390_v14  ;;  %v5325_v13 = vld [vmem:[#allocation2 + $0x28] sm:$0xff]  ;;  %v769_v14 = vld [vmem:[#allocation5 + $0x1340] sm:$0xff] }
 0x15a   :  { %2416 = vmatpush2.msra.mxu1 %v1806_v15  ;;  %2346 = vmatprep.subr.mxu0 %v1378_v16  ;;  %v5326_v15 = vld [vmem:[#allocation2 + $0x20] sm:$0xff]  ;;  %v352_v16 = vld [vmem:[#allocation5 + $0x638] sm:$0xff] }
 0x15b   :  { %2417 = vmatprep.subr.mxu1 %v1794_v17  ;;  %2347 = vmatpush2.msra.mxu0 %v1377_v18  ;;  %v768_v17 = vld [vmem:[#allocation5 + $0x1338] sm:$0xff] }
 0x15c   :  { %2418 = vmatpush2.msra.mxu1 %v1793_v19  ;;  %2348 = vmatprep.subr.mxu0 %v1365_v20  ;;  %v5327_v18 = vld [vmem:[#allocation2 + $0x38] sm:$0xff] }
 0x15d   :  { %2419 = vmatprep.subr.mxu1 %v1781_v21  ;;  %2349 = vmatpush2.msra.mxu0 %v1364_v22  ;;  %v340_v19 = vld [vmem:[#allocation5 + $0x5d8] sm:$0xff]  ;;  %v5328_v21 = vld [vmem:[#allocation2 + $0x30] sm:$0xff] }
 0x15e   :  { %2420 = vmatpush2.msra.mxu1 %v1780_v23  ;;  %2350 = vmatprep.subr.mxu0 %v1352_v24  ;;  %v756_v20 = vld [vmem:[#allocation5 + $0x12d8] sm:$0xff]  ;;  %v339_v22 = vld [vmem:[#allocation5 + $0x5d0] sm:$0xff] }
 0x15f   :  { %2421 = vmatprep.subr.mxu1 %v1768_v25  ;;  %2351 = vmatpush2.msra.mxu0 %v1351_v26  ;;  %v755_v23 = vld [vmem:[#allocation5 + $0x12d0] sm:$0xff]  ;;  %v326_v26 = vld [vmem:[#allocation5 + $0x568] sm:$0xff] }
 0x160   :  { %2422 = vmatpush2.msra.mxu1 %v1767_v27  ;;  %2352 = vmatprep.subr.mxu0 %v1339_v28  ;;  %v327_v24 = vld [vmem:[#allocation5 + $0x570] sm:$0xff]  ;;  %v742_v27 = vld [vmem:[#allocation5 + $0x1268] sm:$0xff] }
 0x161   :  { %2423 = vmatprep.subr.mxu1 %v1755_v29  ;;  %2353 = vmatpush2.msra.mxu0 %v1338_v30  ;;  %v743_v25 = vld [vmem:[#allocation5 + $0x1270] sm:$0xff]  ;;  %v314_v28 = vld [vmem:[#allocation5 + $0x508] sm:$0xff]  ;;  %v313_v30 = vld [vmem:[#allocation5 + $0x500] sm:$0xff] }
 0x162   :  { %2424 = vmatpush2.msra.mxu1 %v1754_v31  ;;  %2354 = vmatprep.subr.mxu0 %v1326_v32  ;;  %v730_v29 = vld [vmem:[#allocation5 + $0x1208] sm:$0xff]  ;;  %v729_v31 = vld [vmem:[#allocation5 + $0x1200] sm:$0xff] }
 0x163   :  { %2425 = vmatprep.subr.mxu1 %v1742_v33  ;;  %2355 = vmatpush2.msra.mxu0 %v1325_v34  ;;  %v301_v32 = vld [vmem:[#allocation5 + $0x4a0] sm:$0xff]  ;;  %v300_v34 = vld [vmem:[#allocation5 + $0x498] sm:$0xff] }
 0x164   :  { %2426 = vmatpush2.msra.mxu1 %v1741_v35  ;;  %2356 = vmatprep.subr.mxu0 %v1313_v36  ;;  %v717_v33 = vld [vmem:[#allocation5 + $0x11a0] sm:$0xff]  ;;  %v716_v35 = vld [vmem:[#allocation5 + $0x1198] sm:$0xff] }
 0x165   :  { %2427 = vmatprep.subr.mxu1 %v1729_v37  ;;  %2357 = vmatpush2.msra.mxu0 %v1312_v38  ;;  %v288_v36 = vld [vmem:[#allocation5 + $0x438] sm:$0xff]  ;;  %v287_v38 = vld [vmem:[#allocation5 + $0x430] sm:$0xff] }
 0x166   :  { %2428 = vmatpush2.msra.mxu1 %v1728_v39  ;;  %2358 = vmatprep.subr.mxu0 %v1300_v40  ;;  %v704_v37 = vld [vmem:[#allocation5 + $0x1138] sm:$0xff]  ;;  %v703_v39 = vld [vmem:[#allocation5 + $0x1130] sm:$0xff] }
 0x167   :  { %2429 = vmatprep.subr.mxu1 %v1716_v41  ;;  %2359 = vmatpush2.msra.mxu0 %v1299_v42  ;;  %v275_v40 = vld [vmem:[#allocation5 + $0x3d0] sm:$0xff]  ;;  %v274_v42 = vld [vmem:[#allocation5 + $0x3c8] sm:$0xff] }
 0x168   :  { %2430 = vmatpush2.msra.mxu1 %v1715_v43  ;;  %2360 = vmatprep.subr.mxu0 %v1287_v44  ;;  %v691_v41 = vld [vmem:[#allocation5 + $0x10d0] sm:$0xff]  ;;  %v690_v43 = vld [vmem:[#allocation5 + $0x10c8] sm:$0xff] }
 0x169   :  { %2431 = vmatprep.subr.mxu1 %v1703_v45  ;;  %2361 = vmatpush2.msra.mxu0 %v1286_v46  ;;  %v262_v44 = vld [vmem:[#allocation5 + $0x368] sm:$0xff]  ;;  %v261_v46 = vld [vmem:[#allocation5 + $0x360] sm:$0xff] }
 0x16a   :  { %2432 = vmatpush2.msra.mxu1 %v1702_v47  ;;  %2362 = vmatprep.subr.mxu0 %v1274_v48  ;;  %v678_v45 = vld [vmem:[#allocation5 + $0x1068] sm:$0xff]  ;;  %v677_v47 = vld [vmem:[#allocation5 + $0x1060] sm:$0xff] }
 0x16b   :  { %2433 = vmatprep.subr.mxu1 %v1690_v49  ;;  %2363 = vmatpush2.msra.mxu0 %v1273_v50  ;;  %v249_v48 = vld [vmem:[#allocation5 + $0x300] sm:$0xff]  ;;  %v248_v50 = vld [vmem:[#allocation5 + $0x2f8] sm:$0xff] }
 0x16c   :  { %2434 = vmatpush2.msra.mxu1 %v1689_v51  ;;  %2364 = vmatprep.subr.mxu0 %v1261_v52  ;;  %v665_v49 = vld [vmem:[#allocation5 + $0x1000] sm:$0xff]  ;;  %v664_v51 = vld [vmem:[#allocation5 + $0xff8] sm:$0xff] }
 0x16d   :  { %2435 = vmatprep.subr.mxu1 %v1677_v53  ;;  %2365 = vmatpush2.msra.mxu0 %v1260_v54  ;;  %v236_v52 = vld [vmem:[#allocation5 + $0x298] sm:$0xff]  ;;  %v235_v54 = vld [vmem:[#allocation5 + $0x290] sm:$0xff] }
 0x16e   :  { %2436 = vmatpush2.msra.mxu1 %v1676_v55  ;;  %2366 = vmatprep.subr.mxu0 %v1248_v56  ;;  %v652_v53 = vld [vmem:[#allocation5 + $0xf98] sm:$0xff]  ;;  %v651_v55 = vld [vmem:[#allocation5 + $0xf90] sm:$0xff] }
 0x16f   :  { %2437 = vmatprep.subr.mxu1 %v1664_v57  ;;  %2367 = vmatpush2.msra.mxu0 %v1247_v58  ;;  %v223_v56 = vld [vmem:[#allocation5 + $0x230] sm:$0xff]  ;;  %v222_v58 = vld [vmem:[#allocation5 + $0x228] sm:$0xff] }
 0x170   :  { %2438 = vmatpush2.msra.mxu1 %v1663_v59  ;;  %2368 = vmatprep.subr.mxu0 %v1235_v60  ;;  %v639_v57 = vld [vmem:[#allocation5 + $0xf30] sm:$0xff]  ;;  %v638_v59 = vld [vmem:[#allocation5 + $0xf28] sm:$0xff] }
 0x171   :  { %2439 = vmatprep.subr.mxu1 %v1651_v61  ;;  %2369 = vmatpush2.msra.mxu0 %v1234_v62  ;;  %v210_v60 = vld [vmem:[#allocation5 + $0x1c8] sm:$0xff]  ;;  %v209_v62 = vld [vmem:[#allocation5 + $0x1c0] sm:$0xff] }
 0x172   :  { %2440 = vmatpush2.msra.mxu1 %v1650_v63  ;;  %2370 = vmatprep.subr.mxu0 %v1222_v0  ;;  %v626_v61 = vld [vmem:[#allocation5 + $0xec8] sm:$0xff]  ;;  %v625_v63 = vld [vmem:[#allocation5 + $0xec0] sm:$0xff] }
 0x173   :  { %2441 = vmatprep.subr.mxu1 %v1638_v1  ;;  %2371 = vmatpush2.msra.mxu0 %v1221_v2  ;;  %v197_v0 = vld [vmem:[#allocation5 + $0x160] sm:$0xff]  ;;  %v196_v2 = vld [vmem:[#allocation5 + $0x158] sm:$0xff] }
 0x174   :  { %2442 = vmatpush2.msra.mxu1 %v1637_v3  ;;  %2372 = vmatprep.subr.mxu0 %v1209_v4  ;;  %v613_v1 = vld [vmem:[#allocation5 + $0xe60] sm:$0xff]  ;;  %v612_v3 = vld [vmem:[#allocation5 + $0xe58] sm:$0xff] }
 0x175   :  { %2443 = vmatprep.subr.mxu1 %v1625_v5  ;;  %2373 = vmatpush2.msra.mxu0 %v1208_v6  ;;  %v184_v4 = vld [vmem:[#allocation5 + $0xf8] sm:$0xff]  ;;  %v183_v6 = vld [vmem:[#allocation5 + $0xf0] sm:$0xff] }
 0x176   :  { %2444 = vmatpush2.msra.mxu1 %v1624_v7  ;;  %2374 = vmatprep.subr.mxu0 %v1196_v8  ;;  %v600_v5 = vld [vmem:[#allocation5 + $0xdf8] sm:$0xff]  ;;  %v599_v7 = vld [vmem:[#allocation5 + $0xdf0] sm:$0xff] }
 0x177   :  { %2445 = vmatprep.subr.mxu1 %v1612_v9  ;;  %2375 = vmatpush2.msra.mxu0 %v1195_v10  ;;  %v171_v8 = vld [vmem:[#allocation5 + $0x90] sm:$0xff]  ;;  %v170_v10 = vld [vmem:[#allocation5 + $0x88] sm:$0xff] }
 0x178   :  { %2376 = vmatprep.mubr.f32.mxu0 %v5325_v13  ;;  %2446 = vmatpush2.msra.mxu1 %v1611_v11  ;;  %v587_v9 = vld [vmem:[#allocation5 + $0xd90] sm:$0xff]  ;;  %v586_v11 = vld [vmem:[#allocation5 + $0xd88] sm:$0xff] }
 0x179   :  { %2377 = vmatmul.mubr.f32.vlgmr.msra.gmra.mxu0 %v5326_v15  ;;  %2447 = vmatprep.mubr.f32.mxu1 %v5327_v18  ;;  %v574_v13 = vld [vmem:[#allocation5 + $0xd28] sm:$0xff]  ;;  %v573_v15 = vld [vmem:[#allocation5 + $0xd20] sm:$0xff]  ;;  %v560_v18 = vld [vmem:[#allocation5 + $0xcb8] sm:$0xff] }
 0x17a   :  { %2454 = vmatprep.subr.mxu0 %v353_v12  ;;  %2525 = vmatprep.subr.mxu1 %v769_v14  ;;  %v158_v12 = vld [vmem:[#allocation5 + $0x28] sm:$0xff]  ;;  %v157_v14 = vld [vmem:[#allocation5 + $0x20] sm:$0xff] }
 0x17b   :  { %2448 = vmatmul.mubr.f32.vlgmr.msra.gmra.mxu1 %v5328_v21  ;;  %2455 = vmatpush1.msra.mxu0 %v352_v16  ;;  %v561_v16 = vld [vmem:[#allocation5 + $0xcc0] sm:$0xff]  ;;  %v964_v21 = vld [vmem:[#allocation5 + $0x1958] sm:$0xff] }
 0x17c   :  { %2526 = vmatpush1.msra.mxu1 %v768_v17  ;;  %2456 = vmatprep.subr.mxu0 %v340_v19  ;;  %v977_v17 = vld [vmem:[#allocation5 + $0x19c0] sm:$0xff]  ;;  %v976_v19 = vld [vmem:[#allocation5 + $0x19b8] sm:$0xff] }
 0x17d   :  { %2527 = vmatprep.subr.mxu1 %v756_v20  ;;  %2457 = vmatpush1.msra.mxu0 %v339_v22  ;;  %v548_v20 = vld [vmem:[#allocation5 + $0xc58] sm:$0xff]  ;;  %v547_v22 = vld [vmem:[#allocation5 + $0xc50] sm:$0xff] }
 0x17e   :  { %2528 = vmatpush1.msra.mxu1 %v755_v23  ;;  %2458 = vmatprep.subr.mxu0 %v327_v24  ;;  %v963_v23 = vld [vmem:[#allocation5 + $0x1950] sm:$0xff] }
 0x17f   :  { %2529 = vmatprep.subr.mxu1 %v743_v25  ;;  %2459 = vmatpush1.msra.mxu0 %v326_v26  ;;  %v535_v24 = vld [vmem:[#allocation5 + $0xbf0] sm:$0xff]  ;;  %v534_v26 = vld [vmem:[#allocation5 + $0xbe8] sm:$0xff] }
 0x180   :  { %2530 = vmatpush1.msra.mxu1 %v742_v27  ;;  %2460 = vmatprep.subr.mxu0 %v314_v28  ;;  %v951_v25 = vld [vmem:[#allocation5 + $0x18f0] sm:$0xff]  ;;  %v950_v27 = vld [vmem:[#allocation5 + $0x18e8] sm:$0xff] }
 0x181   :  { %2531 = vmatprep.subr.mxu1 %v730_v29  ;;  %2461 = vmatpush1.msra.mxu0 %v313_v30  ;;  %v522_v28 = vld [vmem:[#allocation5 + $0xb88] sm:$0xff]  ;;  %v521_v30 = vld [vmem:[#allocation5 + $0xb80] sm:$0xff] }
 0x182   :  { %2532 = vmatpush1.msra.mxu1 %v729_v31  ;;  %2462 = vmatprep.subr.mxu0 %v301_v32  ;;  %v938_v29 = vld [vmem:[#allocation5 + $0x1888] sm:$0xff]  ;;  %v937_v31 = vld [vmem:[#allocation5 + $0x1880] sm:$0xff] }
 0x183   :  { %2533 = vmatprep.subr.mxu1 %v717_v33  ;;  %2463 = vmatpush1.msra.mxu0 %v300_v34  ;;  %v509_v32 = vld [vmem:[#allocation5 + $0xb20] sm:$0xff]  ;;  %v508_v34 = vld [vmem:[#allocation5 + $0xb18] sm:$0xff] }
 0x184   :  { %2534 = vmatpush1.msra.mxu1 %v716_v35  ;;  %2464 = vmatprep.subr.mxu0 %v288_v36  ;;  %v925_v33 = vld [vmem:[#allocation5 + $0x1820] sm:$0xff]  ;;  %v924_v35 = vld [vmem:[#allocation5 + $0x1818] sm:$0xff] }
 0x185   :  { %2535 = vmatprep.subr.mxu1 %v704_v37  ;;  %2465 = vmatpush1.msra.mxu0 %v287_v38  ;;  %v496_v36 = vld [vmem:[#allocation5 + $0xab8] sm:$0xff]  ;;  %v495_v38 = vld [vmem:[#allocation5 + $0xab0] sm:$0xff] }
 0x186   :  { %2536 = vmatpush1.msra.mxu1 %v703_v39  ;;  %2466 = vmatprep.subr.mxu0 %v275_v40  ;;  %v912_v37 = vld [vmem:[#allocation5 + $0x17b8] sm:$0xff]  ;;  %v911_v39 = vld [vmem:[#allocation5 + $0x17b0] sm:$0xff] }
 0x187   :  { %2537 = vmatprep.subr.mxu1 %v691_v41  ;;  %2467 = vmatpush1.msra.mxu0 %v274_v42  ;;  %v483_v40 = vld [vmem:[#allocation5 + $0xa50] sm:$0xff]  ;;  %v482_v42 = vld [vmem:[#allocation5 + $0xa48] sm:$0xff] }
 0x188   :  { %2538 = vmatpush1.msra.mxu1 %v690_v43  ;;  %2468 = vmatprep.subr.mxu0 %v262_v44  ;;  %v899_v41 = vld [vmem:[#allocation5 + $0x1750] sm:$0xff]  ;;  %v898_v43 = vld [vmem:[#allocation5 + $0x1748] sm:$0xff] }
 0x189   :  { %2539 = vmatprep.subr.mxu1 %v678_v45  ;;  %2469 = vmatpush1.msra.mxu0 %v261_v46  ;;  %v470_v44 = vld [vmem:[#allocation5 + $0x9e8] sm:$0xff]  ;;  %v469_v46 = vld [vmem:[#allocation5 + $0x9e0] sm:$0xff] }
 0x18a   :  { %2540 = vmatpush1.msra.mxu1 %v677_v47  ;;  %2470 = vmatprep.subr.mxu0 %v249_v48  ;;  %v886_v45 = vld [vmem:[#allocation5 + $0x16e8] sm:$0xff]  ;;  %v885_v47 = vld [vmem:[#allocation5 + $0x16e0] sm:$0xff] }
 0x18b   :  { %2541 = vmatprep.subr.mxu1 %v665_v49  ;;  %2471 = vmatpush1.msra.mxu0 %v248_v50  ;;  %v457_v48 = vld [vmem:[#allocation5 + $0x980] sm:$0xff]  ;;  %v456_v50 = vld [vmem:[#allocation5 + $0x978] sm:$0xff] }
 0x18c   :  { %2542 = vmatpush1.msra.mxu1 %v664_v51  ;;  %2472 = vmatprep.subr.mxu0 %v236_v52  ;;  %v873_v49 = vld [vmem:[#allocation5 + $0x1680] sm:$0xff]  ;;  %v872_v51 = vld [vmem:[#allocation5 + $0x1678] sm:$0xff] }
 0x18d   :  { %2543 = vmatprep.subr.mxu1 %v652_v53  ;;  %2473 = vmatpush1.msra.mxu0 %v235_v54  ;;  %v444_v52 = vld [vmem:[#allocation5 + $0x918] sm:$0xff]  ;;  %v443_v54 = vld [vmem:[#allocation5 + $0x910] sm:$0xff] }
 0x18e   :  { %2544 = vmatpush1.msra.mxu1 %v651_v55  ;;  %2474 = vmatprep.subr.mxu0 %v223_v56  ;;  %v860_v53 = vld [vmem:[#allocation5 + $0x1618] sm:$0xff]  ;;  %v859_v55 = vld [vmem:[#allocation5 + $0x1610] sm:$0xff] }
 0x18f   :  { %2545 = vmatprep.subr.mxu1 %v639_v57  ;;  %2475 = vmatpush1.msra.mxu0 %v222_v58  ;;  %v431_v56 = vld [vmem:[#allocation5 + $0x8b0] sm:$0xff]  ;;  %v430_v58 = vld [vmem:[#allocation5 + $0x8a8] sm:$0xff] }
 0x190   :  { %2546 = vmatpush1.msra.mxu1 %v638_v59  ;;  %2476 = vmatprep.subr.mxu0 %v210_v60  ;;  %v847_v57 = vld [vmem:[#allocation5 + $0x15b0] sm:$0xff]  ;;  %v846_v59 = vld [vmem:[#allocation5 + $0x15a8] sm:$0xff] }
 0x191   :  { %2547 = vmatprep.subr.mxu1 %v626_v61  ;;  %2477 = vmatpush1.msra.mxu0 %v209_v62  ;;  %v418_v60 = vld [vmem:[#allocation5 + $0x848] sm:$0xff]  ;;  %v417_v62 = vld [vmem:[#allocation5 + $0x840] sm:$0xff] }
 0x192   :  { %2548 = vmatpush1.msra.mxu1 %v625_v63  ;;  %2478 = vmatprep.subr.mxu0 %v197_v0  ;;  %v834_v61 = vld [vmem:[#allocation5 + $0x1548] sm:$0xff]  ;;  %v833_v63 = vld [vmem:[#allocation5 + $0x1540] sm:$0xff] }
 0x193   :  { %2549 = vmatprep.subr.mxu1 %v613_v1  ;;  %2479 = vmatpush1.msra.mxu0 %v196_v2  ;;  %v405_v0 = vld [vmem:[#allocation5 + $0x7e0] sm:$0xff]  ;;  %v404_v2 = vld [vmem:[#allocation5 + $0x7d8] sm:$0xff] }
 0x194   :  { %2550 = vmatpush1.msra.mxu1 %v612_v3  ;;  %2480 = vmatprep.subr.mxu0 %v184_v4  ;;  %v821_v1 = vld [vmem:[#allocation5 + $0x14e0] sm:$0xff]  ;;  %v820_v3 = vld [vmem:[#allocation5 + $0x14d8] sm:$0xff] }
 0x195   :  { %2551 = vmatprep.subr.mxu1 %v600_v5  ;;  %2481 = vmatpush1.msra.mxu0 %v183_v6  ;;  %v392_v4 = vld [vmem:[#allocation5 + $0x778] sm:$0xff]  ;;  %v391_v6 = vld [vmem:[#allocation5 + $0x770] sm:$0xff] }
 0x196   :  { %2552 = vmatpush1.msra.mxu1 %v599_v7  ;;  %2482 = vmatprep.subr.mxu0 %v171_v8  ;;  %v808_v5 = vld [vmem:[#allocation5 + $0x1478] sm:$0xff]  ;;  %v807_v7 = vld [vmem:[#allocation5 + $0x1470] sm:$0xff] }
 0x197   :  { %2553 = vmatprep.subr.mxu1 %v587_v9  ;;  %2483 = vmatpush1.msra.mxu0 %v170_v10  ;;  %v379_v8 = vld [vmem:[#allocation5 + $0x710] sm:$0xff]  ;;  %v378_v10 = vld [vmem:[#allocation5 + $0x708] sm:$0xff] }
 0x198   :  { %2554 = vmatpush1.msra.mxu1 %v586_v11  ;;  %2484 = vmatprep.subr.mxu0 %v158_v12  ;;  %v795_v9 = vld [vmem:[#allocation5 + $0x1410] sm:$0xff]  ;;  %v794_v11 = vld [vmem:[#allocation5 + $0x1408] sm:$0xff] }
 0x199   :  { %2555 = vmatprep.subr.mxu1 %v574_v13  ;;  %2485 = vmatpush1.msra.mxu0 %v157_v14  ;;  %v366_v12 = vld [vmem:[#allocation5 + $0x6a8] sm:$0xff]  ;;  %v365_v14 = vld [vmem:[#allocation5 + $0x6a0] sm:$0xff] }
 0x19a   :  { %2556 = vmatpush1.msra.mxu1 %v573_v15  ;;  %2486 = vmatprep.subr.mxu0 %v561_v16  ;;  %v782_v13 = vld [vmem:[#allocation5 + $0x13a8] sm:$0xff]  ;;  %v781_v15 = vld [vmem:[#allocation5 + $0x13a0] sm:$0xff] }
 0x19b   :  { %2557 = vmatprep.subr.mxu1 %v977_v17  ;;  %2487 = vmatpush2.msra.mxu0 %v560_v18  ;;  %v1185_v16 = vld [vmem:[#allocation5 + $0x2040] sm:$0xff]  ;;  %v5329_v17 = vld [vmem:[#allocation2 + $0x8] sm:$0xff] }
 0x19c   :  { %2558 = vmatpush2.msra.mxu1 %v976_v19  ;;  %2488 = vmatprep.subr.mxu0 %v548_v20  ;;  %v1601_v18 = vld [vmem:[#allocation5 + $0x2d40] sm:$0xff]  ;;  %v1184_v20 = vld [vmem:[#allocation5 + $0x2038] sm:$0xff] }
 0x19d   :  { %2559 = vmatprep.subr.mxu1 %v964_v21  ;;  %2489 = vmatpush2.msra.mxu0 %v547_v22  ;;  %v5330_v19 = vld [vmem:[#allocation2] sm:$0xff]  ;;  %v1600_v21 = vld [vmem:[#allocation5 + $0x2d38] sm:$0xff] }
 0x19e   :  { %2560 = vmatpush2.msra.mxu1 %v963_v23  ;;  %2490 = vmatprep.subr.mxu0 %v535_v24  ;;  %v5331_v22 = vld [vmem:[#allocation2 + $0x18] sm:$0xff] }
 0x19f   :  { %2561 = vmatprep.subr.mxu1 %v951_v25  ;;  %2491 = vmatpush2.msra.mxu0 %v534_v26  ;;  %v1172_v23 = vld [vmem:[#allocation5 + $0x1fd8] sm:$0xff]  ;;  %v5332_v25 = vld [vmem:[#allocation2 + $0x10] sm:$0xff] }
 0x1a0   :  { %2562 = vmatpush2.msra.mxu1 %v950_v27  ;;  %2492 = vmatprep.subr.mxu0 %v522_v28  ;;  %v1588_v24 = vld [vmem:[#allocation5 + $0x2cd8] sm:$0xff]  ;;  %v1171_v26 = vld [vmem:[#allocation5 + $0x1fd0] sm:$0xff] }
 0x1a1   :  { %2563 = vmatprep.subr.mxu1 %v938_v29  ;;  %2493 = vmatpush2.msra.mxu0 %v521_v30  ;;  %v1587_v27 = vld [vmem:[#allocation5 + $0x2cd0] sm:$0xff]  ;;  %v1158_v30 = vld [vmem:[#allocation5 + $0x1f68] sm:$0xff] }
 0x1a2   :  { %2564 = vmatpush2.msra.mxu1 %v937_v31  ;;  %2494 = vmatprep.subr.mxu0 %v509_v32  ;;  %v1159_v28 = vld [vmem:[#allocation5 + $0x1f70] sm:$0xff]  ;;  %v1574_v31 = vld [vmem:[#allocation5 + $0x2c68] sm:$0xff] }
 0x1a3   :  { %2565 = vmatprep.subr.mxu1 %v925_v33  ;;  %2495 = vmatpush2.msra.mxu0 %v508_v34  ;;  %v1575_v29 = vld [vmem:[#allocation5 + $0x2c70] sm:$0xff]  ;;  %v1146_v32 = vld [vmem:[#allocation5 + $0x1f08] sm:$0xff]  ;;  %v1145_v34 = vld [vmem:[#allocation5 + $0x1f00] sm:$0xff] }
 0x1a4   :  { %2566 = vmatpush2.msra.mxu1 %v924_v35  ;;  %2496 = vmatprep.subr.mxu0 %v496_v36  ;;  %v1562_v33 = vld [vmem:[#allocation5 + $0x2c08] sm:$0xff]  ;;  %v1561_v35 = vld [vmem:[#allocation5 + $0x2c00] sm:$0xff] }
 0x1a5   :  { %2567 = vmatprep.subr.mxu1 %v912_v37  ;;  %2497 = vmatpush2.msra.mxu0 %v495_v38  ;;  %v1133_v36 = vld [vmem:[#allocation5 + $0x1ea0] sm:$0xff]  ;;  %v1132_v38 = vld [vmem:[#allocation5 + $0x1e98] sm:$0xff] }
 0x1a6   :  { %2568 = vmatpush2.msra.mxu1 %v911_v39  ;;  %2498 = vmatprep.subr.mxu0 %v483_v40  ;;  %v1549_v37 = vld [vmem:[#allocation5 + $0x2ba0] sm:$0xff]  ;;  %v1548_v39 = vld [vmem:[#allocation5 + $0x2b98] sm:$0xff] }
 0x1a7   :  { %2569 = vmatprep.subr.mxu1 %v899_v41  ;;  %2499 = vmatpush2.msra.mxu0 %v482_v42  ;;  %v1120_v40 = vld [vmem:[#allocation5 + $0x1e38] sm:$0xff]  ;;  %v1119_v42 = vld [vmem:[#allocation5 + $0x1e30] sm:$0xff] }
 0x1a8   :  { %2570 = vmatpush2.msra.mxu1 %v898_v43  ;;  %2500 = vmatprep.subr.mxu0 %v470_v44  ;;  %v1536_v41 = vld [vmem:[#allocation5 + $0x2b38] sm:$0xff]  ;;  %v1535_v43 = vld [vmem:[#allocation5 + $0x2b30] sm:$0xff] }
 0x1a9   :  { %2571 = vmatprep.subr.mxu1 %v886_v45  ;;  %2501 = vmatpush2.msra.mxu0 %v469_v46  ;;  %v1107_v44 = vld [vmem:[#allocation5 + $0x1dd0] sm:$0xff]  ;;  %v1106_v46 = vld [vmem:[#allocation5 + $0x1dc8] sm:$0xff] }
 0x1aa   :  { %2572 = vmatpush2.msra.mxu1 %v885_v47  ;;  %2502 = vmatprep.subr.mxu0 %v457_v48  ;;  %v1523_v45 = vld [vmem:[#allocation5 + $0x2ad0] sm:$0xff]  ;;  %v1522_v47 = vld [vmem:[#allocation5 + $0x2ac8] sm:$0xff] }
 0x1ab   :  { %2573 = vmatprep.subr.mxu1 %v873_v49  ;;  %2503 = vmatpush2.msra.mxu0 %v456_v50  ;;  %v1094_v48 = vld [vmem:[#allocation5 + $0x1d68] sm:$0xff]  ;;  %v1093_v50 = vld [vmem:[#allocation5 + $0x1d60] sm:$0xff] }
 0x1ac   :  { %2574 = vmatpush2.msra.mxu1 %v872_v51  ;;  %2504 = vmatprep.subr.mxu0 %v444_v52  ;;  %v1510_v49 = vld [vmem:[#allocation5 + $0x2a68] sm:$0xff]  ;;  %v1509_v51 = vld [vmem:[#allocation5 + $0x2a60] sm:$0xff] }
 0x1ad   :  { %2575 = vmatprep.subr.mxu1 %v860_v53  ;;  %2505 = vmatpush2.msra.mxu0 %v443_v54  ;;  %v1081_v52 = vld [vmem:[#allocation5 + $0x1d00] sm:$0xff]  ;;  %v1080_v54 = vld [vmem:[#allocation5 + $0x1cf8] sm:$0xff] }
 0x1ae   :  { %2576 = vmatpush2.msra.mxu1 %v859_v55  ;;  %2506 = vmatprep.subr.mxu0 %v431_v56  ;;  %v1497_v53 = vld [vmem:[#allocation5 + $0x2a00] sm:$0xff]  ;;  %v1496_v55 = vld [vmem:[#allocation5 + $0x29f8] sm:$0xff] }
 0x1af   :  { %2577 = vmatprep.subr.mxu1 %v847_v57  ;;  %2507 = vmatpush2.msra.mxu0 %v430_v58  ;;  %v1068_v56 = vld [vmem:[#allocation5 + $0x1c98] sm:$0xff]  ;;  %v1067_v58 = vld [vmem:[#allocation5 + $0x1c90] sm:$0xff] }
 0x1b0   :  { %2578 = vmatpush2.msra.mxu1 %v846_v59  ;;  %2508 = vmatprep.subr.mxu0 %v418_v60  ;;  %v1484_v57 = vld [vmem:[#allocation5 + $0x2998] sm:$0xff]  ;;  %v1483_v59 = vld [vmem:[#allocation5 + $0x2990] sm:$0xff] }
 0x1b1   :  { %2579 = vmatprep.subr.mxu1 %v834_v61  ;;  %2509 = vmatpush2.msra.mxu0 %v417_v62  ;;  %v1055_v60 = vld [vmem:[#allocation5 + $0x1c30] sm:$0xff]  ;;  %v1054_v62 = vld [vmem:[#allocation5 + $0x1c28] sm:$0xff] }
 0x1b2   :  { %2580 = vmatpush2.msra.mxu1 %v833_v63  ;;  %2510 = vmatprep.subr.mxu0 %v405_v0  ;;  %v1471_v61 = vld [vmem:[#allocation5 + $0x2930] sm:$0xff]  ;;  %v1470_v63 = vld [vmem:[#allocation5 + $0x2928] sm:$0xff] }
 0x1b3   :  { %2581 = vmatprep.subr.mxu1 %v821_v1  ;;  %2511 = vmatpush2.msra.mxu0 %v404_v2  ;;  %v1042_v0 = vld [vmem:[#allocation5 + $0x1bc8] sm:$0xff]  ;;  %v1041_v2 = vld [vmem:[#allocation5 + $0x1bc0] sm:$0xff] }
 0x1b4   :  { %2582 = vmatpush2.msra.mxu1 %v820_v3  ;;  %2512 = vmatprep.subr.mxu0 %v392_v4  ;;  %v1458_v1 = vld [vmem:[#allocation5 + $0x28c8] sm:$0xff]  ;;  %v1457_v3 = vld [vmem:[#allocation5 + $0x28c0] sm:$0xff] }
 0x1b5   :  { %2583 = vmatprep.subr.mxu1 %v808_v5  ;;  %2513 = vmatpush2.msra.mxu0 %v391_v6  ;;  %v1029_v4 = vld [vmem:[#allocation5 + $0x1b60] sm:$0xff]  ;;  %v1028_v6 = vld [vmem:[#allocation5 + $0x1b58] sm:$0xff] }
 0x1b6   :  { %2584 = vmatpush2.msra.mxu1 %v807_v7  ;;  %2514 = vmatprep.subr.mxu0 %v379_v8  ;;  %v1445_v5 = vld [vmem:[#allocation5 + $0x2860] sm:$0xff]  ;;  %v1444_v7 = vld [vmem:[#allocation5 + $0x2858] sm:$0xff] }
 0x1b7   :  { %2585 = vmatprep.subr.mxu1 %v795_v9  ;;  %2515 = vmatpush2.msra.mxu0 %v378_v10  ;;  %v1016_v8 = vld [vmem:[#allocation5 + $0x1af8] sm:$0xff]  ;;  %v1015_v10 = vld [vmem:[#allocation5 + $0x1af0] sm:$0xff] }
 0x1b8   :  { %2586 = vmatpush2.msra.mxu1 %v794_v11  ;;  %2516 = vmatprep.subr.mxu0 %v366_v12  ;;  %v1432_v9 = vld [vmem:[#allocation5 + $0x27f8] sm:$0xff]  ;;  %v1431_v11 = vld [vmem:[#allocation5 + $0x27f0] sm:$0xff] }
 0x1b9   :  { %2587 = vmatprep.subr.mxu1 %v782_v13  ;;  %2517 = vmatpush2.msra.mxu0 %v365_v14  ;;  %v1003_v12 = vld [vmem:[#allocation5 + $0x1a90] sm:$0xff]  ;;  %v1002_v14 = vld [vmem:[#allocation5 + $0x1a88] sm:$0xff] }
 0x1ba   :  { %2518 = vmatprep.mubr.f32.mxu0 %v5329_v17  ;;  %2588 = vmatpush2.msra.mxu1 %v781_v15  ;;  %v1419_v13 = vld [vmem:[#allocation5 + $0x2790] sm:$0xff]  ;;  %v1418_v15 = vld [vmem:[#allocation5 + $0x2788] sm:$0xff] }
 0x1bb   :  { %2519 = vmatmul.mubr.f32.vlgmr.msra.gmra.mxu0 %v5330_v19  ;;  %2589 = vmatprep.mubr.f32.mxu1 %v5331_v22  ;;  %v1406_v17 = vld [vmem:[#allocation5 + $0x2728] sm:$0xff]  ;;  %v1405_v19 = vld [vmem:[#allocation5 + $0x2720] sm:$0xff]  ;;  %v1392_v22 = vld [vmem:[#allocation5 + $0x26b8] sm:$0xff] }
 0x1bc   :  { %2596 = vmatprep.subr.mxu0 %v1185_v16  ;;  %2667 = vmatprep.subr.mxu1 %v1601_v18  ;;  %v990_v16 = vld [vmem:[#allocation5 + $0x1a28] sm:$0xff]  ;;  %v989_v18 = vld [vmem:[#allocation5 + $0x1a20] sm:$0xff] }
 0x1bd   :  { %2590 = vmatmul.mubr.f32.vlgmr.msra.gmra.mxu1 %v5332_v25  ;;  %2597 = vmatpush1.msra.mxu0 %v1184_v20  ;;  %v1393_v20 = vld [vmem:[#allocation5 + $0x26c0] sm:$0xff]  ;;  %v1796_v25 = vld [vmem:[#allocation5 + $0x3358] sm:$0xff] }
 0x1be   :  { %2668 = vmatpush1.msra.mxu1 %v1600_v21  ;;  %2598 = vmatprep.subr.mxu0 %v1172_v23  ;;  %v1809_v21 = vld [vmem:[#allocation5 + $0x33c0] sm:$0xff]  ;;  %v1808_v23 = vld [vmem:[#allocation5 + $0x33b8] sm:$0xff] }
 0x1bf   :  { %2669 = vmatprep.subr.mxu1 %v1588_v24  ;;  %2599 = vmatpush1.msra.mxu0 %v1171_v26  ;;  %v1380_v24 = vld [vmem:[#allocation5 + $0x2658] sm:$0xff]  ;;  %v1379_v26 = vld [vmem:[#allocation5 + $0x2650] sm:$0xff] }
 0x1c0   :  { %2670 = vmatpush1.msra.mxu1 %v1587_v27  ;;  %2600 = vmatprep.subr.mxu0 %v1159_v28  ;;  %v1795_v27 = vld [vmem:[#allocation5 + $0x3350] sm:$0xff] }
 0x1c1   :  { %2671 = vmatprep.subr.mxu1 %v1575_v29  ;;  %2601 = vmatpush1.msra.mxu0 %v1158_v30  ;;  %v1367_v28 = vld [vmem:[#allocation5 + $0x25f0] sm:$0xff]  ;;  %v1366_v30 = vld [vmem:[#allocation5 + $0x25e8] sm:$0xff] }
 0x1c2   :  { %2672 = vmatpush1.msra.mxu1 %v1574_v31  ;;  %2602 = vmatprep.subr.mxu0 %v1146_v32  ;;  %v1783_v29 = vld [vmem:[#allocation5 + $0x32f0] sm:$0xff]  ;;  %v1782_v31 = vld [vmem:[#allocation5 + $0x32e8] sm:$0xff] }
 0x1c3   :  { %2673 = vmatprep.subr.mxu1 %v1562_v33  ;;  %2603 = vmatpush1.msra.mxu0 %v1145_v34  ;;  %v1354_v32 = vld [vmem:[#allocation5 + $0x2588] sm:$0xff]  ;;  %v1353_v34 = vld [vmem:[#allocation5 + $0x2580] sm:$0xff] }
 0x1c4   :  { %2674 = vmatpush1.msra.mxu1 %v1561_v35  ;;  %2604 = vmatprep.subr.mxu0 %v1133_v36  ;;  %v1770_v33 = vld [vmem:[#allocation5 + $0x3288] sm:$0xff]  ;;  %v1769_v35 = vld [vmem:[#allocation5 + $0x3280] sm:$0xff] }
 0x1c5   :  { %2675 = vmatprep.subr.mxu1 %v1549_v37  ;;  %2605 = vmatpush1.msra.mxu0 %v1132_v38  ;;  %v1341_v36 = vld [vmem:[#allocation5 + $0x2520] sm:$0xff]  ;;  %v1340_v38 = vld [vmem:[#allocation5 + $0x2518] sm:$0xff] }
 0x1c6   :  { %2676 = vmatpush1.msra.mxu1 %v1548_v39  ;;  %2606 = vmatprep.subr.mxu0 %v1120_v40  ;;  %v1757_v37 = vld [vmem:[#allocation5 + $0x3220] sm:$0xff]  ;;  %v1756_v39 = vld [vmem:[#allocation5 + $0x3218] sm:$0xff] }
 0x1c7   :  { %2677 = vmatprep.subr.mxu1 %v1536_v41  ;;  %2607 = vmatpush1.msra.mxu0 %v1119_v42  ;;  %v1328_v40 = vld [vmem:[#allocation5 + $0x24b8] sm:$0xff]  ;;  %v1327_v42 = vld [vmem:[#allocation5 + $0x24b0] sm:$0xff] }
 0x1c8   :  { %2678 = vmatpush1.msra.mxu1 %v1535_v43  ;;  %2608 = vmatprep.subr.mxu0 %v1107_v44  ;;  %v1744_v41 = vld [vmem:[#allocation5 + $0x31b8] sm:$0xff]  ;;  %v1743_v43 = vld [vmem:[#allocation5 + $0x31b0] sm:$0xff] }
 0x1c9   :  { %2679 = vmatprep.subr.mxu1 %v1523_v45  ;;  %2609 = vmatpush1.msra.mxu0 %v1106_v46  ;;  %v1315_v44 = vld [vmem:[#allocation5 + $0x2450] sm:$0xff]  ;;  %v1314_v46 = vld [vmem:[#allocation5 + $0x2448] sm:$0xff] }
 0x1ca   :  { %2680 = vmatpush1.msra.mxu1 %v1522_v47  ;;  %2610 = vmatprep.subr.mxu0 %v1094_v48  ;;  %v1731_v45 = vld [vmem:[#allocation5 + $0x3150] sm:$0xff]  ;;  %v1730_v47 = vld [vmem:[#allocation5 + $0x3148] sm:$0xff] }
 0x1cb   :  { %2681 = vmatprep.subr.mxu1 %v1510_v49  ;;  %2611 = vmatpush1.msra.mxu0 %v1093_v50  ;;  %v1302_v48 = vld [vmem:[#allocation5 + $0x23e8] sm:$0xff]  ;;  %v1301_v50 = vld [vmem:[#allocation5 + $0x23e0] sm:$0xff] }
 0x1cc   :  { %2682 = vmatpush1.msra.mxu1 %v1509_v51  ;;  %2612 = vmatprep.subr.mxu0 %v1081_v52  ;;  %v1718_v49 = vld [vmem:[#allocation5 + $0x30e8] sm:$0xff]  ;;  %v1717_v51 = vld [vmem:[#allocation5 + $0x30e0] sm:$0xff] }
 0x1cd   :  { %2683 = vmatprep.subr.mxu1 %v1497_v53  ;;  %2613 = vmatpush1.msra.mxu0 %v1080_v54  ;;  %v1289_v52 = vld [vmem:[#allocation5 + $0x2380] sm:$0xff]  ;;  %v1288_v54 = vld [vmem:[#allocation5 + $0x2378] sm:$0xff] }
 0x1ce   :  { %2684 = vmatpush1.msra.mxu1 %v1496_v55  ;;  %2614 = vmatprep.subr.mxu0 %v1068_v56  ;;  %v1705_v53 = vld [vmem:[#allocation5 + $0x3080] sm:$0xff]  ;;  %v1704_v55 = vld [vmem:[#allocation5 + $0x3078] sm:$0xff] }
 0x1cf   :  { %2685 = vmatprep.subr.mxu1 %v1484_v57  ;;  %2615 = vmatpush1.msra.mxu0 %v1067_v58  ;;  %v1276_v56 = vld [vmem:[#allocation5 + $0x2318] sm:$0xff]  ;;  %v1275_v58 = vld [vmem:[#allocation5 + $0x2310] sm:$0xff] }
 0x1d0   :  { %2686 = vmatpush1.msra.mxu1 %v1483_v59  ;;  %2616 = vmatprep.subr.mxu0 %v1055_v60  ;;  %v1692_v57 = vld [vmem:[#allocation5 + $0x3018] sm:$0xff]  ;;  %v1691_v59 = vld [vmem:[#allocation5 + $0x3010] sm:$0xff] }
 0x1d1   :  { %2687 = vmatprep.subr.mxu1 %v1471_v61  ;;  %2617 = vmatpush1.msra.mxu0 %v1054_v62  ;;  %v1263_v60 = vld [vmem:[#allocation5 + $0x22b0] sm:$0xff]  ;;  %v1262_v62 = vld [vmem:[#allocation5 + $0x22a8] sm:$0xff] }
 0x1d2   :  { %2688 = vmatpush1.msra.mxu1 %v1470_v63  ;;  %2618 = vmatprep.subr.mxu0 %v1042_v0  ;;  %v1679_v61 = vld [vmem:[#allocation5 + $0x2fb0] sm:$0xff]  ;;  %v1678_v63 = vld [vmem:[#allocation5 + $0x2fa8] sm:$0xff] }
 0x1d3   :  { %2689 = vmatprep.subr.mxu1 %v1458_v1  ;;  %2619 = vmatpush1.msra.mxu0 %v1041_v2  ;;  %v1250_v0 = vld [vmem:[#allocation5 + $0x2248] sm:$0xff]  ;;  %v1249_v2 = vld [vmem:[#allocation5 + $0x2240] sm:$0xff] }
 0x1d4   :  { %2690 = vmatpush1.msra.mxu1 %v1457_v3  ;;  %2620 = vmatprep.subr.mxu0 %v1029_v4  ;;  %v1666_v1 = vld [vmem:[#allocation5 + $0x2f48] sm:$0xff]  ;;  %v1665_v3 = vld [vmem:[#allocation5 + $0x2f40] sm:$0xff] }
 0x1d5   :  { %2691 = vmatprep.subr.mxu1 %v1445_v5  ;;  %2621 = vmatpush1.msra.mxu0 %v1028_v6  ;;  %v1237_v4 = vld [vmem:[#allocation5 + $0x21e0] sm:$0xff]  ;;  %v1236_v6 = vld [vmem:[#allocation5 + $0x21d8] sm:$0xff] }
 0x1d6   :  { %2692 = vmatpush1.msra.mxu1 %v1444_v7  ;;  %2622 = vmatprep.subr.mxu0 %v1016_v8  ;;  %v1653_v5 = vld [vmem:[#allocation5 + $0x2ee0] sm:$0xff]  ;;  %v1652_v7 = vld [vmem:[#allocation5 + $0x2ed8] sm:$0xff] }
 0x1d7   :  { %2693 = vmatprep.subr.mxu1 %v1432_v9  ;;  %2623 = vmatpush1.msra.mxu0 %v1015_v10  ;;  %v1224_v8 = vld [vmem:[#allocation5 + $0x2178] sm:$0xff]  ;;  %v1223_v10 = vld [vmem:[#allocation5 + $0x2170] sm:$0xff] }
 0x1d8   :  { %2694 = vmatpush1.msra.mxu1 %v1431_v11  ;;  %2624 = vmatprep.subr.mxu0 %v1003_v12  ;;  %v1640_v9 = vld [vmem:[#allocation5 + $0x2e78] sm:$0xff]  ;;  %v1639_v11 = vld [vmem:[#allocation5 + $0x2e70] sm:$0xff] }
 0x1d9   :  { %2695 = vmatprep.subr.mxu1 %v1419_v13  ;;  %2625 = vmatpush1.msra.mxu0 %v1002_v14  ;;  %v1211_v12 = vld [vmem:[#allocation5 + $0x2110] sm:$0xff]  ;;  %v1210_v14 = vld [vmem:[#allocation5 + $0x2108] sm:$0xff] }
 0x1da   :  { %2696 = vmatpush1.msra.mxu1 %v1418_v15  ;;  %2626 = vmatprep.subr.mxu0 %v990_v16  ;;  %v1627_v13 = vld [vmem:[#allocation5 + $0x2e10] sm:$0xff]  ;;  %v1626_v15 = vld [vmem:[#allocation5 + $0x2e08] sm:$0xff] }
 0x1db   :  { %2697 = vmatprep.subr.mxu1 %v1406_v17  ;;  %2627 = vmatpush1.msra.mxu0 %v989_v18  ;;  %v1198_v16 = vld [vmem:[#allocation5 + $0x20a8] sm:$0xff]  ;;  %v1197_v18 = vld [vmem:[#allocation5 + $0x20a0] sm:$0xff] }
 0x1dc   :  { %2698 = vmatpush1.msra.mxu1 %v1405_v19  ;;  %2628 = vmatprep.subr.mxu0 %v1393_v20  ;;  %v1614_v17 = vld [vmem:[#allocation5 + $0x2da8] sm:$0xff]  ;;  %v1613_v19 = vld [vmem:[#allocation5 + $0x2da0] sm:$0xff]  ;;  %v355_v20 = vld [vmem:[#allocation5 + $0x650] sm:$0xff] }
 0x1dd   :  { %2699 = vmatprep.subr.mxu1 %v1809_v21  ;;  %2629 = vmatpush2.msra.mxu0 %v1392_v22  ;;  %v5333_v21 = vld [vmem:[#allocation2 + $0x28] sm:$0xff]  ;;  %v771_v22 = vld [vmem:[#allocation5 + $0x1350] sm:$0xff] }
 0x1de   :  { %2700 = vmatpush2.msra.mxu1 %v1808_v23  ;;  %2630 = vmatprep.subr.mxu0 %v1380_v24  ;;  %v5334_v23 = vld [vmem:[#allocation2 + $0x20] sm:$0xff]  ;;  %v354_v24 = vld [vmem:[#allocation5 + $0x648] sm:$0xff] }
 0x1df   :  { %2701 = vmatprep.subr.mxu1 %v1796_v25  ;;  %2631 = vmatpush2.msra.mxu0 %v1379_v26  ;;  %v770_v25 = vld [vmem:[#allocation5 + $0x1348] sm:$0xff]  ;;  %v5335_v26 = vld [vmem:[#allocation2 + $0x38] sm:$0xff] }
 0x1e0   :  { %2702 = vmatpush2.msra.mxu1 %v1795_v27  ;;  %2632 = vmatprep.subr.mxu0 %v1367_v28  ;;  %v342_v27 = vld [vmem:[#allocation5 + $0x5e8] sm:$0xff] }
 0x1e1   :  { %2703 = vmatprep.subr.mxu1 %v1783_v29  ;;  %2633 = vmatpush2.msra.mxu0 %v1366_v30  ;;  %v758_v28 = vld [vmem:[#allocation5 + $0x12e8] sm:$0xff]  ;;  %v5336_v29 = vld [vmem:[#allocation2 + $0x30] sm:$0xff]  ;;  %v341_v30 = vld [vmem:[#allocation5 + $0x5e0] sm:$0xff] }
 0x1e2   :  { %2704 = vmatpush2.msra.mxu1 %v1782_v31  ;;  %2634 = vmatprep.subr.mxu0 %v1354_v32  ;;  %v757_v31 = vld [vmem:[#allocation5 + $0x12e0] sm:$0xff] }
 0x1e3   :  { %2705 = vmatprep.subr.mxu1 %v1770_v33  ;;  %2635 = vmatpush2.msra.mxu0 %v1353_v34  ;;  %v329_v32 = vld [vmem:[#allocation5 + $0x580] sm:$0xff]  ;;  %v328_v34 = vld [vmem:[#allocation5 + $0x578] sm:$0xff] }
 0x1e4   :  { %2706 = vmatpush2.msra.mxu1 %v1769_v35  ;;  %2636 = vmatprep.subr.mxu0 %v1341_v36  ;;  %v745_v33 = vld [vmem:[#allocation5 + $0x1280] sm:$0xff]  ;;  %v744_v35 = vld [vmem:[#allocation5 + $0x1278] sm:$0xff] }
 0x1e5   :  { %2707 = vmatprep.subr.mxu1 %v1757_v37  ;;  %2637 = vmatpush2.msra.mxu0 %v1340_v38  ;;  %v316_v36 = vld [vmem:[#allocation5 + $0x518] sm:$0xff]  ;;  %v315_v38 = vld [vmem:[#allocation5 + $0x510] sm:$0xff] }
 0x1e6   :  { %2708 = vmatpush2.msra.mxu1 %v1756_v39  ;;  %2638 = vmatprep.subr.mxu0 %v1328_v40  ;;  %v732_v37 = vld [vmem:[#allocation5 + $0x1218] sm:$0xff]  ;;  %v731_v39 = vld [vmem:[#allocation5 + $0x1210] sm:$0xff] }
 0x1e7   :  { %2709 = vmatprep.subr.mxu1 %v1744_v41  ;;  %2639 = vmatpush2.msra.mxu0 %v1327_v42  ;;  %v303_v40 = vld [vmem:[#allocation5 + $0x4b0] sm:$0xff]  ;;  %v302_v42 = vld [vmem:[#allocation5 + $0x4a8] sm:$0xff] }
 0x1e8   :  { %2710 = vmatpush2.msra.mxu1 %v1743_v43  ;;  %2640 = vmatprep.subr.mxu0 %v1315_v44  ;;  %v719_v41 = vld [vmem:[#allocation5 + $0x11b0] sm:$0xff]  ;;  %v718_v43 = vld [vmem:[#allocation5 + $0x11a8] sm:$0xff] }
 0x1e9   :  { %2711 = vmatprep.subr.mxu1 %v1731_v45  ;;  %2641 = vmatpush2.msra.mxu0 %v1314_v46  ;;  %v290_v44 = vld [vmem:[#allocation5 + $0x448] sm:$0xff]  ;;  %v289_v46 = vld [vmem:[#allocation5 + $0x440] sm:$0xff] }
 0x1ea   :  { %2712 = vmatpush2.msra.mxu1 %v1730_v47  ;;  %2642 = vmatprep.subr.mxu0 %v1302_v48  ;;  %v706_v45 = vld [vmem:[#allocation5 + $0x1148] sm:$0xff]  ;;  %v705_v47 = vld [vmem:[#allocation5 + $0x1140] sm:$0xff] }
 0x1eb   :  { %2713 = vmatprep.subr.mxu1 %v1718_v49  ;;  %2643 = vmatpush2.msra.mxu0 %v1301_v50  ;;  %v277_v48 = vld [vmem:[#allocation5 + $0x3e0] sm:$0xff]  ;;  %v276_v50 = vld [vmem:[#allocation5 + $0x3d8] sm:$0xff] }
 0x1ec   :  { %2714 = vmatpush2.msra.mxu1 %v1717_v51  ;;  %2644 = vmatprep.subr.mxu0 %v1289_v52  ;;  %v693_v49 = vld [vmem:[#allocation5 + $0x10e0] sm:$0xff]  ;;  %v692_v51 = vld [vmem:[#allocation5 + $0x10d8] sm:$0xff] }
 0x1ed   :  { %2715 = vmatprep.subr.mxu1 %v1705_v53  ;;  %2645 = vmatpush2.msra.mxu0 %v1288_v54  ;;  %v264_v52 = vld [vmem:[#allocation5 + $0x378] sm:$0xff]  ;;  %v263_v54 = vld [vmem:[#allocation5 + $0x370] sm:$0xff] }
 0x1ee   :  { %2716 = vmatpush2.msra.mxu1 %v1704_v55  ;;  %2646 = vmatprep.subr.mxu0 %v1276_v56  ;;  %v680_v53 = vld [vmem:[#allocation5 + $0x1078] sm:$0xff]  ;;  %v679_v55 = vld [vmem:[#allocation5 + $0x1070] sm:$0xff] }
 0x1ef   :  { %2717 = vmatprep.subr.mxu1 %v1692_v57  ;;  %2647 = vmatpush2.msra.mxu0 %v1275_v58  ;;  %v251_v56 = vld [vmem:[#allocation5 + $0x310] sm:$0xff]  ;;  %v250_v58 = vld [vmem:[#allocation5 + $0x308] sm:$0xff] }
 0x1f0   :  { %2718 = vmatpush2.msra.mxu1 %v1691_v59  ;;  %2648 = vmatprep.subr.mxu0 %v1263_v60  ;;  %v667_v57 = vld [vmem:[#allocation5 + $0x1010] sm:$0xff]  ;;  %v666_v59 = vld [vmem:[#allocation5 + $0x1008] sm:$0xff] }
 0x1f1   :  { %2719 = vmatprep.subr.mxu1 %v1679_v61  ;;  %2649 = vmatpush2.msra.mxu0 %v1262_v62  ;;  %v238_v60 = vld [vmem:[#allocation5 + $0x2a8] sm:$0xff]  ;;  %v237_v62 = vld [vmem:[#allocation5 + $0x2a0] sm:$0xff] }
 0x1f2   :  { %2720 = vmatpush2.msra.mxu1 %v1678_v63  ;;  %2650 = vmatprep.subr.mxu0 %v1250_v0  ;;  %v654_v61 = vld [vmem:[#allocation5 + $0xfa8] sm:$0xff]  ;;  %v653_v63 = vld [vmem:[#allocation5 + $0xfa0] sm:$0xff] }
 0x1f3   :  { %2721 = vmatprep.subr.mxu1 %v1666_v1  ;;  %2651 = vmatpush2.msra.mxu0 %v1249_v2  ;;  %v225_v0 = vld [vmem:[#allocation5 + $0x240] sm:$0xff]  ;;  %v224_v2 = vld [vmem:[#allocation5 + $0x238] sm:$0xff] }
 0x1f4   :  { %2722 = vmatpush2.msra.mxu1 %v1665_v3  ;;  %2652 = vmatprep.subr.mxu0 %v1237_v4  ;;  %v641_v1 = vld [vmem:[#allocation5 + $0xf40] sm:$0xff]  ;;  %v640_v3 = vld [vmem:[#allocation5 + $0xf38] sm:$0xff] }
 0x1f5   :  { %2723 = vmatprep.subr.mxu1 %v1653_v5  ;;  %2653 = vmatpush2.msra.mxu0 %v1236_v6  ;;  %v212_v4 = vld [vmem:[#allocation5 + $0x1d8] sm:$0xff]  ;;  %v211_v6 = vld [vmem:[#allocation5 + $0x1d0] sm:$0xff] }
 0x1f6   :  { %2724 = vmatpush2.msra.mxu1 %v1652_v7  ;;  %2654 = vmatprep.subr.mxu0 %v1224_v8  ;;  %v628_v5 = vld [vmem:[#allocation5 + $0xed8] sm:$0xff]  ;;  %v627_v7 = vld [vmem:[#allocation5 + $0xed0] sm:$0xff] }
 0x1f7   :  { %2725 = vmatprep.subr.mxu1 %v1640_v9  ;;  %2655 = vmatpush2.msra.mxu0 %v1223_v10  ;;  %v199_v8 = vld [vmem:[#allocation5 + $0x170] sm:$0xff]  ;;  %v198_v10 = vld [vmem:[#allocation5 + $0x168] sm:$0xff] }
 0x1f8   :  { %2726 = vmatpush2.msra.mxu1 %v1639_v11  ;;  %2656 = vmatprep.subr.mxu0 %v1211_v12  ;;  %v615_v9 = vld [vmem:[#allocation5 + $0xe70] sm:$0xff]  ;;  %v614_v11 = vld [vmem:[#allocation5 + $0xe68] sm:$0xff] }
 0x1f9   :  { %2727 = vmatprep.subr.mxu1 %v1627_v13  ;;  %2657 = vmatpush2.msra.mxu0 %v1210_v14  ;;  %v186_v12 = vld [vmem:[#allocation5 + $0x108] sm:$0xff]  ;;  %v185_v14 = vld [vmem:[#allocation5 + $0x100] sm:$0xff] }
 0x1fa   :  { %2728 = vmatpush2.msra.mxu1 %v1626_v15  ;;  %2658 = vmatprep.subr.mxu0 %v1198_v16  ;;  %v602_v13 = vld [vmem:[#allocation5 + $0xe08] sm:$0xff]  ;;  %v601_v15 = vld [vmem:[#allocation5 + $0xe00] sm:$0xff] }
 0x1fb   :  { %2729 = vmatprep.subr.mxu1 %v1614_v17  ;;  %2659 = vmatpush2.msra.mxu0 %v1197_v18  ;;  %v173_v16 = vld [vmem:[#allocation5 + $0xa0] sm:$0xff]  ;;  %v172_v18 = vld [vmem:[#allocation5 + $0x98] sm:$0xff] }
 0x1fc   :  { %2660 = vmatprep.mubr.f32.mxu0 %v5333_v21  ;;  %2730 = vmatpush2.msra.mxu1 %v1613_v19  ;;  %v589_v17 = vld [vmem:[#allocation5 + $0xda0] sm:$0xff]  ;;  %v588_v19 = vld [vmem:[#allocation5 + $0xd98] sm:$0xff] }
 0x1fd   :  { %2661 = vmatmul.mubr.f32.vlgmr.msra.gmra.mxu0 %v5334_v23  ;;  %2731 = vmatprep.mubr.f32.mxu1 %v5335_v26  ;;  %v576_v21 = vld [vmem:[#allocation5 + $0xd38] sm:$0xff]  ;;  %v575_v23 = vld [vmem:[#allocation5 + $0xd30] sm:$0xff]  ;;  %v562_v26 = vld [vmem:[#allocation5 + $0xcc8] sm:$0xff] }
 0x1fe   :  { %2738 = vmatprep.subr.mxu0 %v355_v20  ;;  %2809 = vmatprep.subr.mxu1 %v771_v22  ;;  %v160_v20 = vld [vmem:[#allocation5 + $0x38] sm:$0xff]  ;;  %v159_v22 = vld [vmem:[#allocation5 + $0x30] sm:$0xff] }
 0x1ff   :  { %2732 = vmatmul.mubr.f32.vlgmr.msra.gmra.mxu1 %v5336_v29  ;;  %2739 = vmatpush1.msra.mxu0 %v354_v24  ;;  %v563_v24 = vld [vmem:[#allocation5 + $0xcd0] sm:$0xff]  ;;  %v966_v29 = vld [vmem:[#allocation5 + $0x1968] sm:$0xff] }
 0x200   :  { %2810 = vmatpush1.msra.mxu1 %v770_v25  ;;  %2740 = vmatprep.subr.mxu0 %v342_v27  ;;  %v979_v25 = vld [vmem:[#allocation5 + $0x19d0] sm:$0xff]  ;;  %v978_v27 = vld [vmem:[#allocation5 + $0x19c8] sm:$0xff] }
 0x201   :  { %2811 = vmatprep.subr.mxu1 %v758_v28  ;;  %2741 = vmatpush1.msra.mxu0 %v341_v30  ;;  %v550_v28 = vld [vmem:[#allocation5 + $0xc68] sm:$0xff]  ;;  %v549_v30 = vld [vmem:[#allocation5 + $0xc60] sm:$0xff] }
 0x202   :  { %2812 = vmatpush1.msra.mxu1 %v757_v31  ;;  %2742 = vmatprep.subr.mxu0 %v329_v32  ;;  %v965_v31 = vld [vmem:[#allocation5 + $0x1960] sm:$0xff] }
 0x203   :  { %2813 = vmatprep.subr.mxu1 %v745_v33  ;;  %2743 = vmatpush1.msra.mxu0 %v328_v34  ;;  %v537_v32 = vld [vmem:[#allocation5 + $0xc00] sm:$0xff]  ;;  %v536_v34 = vld [vmem:[#allocation5 + $0xbf8] sm:$0xff] }
 0x204   :  { %2814 = vmatpush1.msra.mxu1 %v744_v35  ;;  %2744 = vmatprep.subr.mxu0 %v316_v36  ;;  %v953_v33 = vld [vmem:[#allocation5 + $0x1900] sm:$0xff]  ;;  %v952_v35 = vld [vmem:[#allocation5 + $0x18f8] sm:$0xff] }
 0x205   :  { %2815 = vmatprep.subr.mxu1 %v732_v37  ;;  %2745 = vmatpush1.msra.mxu0 %v315_v38  ;;  %v524_v36 = vld [vmem:[#allocation5 + $0xb98] sm:$0xff]  ;;  %v523_v38 = vld [vmem:[#allocation5 + $0xb90] sm:$0xff] }
 0x206   :  { %2816 = vmatpush1.msra.mxu1 %v731_v39  ;;  %2746 = vmatprep.subr.mxu0 %v303_v40  ;;  %v940_v37 = vld [vmem:[#allocation5 + $0x1898] sm:$0xff]  ;;  %v939_v39 = vld [vmem:[#allocation5 + $0x1890] sm:$0xff] }
 0x207   :  { %2817 = vmatprep.subr.mxu1 %v719_v41  ;;  %2747 = vmatpush1.msra.mxu0 %v302_v42  ;;  %v511_v40 = vld [vmem:[#allocation5 + $0xb30] sm:$0xff]  ;;  %v510_v42 = vld [vmem:[#allocation5 + $0xb28] sm:$0xff] }
 0x208   :  { %2818 = vmatpush1.msra.mxu1 %v718_v43  ;;  %2748 = vmatprep.subr.mxu0 %v290_v44  ;;  %v927_v41 = vld [vmem:[#allocation5 + $0x1830] sm:$0xff]  ;;  %v926_v43 = vld [vmem:[#allocation5 + $0x1828] sm:$0xff] }
 0x209   :  { %2819 = vmatprep.subr.mxu1 %v706_v45  ;;  %2749 = vmatpush1.msra.mxu0 %v289_v46  ;;  %v498_v44 = vld [vmem:[#allocation5 + $0xac8] sm:$0xff]  ;;  %v497_v46 = vld [vmem:[#allocation5 + $0xac0] sm:$0xff] }
 0x20a   :  { %2820 = vmatpush1.msra.mxu1 %v705_v47  ;;  %2750 = vmatprep.subr.mxu0 %v277_v48  ;;  %v914_v45 = vld [vmem:[#allocation5 + $0x17c8] sm:$0xff]  ;;  %v913_v47 = vld [vmem:[#allocation5 + $0x17c0] sm:$0xff] }
 0x20b   :  { %2821 = vmatprep.subr.mxu1 %v693_v49  ;;  %2751 = vmatpush1.msra.mxu0 %v276_v50  ;;  %v485_v48 = vld [vmem:[#allocation5 + $0xa60] sm:$0xff]  ;;  %v484_v50 = vld [vmem:[#allocation5 + $0xa58] sm:$0xff] }
 0x20c   :  { %2822 = vmatpush1.msra.mxu1 %v692_v51  ;;  %2752 = vmatprep.subr.mxu0 %v264_v52  ;;  %v901_v49 = vld [vmem:[#allocation5 + $0x1760] sm:$0xff]  ;;  %v900_v51 = vld [vmem:[#allocation5 + $0x1758] sm:$0xff] }
 0x20d   :  { %2823 = vmatprep.subr.mxu1 %v680_v53  ;;  %2753 = vmatpush1.msra.mxu0 %v263_v54  ;;  %v472_v52 = vld [vmem:[#allocation5 + $0x9f8] sm:$0xff]  ;;  %v471_v54 = vld [vmem:[#allocation5 + $0x9f0] sm:$0xff] }
 0x20e   :  { %2824 = vmatpush1.msra.mxu1 %v679_v55  ;;  %2754 = vmatprep.subr.mxu0 %v251_v56  ;;  %v888_v53 = vld [vmem:[#allocation5 + $0x16f8] sm:$0xff]  ;;  %v887_v55 = vld [vmem:[#allocation5 + $0x16f0] sm:$0xff] }
 0x20f   :  { %2825 = vmatprep.subr.mxu1 %v667_v57  ;;  %2755 = vmatpush1.msra.mxu0 %v250_v58  ;;  %v459_v56 = vld [vmem:[#allocation5 + $0x990] sm:$0xff]  ;;  %v458_v58 = vld [vmem:[#allocation5 + $0x988] sm:$0xff] }
 0x210   :  { %2826 = vmatpush1.msra.mxu1 %v666_v59  ;;  %2756 = vmatprep.subr.mxu0 %v238_v60  ;;  %v875_v57 = vld [vmem:[#allocation5 + $0x1690] sm:$0xff]  ;;  %v874_v59 = vld [vmem:[#allocation5 + $0x1688] sm:$0xff] }
 0x211   :  { %2827 = vmatprep.subr.mxu1 %v654_v61  ;;  %2757 = vmatpush1.msra.mxu0 %v237_v62  ;;  %v446_v60 = vld [vmem:[#allocation5 + $0x928] sm:$0xff]  ;;  %v445_v62 = vld [vmem:[#allocation5 + $0x920] sm:$0xff] }
 0x212   :  { %2828 = vmatpush1.msra.mxu1 %v653_v63  ;;  %2758 = vmatprep.subr.mxu0 %v225_v0  ;;  %v862_v61 = vld [vmem:[#allocation5 + $0x1628] sm:$0xff]  ;;  %v861_v63 = vld [vmem:[#allocation5 + $0x1620] sm:$0xff] }
 0x213   :  { %2829 = vmatprep.subr.mxu1 %v641_v1  ;;  %2759 = vmatpush1.msra.mxu0 %v224_v2  ;;  %v433_v0 = vld [vmem:[#allocation5 + $0x8c0] sm:$0xff]  ;;  %v432_v2 = vld [vmem:[#allocation5 + $0x8b8] sm:$0xff] }
 0x214   :  { %2830 = vmatpush1.msra.mxu1 %v640_v3  ;;  %2760 = vmatprep.subr.mxu0 %v212_v4  ;;  %v849_v1 = vld [vmem:[#allocation5 + $0x15c0] sm:$0xff]  ;;  %v848_v3 = vld [vmem:[#allocation5 + $0x15b8] sm:$0xff] }
 0x215   :  { %2831 = vmatprep.subr.mxu1 %v628_v5  ;;  %2761 = vmatpush1.msra.mxu0 %v211_v6  ;;  %v420_v4 = vld [vmem:[#allocation5 + $0x858] sm:$0xff]  ;;  %v419_v6 = vld [vmem:[#allocation5 + $0x850] sm:$0xff] }
 0x216   :  { %2832 = vmatpush1.msra.mxu1 %v627_v7  ;;  %2762 = vmatprep.subr.mxu0 %v199_v8  ;;  %v836_v5 = vld [vmem:[#allocation5 + $0x1558] sm:$0xff]  ;;  %v835_v7 = vld [vmem:[#allocation5 + $0x1550] sm:$0xff] }
 0x217   :  { %2833 = vmatprep.subr.mxu1 %v615_v9  ;;  %2763 = vmatpush1.msra.mxu0 %v198_v10  ;;  %v407_v8 = vld [vmem:[#allocation5 + $0x7f0] sm:$0xff]  ;;  %v406_v10 = vld [vmem:[#allocation5 + $0x7e8] sm:$0xff] }
 0x218   :  { %2834 = vmatpush1.msra.mxu1 %v614_v11  ;;  %2764 = vmatprep.subr.mxu0 %v186_v12  ;;  %v823_v9 = vld [vmem:[#allocation5 + $0x14f0] sm:$0xff]  ;;  %v822_v11 = vld [vmem:[#allocation5 + $0x14e8] sm:$0xff] }
 0x219   :  { %2835 = vmatprep.subr.mxu1 %v602_v13  ;;  %2765 = vmatpush1.msra.mxu0 %v185_v14  ;;  %v394_v12 = vld [vmem:[#allocation5 + $0x788] sm:$0xff]  ;;  %v393_v14 = vld [vmem:[#allocation5 + $0x780] sm:$0xff] }
 0x21a   :  { %2836 = vmatpush1.msra.mxu1 %v601_v15  ;;  %2766 = vmatprep.subr.mxu0 %v173_v16  ;;  %v810_v13 = vld [vmem:[#allocation5 + $0x1488] sm:$0xff]  ;;  %v809_v15 = vld [vmem:[#allocation5 + $0x1480] sm:$0xff] }
 0x21b   :  { %2837 = vmatprep.subr.mxu1 %v589_v17  ;;  %2767 = vmatpush1.msra.mxu0 %v172_v18  ;;  %v381_v16 = vld [vmem:[#allocation5 + $0x720] sm:$0xff]  ;;  %v380_v18 = vld [vmem:[#allocation5 + $0x718] sm:$0xff] }
 0x21c   :  { %2838 = vmatpush1.msra.mxu1 %v588_v19  ;;  %2768 = vmatprep.subr.mxu0 %v160_v20  ;;  %v797_v17 = vld [vmem:[#allocation5 + $0x1420] sm:$0xff]  ;;  %v796_v19 = vld [vmem:[#allocation5 + $0x1418] sm:$0xff] }
 0x21d   :  { %2839 = vmatprep.subr.mxu1 %v576_v21  ;;  %2769 = vmatpush1.msra.mxu0 %v159_v22  ;;  %v368_v20 = vld [vmem:[#allocation5 + $0x6b8] sm:$0xff]  ;;  %v367_v22 = vld [vmem:[#allocation5 + $0x6b0] sm:$0xff] }
 0x21e   :  { %2840 = vmatpush1.msra.mxu1 %v575_v23  ;;  %2770 = vmatprep.subr.mxu0 %v563_v24  ;;  %v784_v21 = vld [vmem:[#allocation5 + $0x13b8] sm:$0xff]  ;;  %v783_v23 = vld [vmem:[#allocation5 + $0x13b0] sm:$0xff] }
 0x21f   :  { %2841 = vmatprep.subr.mxu1 %v979_v25  ;;  %2771 = vmatpush2.msra.mxu0 %v562_v26  ;;  %v1187_v24 = vld [vmem:[#allocation5 + $0x2050] sm:$0xff]  ;;  %v5337_v25 = vld [vmem:[#allocation2 + $0x8] sm:$0xff] }
 0x220   :  { %2842 = vmatpush2.msra.mxu1 %v978_v27  ;;  %2772 = vmatprep.subr.mxu0 %v550_v28  ;;  %v1603_v26 = vld [vmem:[#allocation5 + $0x2d50] sm:$0xff]  ;;  %v5338_v27 = vld [vmem:[#allocation2] sm:$0xff]  ;;  %v1186_v28 = vld [vmem:[#allocation5 + $0x2048] sm:$0xff] }
 0x221   :  { %2843 = vmatprep.subr.mxu1 %v966_v29  ;;  %2773 = vmatpush2.msra.mxu0 %v549_v30  ;;  %v1602_v29 = vld [vmem:[#allocation5 + $0x2d48] sm:$0xff]  ;;  %v5339_v30 = vld [vmem:[#allocation2 + $0x18] sm:$0xff] }
 0x222   :  { %2844 = vmatpush2.msra.mxu1 %v965_v31  ;;  %2774 = vmatprep.subr.mxu0 %v537_v32  ;;  %v1174_v31 = vld [vmem:[#allocation5 + $0x1fe8] sm:$0xff] }
 0x223   :  { %2845 = vmatprep.subr.mxu1 %v953_v33  ;;  %2775 = vmatpush2.msra.mxu0 %v536_v34  ;;  %v1590_v32 = vld [vmem:[#allocation5 + $0x2ce8] sm:$0xff]  ;;  %v5340_v33 = vld [vmem:[#allocation2 + $0x10] sm:$0xff]  ;;  %v1173_v34 = vld [vmem:[#allocation5 + $0x1fe0] sm:$0xff] }
 0x224   :  { %2846 = vmatpush2.msra.mxu1 %v952_v35  ;;  %2776 = vmatprep.subr.mxu0 %v524_v36  ;;  %v1589_v35 = vld [vmem:[#allocation5 + $0x2ce0] sm:$0xff] }
 0x225   :  { %2847 = vmatprep.subr.mxu1 %v940_v37  ;;  %2777 = vmatpush2.msra.mxu0 %v523_v38  ;;  %v1161_v36 = vld [vmem:[#allocation5 + $0x1f80] sm:$0xff]  ;;  %v1160_v38 = vld [vmem:[#allocation5 + $0x1f78] sm:$0xff] }
 0x226   :  { %2848 = vmatpush2.msra.mxu1 %v939_v39  ;;  %2778 = vmatprep.subr.mxu0 %v511_v40  ;;  %v1577_v37 = vld [vmem:[#allocation5 + $0x2c80] sm:$0xff]  ;;  %v1576_v39 = vld [vmem:[#allocation5 + $0x2c78] sm:$0xff] }
 0x227   :  { %2849 = vmatprep.subr.mxu1 %v927_v41  ;;  %2779 = vmatpush2.msra.mxu0 %v510_v42  ;;  %v1148_v40 = vld [vmem:[#allocation5 + $0x1f18] sm:$0xff]  ;;  %v1147_v42 = vld [vmem:[#allocation5 + $0x1f10] sm:$0xff] }
 0x228   :  { %2850 = vmatpush2.msra.mxu1 %v926_v43  ;;  %2780 = vmatprep.subr.mxu0 %v498_v44  ;;  %v1564_v41 = vld [vmem:[#allocation5 + $0x2c18] sm:$0xff]  ;;  %v1563_v43 = vld [vmem:[#allocation5 + $0x2c10] sm:$0xff] }
 0x229   :  { %2851 = vmatprep.subr.mxu1 %v914_v45  ;;  %2781 = vmatpush2.msra.mxu0 %v497_v46  ;;  %v1135_v44 = vld [vmem:[#allocation5 + $0x1eb0] sm:$0xff]  ;;  %v1134_v46 = vld [vmem:[#allocation5 + $0x1ea8] sm:$0xff] }
 0x22a   :  { %2852 = vmatpush2.msra.mxu1 %v913_v47  ;;  %2782 = vmatprep.subr.mxu0 %v485_v48  ;;  %v1551_v45 = vld [vmem:[#allocation5 + $0x2bb0] sm:$0xff]  ;;  %v1550_v47 = vld [vmem:[#allocation5 + $0x2ba8] sm:$0xff] }
 0x22b   :  { %2853 = vmatprep.subr.mxu1 %v901_v49  ;;  %2783 = vmatpush2.msra.mxu0 %v484_v50  ;;  %v1122_v48 = vld [vmem:[#allocation5 + $0x1e48] sm:$0xff]  ;;  %v1121_v50 = vld [vmem:[#allocation5 + $0x1e40] sm:$0xff] }
 0x22c   :  { %2854 = vmatpush2.msra.mxu1 %v900_v51  ;;  %2784 = vmatprep.subr.mxu0 %v472_v52  ;;  %v1538_v49 = vld [vmem:[#allocation5 + $0x2b48] sm:$0xff]  ;;  %v1537_v51 = vld [vmem:[#allocation5 + $0x2b40] sm:$0xff] }
 0x22d   :  { %2855 = vmatprep.subr.mxu1 %v888_v53  ;;  %2785 = vmatpush2.msra.mxu0 %v471_v54  ;;  %v1109_v52 = vld [vmem:[#allocation5 + $0x1de0] sm:$0xff]  ;;  %v1108_v54 = vld [vmem:[#allocation5 + $0x1dd8] sm:$0xff] }
 0x22e   :  { %2856 = vmatpush2.msra.mxu1 %v887_v55  ;;  %2786 = vmatprep.subr.mxu0 %v459_v56  ;;  %v1525_v53 = vld [vmem:[#allocation5 + $0x2ae0] sm:$0xff]  ;;  %v1524_v55 = vld [vmem:[#allocation5 + $0x2ad8] sm:$0xff] }
 0x22f   :  { %2857 = vmatprep.subr.mxu1 %v875_v57  ;;  %2787 = vmatpush2.msra.mxu0 %v458_v58  ;;  %v1096_v56 = vld [vmem:[#allocation5 + $0x1d78] sm:$0xff]  ;;  %v1095_v58 = vld [vmem:[#allocation5 + $0x1d70] sm:$0xff] }
 0x230   :  { %2858 = vmatpush2.msra.mxu1 %v874_v59  ;;  %2788 = vmatprep.subr.mxu0 %v446_v60  ;;  %v1512_v57 = vld [vmem:[#allocation5 + $0x2a78] sm:$0xff]  ;;  %v1511_v59 = vld [vmem:[#allocation5 + $0x2a70] sm:$0xff] }
 0x231   :  { %2859 = vmatprep.subr.mxu1 %v862_v61  ;;  %2789 = vmatpush2.msra.mxu0 %v445_v62  ;;  %v1083_v60 = vld [vmem:[#allocation5 + $0x1d10] sm:$0xff]  ;;  %v1082_v62 = vld [vmem:[#allocation5 + $0x1d08] sm:$0xff] }
 0x232   :  { %2860 = vmatpush2.msra.mxu1 %v861_v63  ;;  %2790 = vmatprep.subr.mxu0 %v433_v0  ;;  %v1499_v61 = vld [vmem:[#allocation5 + $0x2a10] sm:$0xff]  ;;  %v1498_v63 = vld [vmem:[#allocation5 + $0x2a08] sm:$0xff] }
 0x233   :  { %2861 = vmatprep.subr.mxu1 %v849_v1  ;;  %2791 = vmatpush2.msra.mxu0 %v432_v2  ;;  %v1070_v0 = vld [vmem:[#allocation5 + $0x1ca8] sm:$0xff]  ;;  %v1069_v2 = vld [vmem:[#allocation5 + $0x1ca0] sm:$0xff] }
 0x234   :  { %2862 = vmatpush2.msra.mxu1 %v848_v3  ;;  %2792 = vmatprep.subr.mxu0 %v420_v4  ;;  %v1486_v1 = vld [vmem:[#allocation5 + $0x29a8] sm:$0xff]  ;;  %v1485_v3 = vld [vmem:[#allocation5 + $0x29a0] sm:$0xff] }
 0x235   :  { %2863 = vmatprep.subr.mxu1 %v836_v5  ;;  %2793 = vmatpush2.msra.mxu0 %v419_v6  ;;  %v1057_v4 = vld [vmem:[#allocation5 + $0x1c40] sm:$0xff]  ;;  %v1056_v6 = vld [vmem:[#allocation5 + $0x1c38] sm:$0xff] }
 0x236   :  { %2864 = vmatpush2.msra.mxu1 %v835_v7  ;;  %2794 = vmatprep.subr.mxu0 %v407_v8  ;;  %v1473_v5 = vld [vmem:[#allocation5 + $0x2940] sm:$0xff]  ;;  %v1472_v7 = vld [vmem:[#allocation5 + $0x2938] sm:$0xff] }
 0x237   :  { %2865 = vmatprep.subr.mxu1 %v823_v9  ;;  %2795 = vmatpush2.msra.mxu0 %v406_v10  ;;  %v1044_v8 = vld [vmem:[#allocation5 + $0x1bd8] sm:$0xff]  ;;  %v1043_v10 = vld [vmem:[#allocation5 + $0x1bd0] sm:$0xff] }
 0x238   :  { %2866 = vmatpush2.msra.mxu1 %v822_v11  ;;  %2796 = vmatprep.subr.mxu0 %v394_v12  ;;  %v1460_v9 = vld [vmem:[#allocation5 + $0x28d8] sm:$0xff]  ;;  %v1459_v11 = vld [vmem:[#allocation5 + $0x28d0] sm:$0xff] }
 0x239   :  { %2867 = vmatprep.subr.mxu1 %v810_v13  ;;  %2797 = vmatpush2.msra.mxu0 %v393_v14  ;;  %v1031_v12 = vld [vmem:[#allocation5 + $0x1b70] sm:$0xff]  ;;  %v1030_v14 = vld [vmem:[#allocation5 + $0x1b68] sm:$0xff] }
 0x23a   :  { %2868 = vmatpush2.msra.mxu1 %v809_v15  ;;  %2798 = vmatprep.subr.mxu0 %v381_v16  ;;  %v1447_v13 = vld [vmem:[#allocation5 + $0x2870] sm:$0xff]  ;;  %v1446_v15 = vld [vmem:[#allocation5 + $0x2868] sm:$0xff] }
 0x23b   :  { %2869 = vmatprep.subr.mxu1 %v797_v17  ;;  %2799 = vmatpush2.msra.mxu0 %v380_v18  ;;  %v1018_v16 = vld [vmem:[#allocation5 + $0x1b08] sm:$0xff]  ;;  %v1017_v18 = vld [vmem:[#allocation5 + $0x1b00] sm:$0xff] }
 0x23c   :  { %2870 = vmatpush2.msra.mxu1 %v796_v19  ;;  %2800 = vmatprep.subr.mxu0 %v368_v20  ;;  %v1434_v17 = vld [vmem:[#allocation5 + $0x2808] sm:$0xff]  ;;  %v1433_v19 = vld [vmem:[#allocation5 + $0x2800] sm:$0xff] }
 0x23d   :  { %2871 = vmatprep.subr.mxu1 %v784_v21  ;;  %2801 = vmatpush2.msra.mxu0 %v367_v22  ;;  %v1005_v20 = vld [vmem:[#allocation5 + $0x1aa0] sm:$0xff]  ;;  %v1004_v22 = vld [vmem:[#allocation5 + $0x1a98] sm:$0xff] }
 0x23e   :  { %2802 = vmatprep.mubr.f32.mxu0 %v5337_v25  ;;  %2872 = vmatpush2.msra.mxu1 %v783_v23  ;;  %v1421_v21 = vld [vmem:[#allocation5 + $0x27a0] sm:$0xff]  ;;  %v1420_v23 = vld [vmem:[#allocation5 + $0x2798] sm:$0xff] }
 0x23f   :  { %2803 = vmatmul.mubr.f32.vlgmr.msra.gmra.mxu0 %v5338_v27  ;;  %2873 = vmatprep.mubr.f32.mxu1 %v5339_v30  ;;  %v1408_v25 = vld [vmem:[#allocation5 + $0x2738] sm:$0xff]  ;;  %v1407_v27 = vld [vmem:[#allocation5 + $0x2730] sm:$0xff]  ;;  %v1394_v30 = vld [vmem:[#allocation5 + $0x26c8] sm:$0xff] }
 0x240   :  { %2880 = vmatprep.subr.mxu0 %v1187_v24  ;;  %2951 = vmatprep.subr.mxu1 %v1603_v26  ;;  %v992_v24 = vld [vmem:[#allocation5 + $0x1a38] sm:$0xff]  ;;  %v991_v26 = vld [vmem:[#allocation5 + $0x1a30] sm:$0xff] }
 0x241   :  { %2874 = vmatmul.mubr.f32.vlgmr.msra.gmra.mxu1 %v5340_v33  ;;  %2881 = vmatpush1.msra.mxu0 %v1186_v28  ;;  %v1395_v28 = vld [vmem:[#allocation5 + $0x26d0] sm:$0xff]  ;;  %v1798_v33 = vld [vmem:[#allocation5 + $0x3368] sm:$0xff] }
 0x242   :  { %2952 = vmatpush1.msra.mxu1 %v1602_v29  ;;  %2882 = vmatprep.subr.mxu0 %v1174_v31  ;;  %v1811_v29 = vld [vmem:[#allocation5 + $0x33d0] sm:$0xff]  ;;  %v1810_v31 = vld [vmem:[#allocation5 + $0x33c8] sm:$0xff] }
 0x243   :  { %2953 = vmatprep.subr.mxu1 %v1590_v32  ;;  %2883 = vmatpush1.msra.mxu0 %v1173_v34  ;;  %v1382_v32 = vld [vmem:[#allocation5 + $0x2668] sm:$0xff]  ;;  %v1381_v34 = vld [vmem:[#allocation5 + $0x2660] sm:$0xff] }
 0x244   :  { %2954 = vmatpush1.msra.mxu1 %v1589_v35  ;;  %2884 = vmatprep.subr.mxu0 %v1161_v36  ;;  %v1797_v35 = vld [vmem:[#allocation5 + $0x3360] sm:$0xff] }
 0x245   :  { %2955 = vmatprep.subr.mxu1 %v1577_v37  ;;  %2885 = vmatpush1.msra.mxu0 %v1160_v38  ;;  %v1369_v36 = vld [vmem:[#allocation5 + $0x2600] sm:$0xff]  ;;  %v1368_v38 = vld [vmem:[#allocation5 + $0x25f8] sm:$0xff] }
 0x246   :  { %2956 = vmatpush1.msra.mxu1 %v1576_v39  ;;  %2886 = vmatprep.subr.mxu0 %v1148_v40  ;;  %v1785_v37 = vld [vmem:[#allocation5 + $0x3300] sm:$0xff]  ;;  %v1784_v39 = vld [vmem:[#allocation5 + $0x32f8] sm:$0xff] }
 0x247   :  { %2957 = vmatprep.subr.mxu1 %v1564_v41  ;;  %2887 = vmatpush1.msra.mxu0 %v1147_v42  ;;  %v1356_v40 = vld [vmem:[#allocation5 + $0x2598] sm:$0xff]  ;;  %v1355_v42 = vld [vmem:[#allocation5 + $0x2590] sm:$0xff] }
 0x248   :  { %2958 = vmatpush1.msra.mxu1 %v1563_v43  ;;  %2888 = vmatprep.subr.mxu0 %v1135_v44  ;;  %v1772_v41 = vld [vmem:[#allocation5 + $0x3298] sm:$0xff]  ;;  %v1771_v43 = vld [vmem:[#allocation5 + $0x3290] sm:$0xff] }
 0x249   :  { %2959 = vmatprep.subr.mxu1 %v1551_v45  ;;  %2889 = vmatpush1.msra.mxu0 %v1134_v46  ;;  %v1343_v44 = vld [vmem:[#allocation5 + $0x2530] sm:$0xff]  ;;  %v1342_v46 = vld [vmem:[#allocation5 + $0x2528] sm:$0xff] }
 0x24a   :  { %2960 = vmatpush1.msra.mxu1 %v1550_v47  ;;  %2890 = vmatprep.subr.mxu0 %v1122_v48  ;;  %v1759_v45 = vld [vmem:[#allocation5 + $0x3230] sm:$0xff]  ;;  %v1758_v47 = vld [vmem:[#allocation5 + $0x3228] sm:$0xff] }
 0x24b   :  { %2961 = vmatprep.subr.mxu1 %v1538_v49  ;;  %2891 = vmatpush1.msra.mxu0 %v1121_v50  ;;  %v1330_v48 = vld [vmem:[#allocation5 + $0x24c8] sm:$0xff]  ;;  %v1329_v50 = vld [vmem:[#allocation5 + $0x24c0] sm:$0xff] }
 0x24c   :  { %2962 = vmatpush1.msra.mxu1 %v1537_v51  ;;  %2892 = vmatprep.subr.mxu0 %v1109_v52  ;;  %v1746_v49 = vld [vmem:[#allocation5 + $0x31c8] sm:$0xff]  ;;  %v1745_v51 = vld [vmem:[#allocation5 + $0x31c0] sm:$0xff] }
 0x24d   :  { %2963 = vmatprep.subr.mxu1 %v1525_v53  ;;  %2893 = vmatpush1.msra.mxu0 %v1108_v54  ;;  %v1317_v52 = vld [vmem:[#allocation5 + $0x2460] sm:$0xff]  ;;  %v1316_v54 = vld [vmem:[#allocation5 + $0x2458] sm:$0xff] }
 0x24e   :  { %2964 = vmatpush1.msra.mxu1 %v1524_v55  ;;  %2894 = vmatprep.subr.mxu0 %v1096_v56  ;;  %v1733_v53 = vld [vmem:[#allocation5 + $0x3160] sm:$0xff]  ;;  %v1732_v55 = vld [vmem:[#allocation5 + $0x3158] sm:$0xff] }
 0x24f   :  { %2965 = vmatprep.subr.mxu1 %v1512_v57  ;;  %2895 = vmatpush1.msra.mxu0 %v1095_v58  ;;  %v1304_v56 = vld [vmem:[#allocation5 + $0x23f8] sm:$0xff]  ;;  %v1303_v58 = vld [vmem:[#allocation5 + $0x23f0] sm:$0xff] }
 0x250   :  { %2966 = vmatpush1.msra.mxu1 %v1511_v59  ;;  %2896 = vmatprep.subr.mxu0 %v1083_v60  ;;  %v1720_v57 = vld [vmem:[#allocation5 + $0x30f8] sm:$0xff]  ;;  %v1719_v59 = vld [vmem:[#allocation5 + $0x30f0] sm:$0xff] }
 0x251   :  { %2967 = vmatprep.subr.mxu1 %v1499_v61  ;;  %2897 = vmatpush1.msra.mxu0 %v1082_v62  ;;  %v1291_v60 = vld [vmem:[#allocation5 + $0x2390] sm:$0xff]  ;;  %v1290_v62 = vld [vmem:[#allocation5 + $0x2388] sm:$0xff] }
 0x252   :  { %2968 = vmatpush1.msra.mxu1 %v1498_v63  ;;  %2898 = vmatprep.subr.mxu0 %v1070_v0  ;;  %v1707_v61 = vld [vmem:[#allocation5 + $0x3090] sm:$0xff]  ;;  %v1706_v63 = vld [vmem:[#allocation5 + $0x3088] sm:$0xff] }
 0x253   :  { %2969 = vmatprep.subr.mxu1 %v1486_v1  ;;  %2899 = vmatpush1.msra.mxu0 %v1069_v2  ;;  %v1278_v0 = vld [vmem:[#allocation5 + $0x2328] sm:$0xff]  ;;  %v1277_v2 = vld [vmem:[#allocation5 + $0x2320] sm:$0xff] }
 0x254   :  { %2970 = vmatpush1.msra.mxu1 %v1485_v3  ;;  %2900 = vmatprep.subr.mxu0 %v1057_v4  ;;  %v1694_v1 = vld [vmem:[#allocation5 + $0x3028] sm:$0xff]  ;;  %v1693_v3 = vld [vmem:[#allocation5 + $0x3020] sm:$0xff] }
 0x255   :  { %2971 = vmatprep.subr.mxu1 %v1473_v5  ;;  %2901 = vmatpush1.msra.mxu0 %v1056_v6  ;;  %v1265_v4 = vld [vmem:[#allocation5 + $0x22c0] sm:$0xff]  ;;  %v1264_v6 = vld [vmem:[#allocation5 + $0x22b8] sm:$0xff] }
 0x256   :  { %2972 = vmatpush1.msra.mxu1 %v1472_v7  ;;  %2902 = vmatprep.subr.mxu0 %v1044_v8  ;;  %v1681_v5 = vld [vmem:[#allocation5 + $0x2fc0] sm:$0xff]  ;;  %v1680_v7 = vld [vmem:[#allocation5 + $0x2fb8] sm:$0xff] }
 0x257   :  { %2973 = vmatprep.subr.mxu1 %v1460_v9  ;;  %2903 = vmatpush1.msra.mxu0 %v1043_v10  ;;  %v1252_v8 = vld [vmem:[#allocation5 + $0x2258] sm:$0xff]  ;;  %v1251_v10 = vld [vmem:[#allocation5 + $0x2250] sm:$0xff] }
 0x258   :  { %2974 = vmatpush1.msra.mxu1 %v1459_v11  ;;  %2904 = vmatprep.subr.mxu0 %v1031_v12  ;;  %v1668_v9 = vld [vmem:[#allocation5 + $0x2f58] sm:$0xff]  ;;  %v1667_v11 = vld [vmem:[#allocation5 + $0x2f50] sm:$0xff] }
 0x259   :  { %2975 = vmatprep.subr.mxu1 %v1447_v13  ;;  %2905 = vmatpush1.msra.mxu0 %v1030_v14  ;;  %v1239_v12 = vld [vmem:[#allocation5 + $0x21f0] sm:$0xff]  ;;  %v1238_v14 = vld [vmem:[#allocation5 + $0x21e8] sm:$0xff] }
 0x25a   :  { %2976 = vmatpush1.msra.mxu1 %v1446_v15  ;;  %2906 = vmatprep.subr.mxu0 %v1018_v16  ;;  %v1655_v13 = vld [vmem:[#allocation5 + $0x2ef0] sm:$0xff]  ;;  %v1654_v15 = vld [vmem:[#allocation5 + $0x2ee8] sm:$0xff] }
 0x25b   :  { %2977 = vmatprep.subr.mxu1 %v1434_v17  ;;  %2907 = vmatpush1.msra.mxu0 %v1017_v18  ;;  %v1226_v16 = vld [vmem:[#allocation5 + $0x2188] sm:$0xff]  ;;  %v1225_v18 = vld [vmem:[#allocation5 + $0x2180] sm:$0xff] }
 0x25c   :  { %2978 = vmatpush1.msra.mxu1 %v1433_v19  ;;  %2908 = vmatprep.subr.mxu0 %v1005_v20  ;;  %v1642_v17 = vld [vmem:[#allocation5 + $0x2e88] sm:$0xff]  ;;  %v1641_v19 = vld [vmem:[#allocation5 + $0x2e80] sm:$0xff] }
 0x25d   :  { %2979 = vmatprep.subr.mxu1 %v1421_v21  ;;  %2909 = vmatpush1.msra.mxu0 %v1004_v22  ;;  %v1213_v20 = vld [vmem:[#allocation5 + $0x2120] sm:$0xff]  ;;  %v1212_v22 = vld [vmem:[#allocation5 + $0x2118] sm:$0xff] }
 0x25e   :  { %2980 = vmatpush1.msra.mxu1 %v1420_v23  ;;  %2910 = vmatprep.subr.mxu0 %v992_v24  ;;  %v1629_v21 = vld [vmem:[#allocation5 + $0x2e20] sm:$0xff]  ;;  %v1628_v23 = vld [vmem:[#allocation5 + $0x2e18] sm:$0xff] }
 0x25f   :  { %2981 = vmatprep.subr.mxu1 %v1408_v25  ;;  %2911 = vmatpush1.msra.mxu0 %v991_v26  ;;  %v1200_v24 = vld [vmem:[#allocation5 + $0x20b8] sm:$0xff]  ;;  %v1199_v26 = vld [vmem:[#allocation5 + $0x20b0] sm:$0xff] }
 0x260   :  { %2982 = vmatpush1.msra.mxu1 %v1407_v27  ;;  %2912 = vmatprep.subr.mxu0 %v1395_v28  ;;  %v1616_v25 = vld [vmem:[#allocation5 + $0x2db8] sm:$0xff]  ;;  %v1615_v27 = vld [vmem:[#allocation5 + $0x2db0] sm:$0xff]  ;;  %v357_v28 = vld [vmem:[#allocation5 + $0x660] sm:$0xff] }
 0x261   :  { %2983 = vmatprep.subr.mxu1 %v1811_v29  ;;  %2913 = vmatpush2.msra.mxu0 %v1394_v30  ;;  %v5341_v29 = vld [vmem:[#allocation2 + $0x28] sm:$0xff]  ;;  %v773_v30 = vld [vmem:[#allocation5 + $0x1360] sm:$0xff] }
 0x262   :  { %2984 = vmatpush2.msra.mxu1 %v1810_v31  ;;  %2914 = vmatprep.subr.mxu0 %v1382_v32  ;;  %v5342_v31 = vld [vmem:[#allocation2 + $0x20] sm:$0xff]  ;;  %v356_v32 = vld [vmem:[#allocation5 + $0x658] sm:$0xff] }
 0x263   :  { %2985 = vmatprep.subr.mxu1 %v1798_v33  ;;  %2915 = vmatpush2.msra.mxu0 %v1381_v34  ;;  %v772_v33 = vld [vmem:[#allocation5 + $0x1358] sm:$0xff] }
 0x264   :  { %2986 = vmatpush2.msra.mxu1 %v1797_v35  ;;  %2916 = vmatprep.subr.mxu0 %v1369_v36  ;;  %v5343_v34 = vld [vmem:[#allocation2 + $0x38] sm:$0xff] }
 0x265   :  { %2987 = vmatprep.subr.mxu1 %v1785_v37  ;;  %2917 = vmatpush2.msra.mxu0 %v1368_v38  ;;  %v344_v35 = vld [vmem:[#allocation5 + $0x5f8] sm:$0xff]  ;;  %v5344_v37 = vld [vmem:[#allocation2 + $0x30] sm:$0xff] }
 0x266   :  { %2988 = vmatpush2.msra.mxu1 %v1784_v39  ;;  %2918 = vmatprep.subr.mxu0 %v1356_v40  ;;  %v760_v36 = vld [vmem:[#allocation5 + $0x12f8] sm:$0xff]  ;;  %v343_v38 = vld [vmem:[#allocation5 + $0x5f0] sm:$0xff] }
 0x267   :  { %2989 = vmatprep.subr.mxu1 %v1772_v41  ;;  %2919 = vmatpush2.msra.mxu0 %v1355_v42  ;;  %v759_v39 = vld [vmem:[#allocation5 + $0x12f0] sm:$0xff]  ;;  %v330_v42 = vld [vmem:[#allocation5 + $0x588] sm:$0xff] }
 0x268   :  { %2990 = vmatpush2.msra.mxu1 %v1771_v43  ;;  %2920 = vmatprep.subr.mxu0 %v1343_v44  ;;  %v331_v40 = vld [vmem:[#allocation5 + $0x590] sm:$0xff]  ;;  %v746_v43 = vld [vmem:[#allocation5 + $0x1288] sm:$0xff] }
 0x269   :  { %2991 = vmatprep.subr.mxu1 %v1759_v45  ;;  %2921 = vmatpush2.msra.mxu0 %v1342_v46  ;;  %v747_v41 = vld [vmem:[#allocation5 + $0x1290] sm:$0xff]  ;;  %v318_v44 = vld [vmem:[#allocation5 + $0x528] sm:$0xff]  ;;  %v317_v46 = vld [vmem:[#allocation5 + $0x520] sm:$0xff] }
 0x26a   :  { %2992 = vmatpush2.msra.mxu1 %v1758_v47  ;;  %2922 = vmatprep.subr.mxu0 %v1330_v48  ;;  %v734_v45 = vld [vmem:[#allocation5 + $0x1228] sm:$0xff]  ;;  %v733_v47 = vld [vmem:[#allocation5 + $0x1220] sm:$0xff] }
 0x26b   :  { %2993 = vmatprep.subr.mxu1 %v1746_v49  ;;  %2923 = vmatpush2.msra.mxu0 %v1329_v50  ;;  %v305_v48 = vld [vmem:[#allocation5 + $0x4c0] sm:$0xff]  ;;  %v304_v50 = vld [vmem:[#allocation5 + $0x4b8] sm:$0xff] }
 0x26c   :  { %2994 = vmatpush2.msra.mxu1 %v1745_v51  ;;  %2924 = vmatprep.subr.mxu0 %v1317_v52  ;;  %v721_v49 = vld [vmem:[#allocation5 + $0x11c0] sm:$0xff]  ;;  %v720_v51 = vld [vmem:[#allocation5 + $0x11b8] sm:$0xff] }
 0x26d   :  { %2995 = vmatprep.subr.mxu1 %v1733_v53  ;;  %2925 = vmatpush2.msra.mxu0 %v1316_v54  ;;  %v292_v52 = vld [vmem:[#allocation5 + $0x458] sm:$0xff]  ;;  %v291_v54 = vld [vmem:[#allocation5 + $0x450] sm:$0xff] }
 0x26e   :  { %2996 = vmatpush2.msra.mxu1 %v1732_v55  ;;  %2926 = vmatprep.subr.mxu0 %v1304_v56  ;;  %v708_v53 = vld [vmem:[#allocation5 + $0x1158] sm:$0xff]  ;;  %v707_v55 = vld [vmem:[#allocation5 + $0x1150] sm:$0xff] }
 0x26f   :  { %2997 = vmatprep.subr.mxu1 %v1720_v57  ;;  %2927 = vmatpush2.msra.mxu0 %v1303_v58  ;;  %v279_v56 = vld [vmem:[#allocation5 + $0x3f0] sm:$0xff]  ;;  %v278_v58 = vld [vmem:[#allocation5 + $0x3e8] sm:$0xff] }
 0x270   :  { %2998 = vmatpush2.msra.mxu1 %v1719_v59  ;;  %2928 = vmatprep.subr.mxu0 %v1291_v60  ;;  %v695_v57 = vld [vmem:[#allocation5 + $0x10f0] sm:$0xff]  ;;  %v694_v59 = vld [vmem:[#allocation5 + $0x10e8] sm:$0xff] }
 0x271   :  { %2999 = vmatprep.subr.mxu1 %v1707_v61  ;;  %2929 = vmatpush2.msra.mxu0 %v1290_v62  ;;  %v266_v60 = vld [vmem:[#allocation5 + $0x388] sm:$0xff]  ;;  %v265_v62 = vld [vmem:[#allocation5 + $0x380] sm:$0xff] }
 0x272   :  { %3000 = vmatpush2.msra.mxu1 %v1706_v63  ;;  %2930 = vmatprep.subr.mxu0 %v1278_v0  ;;  %v682_v61 = vld [vmem:[#allocation5 + $0x1088] sm:$0xff]  ;;  %v681_v63 = vld [vmem:[#allocation5 + $0x1080] sm:$0xff] }
 0x273   :  { %3001 = vmatprep.subr.mxu1 %v1694_v1  ;;  %2931 = vmatpush2.msra.mxu0 %v1277_v2  ;;  %v253_v0 = vld [vmem:[#allocation5 + $0x320] sm:$0xff]  ;;  %v252_v2 = vld [vmem:[#allocation5 + $0x318] sm:$0xff] }
 0x274   :  { %3002 = vmatpush2.msra.mxu1 %v1693_v3  ;;  %2932 = vmatprep.subr.mxu0 %v1265_v4  ;;  %v669_v1 = vld [vmem:[#allocation5 + $0x1020] sm:$0xff]  ;;  %v668_v3 = vld [vmem:[#allocation5 + $0x1018] sm:$0xff] }
 0x275   :  { %3003 = vmatprep.subr.mxu1 %v1681_v5  ;;  %2933 = vmatpush2.msra.mxu0 %v1264_v6  ;;  %v240_v4 = vld [vmem:[#allocation5 + $0x2b8] sm:$0xff]  ;;  %v239_v6 = vld [vmem:[#allocation5 + $0x2b0] sm:$0xff] }
 0x276   :  { %3004 = vmatpush2.msra.mxu1 %v1680_v7  ;;  %2934 = vmatprep.subr.mxu0 %v1252_v8  ;;  %v656_v5 = vld [vmem:[#allocation5 + $0xfb8] sm:$0xff]  ;;  %v655_v7 = vld [vmem:[#allocation5 + $0xfb0] sm:$0xff] }
 0x277   :  { %3005 = vmatprep.subr.mxu1 %v1668_v9  ;;  %2935 = vmatpush2.msra.mxu0 %v1251_v10  ;;  %v227_v8 = vld [vmem:[#allocation5 + $0x250] sm:$0xff]  ;;  %v226_v10 = vld [vmem:[#allocation5 + $0x248] sm:$0xff] }
 0x278   :  { %3006 = vmatpush2.msra.mxu1 %v1667_v11  ;;  %2936 = vmatprep.subr.mxu0 %v1239_v12  ;;  %v643_v9 = vld [vmem:[#allocation5 + $0xf50] sm:$0xff]  ;;  %v642_v11 = vld [vmem:[#allocation5 + $0xf48] sm:$0xff] }
 0x279   :  { %3007 = vmatprep.subr.mxu1 %v1655_v13  ;;  %2937 = vmatpush2.msra.mxu0 %v1238_v14  ;;  %v214_v12 = vld [vmem:[#allocation5 + $0x1e8] sm:$0xff]  ;;  %v213_v14 = vld [vmem:[#allocation5 + $0x1e0] sm:$0xff] }
 0x27a   :  { %3008 = vmatpush2.msra.mxu1 %v1654_v15  ;;  %2938 = vmatprep.subr.mxu0 %v1226_v16  ;;  %v630_v13 = vld [vmem:[#allocation5 + $0xee8] sm:$0xff]  ;;  %v629_v15 = vld [vmem:[#allocation5 + $0xee0] sm:$0xff] }
 0x27b   :  { %3009 = vmatprep.subr.mxu1 %v1642_v17  ;;  %2939 = vmatpush2.msra.mxu0 %v1225_v18  ;;  %v201_v16 = vld [vmem:[#allocation5 + $0x180] sm:$0xff]  ;;  %v200_v18 = vld [vmem:[#allocation5 + $0x178] sm:$0xff] }
 0x27c   :  { %3010 = vmatpush2.msra.mxu1 %v1641_v19  ;;  %2940 = vmatprep.subr.mxu0 %v1213_v20  ;;  %v617_v17 = vld [vmem:[#allocation5 + $0xe80] sm:$0xff]  ;;  %v616_v19 = vld [vmem:[#allocation5 + $0xe78] sm:$0xff] }
 0x27d   :  { %3011 = vmatprep.subr.mxu1 %v1629_v21  ;;  %2941 = vmatpush2.msra.mxu0 %v1212_v22  ;;  %v188_v20 = vld [vmem:[#allocation5 + $0x118] sm:$0xff]  ;;  %v187_v22 = vld [vmem:[#allocation5 + $0x110] sm:$0xff] }
 0x27e   :  { %3012 = vmatpush2.msra.mxu1 %v1628_v23  ;;  %2942 = vmatprep.subr.mxu0 %v1200_v24  ;;  %v604_v21 = vld [vmem:[#allocation5 + $0xe18] sm:$0xff]  ;;  %v603_v23 = vld [vmem:[#allocation5 + $0xe10] sm:$0xff] }
 0x27f   :  { %3013 = vmatprep.subr.mxu1 %v1616_v25  ;;  %2943 = vmatpush2.msra.mxu0 %v1199_v26  ;;  %v175_v24 = vld [vmem:[#allocation5 + $0xb0] sm:$0xff]  ;;  %v174_v26 = vld [vmem:[#allocation5 + $0xa8] sm:$0xff] }
 0x280   :  { %2944 = vmatprep.mubr.f32.mxu0 %v5341_v29  ;;  %3014 = vmatpush2.msra.mxu1 %v1615_v27  ;;  %v591_v25 = vld [vmem:[#allocation5 + $0xdb0] sm:$0xff]  ;;  %v590_v27 = vld [vmem:[#allocation5 + $0xda8] sm:$0xff] }
 0x281   :  { %2945 = vmatmul.mubr.f32.vlgmr.msra.gmra.mxu0 %v5342_v31  ;;  %3015 = vmatprep.mubr.f32.mxu1 %v5343_v34  ;;  %v578_v29 = vld [vmem:[#allocation5 + $0xd48] sm:$0xff]  ;;  %v577_v31 = vld [vmem:[#allocation5 + $0xd40] sm:$0xff]  ;;  %v564_v34 = vld [vmem:[#allocation5 + $0xcd8] sm:$0xff] }
 0x282   :  { %3022 = vmatprep.subr.mxu0 %v357_v28  ;;  %3093 = vmatprep.subr.mxu1 %v773_v30  ;;  %v162_v28 = vld [vmem:[#allocation5 + $0x48] sm:$0xff]  ;;  %v161_v30 = vld [vmem:[#allocation5 + $0x40] sm:$0xff] }
 0x283   :  { %3016 = vmatmul.mubr.f32.vlgmr.msra.gmra.mxu1 %v5344_v37  ;;  %3023 = vmatpush1.msra.mxu0 %v356_v32  ;;  %v565_v32 = vld [vmem:[#allocation5 + $0xce0] sm:$0xff]  ;;  %v968_v37 = vld [vmem:[#allocation5 + $0x1978] sm:$0xff] }
 0x284   :  { %3094 = vmatpush1.msra.mxu1 %v772_v33  ;;  %3024 = vmatprep.subr.mxu0 %v344_v35  ;;  %v981_v33 = vld [vmem:[#allocation5 + $0x19e0] sm:$0xff]  ;;  %v980_v35 = vld [vmem:[#allocation5 + $0x19d8] sm:$0xff] }
 0x285   :  { %3095 = vmatprep.subr.mxu1 %v760_v36  ;;  %3025 = vmatpush1.msra.mxu0 %v343_v38  ;;  %v552_v36 = vld [vmem:[#allocation5 + $0xc78] sm:$0xff]  ;;  %v551_v38 = vld [vmem:[#allocation5 + $0xc70] sm:$0xff] }
 0x286   :  { %3096 = vmatpush1.msra.mxu1 %v759_v39  ;;  %3026 = vmatprep.subr.mxu0 %v331_v40  ;;  %v967_v39 = vld [vmem:[#allocation5 + $0x1970] sm:$0xff] }
 0x287   :  { %3097 = vmatprep.subr.mxu1 %v747_v41  ;;  %3027 = vmatpush1.msra.mxu0 %v330_v42  ;;  %v539_v40 = vld [vmem:[#allocation5 + $0xc10] sm:$0xff]  ;;  %v538_v42 = vld [vmem:[#allocation5 + $0xc08] sm:$0xff] }
 0x288   :  { %3098 = vmatpush1.msra.mxu1 %v746_v43  ;;  %3028 = vmatprep.subr.mxu0 %v318_v44  ;;  %v955_v41 = vld [vmem:[#allocation5 + $0x1910] sm:$0xff]  ;;  %v954_v43 = vld [vmem:[#allocation5 + $0x1908] sm:$0xff] }
 0x289   :  { %3099 = vmatprep.subr.mxu1 %v734_v45  ;;  %3029 = vmatpush1.msra.mxu0 %v317_v46  ;;  %v526_v44 = vld [vmem:[#allocation5 + $0xba8] sm:$0xff]  ;;  %v525_v46 = vld [vmem:[#allocation5 + $0xba0] sm:$0xff] }
 0x28a   :  { %3100 = vmatpush1.msra.mxu1 %v733_v47  ;;  %3030 = vmatprep.subr.mxu0 %v305_v48  ;;  %v942_v45 = vld [vmem:[#allocation5 + $0x18a8] sm:$0xff]  ;;  %v941_v47 = vld [vmem:[#allocation5 + $0x18a0] sm:$0xff] }
 0x28b   :  { %3101 = vmatprep.subr.mxu1 %v721_v49  ;;  %3031 = vmatpush1.msra.mxu0 %v304_v50  ;;  %v513_v48 = vld [vmem:[#allocation5 + $0xb40] sm:$0xff]  ;;  %v512_v50 = vld [vmem:[#allocation5 + $0xb38] sm:$0xff] }
 0x28c   :  { %3102 = vmatpush1.msra.mxu1 %v720_v51  ;;  %3032 = vmatprep.subr.mxu0 %v292_v52  ;;  %v929_v49 = vld [vmem:[#allocation5 + $0x1840] sm:$0xff]  ;;  %v928_v51 = vld [vmem:[#allocation5 + $0x1838] sm:$0xff] }
 0x28d   :  { %3103 = vmatprep.subr.mxu1 %v708_v53  ;;  %3033 = vmatpush1.msra.mxu0 %v291_v54  ;;  %v500_v52 = vld [vmem:[#allocation5 + $0xad8] sm:$0xff]  ;;  %v499_v54 = vld [vmem:[#allocation5 + $0xad0] sm:$0xff] }
 0x28e   :  { %3104 = vmatpush1.msra.mxu1 %v707_v55  ;;  %3034 = vmatprep.subr.mxu0 %v279_v56  ;;  %v916_v53 = vld [vmem:[#allocation5 + $0x17d8] sm:$0xff]  ;;  %v915_v55 = vld [vmem:[#allocation5 + $0x17d0] sm:$0xff] }
 0x28f   :  { %3105 = vmatprep.subr.mxu1 %v695_v57  ;;  %3035 = vmatpush1.msra.mxu0 %v278_v58  ;;  %v487_v56 = vld [vmem:[#allocation5 + $0xa70] sm:$0xff]  ;;  %v486_v58 = vld [vmem:[#allocation5 + $0xa68] sm:$0xff] }
 0x290   :  { %3106 = vmatpush1.msra.mxu1 %v694_v59  ;;  %3036 = vmatprep.subr.mxu0 %v266_v60  ;;  %v903_v57 = vld [vmem:[#allocation5 + $0x1770] sm:$0xff]  ;;  %v902_v59 = vld [vmem:[#allocation5 + $0x1768] sm:$0xff] }
 0x291   :  { %3107 = vmatprep.subr.mxu1 %v682_v61  ;;  %3037 = vmatpush1.msra.mxu0 %v265_v62  ;;  %v474_v60 = vld [vmem:[#allocation5 + $0xa08] sm:$0xff]  ;;  %v473_v62 = vld [vmem:[#allocation5 + $0xa00] sm:$0xff] }
 0x292   :  { %3108 = vmatpush1.msra.mxu1 %v681_v63  ;;  %3038 = vmatprep.subr.mxu0 %v253_v0  ;;  %v890_v61 = vld [vmem:[#allocation5 + $0x1708] sm:$0xff]  ;;  %v889_v63 = vld [vmem:[#allocation5 + $0x1700] sm:$0xff] }
 0x293   :  { %3109 = vmatprep.subr.mxu1 %v669_v1  ;;  %3039 = vmatpush1.msra.mxu0 %v252_v2  ;;  %v461_v0 = vld [vmem:[#allocation5 + $0x9a0] sm:$0xff]  ;;  %v460_v2 = vld [vmem:[#allocation5 + $0x998] sm:$0xff] }
 0x294   :  { %3110 = vmatpush1.msra.mxu1 %v668_v3  ;;  %3040 = vmatprep.subr.mxu0 %v240_v4  ;;  %v877_v1 = vld [vmem:[#allocation5 + $0x16a0] sm:$0xff]  ;;  %v876_v3 = vld [vmem:[#allocation5 + $0x1698] sm:$0xff] }
 0x295   :  { %3111 = vmatprep.subr.mxu1 %v656_v5  ;;  %3041 = vmatpush1.msra.mxu0 %v239_v6  ;;  %v448_v4 = vld [vmem:[#allocation5 + $0x938] sm:$0xff]  ;;  %v447_v6 = vld [vmem:[#allocation5 + $0x930] sm:$0xff] }
 0x296   :  { %3112 = vmatpush1.msra.mxu1 %v655_v7  ;;  %3042 = vmatprep.subr.mxu0 %v227_v8  ;;  %v864_v5 = vld [vmem:[#allocation5 + $0x1638] sm:$0xff]  ;;  %v863_v7 = vld [vmem:[#allocation5 + $0x1630] sm:$0xff] }
 0x297   :  { %3113 = vmatprep.subr.mxu1 %v643_v9  ;;  %3043 = vmatpush1.msra.mxu0 %v226_v10  ;;  %v435_v8 = vld [vmem:[#allocation5 + $0x8d0] sm:$0xff]  ;;  %v434_v10 = vld [vmem:[#allocation5 + $0x8c8] sm:$0xff] }
 0x298   :  { %3114 = vmatpush1.msra.mxu1 %v642_v11  ;;  %3044 = vmatprep.subr.mxu0 %v214_v12  ;;  %v851_v9 = vld [vmem:[#allocation5 + $0x15d0] sm:$0xff]  ;;  %v850_v11 = vld [vmem:[#allocation5 + $0x15c8] sm:$0xff] }
 0x299   :  { %3115 = vmatprep.subr.mxu1 %v630_v13  ;;  %3045 = vmatpush1.msra.mxu0 %v213_v14  ;;  %v422_v12 = vld [vmem:[#allocation5 + $0x868] sm:$0xff]  ;;  %v421_v14 = vld [vmem:[#allocation5 + $0x860] sm:$0xff] }
 0x29a   :  { %3116 = vmatpush1.msra.mxu1 %v629_v15  ;;  %3046 = vmatprep.subr.mxu0 %v201_v16  ;;  %v838_v13 = vld [vmem:[#allocation5 + $0x1568] sm:$0xff]  ;;  %v837_v15 = vld [vmem:[#allocation5 + $0x1560] sm:$0xff] }
 0x29b   :  { %3117 = vmatprep.subr.mxu1 %v617_v17  ;;  %3047 = vmatpush1.msra.mxu0 %v200_v18  ;;  %v409_v16 = vld [vmem:[#allocation5 + $0x800] sm:$0xff]  ;;  %v408_v18 = vld [vmem:[#allocation5 + $0x7f8] sm:$0xff] }
 0x29c   :  { %3118 = vmatpush1.msra.mxu1 %v616_v19  ;;  %3048 = vmatprep.subr.mxu0 %v188_v20  ;;  %v825_v17 = vld [vmem:[#allocation5 + $0x1500] sm:$0xff]  ;;  %v824_v19 = vld [vmem:[#allocation5 + $0x14f8] sm:$0xff] }
 0x29d   :  { %3119 = vmatprep.subr.mxu1 %v604_v21  ;;  %3049 = vmatpush1.msra.mxu0 %v187_v22  ;;  %v396_v20 = vld [vmem:[#allocation5 + $0x798] sm:$0xff]  ;;  %v395_v22 = vld [vmem:[#allocation5 + $0x790] sm:$0xff] }
 0x29e   :  { %3120 = vmatpush1.msra.mxu1 %v603_v23  ;;  %3050 = vmatprep.subr.mxu0 %v175_v24  ;;  %v812_v21 = vld [vmem:[#allocation5 + $0x1498] sm:$0xff]  ;;  %v811_v23 = vld [vmem:[#allocation5 + $0x1490] sm:$0xff] }
 0x29f   :  { %3121 = vmatprep.subr.mxu1 %v591_v25  ;;  %3051 = vmatpush1.msra.mxu0 %v174_v26  ;;  %v383_v24 = vld [vmem:[#allocation5 + $0x730] sm:$0xff]  ;;  %v382_v26 = vld [vmem:[#allocation5 + $0x728] sm:$0xff] }
 0x2a0   :  { %3122 = vmatpush1.msra.mxu1 %v590_v27  ;;  %3052 = vmatprep.subr.mxu0 %v162_v28  ;;  %v799_v25 = vld [vmem:[#allocation5 + $0x1430] sm:$0xff]  ;;  %v798_v27 = vld [vmem:[#allocation5 + $0x1428] sm:$0xff] }
 0x2a1   :  { %3123 = vmatprep.subr.mxu1 %v578_v29  ;;  %3053 = vmatpush1.msra.mxu0 %v161_v30  ;;  %v370_v28 = vld [vmem:[#allocation5 + $0x6c8] sm:$0xff]  ;;  %v369_v30 = vld [vmem:[#allocation5 + $0x6c0] sm:$0xff] }
 0x2a2   :  { %3124 = vmatpush1.msra.mxu1 %v577_v31  ;;  %3054 = vmatprep.subr.mxu0 %v565_v32  ;;  %v786_v29 = vld [vmem:[#allocation5 + $0x13c8] sm:$0xff]  ;;  %v785_v31 = vld [vmem:[#allocation5 + $0x13c0] sm:$0xff] }
 0x2a3   :  { %3125 = vmatprep.subr.mxu1 %v981_v33  ;;  %3055 = vmatpush2.msra.mxu0 %v564_v34  ;;  %v1189_v32 = vld [vmem:[#allocation5 + $0x2060] sm:$0xff]  ;;  %v5345_v33 = vld [vmem:[#allocation2 + $0x8] sm:$0xff] }
 0x2a4   :  { %3126 = vmatpush2.msra.mxu1 %v980_v35  ;;  %3056 = vmatprep.subr.mxu0 %v552_v36  ;;  %v1605_v34 = vld [vmem:[#allocation5 + $0x2d60] sm:$0xff]  ;;  %v1188_v36 = vld [vmem:[#allocation5 + $0x2058] sm:$0xff] }
 0x2a5   :  { %3127 = vmatprep.subr.mxu1 %v968_v37  ;;  %3057 = vmatpush2.msra.mxu0 %v551_v38  ;;  %v5346_v35 = vld [vmem:[#allocation2] sm:$0xff]  ;;  %v1604_v37 = vld [vmem:[#allocation5 + $0x2d58] sm:$0xff] }
 0x2a6   :  { %3128 = vmatpush2.msra.mxu1 %v967_v39  ;;  %3058 = vmatprep.subr.mxu0 %v539_v40  ;;  %v5347_v38 = vld [vmem:[#allocation2 + $0x18] sm:$0xff] }
 0x2a7   :  { %3129 = vmatprep.subr.mxu1 %v955_v41  ;;  %3059 = vmatpush2.msra.mxu0 %v538_v42  ;;  %v1176_v39 = vld [vmem:[#allocation5 + $0x1ff8] sm:$0xff]  ;;  %v5348_v41 = vld [vmem:[#allocation2 + $0x10] sm:$0xff] }
 0x2a8   :  { %3130 = vmatpush2.msra.mxu1 %v954_v43  ;;  %3060 = vmatprep.subr.mxu0 %v526_v44  ;;  %v1592_v40 = vld [vmem:[#allocation5 + $0x2cf8] sm:$0xff]  ;;  %v1175_v42 = vld [vmem:[#allocation5 + $0x1ff0] sm:$0xff] }
 0x2a9   :  { %3131 = vmatprep.subr.mxu1 %v942_v45  ;;  %3061 = vmatpush2.msra.mxu0 %v525_v46  ;;  %v1591_v43 = vld [vmem:[#allocation5 + $0x2cf0] sm:$0xff]  ;;  %v1162_v46 = vld [vmem:[#allocation5 + $0x1f88] sm:$0xff] }
 0x2aa   :  { %3132 = vmatpush2.msra.mxu1 %v941_v47  ;;  %3062 = vmatprep.subr.mxu0 %v513_v48  ;;  %v1163_v44 = vld [vmem:[#allocation5 + $0x1f90] sm:$0xff]  ;;  %v1578_v47 = vld [vmem:[#allocation5 + $0x2c88] sm:$0xff] }
 0x2ab   :  { %3133 = vmatprep.subr.mxu1 %v929_v49  ;;  %3063 = vmatpush2.msra.mxu0 %v512_v50  ;;  %v1579_v45 = vld [vmem:[#allocation5 + $0x2c90] sm:$0xff]  ;;  %v1150_v48 = vld [vmem:[#allocation5 + $0x1f28] sm:$0xff]  ;;  %v1149_v50 = vld [vmem:[#allocation5 + $0x1f20] sm:$0xff] }
 0x2ac   :  { %3134 = vmatpush2.msra.mxu1 %v928_v51  ;;  %3064 = vmatprep.subr.mxu0 %v500_v52  ;;  %v1566_v49 = vld [vmem:[#allocation5 + $0x2c28] sm:$0xff]  ;;  %v1565_v51 = vld [vmem:[#allocation5 + $0x2c20] sm:$0xff] }
 0x2ad   :  { %3135 = vmatprep.subr.mxu1 %v916_v53  ;;  %3065 = vmatpush2.msra.mxu0 %v499_v54  ;;  %v1137_v52 = vld [vmem:[#allocation5 + $0x1ec0] sm:$0xff]  ;;  %v1136_v54 = vld [vmem:[#allocation5 + $0x1eb8] sm:$0xff] }
 0x2ae   :  { %3136 = vmatpush2.msra.mxu1 %v915_v55  ;;  %3066 = vmatprep.subr.mxu0 %v487_v56  ;;  %v1553_v53 = vld [vmem:[#allocation5 + $0x2bc0] sm:$0xff]  ;;  %v1552_v55 = vld [vmem:[#allocation5 + $0x2bb8] sm:$0xff] }
 0x2af   :  { %3137 = vmatprep.subr.mxu1 %v903_v57  ;;  %3067 = vmatpush2.msra.mxu0 %v486_v58  ;;  %v1124_v56 = vld [vmem:[#allocation5 + $0x1e58] sm:$0xff]  ;;  %v1123_v58 = vld [vmem:[#allocation5 + $0x1e50] sm:$0xff] }
 0x2b0   :  { %3138 = vmatpush2.msra.mxu1 %v902_v59  ;;  %3068 = vmatprep.subr.mxu0 %v474_v60  ;;  %v1540_v57 = vld [vmem:[#allocation5 + $0x2b58] sm:$0xff]  ;;  %v1539_v59 = vld [vmem:[#allocation5 + $0x2b50] sm:$0xff] }
 0x2b1   :  { %3139 = vmatprep.subr.mxu1 %v890_v61  ;;  %3069 = vmatpush2.msra.mxu0 %v473_v62  ;;  %v1111_v60 = vld [vmem:[#allocation5 + $0x1df0] sm:$0xff]  ;;  %v1110_v62 = vld [vmem:[#allocation5 + $0x1de8] sm:$0xff] }
 0x2b2   :  { %3140 = vmatpush2.msra.mxu1 %v889_v63  ;;  %3070 = vmatprep.subr.mxu0 %v461_v0  ;;  %v1527_v61 = vld [vmem:[#allocation5 + $0x2af0] sm:$0xff]  ;;  %v1526_v63 = vld [vmem:[#allocation5 + $0x2ae8] sm:$0xff] }
 0x2b3   :  { %3141 = vmatprep.subr.mxu1 %v877_v1  ;;  %3071 = vmatpush2.msra.mxu0 %v460_v2  ;;  %v1098_v0 = vld [vmem:[#allocation5 + $0x1d88] sm:$0xff]  ;;  %v1097_v2 = vld [vmem:[#allocation5 + $0x1d80] sm:$0xff] }
 0x2b4   :  { %3142 = vmatpush2.msra.mxu1 %v876_v3  ;;  %3072 = vmatprep.subr.mxu0 %v448_v4  ;;  %v1514_v1 = vld [vmem:[#allocation5 + $0x2a88] sm:$0xff]  ;;  %v1513_v3 = vld [vmem:[#allocation5 + $0x2a80] sm:$0xff] }
 0x2b5   :  { %3143 = vmatprep.subr.mxu1 %v864_v5  ;;  %3073 = vmatpush2.msra.mxu0 %v447_v6  ;;  %v1085_v4 = vld [vmem:[#allocation5 + $0x1d20] sm:$0xff]  ;;  %v1084_v6 = vld [vmem:[#allocation5 + $0x1d18] sm:$0xff] }
 0x2b6   :  { %3144 = vmatpush2.msra.mxu1 %v863_v7  ;;  %3074 = vmatprep.subr.mxu0 %v435_v8  ;;  %v1501_v5 = vld [vmem:[#allocation5 + $0x2a20] sm:$0xff]  ;;  %v1500_v7 = vld [vmem:[#allocation5 + $0x2a18] sm:$0xff] }
 0x2b7   :  { %3145 = vmatprep.subr.mxu1 %v851_v9  ;;  %3075 = vmatpush2.msra.mxu0 %v434_v10  ;;  %v1072_v8 = vld [vmem:[#allocation5 + $0x1cb8] sm:$0xff]  ;;  %v1071_v10 = vld [vmem:[#allocation5 + $0x1cb0] sm:$0xff] }
 0x2b8   :  { %3146 = vmatpush2.msra.mxu1 %v850_v11  ;;  %3076 = vmatprep.subr.mxu0 %v422_v12  ;;  %v1488_v9 = vld [vmem:[#allocation5 + $0x29b8] sm:$0xff]  ;;  %v1487_v11 = vld [vmem:[#allocation5 + $0x29b0] sm:$0xff] }
 0x2b9   :  { %3147 = vmatprep.subr.mxu1 %v838_v13  ;;  %3077 = vmatpush2.msra.mxu0 %v421_v14  ;;  %v1059_v12 = vld [vmem:[#allocation5 + $0x1c50] sm:$0xff]  ;;  %v1058_v14 = vld [vmem:[#allocation5 + $0x1c48] sm:$0xff] }
 0x2ba   :  { %3148 = vmatpush2.msra.mxu1 %v837_v15  ;;  %3078 = vmatprep.subr.mxu0 %v409_v16  ;;  %v1475_v13 = vld [vmem:[#allocation5 + $0x2950] sm:$0xff]  ;;  %v1474_v15 = vld [vmem:[#allocation5 + $0x2948] sm:$0xff] }
 0x2bb   :  { %3149 = vmatprep.subr.mxu1 %v825_v17  ;;  %3079 = vmatpush2.msra.mxu0 %v408_v18  ;;  %v1046_v16 = vld [vmem:[#allocation5 + $0x1be8] sm:$0xff]  ;;  %v1045_v18 = vld [vmem:[#allocation5 + $0x1be0] sm:$0xff] }
 0x2bc   :  { %3150 = vmatpush2.msra.mxu1 %v824_v19  ;;  %3080 = vmatprep.subr.mxu0 %v396_v20  ;;  %v1462_v17 = vld [vmem:[#allocation5 + $0x28e8] sm:$0xff]  ;;  %v1461_v19 = vld [vmem:[#allocation5 + $0x28e0] sm:$0xff] }
 0x2bd   :  { %3151 = vmatprep.subr.mxu1 %v812_v21  ;;  %3081 = vmatpush2.msra.mxu0 %v395_v22  ;;  %v1033_v20 = vld [vmem:[#allocation5 + $0x1b80] sm:$0xff]  ;;  %v1032_v22 = vld [vmem:[#allocation5 + $0x1b78] sm:$0xff] }
 0x2be   :  { %3152 = vmatpush2.msra.mxu1 %v811_v23  ;;  %3082 = vmatprep.subr.mxu0 %v383_v24  ;;  %v1449_v21 = vld [vmem:[#allocation5 + $0x2880] sm:$0xff]  ;;  %v1448_v23 = vld [vmem:[#allocation5 + $0x2878] sm:$0xff] }
 0x2bf   :  { %3153 = vmatprep.subr.mxu1 %v799_v25  ;;  %3083 = vmatpush2.msra.mxu0 %v382_v26  ;;  %v1020_v24 = vld [vmem:[#allocation5 + $0x1b18] sm:$0xff]  ;;  %v1019_v26 = vld [vmem:[#allocation5 + $0x1b10] sm:$0xff] }
 0x2c0   :  { %3154 = vmatpush2.msra.mxu1 %v798_v27  ;;  %3084 = vmatprep.subr.mxu0 %v370_v28  ;;  %v1436_v25 = vld [vmem:[#allocation5 + $0x2818] sm:$0xff]  ;;  %v1435_v27 = vld [vmem:[#allocation5 + $0x2810] sm:$0xff] }
 0x2c1   :  { %3155 = vmatprep.subr.mxu1 %v786_v29  ;;  %3085 = vmatpush2.msra.mxu0 %v369_v30  ;;  %v1007_v28 = vld [vmem:[#allocation5 + $0x1ab0] sm:$0xff]  ;;  %v1006_v30 = vld [vmem:[#allocation5 + $0x1aa8] sm:$0xff] }
 0x2c2   :  { %3086 = vmatprep.mubr.f32.mxu0 %v5345_v33  ;;  %3156 = vmatpush2.msra.mxu1 %v785_v31  ;;  %v1423_v29 = vld [vmem:[#allocation5 + $0x27b0] sm:$0xff]  ;;  %v1422_v31 = vld [vmem:[#allocation5 + $0x27a8] sm:$0xff] }
 0x2c3   :  { %3087 = vmatmul.mubr.f32.vlgmr.msra.gmra.mxu0 %v5346_v35  ;;  %3157 = vmatprep.mubr.f32.mxu1 %v5347_v38  ;;  %v1410_v33 = vld [vmem:[#allocation5 + $0x2748] sm:$0xff]  ;;  %v1409_v35 = vld [vmem:[#allocation5 + $0x2740] sm:$0xff]  ;;  %v1396_v38 = vld [vmem:[#allocation5 + $0x26d8] sm:$0xff] }
 0x2c4   :  { %3164 = vmatprep.subr.mxu0 %v1189_v32  ;;  %3235 = vmatprep.subr.mxu1 %v1605_v34  ;;  %v994_v32 = vld [vmem:[#allocation5 + $0x1a48] sm:$0xff]  ;;  %v993_v34 = vld [vmem:[#allocation5 + $0x1a40] sm:$0xff] }
 0x2c5   :  { %3158 = vmatmul.mubr.f32.vlgmr.msra.gmra.mxu1 %v5348_v41  ;;  %3165 = vmatpush1.msra.mxu0 %v1188_v36  ;;  %v1397_v36 = vld [vmem:[#allocation5 + $0x26e0] sm:$0xff]  ;;  %v1800_v41 = vld [vmem:[#allocation5 + $0x3378] sm:$0xff] }
 0x2c6   :  { %3236 = vmatpush1.msra.mxu1 %v1604_v37  ;;  %3166 = vmatprep.subr.mxu0 %v1176_v39  ;;  %v1813_v37 = vld [vmem:[#allocation5 + $0x33e0] sm:$0xff]  ;;  %v1812_v39 = vld [vmem:[#allocation5 + $0x33d8] sm:$0xff] }
 0x2c7   :  { %3237 = vmatprep.subr.mxu1 %v1592_v40  ;;  %3167 = vmatpush1.msra.mxu0 %v1175_v42  ;;  %v1384_v40 = vld [vmem:[#allocation5 + $0x2678] sm:$0xff]  ;;  %v1383_v42 = vld [vmem:[#allocation5 + $0x2670] sm:$0xff] }
 0x2c8   :  { %3238 = vmatpush1.msra.mxu1 %v1591_v43  ;;  %3168 = vmatprep.subr.mxu0 %v1163_v44  ;;  %v1799_v43 = vld [vmem:[#allocation5 + $0x3370] sm:$0xff] }
 0x2c9   :  { %3239 = vmatprep.subr.mxu1 %v1579_v45  ;;  %3169 = vmatpush1.msra.mxu0 %v1162_v46  ;;  %v1371_v44 = vld [vmem:[#allocation5 + $0x2610] sm:$0xff]  ;;  %v1370_v46 = vld [vmem:[#allocation5 + $0x2608] sm:$0xff] }
 0x2ca   :  { %3240 = vmatpush1.msra.mxu1 %v1578_v47  ;;  %3170 = vmatprep.subr.mxu0 %v1150_v48  ;;  %v1787_v45 = vld [vmem:[#allocation5 + $0x3310] sm:$0xff]  ;;  %v1786_v47 = vld [vmem:[#allocation5 + $0x3308] sm:$0xff] }
 0x2cb   :  { %3241 = vmatprep.subr.mxu1 %v1566_v49  ;;  %3171 = vmatpush1.msra.mxu0 %v1149_v50  ;;  %v1358_v48 = vld [vmem:[#allocation5 + $0x25a8] sm:$0xff]  ;;  %v1357_v50 = vld [vmem:[#allocation5 + $0x25a0] sm:$0xff] }
 0x2cc   :  { %3242 = vmatpush1.msra.mxu1 %v1565_v51  ;;  %3172 = vmatprep.subr.mxu0 %v1137_v52  ;;  %v1774_v49 = vld [vmem:[#allocation5 + $0x32a8] sm:$0xff]  ;;  %v1773_v51 = vld [vmem:[#allocation5 + $0x32a0] sm:$0xff] }
 0x2cd   :  { %3243 = vmatprep.subr.mxu1 %v1553_v53  ;;  %3173 = vmatpush1.msra.mxu0 %v1136_v54  ;;  %v1345_v52 = vld [vmem:[#allocation5 + $0x2540] sm:$0xff]  ;;  %v1344_v54 = vld [vmem:[#allocation5 + $0x2538] sm:$0xff] }
 0x2ce   :  { %3244 = vmatpush1.msra.mxu1 %v1552_v55  ;;  %3174 = vmatprep.subr.mxu0 %v1124_v56  ;;  %v1761_v53 = vld [vmem:[#allocation5 + $0x3240] sm:$0xff]  ;;  %v1760_v55 = vld [vmem:[#allocation5 + $0x3238] sm:$0xff] }
 0x2cf   :  { %3245 = vmatprep.subr.mxu1 %v1540_v57  ;;  %3175 = vmatpush1.msra.mxu0 %v1123_v58  ;;  %v1332_v56 = vld [vmem:[#allocation5 + $0x24d8] sm:$0xff]  ;;  %v1331_v58 = vld [vmem:[#allocation5 + $0x24d0] sm:$0xff] }
 0x2d0   :  { %3246 = vmatpush1.msra.mxu1 %v1539_v59  ;;  %3176 = vmatprep.subr.mxu0 %v1111_v60  ;;  %v1748_v57 = vld [vmem:[#allocation5 + $0x31d8] sm:$0xff]  ;;  %v1747_v59 = vld [vmem:[#allocation5 + $0x31d0] sm:$0xff] }
 0x2d1   :  { %3247 = vmatprep.subr.mxu1 %v1527_v61  ;;  %3177 = vmatpush1.msra.mxu0 %v1110_v62  ;;  %v1319_v60 = vld [vmem:[#allocation5 + $0x2470] sm:$0xff]  ;;  %v1318_v62 = vld [vmem:[#allocation5 + $0x2468] sm:$0xff] }
 0x2d2   :  { %3248 = vmatpush1.msra.mxu1 %v1526_v63  ;;  %3178 = vmatprep.subr.mxu0 %v1098_v0  ;;  %v1735_v61 = vld [vmem:[#allocation5 + $0x3170] sm:$0xff]  ;;  %v1734_v63 = vld [vmem:[#allocation5 + $0x3168] sm:$0xff] }
 0x2d3   :  { %3249 = vmatprep.subr.mxu1 %v1514_v1  ;;  %3179 = vmatpush1.msra.mxu0 %v1097_v2  ;;  %v1306_v0 = vld [vmem:[#allocation5 + $0x2408] sm:$0xff]  ;;  %v1305_v2 = vld [vmem:[#allocation5 + $0x2400] sm:$0xff] }
 0x2d4   :  { %3250 = vmatpush1.msra.mxu1 %v1513_v3  ;;  %3180 = vmatprep.subr.mxu0 %v1085_v4  ;;  %v1722_v1 = vld [vmem:[#allocation5 + $0x3108] sm:$0xff]  ;;  %v1721_v3 = vld [vmem:[#allocation5 + $0x3100] sm:$0xff] }
 0x2d5   :  { %3251 = vmatprep.subr.mxu1 %v1501_v5  ;;  %3181 = vmatpush1.msra.mxu0 %v1084_v6  ;;  %v1293_v4 = vld [vmem:[#allocation5 + $0x23a0] sm:$0xff]  ;;  %v1292_v6 = vld [vmem:[#allocation5 + $0x2398] sm:$0xff] }
 0x2d6   :  { %3252 = vmatpush1.msra.mxu1 %v1500_v7  ;;  %3182 = vmatprep.subr.mxu0 %v1072_v8  ;;  %v1709_v5 = vld [vmem:[#allocation5 + $0x30a0] sm:$0xff]  ;;  %v1708_v7 = vld [vmem:[#allocation5 + $0x3098] sm:$0xff] }
 0x2d7   :  { %3253 = vmatprep.subr.mxu1 %v1488_v9  ;;  %3183 = vmatpush1.msra.mxu0 %v1071_v10  ;;  %v1280_v8 = vld [vmem:[#allocation5 + $0x2338] sm:$0xff]  ;;  %v1279_v10 = vld [vmem:[#allocation5 + $0x2330] sm:$0xff] }
 0x2d8   :  { %3254 = vmatpush1.msra.mxu1 %v1487_v11  ;;  %3184 = vmatprep.subr.mxu0 %v1059_v12  ;;  %v1696_v9 = vld [vmem:[#allocation5 + $0x3038] sm:$0xff]  ;;  %v1695_v11 = vld [vmem:[#allocation5 + $0x3030] sm:$0xff] }
 0x2d9   :  { %3255 = vmatprep.subr.mxu1 %v1475_v13  ;;  %3185 = vmatpush1.msra.mxu0 %v1058_v14  ;;  %v1267_v12 = vld [vmem:[#allocation5 + $0x22d0] sm:$0xff]  ;;  %v1266_v14 = vld [vmem:[#allocation5 + $0x22c8] sm:$0xff] }
 0x2da   :  { %3256 = vmatpush1.msra.mxu1 %v1474_v15  ;;  %3186 = vmatprep.subr.mxu0 %v1046_v16  ;;  %v1683_v13 = vld [vmem:[#allocation5 + $0x2fd0] sm:$0xff]  ;;  %v1682_v15 = vld [vmem:[#allocation5 + $0x2fc8] sm:$0xff] }
 0x2db   :  { %3257 = vmatprep.subr.mxu1 %v1462_v17  ;;  %3187 = vmatpush1.msra.mxu0 %v1045_v18  ;;  %v1254_v16 = vld [vmem:[#allocation5 + $0x2268] sm:$0xff]  ;;  %v1253_v18 = vld [vmem:[#allocation5 + $0x2260] sm:$0xff] }
 0x2dc   :  { %3258 = vmatpush1.msra.mxu1 %v1461_v19  ;;  %3188 = vmatprep.subr.mxu0 %v1033_v20  ;;  %v1670_v17 = vld [vmem:[#allocation5 + $0x2f68] sm:$0xff]  ;;  %v1669_v19 = vld [vmem:[#allocation5 + $0x2f60] sm:$0xff] }
 0x2dd   :  { %3259 = vmatprep.subr.mxu1 %v1449_v21  ;;  %3189 = vmatpush1.msra.mxu0 %v1032_v22  ;;  %v1241_v20 = vld [vmem:[#allocation5 + $0x2200] sm:$0xff]  ;;  %v1240_v22 = vld [vmem:[#allocation5 + $0x21f8] sm:$0xff] }
 0x2de   :  { %3260 = vmatpush1.msra.mxu1 %v1448_v23  ;;  %3190 = vmatprep.subr.mxu0 %v1020_v24  ;;  %v1657_v21 = vld [vmem:[#allocation5 + $0x2f00] sm:$0xff]  ;;  %v1656_v23 = vld [vmem:[#allocation5 + $0x2ef8] sm:$0xff] }
 0x2df   :  { %3261 = vmatprep.subr.mxu1 %v1436_v25  ;;  %3191 = vmatpush1.msra.mxu0 %v1019_v26  ;;  %v1228_v24 = vld [vmem:[#allocation5 + $0x2198] sm:$0xff]  ;;  %v1227_v26 = vld [vmem:[#allocation5 + $0x2190] sm:$0xff] }
 0x2e0   :  { %3262 = vmatpush1.msra.mxu1 %v1435_v27  ;;  %3192 = vmatprep.subr.mxu0 %v1007_v28  ;;  %v1644_v25 = vld [vmem:[#allocation5 + $0x2e98] sm:$0xff]  ;;  %v1643_v27 = vld [vmem:[#allocation5 + $0x2e90] sm:$0xff] }
 0x2e1   :  { %3263 = vmatprep.subr.mxu1 %v1423_v29  ;;  %3193 = vmatpush1.msra.mxu0 %v1006_v30  ;;  %v1215_v28 = vld [vmem:[#allocation5 + $0x2130] sm:$0xff]  ;;  %v1214_v30 = vld [vmem:[#allocation5 + $0x2128] sm:$0xff] }
 0x2e2   :  { %3264 = vmatpush1.msra.mxu1 %v1422_v31  ;;  %3194 = vmatprep.subr.mxu0 %v994_v32  ;;  %v1631_v29 = vld [vmem:[#allocation5 + $0x2e30] sm:$0xff]  ;;  %v1630_v31 = vld [vmem:[#allocation5 + $0x2e28] sm:$0xff] }
 0x2e3   :  { %3265 = vmatprep.subr.mxu1 %v1410_v33  ;;  %3195 = vmatpush1.msra.mxu0 %v993_v34  ;;  %v1202_v32 = vld [vmem:[#allocation5 + $0x20c8] sm:$0xff]  ;;  %v1201_v34 = vld [vmem:[#allocation5 + $0x20c0] sm:$0xff] }
 0x2e4   :  { %3266 = vmatpush1.msra.mxu1 %v1409_v35  ;;  %3196 = vmatprep.subr.mxu0 %v1397_v36  ;;  %v1618_v33 = vld [vmem:[#allocation5 + $0x2dc8] sm:$0xff]  ;;  %v1617_v35 = vld [vmem:[#allocation5 + $0x2dc0] sm:$0xff]  ;;  %v359_v36 = vld [vmem:[#allocation5 + $0x670] sm:$0xff] }
 0x2e5   :  { %3267 = vmatprep.subr.mxu1 %v1813_v37  ;;  %3197 = vmatpush2.msra.mxu0 %v1396_v38  ;;  %v5349_v37 = vld [vmem:[#allocation2 + $0x28] sm:$0xff]  ;;  %v775_v38 = vld [vmem:[#allocation5 + $0x1370] sm:$0xff] }
 0x2e6   :  { %3268 = vmatpush2.msra.mxu1 %v1812_v39  ;;  %3198 = vmatprep.subr.mxu0 %v1384_v40  ;;  %v5350_v39 = vld [vmem:[#allocation2 + $0x20] sm:$0xff]  ;;  %v358_v40 = vld [vmem:[#allocation5 + $0x668] sm:$0xff] }
 0x2e7   :  { %3269 = vmatprep.subr.mxu1 %v1800_v41  ;;  %3199 = vmatpush2.msra.mxu0 %v1383_v42  ;;  %v774_v41 = vld [vmem:[#allocation5 + $0x1368] sm:$0xff]  ;;  %v5351_v42 = vld [vmem:[#allocation2 + $0x38] sm:$0xff] }
 0x2e8   :  { %3270 = vmatpush2.msra.mxu1 %v1799_v43  ;;  %3200 = vmatprep.subr.mxu0 %v1371_v44  ;;  %v346_v43 = vld [vmem:[#allocation5 + $0x608] sm:$0xff] }
 0x2e9   :  { %3271 = vmatprep.subr.mxu1 %v1787_v45  ;;  %3201 = vmatpush2.msra.mxu0 %v1370_v46  ;;  %v762_v44 = vld [vmem:[#allocation5 + $0x1308] sm:$0xff]  ;;  %v5352_v45 = vld [vmem:[#allocation2 + $0x30] sm:$0xff]  ;;  %v345_v46 = vld [vmem:[#allocation5 + $0x600] sm:$0xff] }
 0x2ea   :  { %3272 = vmatpush2.msra.mxu1 %v1786_v47  ;;  %3202 = vmatprep.subr.mxu0 %v1358_v48  ;;  %v761_v47 = vld [vmem:[#allocation5 + $0x1300] sm:$0xff] }
 0x2eb   :  { %3273 = vmatprep.subr.mxu1 %v1774_v49  ;;  %3203 = vmatpush2.msra.mxu0 %v1357_v50  ;;  %v333_v48 = vld [vmem:[#allocation5 + $0x5a0] sm:$0xff]  ;;  %v332_v50 = vld [vmem:[#allocation5 + $0x598] sm:$0xff] }
 0x2ec   :  { %3274 = vmatpush2.msra.mxu1 %v1773_v51  ;;  %3204 = vmatprep.subr.mxu0 %v1345_v52  ;;  %v749_v49 = vld [vmem:[#allocation5 + $0x12a0] sm:$0xff]  ;;  %v748_v51 = vld [vmem:[#allocation5 + $0x1298] sm:$0xff] }
 0x2ed   :  { %3275 = vmatprep.subr.mxu1 %v1761_v53  ;;  %3205 = vmatpush2.msra.mxu0 %v1344_v54  ;;  %v320_v52 = vld [vmem:[#allocation5 + $0x538] sm:$0xff]  ;;  %v319_v54 = vld [vmem:[#allocation5 + $0x530] sm:$0xff] }
 0x2ee   :  { %3276 = vmatpush2.msra.mxu1 %v1760_v55  ;;  %3206 = vmatprep.subr.mxu0 %v1332_v56  ;;  %v736_v53 = vld [vmem:[#allocation5 + $0x1238] sm:$0xff]  ;;  %v735_v55 = vld [vmem:[#allocation5 + $0x1230] sm:$0xff] }
 0x2ef   :  { %3277 = vmatprep.subr.mxu1 %v1748_v57  ;;  %3207 = vmatpush2.msra.mxu0 %v1331_v58  ;;  %v307_v56 = vld [vmem:[#allocation5 + $0x4d0] sm:$0xff]  ;;  %v306_v58 = vld [vmem:[#allocation5 + $0x4c8] sm:$0xff] }
 0x2f0   :  { %3278 = vmatpush2.msra.mxu1 %v1747_v59  ;;  %3208 = vmatprep.subr.mxu0 %v1319_v60  ;;  %v723_v57 = vld [vmem:[#allocation5 + $0x11d0] sm:$0xff]  ;;  %v722_v59 = vld [vmem:[#allocation5 + $0x11c8] sm:$0xff] }
 0x2f1   :  { %3279 = vmatprep.subr.mxu1 %v1735_v61  ;;  %3209 = vmatpush2.msra.mxu0 %v1318_v62  ;;  %v294_v60 = vld [vmem:[#allocation5 + $0x468] sm:$0xff]  ;;  %v293_v62 = vld [vmem:[#allocation5 + $0x460] sm:$0xff] }
 0x2f2   :  { %3280 = vmatpush2.msra.mxu1 %v1734_v63  ;;  %3210 = vmatprep.subr.mxu0 %v1306_v0  ;;  %v710_v61 = vld [vmem:[#allocation5 + $0x1168] sm:$0xff]  ;;  %v709_v63 = vld [vmem:[#allocation5 + $0x1160] sm:$0xff] }
 0x2f3   :  { %3281 = vmatprep.subr.mxu1 %v1722_v1  ;;  %3211 = vmatpush2.msra.mxu0 %v1305_v2  ;;  %v281_v0 = vld [vmem:[#allocation5 + $0x400] sm:$0xff]  ;;  %v280_v2 = vld [vmem:[#allocation5 + $0x3f8] sm:$0xff] }
 0x2f4   :  { %3282 = vmatpush2.msra.mxu1 %v1721_v3  ;;  %3212 = vmatprep.subr.mxu0 %v1293_v4  ;;  %v697_v1 = vld [vmem:[#allocation5 + $0x1100] sm:$0xff]  ;;  %v696_v3 = vld [vmem:[#allocation5 + $0x10f8] sm:$0xff] }
 0x2f5   :  { %3283 = vmatprep.subr.mxu1 %v1709_v5  ;;  %3213 = vmatpush2.msra.mxu0 %v1292_v6  ;;  %v268_v4 = vld [vmem:[#allocation5 + $0x398] sm:$0xff]  ;;  %v267_v6 = vld [vmem:[#allocation5 + $0x390] sm:$0xff] }
 0x2f6   :  { %3284 = vmatpush2.msra.mxu1 %v1708_v7  ;;  %3214 = vmatprep.subr.mxu0 %v1280_v8  ;;  %v684_v5 = vld [vmem:[#allocation5 + $0x1098] sm:$0xff]  ;;  %v683_v7 = vld [vmem:[#allocation5 + $0x1090] sm:$0xff] }
 0x2f7   :  { %3285 = vmatprep.subr.mxu1 %v1696_v9  ;;  %3215 = vmatpush2.msra.mxu0 %v1279_v10  ;;  %v255_v8 = vld [vmem:[#allocation5 + $0x330] sm:$0xff]  ;;  %v254_v10 = vld [vmem:[#allocation5 + $0x328] sm:$0xff] }
 0x2f8   :  { %3286 = vmatpush2.msra.mxu1 %v1695_v11  ;;  %3216 = vmatprep.subr.mxu0 %v1267_v12  ;;  %v671_v9 = vld [vmem:[#allocation5 + $0x1030] sm:$0xff]  ;;  %v670_v11 = vld [vmem:[#allocation5 + $0x1028] sm:$0xff] }
 0x2f9   :  { %3287 = vmatprep.subr.mxu1 %v1683_v13  ;;  %3217 = vmatpush2.msra.mxu0 %v1266_v14  ;;  %v242_v12 = vld [vmem:[#allocation5 + $0x2c8] sm:$0xff]  ;;  %v241_v14 = vld [vmem:[#allocation5 + $0x2c0] sm:$0xff] }
 0x2fa   :  { %3288 = vmatpush2.msra.mxu1 %v1682_v15  ;;  %3218 = vmatprep.subr.mxu0 %v1254_v16  ;;  %v658_v13 = vld [vmem:[#allocation5 + $0xfc8] sm:$0xff]  ;;  %v657_v15 = vld [vmem:[#allocation5 + $0xfc0] sm:$0xff] }
 0x2fb   :  { %3289 = vmatprep.subr.mxu1 %v1670_v17  ;;  %3219 = vmatpush2.msra.mxu0 %v1253_v18  ;;  %v229_v16 = vld [vmem:[#allocation5 + $0x260] sm:$0xff]  ;;  %v228_v18 = vld [vmem:[#allocation5 + $0x258] sm:$0xff] }
 0x2fc   :  { %3290 = vmatpush2.msra.mxu1 %v1669_v19  ;;  %3220 = vmatprep.subr.mxu0 %v1241_v20  ;;  %v645_v17 = vld [vmem:[#allocation5 + $0xf60] sm:$0xff]  ;;  %v644_v19 = vld [vmem:[#allocation5 + $0xf58] sm:$0xff] }
 0x2fd   :  { %3291 = vmatprep.subr.mxu1 %v1657_v21  ;;  %3221 = vmatpush2.msra.mxu0 %v1240_v22  ;;  %v216_v20 = vld [vmem:[#allocation5 + $0x1f8] sm:$0xff]  ;;  %v215_v22 = vld [vmem:[#allocation5 + $0x1f0] sm:$0xff] }
 0x2fe   :  { %3292 = vmatpush2.msra.mxu1 %v1656_v23  ;;  %3222 = vmatprep.subr.mxu0 %v1228_v24  ;;  %v632_v21 = vld [vmem:[#allocation5 + $0xef8] sm:$0xff]  ;;  %v631_v23 = vld [vmem:[#allocation5 + $0xef0] sm:$0xff] }
 0x2ff   :  { %3293 = vmatprep.subr.mxu1 %v1644_v25  ;;  %3223 = vmatpush2.msra.mxu0 %v1227_v26  ;;  %v203_v24 = vld [vmem:[#allocation5 + $0x190] sm:$0xff]  ;;  %v202_v26 = vld [vmem:[#allocation5 + $0x188] sm:$0xff] }
 0x300   :  { %3294 = vmatpush2.msra.mxu1 %v1643_v27  ;;  %3224 = vmatprep.subr.mxu0 %v1215_v28  ;;  %v619_v25 = vld [vmem:[#allocation5 + $0xe90] sm:$0xff]  ;;  %v618_v27 = vld [vmem:[#allocation5 + $0xe88] sm:$0xff] }
 0x301   :  { %3295 = vmatprep.subr.mxu1 %v1631_v29  ;;  %3225 = vmatpush2.msra.mxu0 %v1214_v30  ;;  %v190_v28 = vld [vmem:[#allocation5 + $0x128] sm:$0xff]  ;;  %v189_v30 = vld [vmem:[#allocation5 + $0x120] sm:$0xff] }
 0x302   :  { %3296 = vmatpush2.msra.mxu1 %v1630_v31  ;;  %3226 = vmatprep.subr.mxu0 %v1202_v32  ;;  %v606_v29 = vld [vmem:[#allocation5 + $0xe28] sm:$0xff]  ;;  %v605_v31 = vld [vmem:[#allocation5 + $0xe20] sm:$0xff] }
 0x303   :  { %3297 = vmatprep.subr.mxu1 %v1618_v33  ;;  %3227 = vmatpush2.msra.mxu0 %v1201_v34  ;;  %v177_v32 = vld [vmem:[#allocation5 + $0xc0] sm:$0xff]  ;;  %v176_v34 = vld [vmem:[#allocation5 + $0xb8] sm:$0xff] }
 0x304   :  { %3228 = vmatprep.mubr.f32.mxu0 %v5349_v37  ;;  %3298 = vmatpush2.msra.mxu1 %v1617_v35  ;;  %v593_v33 = vld [vmem:[#allocation5 + $0xdc0] sm:$0xff]  ;;  %v592_v35 = vld [vmem:[#allocation5 + $0xdb8] sm:$0xff] }
 0x305   :  { %3229 = vmatmul.mubr.f32.vlgmr.msra.gmra.mxu0 %v5350_v39  ;;  %3299 = vmatprep.mubr.f32.mxu1 %v5351_v42  ;;  %v580_v37 = vld [vmem:[#allocation5 + $0xd58] sm:$0xff]  ;;  %v579_v39 = vld [vmem:[#allocation5 + $0xd50] sm:$0xff]  ;;  %v566_v42 = vld [vmem:[#allocation5 + $0xce8] sm:$0xff] }
 0x306   :  { %3306 = vmatprep.subr.mxu0 %v359_v36  ;;  %3377 = vmatprep.subr.mxu1 %v775_v38  ;;  %v164_v36 = vld [vmem:[#allocation5 + $0x58] sm:$0xff]  ;;  %v163_v38 = vld [vmem:[#allocation5 + $0x50] sm:$0xff] }
 0x307   :  { %3300 = vmatmul.mubr.f32.vlgmr.msra.gmra.mxu1 %v5352_v45  ;;  %3307 = vmatpush1.msra.mxu0 %v358_v40  ;;  %v567_v40 = vld [vmem:[#allocation5 + $0xcf0] sm:$0xff]  ;;  %v970_v45 = vld [vmem:[#allocation5 + $0x1988] sm:$0xff] }
 0x308   :  { %3378 = vmatpush1.msra.mxu1 %v774_v41  ;;  %3308 = vmatprep.subr.mxu0 %v346_v43  ;;  %v983_v41 = vld [vmem:[#allocation5 + $0x19f0] sm:$0xff]  ;;  %v982_v43 = vld [vmem:[#allocation5 + $0x19e8] sm:$0xff] }
 0x309   :  { %3379 = vmatprep.subr.mxu1 %v762_v44  ;;  %3309 = vmatpush1.msra.mxu0 %v345_v46  ;;  %v554_v44 = vld [vmem:[#allocation5 + $0xc88] sm:$0xff]  ;;  %v553_v46 = vld [vmem:[#allocation5 + $0xc80] sm:$0xff] }
 0x30a   :  { %3380 = vmatpush1.msra.mxu1 %v761_v47  ;;  %3310 = vmatprep.subr.mxu0 %v333_v48  ;;  %v969_v47 = vld [vmem:[#allocation5 + $0x1980] sm:$0xff] }
 0x30b   :  { %3381 = vmatprep.subr.mxu1 %v749_v49  ;;  %3311 = vmatpush1.msra.mxu0 %v332_v50  ;;  %v541_v48 = vld [vmem:[#allocation5 + $0xc20] sm:$0xff]  ;;  %v540_v50 = vld [vmem:[#allocation5 + $0xc18] sm:$0xff] }
 0x30c   :  { %3382 = vmatpush1.msra.mxu1 %v748_v51  ;;  %3312 = vmatprep.subr.mxu0 %v320_v52  ;;  %v957_v49 = vld [vmem:[#allocation5 + $0x1920] sm:$0xff]  ;;  %v956_v51 = vld [vmem:[#allocation5 + $0x1918] sm:$0xff] }
 0x30d   :  { %3383 = vmatprep.subr.mxu1 %v736_v53  ;;  %3313 = vmatpush1.msra.mxu0 %v319_v54  ;;  %v528_v52 = vld [vmem:[#allocation5 + $0xbb8] sm:$0xff]  ;;  %v527_v54 = vld [vmem:[#allocation5 + $0xbb0] sm:$0xff] }
 0x30e   :  { %3384 = vmatpush1.msra.mxu1 %v735_v55  ;;  %3314 = vmatprep.subr.mxu0 %v307_v56  ;;  %v944_v53 = vld [vmem:[#allocation5 + $0x18b8] sm:$0xff]  ;;  %v943_v55 = vld [vmem:[#allocation5 + $0x18b0] sm:$0xff] }
 0x30f   :  { %3385 = vmatprep.subr.mxu1 %v723_v57  ;;  %3315 = vmatpush1.msra.mxu0 %v306_v58  ;;  %v515_v56 = vld [vmem:[#allocation5 + $0xb50] sm:$0xff]  ;;  %v514_v58 = vld [vmem:[#allocation5 + $0xb48] sm:$0xff] }
 0x310   :  { %3386 = vmatpush1.msra.mxu1 %v722_v59  ;;  %3316 = vmatprep.subr.mxu0 %v294_v60  ;;  %v931_v57 = vld [vmem:[#allocation5 + $0x1850] sm:$0xff]  ;;  %v930_v59 = vld [vmem:[#allocation5 + $0x1848] sm:$0xff] }
 0x311   :  { %3387 = vmatprep.subr.mxu1 %v710_v61  ;;  %3317 = vmatpush1.msra.mxu0 %v293_v62  ;;  %v502_v60 = vld [vmem:[#allocation5 + $0xae8] sm:$0xff]  ;;  %v501_v62 = vld [vmem:[#allocation5 + $0xae0] sm:$0xff] }
 0x312   :  { %3388 = vmatpush1.msra.mxu1 %v709_v63  ;;  %3318 = vmatprep.subr.mxu0 %v281_v0  ;;  %v918_v61 = vld [vmem:[#allocation5 + $0x17e8] sm:$0xff]  ;;  %v917_v63 = vld [vmem:[#allocation5 + $0x17e0] sm:$0xff] }
 0x313   :  { %3389 = vmatprep.subr.mxu1 %v697_v1  ;;  %3319 = vmatpush1.msra.mxu0 %v280_v2  ;;  %v489_v0 = vld [vmem:[#allocation5 + $0xa80] sm:$0xff]  ;;  %v488_v2 = vld [vmem:[#allocation5 + $0xa78] sm:$0xff] }
 0x314   :  { %3390 = vmatpush1.msra.mxu1 %v696_v3  ;;  %3320 = vmatprep.subr.mxu0 %v268_v4  ;;  %v905_v1 = vld [vmem:[#allocation5 + $0x1780] sm:$0xff]  ;;  %v904_v3 = vld [vmem:[#allocation5 + $0x1778] sm:$0xff] }
 0x315   :  { %3391 = vmatprep.subr.mxu1 %v684_v5  ;;  %3321 = vmatpush1.msra.mxu0 %v267_v6  ;;  %v476_v4 = vld [vmem:[#allocation5 + $0xa18] sm:$0xff]  ;;  %v475_v6 = vld [vmem:[#allocation5 + $0xa10] sm:$0xff] }
 0x316   :  { %3392 = vmatpush1.msra.mxu1 %v683_v7  ;;  %3322 = vmatprep.subr.mxu0 %v255_v8  ;;  %v892_v5 = vld [vmem:[#allocation5 + $0x1718] sm:$0xff]  ;;  %v891_v7 = vld [vmem:[#allocation5 + $0x1710] sm:$0xff] }
 0x317   :  { %3393 = vmatprep.subr.mxu1 %v671_v9  ;;  %3323 = vmatpush1.msra.mxu0 %v254_v10  ;;  %v463_v8 = vld [vmem:[#allocation5 + $0x9b0] sm:$0xff]  ;;  %v462_v10 = vld [vmem:[#allocation5 + $0x9a8] sm:$0xff] }
 0x318   :  { %3394 = vmatpush1.msra.mxu1 %v670_v11  ;;  %3324 = vmatprep.subr.mxu0 %v242_v12  ;;  %v879_v9 = vld [vmem:[#allocation5 + $0x16b0] sm:$0xff]  ;;  %v878_v11 = vld [vmem:[#allocation5 + $0x16a8] sm:$0xff] }
 0x319   :  { %3395 = vmatprep.subr.mxu1 %v658_v13  ;;  %3325 = vmatpush1.msra.mxu0 %v241_v14  ;;  %v450_v12 = vld [vmem:[#allocation5 + $0x948] sm:$0xff]  ;;  %v449_v14 = vld [vmem:[#allocation5 + $0x940] sm:$0xff] }
 0x31a   :  { %3396 = vmatpush1.msra.mxu1 %v657_v15  ;;  %3326 = vmatprep.subr.mxu0 %v229_v16  ;;  %v866_v13 = vld [vmem:[#allocation5 + $0x1648] sm:$0xff]  ;;  %v865_v15 = vld [vmem:[#allocation5 + $0x1640] sm:$0xff] }
 0x31b   :  { %3397 = vmatprep.subr.mxu1 %v645_v17  ;;  %3327 = vmatpush1.msra.mxu0 %v228_v18  ;;  %v437_v16 = vld [vmem:[#allocation5 + $0x8e0] sm:$0xff]  ;;  %v436_v18 = vld [vmem:[#allocation5 + $0x8d8] sm:$0xff] }
 0x31c   :  { %3398 = vmatpush1.msra.mxu1 %v644_v19  ;;  %3328 = vmatprep.subr.mxu0 %v216_v20  ;;  %v853_v17 = vld [vmem:[#allocation5 + $0x15e0] sm:$0xff]  ;;  %v852_v19 = vld [vmem:[#allocation5 + $0x15d8] sm:$0xff] }
 0x31d   :  { %3399 = vmatprep.subr.mxu1 %v632_v21  ;;  %3329 = vmatpush1.msra.mxu0 %v215_v22  ;;  %v424_v20 = vld [vmem:[#allocation5 + $0x878] sm:$0xff]  ;;  %v423_v22 = vld [vmem:[#allocation5 + $0x870] sm:$0xff] }
 0x31e   :  { %3400 = vmatpush1.msra.mxu1 %v631_v23  ;;  %3330 = vmatprep.subr.mxu0 %v203_v24  ;;  %v840_v21 = vld [vmem:[#allocation5 + $0x1578] sm:$0xff]  ;;  %v839_v23 = vld [vmem:[#allocation5 + $0x1570] sm:$0xff] }
 0x31f   :  { %3401 = vmatprep.subr.mxu1 %v619_v25  ;;  %3331 = vmatpush1.msra.mxu0 %v202_v26  ;;  %v411_v24 = vld [vmem:[#allocation5 + $0x810] sm:$0xff]  ;;  %v410_v26 = vld [vmem:[#allocation5 + $0x808] sm:$0xff] }
 0x320   :  { %3402 = vmatpush1.msra.mxu1 %v618_v27  ;;  %3332 = vmatprep.subr.mxu0 %v190_v28  ;;  %v827_v25 = vld [vmem:[#allocation5 + $0x1510] sm:$0xff]  ;;  %v826_v27 = vld [vmem:[#allocation5 + $0x1508] sm:$0xff] }
 0x321   :  { %3403 = vmatprep.subr.mxu1 %v606_v29  ;;  %3333 = vmatpush1.msra.mxu0 %v189_v30  ;;  %v398_v28 = vld [vmem:[#allocation5 + $0x7a8] sm:$0xff]  ;;  %v397_v30 = vld [vmem:[#allocation5 + $0x7a0] sm:$0xff] }
 0x322   :  { %3404 = vmatpush1.msra.mxu1 %v605_v31  ;;  %3334 = vmatprep.subr.mxu0 %v177_v32  ;;  %v814_v29 = vld [vmem:[#allocation5 + $0x14a8] sm:$0xff]  ;;  %v813_v31 = vld [vmem:[#allocation5 + $0x14a0] sm:$0xff] }
 0x323   :  { %3405 = vmatprep.subr.mxu1 %v593_v33  ;;  %3335 = vmatpush1.msra.mxu0 %v176_v34  ;;  %v385_v32 = vld [vmem:[#allocation5 + $0x740] sm:$0xff]  ;;  %v384_v34 = vld [vmem:[#allocation5 + $0x738] sm:$0xff] }
 0x324   :  { %3406 = vmatpush1.msra.mxu1 %v592_v35  ;;  %3336 = vmatprep.subr.mxu0 %v164_v36  ;;  %v801_v33 = vld [vmem:[#allocation5 + $0x1440] sm:$0xff]  ;;  %v800_v35 = vld [vmem:[#allocation5 + $0x1438] sm:$0xff] }
 0x325   :  { %3407 = vmatprep.subr.mxu1 %v580_v37  ;;  %3337 = vmatpush1.msra.mxu0 %v163_v38  ;;  %v372_v36 = vld [vmem:[#allocation5 + $0x6d8] sm:$0xff]  ;;  %v371_v38 = vld [vmem:[#allocation5 + $0x6d0] sm:$0xff] }
 0x326   :  { %3408 = vmatpush1.msra.mxu1 %v579_v39  ;;  %3338 = vmatprep.subr.mxu0 %v567_v40  ;;  %v788_v37 = vld [vmem:[#allocation5 + $0x13d8] sm:$0xff]  ;;  %v787_v39 = vld [vmem:[#allocation5 + $0x13d0] sm:$0xff] }
 0x327   :  { %3409 = vmatprep.subr.mxu1 %v983_v41  ;;  %3339 = vmatpush2.msra.mxu0 %v566_v42  ;;  %v1191_v40 = vld [vmem:[#allocation5 + $0x2070] sm:$0xff]  ;;  %v5666_v41 = vld [vmem:[#allocation2 + $0x8] sm:$0xff] }
 0x328   :  { %3410 = vmatpush2.msra.mxu1 %v982_v43  ;;  %3340 = vmatprep.subr.mxu0 %v554_v44  ;;  %v1607_v42 = vld [vmem:[#allocation5 + $0x2d70] sm:$0xff]  ;;  %v5669_v43 = vld [vmem:[#allocation2] sm:$0xff]  ;;  %v1190_v44 = vld [vmem:[#allocation5 + $0x2068] sm:$0xff] }
 0x329   :  { %3411 = vmatprep.subr.mxu1 %v970_v45  ;;  %3341 = vmatpush2.msra.mxu0 %v553_v46  ;;  %v1606_v45 = vld [vmem:[#allocation5 + $0x2d68] sm:$0xff]  ;;  %v5672_v46 = vld [vmem:[#allocation2 + $0x18] sm:$0xff] }
 0x32a   :  { %3412 = vmatpush2.msra.mxu1 %v969_v47  ;;  %3342 = vmatprep.subr.mxu0 %v541_v48  ;;  %v1178_v47 = vld [vmem:[#allocation5 + $0x2008] sm:$0xff] }
 0x32b   :  { %3413 = vmatprep.subr.mxu1 %v957_v49  ;;  %3343 = vmatpush2.msra.mxu0 %v540_v50  ;;  %v1594_v48 = vld [vmem:[#allocation5 + $0x2d08] sm:$0xff]  ;;  %v5675_v49 = vld [vmem:[#allocation2 + $0x10] sm:$0xff]  ;;  %v1177_v50 = vld [vmem:[#allocation5 + $0x2000] sm:$0xff] }
 0x32c   :  { %3414 = vmatpush2.msra.mxu1 %v956_v51  ;;  %3344 = vmatprep.subr.mxu0 %v528_v52  ;;  %v1593_v51 = vld [vmem:[#allocation5 + $0x2d00] sm:$0xff] }
 0x32d   :  { %3415 = vmatprep.subr.mxu1 %v944_v53  ;;  %3345 = vmatpush2.msra.mxu0 %v527_v54  ;;  %v1165_v52 = vld [vmem:[#allocation5 + $0x1fa0] sm:$0xff]  ;;  %v1164_v54 = vld [vmem:[#allocation5 + $0x1f98] sm:$0xff] }
 0x32e   :  { %3416 = vmatpush2.msra.mxu1 %v943_v55  ;;  %3346 = vmatprep.subr.mxu0 %v515_v56  ;;  %v1581_v53 = vld [vmem:[#allocation5 + $0x2ca0] sm:$0xff]  ;;  %v1580_v55 = vld [vmem:[#allocation5 + $0x2c98] sm:$0xff] }
 0x32f   :  { %3417 = vmatprep.subr.mxu1 %v931_v57  ;;  %3347 = vmatpush2.msra.mxu0 %v514_v58  ;;  %v1152_v56 = vld [vmem:[#allocation5 + $0x1f38] sm:$0xff]  ;;  %v1151_v58 = vld [vmem:[#allocation5 + $0x1f30] sm:$0xff] }
 0x330   :  { %3418 = vmatpush2.msra.mxu1 %v930_v59  ;;  %3348 = vmatprep.subr.mxu0 %v502_v60  ;;  %v1568_v57 = vld [vmem:[#allocation5 + $0x2c38] sm:$0xff]  ;;  %v1567_v59 = vld [vmem:[#allocation5 + $0x2c30] sm:$0xff] }
 0x331   :  { %3419 = vmatprep.subr.mxu1 %v918_v61  ;;  %3349 = vmatpush2.msra.mxu0 %v501_v62  ;;  %v1139_v60 = vld [vmem:[#allocation5 + $0x1ed0] sm:$0xff]  ;;  %v1138_v62 = vld [vmem:[#allocation5 + $0x1ec8] sm:$0xff] }
 0x332   :  { %3420 = vmatpush2.msra.mxu1 %v917_v63  ;;  %3350 = vmatprep.subr.mxu0 %v489_v0  ;;  %v1555_v61 = vld [vmem:[#allocation5 + $0x2bd0] sm:$0xff]  ;;  %v1554_v63 = vld [vmem:[#allocation5 + $0x2bc8] sm:$0xff] }
 0x333   :  { %3421 = vmatprep.subr.mxu1 %v905_v1  ;;  %3351 = vmatpush2.msra.mxu0 %v488_v2  ;;  %v1126_v0 = vld [vmem:[#allocation5 + $0x1e68] sm:$0xff]  ;;  %v1125_v2 = vld [vmem:[#allocation5 + $0x1e60] sm:$0xff] }
 0x334   :  { %3422 = vmatpush2.msra.mxu1 %v904_v3  ;;  %3352 = vmatprep.subr.mxu0 %v476_v4  ;;  %v1542_v1 = vld [vmem:[#allocation5 + $0x2b68] sm:$0xff]  ;;  %v1541_v3 = vld [vmem:[#allocation5 + $0x2b60] sm:$0xff] }
 0x335   :  { %3423 = vmatprep.subr.mxu1 %v892_v5  ;;  %3353 = vmatpush2.msra.mxu0 %v475_v6  ;;  %v1113_v4 = vld [vmem:[#allocation5 + $0x1e00] sm:$0xff]  ;;  %v1112_v6 = vld [vmem:[#allocation5 + $0x1df8] sm:$0xff] }
 0x336   :  { %3424 = vmatpush2.msra.mxu1 %v891_v7  ;;  %3354 = vmatprep.subr.mxu0 %v463_v8  ;;  %v1529_v5 = vld [vmem:[#allocation5 + $0x2b00] sm:$0xff]  ;;  %v1528_v7 = vld [vmem:[#allocation5 + $0x2af8] sm:$0xff] }
 0x337   :  { %3425 = vmatprep.subr.mxu1 %v879_v9  ;;  %3355 = vmatpush2.msra.mxu0 %v462_v10  ;;  %v1100_v8 = vld [vmem:[#allocation5 + $0x1d98] sm:$0xff]  ;;  %v1099_v10 = vld [vmem:[#allocation5 + $0x1d90] sm:$0xff] }
 0x338   :  { %3426 = vmatpush2.msra.mxu1 %v878_v11  ;;  %3356 = vmatprep.subr.mxu0 %v450_v12  ;;  %v1516_v9 = vld [vmem:[#allocation5 + $0x2a98] sm:$0xff]  ;;  %v1515_v11 = vld [vmem:[#allocation5 + $0x2a90] sm:$0xff] }
 0x339   :  { %3427 = vmatprep.subr.mxu1 %v866_v13  ;;  %3357 = vmatpush2.msra.mxu0 %v449_v14  ;;  %v1087_v12 = vld [vmem:[#allocation5 + $0x1d30] sm:$0xff]  ;;  %v1086_v14 = vld [vmem:[#allocation5 + $0x1d28] sm:$0xff] }
 0x33a   :  { %3428 = vmatpush2.msra.mxu1 %v865_v15  ;;  %3358 = vmatprep.subr.mxu0 %v437_v16  ;;  %v1503_v13 = vld [vmem:[#allocation5 + $0x2a30] sm:$0xff]  ;;  %v1502_v15 = vld [vmem:[#allocation5 + $0x2a28] sm:$0xff] }
 0x33b   :  { %3429 = vmatprep.subr.mxu1 %v853_v17  ;;  %3359 = vmatpush2.msra.mxu0 %v436_v18  ;;  %v1074_v16 = vld [vmem:[#allocation5 + $0x1cc8] sm:$0xff]  ;;  %v1073_v18 = vld [vmem:[#allocation5 + $0x1cc0] sm:$0xff] }
 0x33c   :  { %3430 = vmatpush2.msra.mxu1 %v852_v19  ;;  %3360 = vmatprep.subr.mxu0 %v424_v20  ;;  %v1490_v17 = vld [vmem:[#allocation5 + $0x29c8] sm:$0xff]  ;;  %v1489_v19 = vld [vmem:[#allocation5 + $0x29c0] sm:$0xff] }
 0x33d   :  { %3431 = vmatprep.subr.mxu1 %v840_v21  ;;  %3361 = vmatpush2.msra.mxu0 %v423_v22  ;;  %v1061_v20 = vld [vmem:[#allocation5 + $0x1c60] sm:$0xff]  ;;  %v1060_v22 = vld [vmem:[#allocation5 + $0x1c58] sm:$0xff] }
 0x33e   :  { %3432 = vmatpush2.msra.mxu1 %v839_v23  ;;  %3362 = vmatprep.subr.mxu0 %v411_v24  ;;  %v1477_v21 = vld [vmem:[#allocation5 + $0x2960] sm:$0xff]  ;;  %v1476_v23 = vld [vmem:[#allocation5 + $0x2958] sm:$0xff] }
 0x33f   :  { %3433 = vmatprep.subr.mxu1 %v827_v25  ;;  %3363 = vmatpush2.msra.mxu0 %v410_v26  ;;  %v1048_v24 = vld [vmem:[#allocation5 + $0x1bf8] sm:$0xff]  ;;  %v1047_v26 = vld [vmem:[#allocation5 + $0x1bf0] sm:$0xff] }
 0x340   :  { %3434 = vmatpush2.msra.mxu1 %v826_v27  ;;  %3364 = vmatprep.subr.mxu0 %v398_v28  ;;  %v1464_v25 = vld [vmem:[#allocation5 + $0x28f8] sm:$0xff]  ;;  %v1463_v27 = vld [vmem:[#allocation5 + $0x28f0] sm:$0xff] }
 0x341   :  { %3435 = vmatprep.subr.mxu1 %v814_v29  ;;  %3365 = vmatpush2.msra.mxu0 %v397_v30  ;;  %v1035_v28 = vld [vmem:[#allocation5 + $0x1b90] sm:$0xff]  ;;  %v1034_v30 = vld [vmem:[#allocation5 + $0x1b88] sm:$0xff] }
 0x342   :  { %3436 = vmatpush2.msra.mxu1 %v813_v31  ;;  %3366 = vmatprep.subr.mxu0 %v385_v32  ;;  %v1451_v29 = vld [vmem:[#allocation5 + $0x2890] sm:$0xff]  ;;  %v1450_v31 = vld [vmem:[#allocation5 + $0x2888] sm:$0xff] }
 0x343   :  { %3437 = vmatprep.subr.mxu1 %v801_v33  ;;  %3367 = vmatpush2.msra.mxu0 %v384_v34  ;;  %v1022_v32 = vld [vmem:[#allocation5 + $0x1b28] sm:$0xff]  ;;  %v1021_v34 = vld [vmem:[#allocation5 + $0x1b20] sm:$0xff] }
 0x344   :  { %3438 = vmatpush2.msra.mxu1 %v800_v35  ;;  %3368 = vmatprep.subr.mxu0 %v372_v36  ;;  %v1438_v33 = vld [vmem:[#allocation5 + $0x2828] sm:$0xff]  ;;  %v1437_v35 = vld [vmem:[#allocation5 + $0x2820] sm:$0xff] }
 0x345   :  { %3439 = vmatprep.subr.mxu1 %v788_v37  ;;  %3369 = vmatpush2.msra.mxu0 %v371_v38  ;;  %v1009_v36 = vld [vmem:[#allocation5 + $0x1ac0] sm:$0xff]  ;;  %v1008_v38 = vld [vmem:[#allocation5 + $0x1ab8] sm:$0xff] }
 0x346   :  { %3370 = vmatprep.mubr.f32.mxu0 %v5666_v41  ;;  %3440 = vmatpush2.msra.mxu1 %v787_v39  ;;  %v1425_v37 = vld [vmem:[#allocation5 + $0x27c0] sm:$0xff]  ;;  %v1424_v39 = vld [vmem:[#allocation5 + $0x27b8] sm:$0xff] }
 0x347   :  { %3371 = vmatmul.mubr.f32.vlgmr.msra.gmra.mxu0 %v5669_v43  ;;  %3441 = vmatprep.mubr.f32.mxu1 %v5672_v46 }
 0x348   :  { %3448 = vmatprep.subr.mxu0 %v1191_v40  ;;  %3519 = vmatprep.subr.mxu1 %v1607_v42  ;;  %v996_v40 = vld [vmem:[#allocation5 + $0x1a58] sm:$0xff] }
 0x349   :  { %3442 = vmatmul.mubr.f32.vlgmr.msra.gmra.mxu1 %v5675_v49  ;;  %3449 = vmatpush1.msra.mxu0 %v1190_v44  ;;  %v1412_v42 = vld [vmem:[#allocation5 + $0x2758] sm:$0xff]  ;;  %v995_v44 = vld [vmem:[#allocation5 + $0x1a50] sm:$0xff] }
 0x34a   :  { %3520 = vmatpush1.msra.mxu1 %v1606_v45  ;;  %3450 = vmatprep.subr.mxu0 %v1178_v47  ;;  %v1411_v45 = vld [vmem:[#allocation5 + $0x2750] sm:$0xff] }
 0x34b   :  { %3521 = vmatprep.subr.mxu1 %v1594_v48  ;;  %3451 = vmatpush1.msra.mxu0 %v1177_v50  ;;  %v1399_v47 = vld [vmem:[#allocation5 + $0x26f0] sm:$0xff]  ;;  %v1398_v50 = vld [vmem:[#allocation5 + $0x26e8] sm:$0xff] }
 0x34c   :  { %3522 = vmatpush1.msra.mxu1 %v1593_v51  ;;  %3452 = vmatprep.subr.mxu0 %v1165_v52  ;;  %v1815_v48 = vld [vmem:[#allocation5 + $0x33f0] sm:$0xff]  ;;  %v1814_v51 = vld [vmem:[#allocation5 + $0x33e8] sm:$0xff] }
 0x34d   :  { %3523 = vmatprep.subr.mxu1 %v1581_v53  ;;  %3453 = vmatpush1.msra.mxu0 %v1164_v54  ;;  %v1386_v52 = vld [vmem:[#allocation5 + $0x2688] sm:$0xff]  ;;  %v1385_v54 = vld [vmem:[#allocation5 + $0x2680] sm:$0xff] }
 0x34e   :  { %3524 = vmatpush1.msra.mxu1 %v1580_v55  ;;  %3454 = vmatprep.subr.mxu0 %v1152_v56  ;;  %v1802_v53 = vld [vmem:[#allocation5 + $0x3388] sm:$0xff]  ;;  %v1801_v55 = vld [vmem:[#allocation5 + $0x3380] sm:$0xff] }
 0x34f   :  { %3525 = vmatprep.subr.mxu1 %v1568_v57  ;;  %3455 = vmatpush1.msra.mxu0 %v1151_v58  ;;  %v1373_v56 = vld [vmem:[#allocation5 + $0x2620] sm:$0xff]  ;;  %v1372_v58 = vld [vmem:[#allocation5 + $0x2618] sm:$0xff] }
 0x350   :  { %3526 = vmatpush1.msra.mxu1 %v1567_v59  ;;  %3456 = vmatprep.subr.mxu0 %v1139_v60  ;;  %v1789_v57 = vld [vmem:[#allocation5 + $0x3320] sm:$0xff]  ;;  %v1788_v59 = vld [vmem:[#allocation5 + $0x3318] sm:$0xff] }
 0x351   :  { %3527 = vmatprep.subr.mxu1 %v1555_v61  ;;  %3457 = vmatpush1.msra.mxu0 %v1138_v62  ;;  %v1360_v60 = vld [vmem:[#allocation5 + $0x25b8] sm:$0xff]  ;;  %v1359_v62 = vld [vmem:[#allocation5 + $0x25b0] sm:$0xff] }
 0x352   :  { %3528 = vmatpush1.msra.mxu1 %v1554_v63  ;;  %3458 = vmatprep.subr.mxu0 %v1126_v0  ;;  %v1776_v61 = vld [vmem:[#allocation5 + $0x32b8] sm:$0xff]  ;;  %v1775_v63 = vld [vmem:[#allocation5 + $0x32b0] sm:$0xff] }
 0x353   :  { %3529 = vmatprep.subr.mxu1 %v1542_v1  ;;  %3459 = vmatpush1.msra.mxu0 %v1125_v2  ;;  %v1347_v0 = vld [vmem:[#allocation5 + $0x2550] sm:$0xff]  ;;  %v1346_v2 = vld [vmem:[#allocation5 + $0x2548] sm:$0xff] }
 0x354   :  { %3530 = vmatpush1.msra.mxu1 %v1541_v3  ;;  %3460 = vmatprep.subr.mxu0 %v1113_v4  ;;  %v1763_v1 = vld [vmem:[#allocation5 + $0x3250] sm:$0xff]  ;;  %v1762_v3 = vld [vmem:[#allocation5 + $0x3248] sm:$0xff] }
 0x355   :  { %3531 = vmatprep.subr.mxu1 %v1529_v5  ;;  %3461 = vmatpush1.msra.mxu0 %v1112_v6  ;;  %v1334_v4 = vld [vmem:[#allocation5 + $0x24e8] sm:$0xff]  ;;  %v1333_v6 = vld [vmem:[#allocation5 + $0x24e0] sm:$0xff] }
 0x356   :  { %3532 = vmatpush1.msra.mxu1 %v1528_v7  ;;  %3462 = vmatprep.subr.mxu0 %v1100_v8  ;;  %v1750_v5 = vld [vmem:[#allocation5 + $0x31e8] sm:$0xff]  ;;  %v1749_v7 = vld [vmem:[#allocation5 + $0x31e0] sm:$0xff] }
 0x357   :  { %3533 = vmatprep.subr.mxu1 %v1516_v9  ;;  %3463 = vmatpush1.msra.mxu0 %v1099_v10  ;;  %v1321_v8 = vld [vmem:[#allocation5 + $0x2480] sm:$0xff]  ;;  %v1320_v10 = vld [vmem:[#allocation5 + $0x2478] sm:$0xff] }
 0x358   :  { %3534 = vmatpush1.msra.mxu1 %v1515_v11  ;;  %3464 = vmatprep.subr.mxu0 %v1087_v12  ;;  %v1737_v9 = vld [vmem:[#allocation5 + $0x3180] sm:$0xff]  ;;  %v1736_v11 = vld [vmem:[#allocation5 + $0x3178] sm:$0xff] }
 0x359   :  { %3535 = vmatprep.subr.mxu1 %v1503_v13  ;;  %3465 = vmatpush1.msra.mxu0 %v1086_v14  ;;  %v1308_v12 = vld [vmem:[#allocation5 + $0x2418] sm:$0xff]  ;;  %v1307_v14 = vld [vmem:[#allocation5 + $0x2410] sm:$0xff] }
 0x35a   :  { %3536 = vmatpush1.msra.mxu1 %v1502_v15  ;;  %3466 = vmatprep.subr.mxu0 %v1074_v16  ;;  %v1724_v13 = vld [vmem:[#allocation5 + $0x3118] sm:$0xff]  ;;  %v1723_v15 = vld [vmem:[#allocation5 + $0x3110] sm:$0xff] }
 0x35b   :  { %3537 = vmatprep.subr.mxu1 %v1490_v17  ;;  %3467 = vmatpush1.msra.mxu0 %v1073_v18  ;;  %v1295_v16 = vld [vmem:[#allocation5 + $0x23b0] sm:$0xff]  ;;  %v1294_v18 = vld [vmem:[#allocation5 + $0x23a8] sm:$0xff] }
 0x35c   :  { %3538 = vmatpush1.msra.mxu1 %v1489_v19  ;;  %3468 = vmatprep.subr.mxu0 %v1061_v20  ;;  %v1711_v17 = vld [vmem:[#allocation5 + $0x30b0] sm:$0xff]  ;;  %v1710_v19 = vld [vmem:[#allocation5 + $0x30a8] sm:$0xff] }
 0x35d   :  { %3539 = vmatprep.subr.mxu1 %v1477_v21  ;;  %3469 = vmatpush1.msra.mxu0 %v1060_v22  ;;  %v1282_v20 = vld [vmem:[#allocation5 + $0x2348] sm:$0xff]  ;;  %v1281_v22 = vld [vmem:[#allocation5 + $0x2340] sm:$0xff] }
 0x35e   :  { %3540 = vmatpush1.msra.mxu1 %v1476_v23  ;;  %3470 = vmatprep.subr.mxu0 %v1048_v24  ;;  %v1698_v21 = vld [vmem:[#allocation5 + $0x3048] sm:$0xff]  ;;  %v1697_v23 = vld [vmem:[#allocation5 + $0x3040] sm:$0xff] }
 0x35f   :  { %3541 = vmatprep.subr.mxu1 %v1464_v25  ;;  %3471 = vmatpush1.msra.mxu0 %v1047_v26  ;;  %v1269_v24 = vld [vmem:[#allocation5 + $0x22e0] sm:$0xff]  ;;  %v1268_v26 = vld [vmem:[#allocation5 + $0x22d8] sm:$0xff] }
 0x360   :  { %3542 = vmatpush1.msra.mxu1 %v1463_v27  ;;  %3472 = vmatprep.subr.mxu0 %v1035_v28  ;;  %v1685_v25 = vld [vmem:[#allocation5 + $0x2fe0] sm:$0xff]  ;;  %v1684_v27 = vld [vmem:[#allocation5 + $0x2fd8] sm:$0xff] }
 0x361   :  { %3543 = vmatprep.subr.mxu1 %v1451_v29  ;;  %3473 = vmatpush1.msra.mxu0 %v1034_v30  ;;  %v1256_v28 = vld [vmem:[#allocation5 + $0x2278] sm:$0xff]  ;;  %v1255_v30 = vld [vmem:[#allocation5 + $0x2270] sm:$0xff] }
 0x362   :  { %3544 = vmatpush1.msra.mxu1 %v1450_v31  ;;  %3474 = vmatprep.subr.mxu0 %v1022_v32  ;;  %v1672_v29 = vld [vmem:[#allocation5 + $0x2f78] sm:$0xff]  ;;  %v1671_v31 = vld [vmem:[#allocation5 + $0x2f70] sm:$0xff] }
 0x363   :  { %3545 = vmatprep.subr.mxu1 %v1438_v33  ;;  %3475 = vmatpush1.msra.mxu0 %v1021_v34  ;;  %v1243_v32 = vld [vmem:[#allocation5 + $0x2210] sm:$0xff]  ;;  %v1242_v34 = vld [vmem:[#allocation5 + $0x2208] sm:$0xff] }
 0x364   :  { %3546 = vmatpush1.msra.mxu1 %v1437_v35  ;;  %3476 = vmatprep.subr.mxu0 %v1009_v36  ;;  %v1659_v33 = vld [vmem:[#allocation5 + $0x2f10] sm:$0xff]  ;;  %v1658_v35 = vld [vmem:[#allocation5 + $0x2f08] sm:$0xff] }
 0x365   :  { %3547 = vmatprep.subr.mxu1 %v1425_v37  ;;  %3477 = vmatpush1.msra.mxu0 %v1008_v38  ;;  %v1230_v36 = vld [vmem:[#allocation5 + $0x21a8] sm:$0xff]  ;;  %v1229_v38 = vld [vmem:[#allocation5 + $0x21a0] sm:$0xff] }
 0x366   :  { %3548 = vmatpush1.msra.mxu1 %v1424_v39  ;;  %3478 = vmatprep.subr.mxu0 %v996_v40  ;;  %v1646_v37 = vld [vmem:[#allocation5 + $0x2ea8] sm:$0xff]  ;;  %v1645_v39 = vld [vmem:[#allocation5 + $0x2ea0] sm:$0xff] }
 0x367   :  { %3549 = vmatprep.subr.mxu1 %v1412_v42  ;;  %3479 = vmatpush1.msra.mxu0 %v995_v44  ;;  %v1217_v40 = vld [vmem:[#allocation5 + $0x2140] sm:$0xff]  ;;  %v1216_v44 = vld [vmem:[#allocation5 + $0x2138] sm:$0xff] }
 0x368   :  { %3550 = vmatpush1.msra.mxu1 %v1411_v45  ;;  %3480 = vmatprep.subr.mxu0 %v1399_v47  ;;  %v1633_v42 = vld [vmem:[#allocation5 + $0x2e40] sm:$0xff]  ;;  %v1632_v45 = vld [vmem:[#allocation5 + $0x2e38] sm:$0xff] }
 0x369   :  { %3551 = vmatprep.subr.mxu1 %v1815_v48  ;;  %3481 = vmatpush2.msra.mxu0 %v1398_v50  ;;  %v1204_v47 = vld [vmem:[#allocation5 + $0x20d8] sm:$0xff]  ;;  %v1203_v50 = vld [vmem:[#allocation5 + $0x20d0] sm:$0xff] }
 0x36a   :  { %3552 = vmatpush2.msra.mxu1 %v1814_v51  ;;  %3482 = vmatprep.subr.mxu0 %v1386_v52  ;;  %v1620_v48 = vld [vmem:[#allocation5 + $0x2dd8] sm:$0xff]  ;;  %v1619_v51 = vld [vmem:[#allocation5 + $0x2dd0] sm:$0xff] }
 0x36b   :  { %3553 = vmatprep.subr.mxu1 %v1802_v53  ;;  %3483 = vmatpush2.msra.mxu0 %v1385_v54  ;;  %v568_v52 = vld [vmem:[#allocation5 + $0xcf8] sm:$0xff]  ;;  %v5678_v53 = vld [vmem:[#allocation2 + $0x28] sm:$0xff] }
 0x36c   :  { %3554 = vmatpush2.msra.mxu1 %v1801_v55  ;;  %3484 = vmatprep.subr.mxu0 %v1373_v56  ;;  %v984_v54 = vld [vmem:[#allocation5 + $0x19f8] sm:$0xff]  ;;  %v5681_v55 = vld [vmem:[#allocation2 + $0x20] sm:$0xff] }
 0x36d   :  { %3555 = vmatprep.subr.mxu1 %v1789_v57  ;;  %3485 = vmatpush2.msra.mxu0 %v1372_v58  ;;  %v360_v56 = vld [vmem:[#allocation5 + $0x678] sm:$0xff] }
 0x36e   :  { %3556 = vmatpush2.msra.mxu1 %v1788_v59  ;;  %3486 = vmatprep.subr.mxu0 %v1360_v60  ;;  %v776_v57 = vld [vmem:[#allocation5 + $0x1378] sm:$0xff]  ;;  %v555_v59 = vld [vmem:[#allocation5 + $0xc90] sm:$0xff] }
 0x36f   :  { %3557 = vmatprep.subr.mxu1 %v1776_v61  ;;  %3487 = vmatpush2.msra.mxu0 %v1359_v62  ;;  %v5684_v58 = vld [vmem:[#allocation2 + $0x38] sm:$0xff]  ;;  %v971_v60 = vld [vmem:[#allocation5 + $0x1990] sm:$0xff] }
 0x370   :  { %3558 = vmatpush2.msra.mxu1 %v1775_v63  ;;  %3488 = vmatprep.subr.mxu0 %v1347_v0  ;;  %v5687_v61 = vld [vmem:[#allocation2 + $0x30] sm:$0xff]  ;;  %v542_v0 = vld [vmem:[#allocation5 + $0xc28] sm:$0xff] }
 0x371   :  { %3559 = vmatprep.subr.mxu1 %v1763_v1  ;;  %3489 = vmatpush2.msra.mxu0 %v1346_v2  ;;  %v347_v62 = vld [vmem:[#allocation5 + $0x610] sm:$0xff]  ;;  %v958_v1 = vld [vmem:[#allocation5 + $0x1928] sm:$0xff] }
 0x372   :  { %3560 = vmatpush2.msra.mxu1 %v1762_v3  ;;  %3490 = vmatprep.subr.mxu0 %v1334_v4  ;;  %v763_v63 = vld [vmem:[#allocation5 + $0x1310] sm:$0xff]  ;;  %v334_v2 = vld [vmem:[#allocation5 + $0x5a8] sm:$0xff]  ;;  %v529_v4 = vld [vmem:[#allocation5 + $0xbc0] sm:$0xff] }
 0x373   :  { %3561 = vmatprep.subr.mxu1 %v1750_v5  ;;  %3491 = vmatpush2.msra.mxu0 %v1333_v6  ;;  %v750_v3 = vld [vmem:[#allocation5 + $0x12a8] sm:$0xff]  ;;  %v945_v5 = vld [vmem:[#allocation5 + $0x18c0] sm:$0xff] }
 0x374   :  { %3562 = vmatpush2.msra.mxu1 %v1749_v7  ;;  %3492 = vmatprep.subr.mxu0 %v1321_v8  ;;  %v321_v6 = vld [vmem:[#allocation5 + $0x540] sm:$0xff]  ;;  %v516_v8 = vld [vmem:[#allocation5 + $0xb58] sm:$0xff] }
 0x375   :  { %3563 = vmatprep.subr.mxu1 %v1737_v9  ;;  %3493 = vmatpush2.msra.mxu0 %v1320_v10  ;;  %v737_v7 = vld [vmem:[#allocation5 + $0x1240] sm:$0xff]  ;;  %v932_v9 = vld [vmem:[#allocation5 + $0x1858] sm:$0xff] }
 0x376   :  { %3564 = vmatpush2.msra.mxu1 %v1736_v11  ;;  %3494 = vmatprep.subr.mxu0 %v1308_v12  ;;  %v308_v10 = vld [vmem:[#allocation5 + $0x4d8] sm:$0xff]  ;;  %v503_v12 = vld [vmem:[#allocation5 + $0xaf0] sm:$0xff] }
 0x377   :  { %3565 = vmatprep.subr.mxu1 %v1724_v13  ;;  %3495 = vmatpush2.msra.mxu0 %v1307_v14  ;;  %v724_v11 = vld [vmem:[#allocation5 + $0x11d8] sm:$0xff]  ;;  %v919_v13 = vld [vmem:[#allocation5 + $0x17f0] sm:$0xff] }
 0x378   :  { %3566 = vmatpush2.msra.mxu1 %v1723_v15  ;;  %3496 = vmatprep.subr.mxu0 %v1295_v16  ;;  %v295_v14 = vld [vmem:[#allocation5 + $0x470] sm:$0xff]  ;;  %v490_v16 = vld [vmem:[#allocation5 + $0xa88] sm:$0xff] }
 0x379   :  { %3567 = vmatprep.subr.mxu1 %v1711_v17  ;;  %3497 = vmatpush2.msra.mxu0 %v1294_v18  ;;  %v711_v15 = vld [vmem:[#allocation5 + $0x1170] sm:$0xff]  ;;  %v906_v17 = vld [vmem:[#allocation5 + $0x1788] sm:$0xff] }
 0x37a   :  { %3568 = vmatpush2.msra.mxu1 %v1710_v19  ;;  %3498 = vmatprep.subr.mxu0 %v1282_v20  ;;  %v282_v18 = vld [vmem:[#allocation5 + $0x408] sm:$0xff]  ;;  %v477_v20 = vld [vmem:[#allocation5 + $0xa20] sm:$0xff] }
 0x37b   :  { %3569 = vmatprep.subr.mxu1 %v1698_v21  ;;  %3499 = vmatpush2.msra.mxu0 %v1281_v22  ;;  %v698_v19 = vld [vmem:[#allocation5 + $0x1108] sm:$0xff]  ;;  %v893_v21 = vld [vmem:[#allocation5 + $0x1720] sm:$0xff] }
 0x37c   :  { %3570 = vmatpush2.msra.mxu1 %v1697_v23  ;;  %3500 = vmatprep.subr.mxu0 %v1269_v24  ;;  %v269_v22 = vld [vmem:[#allocation5 + $0x3a0] sm:$0xff]  ;;  %v464_v24 = vld [vmem:[#allocation5 + $0x9b8] sm:$0xff] }
 0x37d   :  { %3571 = vmatprep.subr.mxu1 %v1685_v25  ;;  %3501 = vmatpush2.msra.mxu0 %v1268_v26  ;;  %v685_v23 = vld [vmem:[#allocation5 + $0x10a0] sm:$0xff]  ;;  %v880_v25 = vld [vmem:[#allocation5 + $0x16b8] sm:$0xff] }
 0x37e   :  { %3572 = vmatpush2.msra.mxu1 %v1684_v27  ;;  %3502 = vmatprep.subr.mxu0 %v1256_v28  ;;  %v256_v26 = vld [vmem:[#allocation5 + $0x338] sm:$0xff]  ;;  %v451_v28 = vld [vmem:[#allocation5 + $0x950] sm:$0xff] }
 0x37f   :  { %3573 = vmatprep.subr.mxu1 %v1672_v29  ;;  %3503 = vmatpush2.msra.mxu0 %v1255_v30  ;;  %v672_v27 = vld [vmem:[#allocation5 + $0x1038] sm:$0xff]  ;;  %v867_v29 = vld [vmem:[#allocation5 + $0x1650] sm:$0xff] }
 0x380   :  { %3574 = vmatpush2.msra.mxu1 %v1671_v31  ;;  %3504 = vmatprep.subr.mxu0 %v1243_v32  ;;  %v243_v30 = vld [vmem:[#allocation5 + $0x2d0] sm:$0xff]  ;;  %v438_v32 = vld [vmem:[#allocation5 + $0x8e8] sm:$0xff] }
 0x381   :  { %3575 = vmatprep.subr.mxu1 %v1659_v33  ;;  %3505 = vmatpush2.msra.mxu0 %v1242_v34  ;;  %v659_v31 = vld [vmem:[#allocation5 + $0xfd0] sm:$0xff]  ;;  %v854_v33 = vld [vmem:[#allocation5 + $0x15e8] sm:$0xff] }
 0x382   :  { %3576 = vmatpush2.msra.mxu1 %v1658_v35  ;;  %3506 = vmatprep.subr.mxu0 %v1230_v36  ;;  %v230_v34 = vld [vmem:[#allocation5 + $0x268] sm:$0xff]  ;;  %v425_v36 = vld [vmem:[#allocation5 + $0x880] sm:$0xff] }
 0x383   :  { %3577 = vmatprep.subr.mxu1 %v1646_v37  ;;  %3507 = vmatpush2.msra.mxu0 %v1229_v38  ;;  %v646_v35 = vld [vmem:[#allocation5 + $0xf68] sm:$0xff]  ;;  %v841_v37 = vld [vmem:[#allocation5 + $0x1580] sm:$0xff] }
 0x384   :  { %3578 = vmatpush2.msra.mxu1 %v1645_v39  ;;  %3508 = vmatprep.subr.mxu0 %v1217_v40  ;;  %v217_v38 = vld [vmem:[#allocation5 + $0x200] sm:$0xff]  ;;  %v412_v40 = vld [vmem:[#allocation5 + $0x818] sm:$0xff] }
 0x385   :  { %3579 = vmatprep.subr.mxu1 %v1633_v42  ;;  %3509 = vmatpush2.msra.mxu0 %v1216_v44  ;;  %v633_v39 = vld [vmem:[#allocation5 + $0xf00] sm:$0xff]  ;;  %v828_v42 = vld [vmem:[#allocation5 + $0x1518] sm:$0xff] }
 0x386   :  { %3580 = vmatpush2.msra.mxu1 %v1632_v45  ;;  %3510 = vmatprep.subr.mxu0 %v1204_v47  ;;  %v204_v44 = vld [vmem:[#allocation5 + $0x198] sm:$0xff]  ;;  %v399_v47 = vld [vmem:[#allocation5 + $0x7b0] sm:$0xff] }
 0x387   :  { %3581 = vmatprep.subr.mxu1 %v1620_v48  ;;  %3511 = vmatpush2.msra.mxu0 %v1203_v50  ;;  %v620_v45 = vld [vmem:[#allocation5 + $0xe98] sm:$0xff]  ;;  %v815_v48 = vld [vmem:[#allocation5 + $0x14b0] sm:$0xff] }
 0x388   :  { %3512 = vmatprep.mubr.f32.mxu0 %v5678_v53  ;;  %3582 = vmatpush2.msra.mxu1 %v1619_v51  ;;  %v191_v50 = vld [vmem:[#allocation5 + $0x130] sm:$0xff] }
 0x389   :  { %3513 = vmatmul.mubr.f32.vlgmr.msra.gmra.mxu0 %v5681_v55  ;;  %3583 = vmatprep.mubr.f32.mxu1 %v5684_v58  ;;  %v607_v51 = vld [vmem:[#allocation5 + $0xe30] sm:$0xff] }
 0x38a   :  { %4799 = vmatprep.subr.mxu0 %v568_v52  ;;  %4834 = vmatprep.subr.mxu1 %v984_v54  ;;  %v386_v52 = vld [vmem:[#allocation5 + $0x748] sm:$0xff] }
 0x38b   :  { %3584 = vmatmul.mubr.f32.vlgmr.msra.gmra.mxu1 %v5687_v61  ;;  %4800 = vmatpush3.msra.mxu0 %v360_v56  ;;  %v802_v54 = vld [vmem:[#allocation5 + $0x1448] sm:$0xff] }
 0x38c   :  { %4835 = vmatpush3.msra.mxu1 %v776_v57  ;;  %4801 = vmatprep.subr.mxu0 %v555_v59  ;;  %v178_v56 = vld [vmem:[#allocation5 + $0xc8] sm:$0xff]  ;;  %v373_v59 = vld [vmem:[#allocation5 + $0x6e0] sm:$0xff] }
 0x38d   :  { %4836 = vmatprep.subr.mxu1 %v971_v60  ;;  %4802 = vmatpush3.msra.mxu0 %v347_v62  ;;  %v594_v57 = vld [vmem:[#allocation5 + $0xdc8] sm:$0xff]  ;;  %v789_v60 = vld [vmem:[#allocation5 + $0x13e0] sm:$0xff] }
 0x38e   :  { %4837 = vmatpush3.msra.mxu1 %v763_v63  ;;  %4803 = vmatprep.subr.mxu0 %v542_v0  ;;  %v165_v62 = vld [vmem:[#allocation5 + $0x60] sm:$0xff]  ;;  %v1400_v0 = vld [vmem:[#allocation5 + $0x26f8] sm:$0xff] }
 0x38f   :  { %4838 = vmatprep.subr.mxu1 %v958_v1  ;;  %4804 = vmatpush3.msra.mxu0 %v334_v2  ;;  %v581_v63 = vld [vmem:[#allocation5 + $0xd60] sm:$0xff]  ;;  %v1816_v1 = vld [vmem:[#allocation5 + $0x33f8] sm:$0xff] }
 0x390   :  { %4839 = vmatpush3.msra.mxu1 %v750_v3  ;;  %4805 = vmatprep.subr.mxu0 %v529_v4  ;;  %v1192_v2 = vld [vmem:[#allocation5 + $0x2078] sm:$0xff]  ;;  %v1387_v4 = vld [vmem:[#allocation5 + $0x2690] sm:$0xff] }
 0x391   :  { %4840 = vmatprep.subr.mxu1 %v945_v5  ;;  %4806 = vmatpush3.msra.mxu0 %v321_v6  ;;  %v1608_v3 = vld [vmem:[#allocation5 + $0x2d78] sm:$0xff]  ;;  %v1803_v5 = vld [vmem:[#allocation5 + $0x3390] sm:$0xff] }
 0x392   :  { %4841 = vmatpush3.msra.mxu1 %v737_v7  ;;  %4807 = vmatprep.subr.mxu0 %v516_v8  ;;  %v1179_v6 = vld [vmem:[#allocation5 + $0x2010] sm:$0xff]  ;;  %v5694_v8 = vpop.f32.mrf.mxu0 }
 0x393   :  { %4842 = vmatprep.subr.mxu1 %v932_v9  ;;  %4808 = vmatpush3.msra.mxu0 %v308_v10  ;;  %v1595_v7 = vld [vmem:[#allocation5 + $0x2d10] sm:$0xff]  ;;  %v1790_v9 = vld [vmem:[#allocation5 + $0x3328] sm:$0xff] }
 0x394   :  { %4843 = vmatpush3.msra.mxu1 %v724_v11  ;;  %4809 = vmatprep.subr.mxu0 %v503_v12  ;;  %v1582_v10 = vld [vmem:[#allocation5 + $0x2ca8] sm:$0xff]  ;;  %v1821_v11 = vlaneseq  ;;  %v1777_v12 = vld [vmem:[#allocation5 + $0x32c0] sm:$0xff] }
 0x395   :  { %4844 = vmatprep.subr.mxu1 %v919_v13  ;;  %4810 = vmatpush3.msra.mxu0 %v295_v14  ;;  %v1569_v13 = vld [vmem:[#allocation5 + $0x2c40] sm:$0xff]  ;;  %v5696_v14 = vpop.f32.mrf.mxu1 }
 0x396   :  { %4845 = vmatpush3.msra.mxu1 %v711_v15  ;;  %4811 = vmatprep.subr.mxu0 %v490_v16  ;;  %v5698_v15 = vpop.f32.mrf.mxu0  ;;  %v1348_v16 = vld [vmem:[#allocation5 + $0x2558] sm:$0xff] }
 0x397   :  { %4846 = vmatprep.subr.mxu1 %v906_v17  ;;  %4812 = vmatpush3.msra.mxu0 %v282_v18  ;;  %v1764_v17 = vld [vmem:[#allocation5 + $0x3258] sm:$0xff] }
 0x398   :  { %4847 = vmatpush3.msra.mxu1 %v698_v19  ;;  %4813 = vmatprep.subr.mxu0 %v477_v20  ;;  %v1140_v18 = vld [vmem:[#allocation5 + $0x1ed8] sm:$0xff]  ;;  %v5700_v20 = vshrl.u32 %v1821_v11, 7 }
 0x399   :  { %4848 = vmatprep.subr.mxu1 %v893_v21  ;;  %4814 = vmatpush3.msra.mxu0 %v269_v22  ;;  %v1556_v19 = vld [vmem:[#allocation5 + $0x2bd8] sm:$0xff]  ;;  %v5702_v21 = vpop.f32.mrf.mxu0  ;;  %v1335_v22 = vld [vmem:[#allocation5 + $0x24f0] sm:$0xff] }
 0x39a   :  { %4849 = vmatpush3.msra.mxu1 %v685_v23  ;;  %4815 = vmatprep.subr.mxu0 %v464_v24  ;;  %v1751_v23 = vld [vmem:[#allocation5 + $0x31f0] sm:$0xff]  ;;  %v1036_v11 = vld [vmem:[#allocation5 + $0x1b98] sm:$0xff] }
 0x39b   :  { %4850 = vmatprep.subr.mxu1 %v880_v25  ;;  %4816 = vmatpush3.msra.mxu0 %v256_v26  ;;  %v1127_v24 = vld [vmem:[#allocation5 + $0x1e70] sm:$0xff]  ;;  %v5704_v26 = vpop.f32.mrf.mxu1 }
 0x39c   :  { %4851 = vmatpush3.msra.mxu1 %v672_v27  ;;  %4817 = vmatprep.subr.mxu0 %v451_v28  ;;  %v1543_v25 = vld [vmem:[#allocation5 + $0x2b70] sm:$0xff]  ;;  %v1322_v27 = vld [vmem:[#allocation5 + $0x2488] sm:$0xff] }
 0x39d   :  { %4852 = vmatprep.subr.mxu1 %v867_v29  ;;  %4818 = vmatpush3.msra.mxu0 %v243_v30  ;;  %v1738_v28 = vld [vmem:[#allocation5 + $0x3188] sm:$0xff] }
 0x39e   :  { %4853 = vmatpush3.msra.mxu1 %v659_v31  ;;  %4819 = vmatprep.subr.mxu0 %v438_v32  ;;  %v1114_v29 = vld [vmem:[#allocation5 + $0x1e08] sm:$0xff]  ;;  %v1827_v31 = vsub.s32 1, %v5700_v20  ;;  %v5707_v32 = vpop.f32.mrf.mxu1 }
 0x39f   :  { %4854 = vmatprep.subr.mxu1 %v854_v33  ;;  %4820 = vmatpush3.msra.mxu0 %v230_v34  ;;  %v1530_v30 = vld [vmem:[#allocation5 + $0x2b08] sm:$0xff]  ;;  %v5709_v33 = vpop.f32.mrf.mxu0  ;;  %v1309_v34 = vld [vmem:[#allocation5 + $0x2420] sm:$0xff] }
 0x3a0   :  { %4855 = vmatpush3.msra.mxu1 %v646_v35  ;;  %4821 = vmatprep.subr.mxu0 %v425_v36  ;;  %v1725_v35 = vld [vmem:[#allocation5 + $0x3120] sm:$0xff] }
 0x3a1   :  { %4856 = vmatprep.subr.mxu1 %v841_v37  ;;  %4822 = vmatpush3.msra.mxu0 %v217_v38  ;;  %v5711_v36 = vld [vmem:[#allocation7] sm:$0xff]  ;;  %v1835_v37 = vsub.s32 3, %v5700_v20 }
 0x3a2   :  { %4857 = vmatpush3.msra.mxu1 %v633_v39  ;;  %4823 = vmatprep.subr.mxu0 %v412_v40  ;;  %v1101_v38 = vld [vmem:[#allocation5 + $0x1da0] sm:$0xff]  ;;  %v5714_v40 = vpop.f32.mrf.mxu0 }
 0x3a3   :  { %4858 = vmatprep.subr.mxu1 %v828_v42  ;;  %4824 = vmatpush3.msra.mxu0 %v204_v44  ;;  %v1517_v39 = vld [vmem:[#allocation5 + $0x2aa0] sm:$0xff]  ;;  %v1296_v42 = vld [vmem:[#allocation5 + $0x23b8] sm:$0xff] }
 0x3a4   :  { %4859 = vmatpush3.msra.mxu1 %v620_v45  ;;  %4825 = vmatprep.subr.mxu0 %v399_v47  ;;  %v1712_v44 = vld [vmem:[#allocation5 + $0x30b8] sm:$0xff] }
 0x3a5   :  { %4860 = vmatprep.subr.mxu1 %v815_v48  ;;  %4826 = vmatpush3.msra.mxu0 %v191_v50  ;;  %v1088_v45 = vld [vmem:[#allocation5 + $0x1d38] sm:$0xff]  ;;  %v1828_v48 = vrot.slane %v5711_v36, %v1827_v31  ;;  %v5719_v50 = vpop.f32.mrf.mxu1 }
 0x3a6   :  { %4861 = vmatpush3.msra.mxu1 %v607_v51  ;;  %4827 = vmatprep.subr.mxu0 %v386_v52  ;;  %v1504_v47 = vld [vmem:[#allocation5 + $0x2a38] sm:$0xff]  ;;  %v1283_v51 = vld [vmem:[#allocation5 + $0x2350] sm:$0xff] }
 0x3a7   :  { %4862 = vmatprep.subr.mxu1 %v802_v54  ;;  %4828 = vmatpush3.msra.mxu0 %v178_v56  ;;  %v1699_v52 = vld [vmem:[#allocation5 + $0x3050] sm:$0xff]  ;;  %v1836_v54 = vrot.slane %v5711_v36, %v1835_v37 }
 0x3a8   :  { %4863 = vmatpush3.msra.mxu1 %v594_v57  ;;  %4829 = vmatprep.subr.mxu0 %v373_v59  ;;  %v1075_v56 = vld [vmem:[#allocation5 + $0x1cd0] sm:$0xff]  ;;  %v5724_v59 = vpop.f32.mrf.mxu1 }
 0x3a9   :  { %4864 = vmatprep.subr.mxu1 %v789_v60  ;;  %4830 = vmatpush3.msra.mxu0 %v165_v62  ;;  %v1491_v57 = vld [vmem:[#allocation5 + $0x29d0] sm:$0xff]  ;;  %v2238_v60 = vpop.f32.mrf.mxu0  ;;  %v1270_v62 = vld [vmem:[#allocation5 + $0x22e8] sm:$0xff] }
 0x3aa   :  { %3654 = vmatprep.mubr.f32.mxu0 %v5666_v41  ;;  %4865 = vmatpush3.msra.mxu1 %v581_v63  ;;  %v1374_v41 = vld [vmem:[#allocation5 + $0x2628] sm:$0xff] }
 0x3ab   :  { %3655 = vmatmul.mubr.f32.vlgmr.msra.gmra.mxu0 %v5669_v43  ;;  %3724 = vmatprep.mubr.f32.mxu1 %v5672_v46  ;;  %v1166_v43 = vld [vmem:[#allocation5 + $0x1fa8] sm:$0xff]  ;;  %v1361_v46 = vld [vmem:[#allocation5 + $0x25c0] sm:$0xff] }
 0x3ac   :  { %4869 = vmatprep.subr.mxu0 %v1400_v0  ;;  %4904 = vmatprep.subr.mxu1 %v1816_v1  ;;  %v1686_v63 = vld [vmem:[#allocation5 + $0x2fe8] sm:$0xff] }
 0x3ad   :  { %3725 = vmatmul.mubr.f32.vlgmr.msra.gmra.mxu1 %v5675_v49  ;;  %4870 = vmatpush3.msra.mxu0 %v1192_v2  ;;  %v1153_v49 = vld [vmem:[#allocation5 + $0x1f40] sm:$0xff]  ;;  %v1062_v0 = vld [vmem:[#allocation5 + $0x1c68] sm:$0xff]  ;;  %v1955_v2 = vadd.f32 %v5698_v15, %v1828_v48  ;;  %v1231_v15 = vld [vmem:[#allocation5 + $0x21b0] sm:$0xff] }
 0x3ae   :  { %4905 = vmatpush3.msra.mxu1 %v1608_v3  ;;  %4871 = vmatprep.subr.mxu0 %v1387_v4  ;;  %v1478_v1 = vld [vmem:[#allocation5 + $0x2968] sm:$0xff]  ;;  %v5727_v3 = vpop.f32.mrf.mxu0  ;;  %v1257_v4 = vld [vmem:[#allocation5 + $0x2280] sm:$0xff] }
 0x3af   :  { %4906 = vmatprep.subr.mxu1 %v1803_v5  ;;  %4872 = vmatpush3.msra.mxu0 %v1179_v6  ;;  %v1673_v5 = vld [vmem:[#allocation5 + $0x2f80] sm:$0xff]  ;;  %v2239_v6 = vadd.f32 %v2238_v60, %v1836_v54  ;;  %v3943_v60 = vld [vmem:[#allocation8 + $0x1e0] sm:$0xff] }
 0x3b0   :  { %4907 = vmatpush3.msra.mxu1 %v1595_v7  ;;  %4873 = vmatprep.subr.mxu0 %v1374_v41  ;;  %v1049_v7 = vld [vmem:[#allocation5 + $0x1c00] sm:$0xff] }
 0x3b1   :  { %4908 = vmatprep.subr.mxu1 %v1790_v9  ;;  %4874 = vmatpush3.msra.mxu0 %v1166_v43  ;;  %v1465_v41 = vld [vmem:[#allocation5 + $0x2900] sm:$0xff]  ;;  %v2309_v9 = vpop.f32.mrf.mxu1  ;;  %v1244_v43 = vld [vmem:[#allocation5 + $0x2218] sm:$0xff] }
 0x3b2   :  { %4909 = vmatpush3.msra.mxu1 %v1582_v10  ;;  %4875 = vmatprep.subr.mxu0 %v1361_v46  ;;  %v1660_v10 = vld [vmem:[#allocation5 + $0x2f18] sm:$0xff] }
 0x3b3   :  { %4910 = vmatprep.subr.mxu1 %v1777_v12  ;;  %4876 = vmatpush3.msra.mxu0 %v1153_v49  ;;  %v1452_v46 = vld [vmem:[#allocation5 + $0x2898] sm:$0xff]  ;;  %v2026_v12 = vadd.f32 %v5704_v26, %v1955_v2  ;;  %v5730_v49 = vpop.f32.mrf.mxu1  ;;  %v1010_v26 = vld [vmem:[#allocation5 + $0x1ac8] sm:$0xff] }
 0x3b4   :  { %4911 = vmatpush3.msra.mxu1 %v1569_v13  ;;  %4877 = vmatprep.subr.mxu0 %v1348_v16  ;;  %v2380_v13 = vpop.f32.mrf.mxu0  ;;  %v1647_v16 = vld [vmem:[#allocation5 + $0x2eb0] sm:$0xff]  ;;  %v3929_v54 = vld [vmem:[#allocation8 + $0x170] sm:$0xff]  ;;  %v3910_v2 = vld [vmem:[#allocation8 + $0xd8] sm:$0xff] }
 0x3b5   :  { %4912 = vmatprep.subr.mxu1 %v1764_v17  ;;  %4878 = vmatpush3.msra.mxu0 %v1140_v18  ;;  %v2310_v17 = vadd.f32 %v2309_v9, %v2239_v6  ;;  %v1023_v18 = vld [vmem:[#allocation5 + $0x1b30] sm:$0xff]  ;;  %v3894_v6 = vld [vmem:[#allocation8 + $0x58] sm:$0xff]  ;;  %v3941_v9 = vld [vmem:[#allocation8 + $0x1d0] sm:$0xff] }
 0x3b6   :  { %4913 = vmatpush3.msra.mxu1 %v1556_v19  ;;  %4879 = vmatprep.subr.mxu0 %v1335_v22  ;;  %v1439_v19 = vld [vmem:[#allocation5 + $0x2830] sm:$0xff]  ;;  %v2097_v22 = vadd.f32 %v5709_v33, %v2026_v12  ;;  %v1413_v33 = vld [vmem:[#allocation5 + $0x2760] sm:$0xff] }
 0x3b7   :  { %4914 = vmatprep.subr.mxu1 %v1751_v23  ;;  %4880 = vmatpush3.msra.mxu0 %v1127_v24  ;;  %v1218_v23 = vld [vmem:[#allocation5 + $0x2148] sm:$0xff]  ;;  %v3925_v12 = vld [vmem:[#allocation8 + $0x150] sm:$0xff] }
 0x3b8   :  { %4915 = vmatpush3.msra.mxu1 %v1543_v25  ;;  %4881 = vmatprep.subr.mxu0 %v1322_v27  ;;  %v1634_v24 = vld [vmem:[#allocation5 + $0x2e48] sm:$0xff]  ;;  %v2381_v25 = vadd.f32 %v2380_v13, %v2310_v17  ;;  %v3908_v13 = vld [vmem:[#allocation8 + $0xc8] sm:$0xff] }
 0x3b9   :  { %4916 = vmatprep.subr.mxu1 %v1738_v28  ;;  %4882 = vmatpush3.msra.mxu0 %v1114_v29  ;;  %v1426_v27 = vld [vmem:[#allocation5 + $0x27c8] sm:$0xff]  ;;  %v2451_v28 = vpop.f32.mrf.mxu1  ;;  %v1205_v29 = vld [vmem:[#allocation5 + $0x20e0] sm:$0xff] }
 0x3ba   :  { %4917 = vmatpush3.msra.mxu1 %v1530_v30  ;;  %4883 = vmatprep.subr.mxu0 %v1309_v34  ;;  %v1621_v30 = vld [vmem:[#allocation5 + $0x2de0] sm:$0xff] }
 0x3bb   :  { %4918 = vmatprep.subr.mxu1 %v1725_v35  ;;  %4884 = vmatpush3.msra.mxu0 %v1101_v38  ;;  %v997_v34 = vld [vmem:[#allocation5 + $0x1a60] sm:$0xff]  ;;  %v2168_v35 = vadd.f32 %v5719_v50, %v2097_v22  ;;  %v2452_v38 = vadd.f32 %v2451_v28, %v2381_v25  ;;  %v3924_v22 = vld [vmem:[#allocation8 + $0x148] sm:$0xff]  ;;  %v3939_v25 = vld [vmem:[#allocation8 + $0x1c0] sm:$0xff] }
 0x3bc   :  { %4919 = vmatpush3.msra.mxu1 %v1517_v39  ;;  %4885 = vmatprep.subr.mxu0 %v1296_v42  ;;  %v3914_v39 = vld [vmem:[#allocation8 + $0xf8] sm:$0xff]  ;;  %v3913_v50 = vld [vmem:[#allocation8 + $0xf0] sm:$0xff] }
 0x3bd   :  { %4920 = vmatprep.subr.mxu1 %v1712_v44  ;;  %4886 = vmatpush3.msra.mxu0 %v1088_v45  ;;  %v3946_v42 = vld [vmem:[#allocation8 + $0x1f8] sm:$0xff]  ;;  %v3871_v45 = vmax.f32 %v2168_v35, 0.0  ;;  %v3873_v48 = vmax.f32 %v2452_v38, 0.0 }
 0x3be   :  { %4921 = vmatpush3.msra.mxu1 %v1504_v47  ;;  %4887 = vmatprep.subr.mxu0 %v1283_v51  ;;  %v3898_v44 = vld [vmem:[#allocation8 + $0x78] sm:$0xff]  ;;  %v3945_v51 = vld [vmem:[#allocation8 + $0x1f0] sm:$0xff] }
 0x3bf   :  { %4922 = vmatprep.subr.mxu1 %v1699_v52  ;;  %4888 = vmatpush3.msra.mxu0 %v1075_v56  ;;  %v3930_v47 = vld [vmem:[#allocation8 + $0x178] sm:$0xff]  ;;  %v5738_v52 = vpop.f32.mrf.mxu0  ;;  %v3944_v56 = vld [vmem:[#allocation8 + $0x1e8] sm:$0xff] }
 0x3c0   :  { %4923 = vmatpush3.msra.mxu1 %v1491_v57  ;;  %4889 = vmatprep.subr.mxu0 %v1270_v62  ;;  %v3911_v57 = vld [vmem:[#allocation8 + $0xe0] sm:$0xff]  ;;  %v5740_v62 = vpop.f32.mrf.mxu1  ;;  %v3938_v35 = vld [vmem:[#allocation8 + $0x1b8] sm:$0xff] }
 0x3c1   :  { %4924 = vmatprep.subr.mxu1 %v1686_v63  ;;  %4890 = vmatpush3.msra.mxu0 %v1062_v0  ;;  %v5742_v63 = vpop.f32.mrf.mxu0  ;;  %v3895_v0 = vld [vmem:[#allocation8 + $0x60] sm:$0xff] }
 0x3c2   :  { %4925 = vmatpush3.msra.mxu1 %v1478_v1  ;;  %4891 = vmatprep.subr.mxu0 %v1257_v4  ;;  %v3927_v1 = vld [vmem:[#allocation8 + $0x160] sm:$0xff]  ;;  %v3942_v4 = vld [vmem:[#allocation8 + $0x1d8] sm:$0xff] }
 0x3c3   :  { %4926 = vmatprep.subr.mxu1 %v1673_v5  ;;  %4892 = vmatpush3.msra.mxu0 %v1049_v7  ;;  %v5744_v5 = vpop.f32.mrf.mxu0  ;;  %v3926_v7 = vld [vmem:[#allocation8 + $0x158] sm:$0xff] }
 0x3c4   :  { %4927 = vmatpush3.msra.mxu1 %v1465_v41  ;;  %4893 = vmatprep.subr.mxu0 %v1244_v43  ;;  %v3909_v41 = vld [vmem:[#allocation8 + $0xd0] sm:$0xff]  ;;  %v1823_v43 = vsub.s32 0, %v5700_v20 }
 0x3c5   :  { %4928 = vmatprep.subr.mxu1 %v1660_v10  ;;  %4894 = vmatpush3.msra.mxu0 %v1036_v11  ;;  %v1831_v10 = vsub.s32 2, %v5700_v20  ;;  %v5748_v11 = vpop.f32.mrf.mxu1 }
 0x3c6   :  { %4929 = vmatpush3.msra.mxu1 %v1452_v46  ;;  %4895 = vmatprep.subr.mxu0 %v1231_v15  ;;  %v3893_v46 = vld [vmem:[#allocation8 + $0x50] sm:$0xff]  ;;  %v3940_v15 = vld [vmem:[#allocation8 + $0x1c8] sm:$0xff] }
 0x3c7   :  { %4930 = vmatprep.subr.mxu1 %v1647_v16  ;;  %4896 = vmatpush3.msra.mxu0 %v1023_v18  ;;  %v1843_v16 = vsub.s32 5, %v5700_v20  ;;  %v5751_v17 = vpop.f32.mrf.mxu1  ;;  %v5753_v18 = vpop.f32.mrf.mxu0 }
 0x3c8   :  { %4931 = vmatpush3.msra.mxu1 %v1439_v19  ;;  %4897 = vmatprep.subr.mxu0 %v1218_v23  ;;  %v3892_v19 = vld [vmem:[#allocation8 + $0x48] sm:$0xff]  ;;  %v1851_v23 = vsub.s32 7, %v5700_v20 }
 0x3c9   :  { %4932 = vmatprep.subr.mxu1 %v1634_v24  ;;  %4898 = vmatpush3.msra.mxu0 %v1010_v26  ;;  %v3907_v24 = vld [vmem:[#allocation8 + $0xc0] sm:$0xff]  ;;  %v1824_v26 = vrot.slane %v5711_v36, %v1823_v43  ;;  %v5762_v28 = vpop.f32.mrf.mxu0  ;;  %v5765_v38 = vpop.f32.mrf.mxu1 }
 0x3ca   :  { %4933 = vmatpush3.msra.mxu1 %v1426_v27  ;;  %4899 = vmatprep.subr.mxu0 %v1205_v29  ;;  %v1832_v27 = vrot.slane %v5711_v36, %v1831_v10  ;;  %v3891_v29 = vld [vmem:[#allocation8 + $0x40] sm:$0xff] }
 0x3cb   :  { %4934 = vmatprep.subr.mxu1 %v1621_v30  ;;  %4900 = vmatpush3.msra.mxu0 %v997_v34  ;;  %v3923_v30 = vld [vmem:[#allocation8 + $0x140] sm:$0xff]  ;;  %v3906_v34 = vld [vmem:[#allocation8 + $0xb8] sm:$0xff] }
 0x3cc   :  { %3794 = vmatprep.mubr.f32.mxu0 %v5678_v53  ;;  %4935 = vmatpush3.msra.mxu1 %v1413_v33  ;;  %v3897_v53 = vld [vmem:[#allocation8 + $0x70] sm:$0xff]  ;;  %v1844_v33 = vrot.slane %v5711_v36, %v1843_v16  ;;  %v3918_v16 = vld [vmem:[#allocation8 + $0x118] sm:$0xff] }
 0x3cd   :  { %3864 = vmatprep.mubr.f32.mxu1 %v5684_v58  ;;  %3795 = vmatmul.mubr.f32.vlgmr.msra.gmra.mxu0 %v5681_v55  ;;  %v3912_v58 = vld [vmem:[#allocation8 + $0xe8] sm:$0xff] }
 0x3ce   :  { %3865 = vmatmul.mubr.f32.vlgmr.msra.gmra.mxu1 %v5687_v61  ;;  %4939 = vmatprep.subr.mxu0 %v3914_v39  ;;  %v3896_v55 = vld [vmem:[#allocation8 + $0x68] sm:$0xff]  ;;  %v3890_v39 = vld [vmem:[#allocation8 + $0x38] sm:$0xff] }
 0x3cf   :  { %4974 = vmatprep.subr.mxu1 %v3946_v42  ;;  %4940 = vmatpush3.msra.mxu0 %v3898_v44  ;;  %v3928_v61 = vld [vmem:[#allocation8 + $0x168] sm:$0xff]  ;;  %v3922_v42 = vld [vmem:[#allocation8 + $0x138] sm:$0xff]  ;;  %v1852_v44 = vrot.slane %v5711_v36, %v1851_v23  ;;  %v3933_v23 = vld [vmem:[#allocation8 + $0x190] sm:$0xff] }
 0x3d0   :  { %4162 = vmatprep.mubr.f32.mxu0 %v3871_v45  ;;  %4975 = vmatpush3.msra.mxu1 %v3930_v47  ;;  %v3905_v45 = vld [vmem:[#allocation8 + $0xb0] sm:$0xff] }
 0x3d1   :  { %4232 = vmatprep.mubr.f32.mxu1 %v3873_v48  ;;  %4941 = vmatprep.subr.mxu0 %v3913_v50  ;;  %v3937_v47 = vld [vmem:[#allocation8 + $0x1b0] sm:$0xff]  ;;  %v1953_v48 = vadd.f32 %v5694_v8, %v1824_v26  ;;  %v2237_v50 = vadd.f32 %v5714_v40, %v1832_v27  ;;  %v3888_v8 = vld [vmem:[#allocation8 + $0x28] sm:$0xff] }
 0x3d2   :  { %4976 = vmatprep.subr.mxu1 %v3945_v51  ;;  %4942 = vmatpush3.msra.mxu0 %v3897_v53  ;;  %v5770_v51 = vpop.f32.mrf.mxu1  ;;  %v2806_v53 = vpop.f32.mrf.mxu0  ;;  %v3932_v26 = vld [vmem:[#allocation8 + $0x188] sm:$0xff] }
 0x3d3   :  { %4977 = vmatpush3.msra.mxu1 %v3929_v54  ;;  %4943 = vmatprep.subr.mxu0 %v3912_v58  ;;  %v3889_v54 = vld [vmem:[#allocation8 + $0x30] sm:$0xff]  ;;  %v2807_v40 = vadd.f32 %v2806_v53, %v1852_v44  ;;  %v3915_v44 = vld [vmem:[#allocation8 + $0x100] sm:$0xff] }
 0x3d4   :  { %4978 = vmatprep.subr.mxu1 %v3944_v56  ;;  %4944 = vmatpush3.msra.mxu0 %v3896_v55  ;;  %v3921_v58 = vld [vmem:[#allocation8 + $0x130] sm:$0xff]  ;;  %v3904_v56 = vld [vmem:[#allocation8 + $0xa8] sm:$0xff] }
 0x3d5   :  { %4979 = vmatpush3.msra.mxu1 %v3928_v61  ;;  %4945 = vmatprep.subr.mxu0 %v3911_v57  ;;  %v3936_v55 = vld [vmem:[#allocation8 + $0x1a8] sm:$0xff]  ;;  %v2523_v61 = vadd.f32 %v5742_v63, %v1844_v33  ;;  %v5773_v57 = vpop.f32.mrf.mxu0  ;;  %v3919_v63 = vld [vmem:[#allocation8 + $0x120] sm:$0xff] }
 0x3d6   :  { %4980 = vmatprep.subr.mxu1 %v3943_v60  ;;  %4946 = vmatpush3.msra.mxu0 %v3895_v0  ;;  %v3920_v60 = vld [vmem:[#allocation8 + $0x128] sm:$0xff]  ;;  %v3903_v0 = vld [vmem:[#allocation8 + $0xa0] sm:$0xff] }
 0x3d7   :  { %4981 = vmatpush3.msra.mxu1 %v3927_v1  ;;  %4947 = vmatprep.subr.mxu0 %v3910_v2  ;;  %v3935_v1 = vld [vmem:[#allocation8 + $0x1a0] sm:$0xff]  ;;  %v2024_v2 = vadd.f32 %v5696_v14, %v1953_v48  ;;  %v2948_v14 = vpop.f32.mrf.mxu0  ;;  %v4010_v48 = vld [vmem:[#allocation8 + $0x3f8] sm:$0xff] }
 0x3d8   :  { %4982 = vmatprep.subr.mxu1 %v3942_v4  ;;  %4948 = vmatpush3.msra.mxu0 %v3894_v6  ;;  %v2308_v4 = vadd.f32 %v5724_v59, %v2237_v50  ;;  %v2877_v6 = vpop.f32.mrf.mxu1  ;;  %v3886_v59 = vld [vmem:[#allocation8 + $0x18] sm:$0xff]  ;;  %v3931_v33 = vld [vmem:[#allocation8 + $0x180] sm:$0xff] }
 0x3d9   :  { %4983 = vmatpush3.msra.mxu1 %v3926_v7  ;;  %4949 = vmatprep.subr.mxu0 %v3909_v41  ;;  %v3887_v7 = vld [vmem:[#allocation8 + $0x20] sm:$0xff]  ;;  %v3902_v41 = vld [vmem:[#allocation8 + $0x98] sm:$0xff] }
 0x3da   :  { %4984 = vmatprep.subr.mxu1 %v3941_v9  ;;  %4950 = vmatpush3.msra.mxu0 %v3893_v46  ;;  %v3934_v9 = vld [vmem:[#allocation8 + $0x198] sm:$0xff]  ;;  %v2095_v46 = vadd.f32 %v5702_v21, %v2024_v2  ;;  %v3885_v21 = vld [vmem:[#allocation8 + $0x10] sm:$0xff]  ;;  %v4007_v2 = vld [vmem:[#allocation8 + $0x3e0] sm:$0xff] }
 0x3db   :  { %4985 = vmatpush3.msra.mxu1 %v3925_v12  ;;  %4951 = vmatprep.subr.mxu0 %v3908_v13  ;;  %v2379_v12 = vadd.f32 %v5727_v3, %v2308_v4  ;;  %v2594_v13 = vadd.f32 %v5748_v11, %v2523_v61  ;;  %v3917_v3 = vld [vmem:[#allocation8 + $0x110] sm:$0xff]  ;;  %v3900_v11 = vld [vmem:[#allocation8 + $0x88] sm:$0xff]  ;;  %v3962_v50 = vld [vmem:[#allocation8 + $0x278] sm:$0xff] }
 0x3dc   :  { %4986 = vmatprep.subr.mxu1 %v3940_v15  ;;  %4952 = vmatpush3.msra.mxu0 %v3892_v19  ;;  %v5780_v15 = vpop.f32.mrf.mxu1  ;;  %v2878_v19 = vadd.f32 %v2877_v6, %v2807_v40  ;;  %v2166_v27 = vadd.f32 %v5707_v32, %v2095_v46  ;;  %v3993_v61 = vld [vmem:[#allocation8 + $0x370] sm:$0xff]  ;;  %v3960_v40 = vld [vmem:[#allocation8 + $0x268] sm:$0xff]  ;;  %v3959_v4 = vld [vmem:[#allocation8 + $0x260] sm:$0xff] }
 0x3dd   :  { %4987 = vmatpush3.msra.mxu1 %v3924_v22  ;;  %4953 = vmatprep.subr.mxu0 %v3907_v24  ;;  %v3901_v22 = vld [vmem:[#allocation8 + $0x90] sm:$0xff]  ;;  %v2665_v24 = vadd.f32 %v5753_v18, %v2594_v13  ;;  %v3899_v18 = vld [vmem:[#allocation8 + $0x80] sm:$0xff]  ;;  %v1839_v13 = vsub.s32 4, %v5700_v20 }
 0x3de   :  { %4988 = vmatprep.subr.mxu1 %v3939_v25  ;;  %4954 = vmatpush3.msra.mxu0 %v3891_v29  ;;  %v2949_v25 = vadd.f32 %v2948_v14, %v2878_v19  ;;  %v2450_v29 = vadd.f32 %v5730_v49, %v2379_v12  ;;  %v3870_v32 = vmax.f32 %v2166_v27, 0.0  ;;  %v3991_v6 = vld [vmem:[#allocation8 + $0x360] sm:$0xff]  ;;  %v3973_v46 = vld [vmem:[#allocation8 + $0x2d0] sm:$0xff]  ;;  %v1847_v14 = vsub.s32 6, %v5700_v20  ;;  %v3972_v19 = vld [vmem:[#allocation8 + $0x2c8] sm:$0xff] }
 0x3df   :  { %4989 = vmatpush3.msra.mxu1 %v3923_v30  ;;  %4955 = vmatprep.subr.mxu0 %v3906_v34  ;;  %v3019_v30 = vpop.f32.mrf.mxu1  ;;  %v3884_v34 = vld [vmem:[#allocation8 + $0x8] sm:$0xff]  ;;  %v4005_v12 = vld [vmem:[#allocation8 + $0x3d0] sm:$0xff] }
 0x3e0   :  { %4990 = vmatprep.subr.mxu1 %v3938_v35  ;;  %4956 = vmatpush3.msra.mxu0 %v3890_v39  ;;  %v3916_v35 = vld [vmem:[#allocation8 + $0x108] sm:$0xff]  ;;  %v2736_v39 = vadd.f32 %v5765_v38, %v2665_v24  ;;  %v3872_v49 = vmax.f32 %v2450_v29, 0.0  ;;  %v3994_v38 = vld [vmem:[#allocation8 + $0x378] sm:$0xff]  ;;  %v5790_v24 = vpop.f32.mrf.mxu0  ;;  %v1848_v27 = vrot.slane %v5711_v36, %v1847_v14  ;;  %v3955_v29 = vld [vmem:[#allocation8 + $0x240] sm:$0xff] }
 0x3e1   :  { %4991 = vmatpush3.msra.mxu1 %v3922_v42  ;;  %4957 = vmatprep.subr.mxu0 %v3905_v45  ;;  %v3883_v42 = vld [vmem:[#allocation8] sm:$0xff]  ;;  %v3020_v45 = vadd.f32 %v3019_v30, %v2949_v25  ;;  %v3981_v14 = vld [vmem:[#allocation8 + $0x310] sm:$0xff] }
 0x3e2   :  { %4992 = vmatprep.subr.mxu1 %v3937_v47  ;;  %4958 = vmatpush3.msra.mxu0 %v3889_v54  ;;  %v3978_v47 = vld [vmem:[#allocation8 + $0x2f8] sm:$0xff]  ;;  %v3875_v53 = vmax.f32 %v2736_v39, 0.0  ;;  %v3971_v25 = vld [vmem:[#allocation8 + $0x2c0] sm:$0xff]  ;;  %v3090_v39 = vpop.f32.mrf.mxu0  ;;  %v4602_v20 = vld [vmem:[#allocation11 + $0x68] sm:$0xff] }
 0x3e3   :  { %4993 = vmatpush3.msra.mxu1 %v3921_v58  ;;  %4959 = vmatprep.subr.mxu0 %v3904_v56  ;;  %v3877_v54 = vmax.f32 %v3020_v45, 0.0  ;;  %v3977_v58 = vld [vmem:[#allocation8 + $0x2f0] sm:$0xff]  ;;  %v3987_v30 = vld [vmem:[#allocation8 + $0x340] sm:$0xff] }
 0x3e4   :  { %4994 = vmatprep.subr.mxu1 %v3936_v55  ;;  %4960 = vmatpush3.msra.mxu0 %v3888_v8  ;;  %v4009_v56 = vld [vmem:[#allocation8 + $0x3f0] sm:$0xff]  ;;  %v3976_v8 = vld [vmem:[#allocation8 + $0x2e8] sm:$0xff] }
 0x3e5   :  { %4995 = vmatpush3.msra.mxu1 %v3920_v60  ;;  %4961 = vmatprep.subr.mxu0 %v3903_v0  ;;  %v3961_v55 = vld [vmem:[#allocation8 + $0x270] sm:$0xff]  ;;  %v4008_v60 = vld [vmem:[#allocation8 + $0x3e8] sm:$0xff] }
 0x3e6   :  { %4996 = vmatprep.subr.mxu1 %v3935_v1  ;;  %4962 = vmatpush3.msra.mxu0 %v3887_v7  ;;  %v3992_v0 = vld [vmem:[#allocation8 + $0x368] sm:$0xff]  ;;  %v3975_v1 = vld [vmem:[#allocation8 + $0x2e0] sm:$0xff]  ;;  %v3974_v7 = vld [vmem:[#allocation8 + $0x2d8] sm:$0xff] }
 0x3e7   :  { %4997 = vmatpush3.msra.mxu1 %v3919_v63  ;;  %4963 = vmatprep.subr.mxu0 %v3902_v41  ;;  %v4006_v63 = vld [vmem:[#allocation8 + $0x3d8] sm:$0xff]  ;;  %v4001_v45 = vld [vmem:[#allocation8 + $0x3b0] sm:$0xff] }
 0x3e8   :  { %4998 = vmatprep.subr.mxu1 %v3934_v9  ;;  %4964 = vmatpush3.msra.mxu0 %v3886_v59  ;;  %v3958_v41 = vld [vmem:[#allocation8 + $0x258] sm:$0xff]  ;;  %v3957_v59 = vld [vmem:[#allocation8 + $0x250] sm:$0xff] }
 0x3e9   :  { %4999 = vmatpush3.msra.mxu1 %v3918_v16  ;;  %4965 = vmatprep.subr.mxu0 %v3901_v22  ;;  %v3990_v9 = vld [vmem:[#allocation8 + $0x358] sm:$0xff]  ;;  %v3989_v16 = vld [vmem:[#allocation8 + $0x350] sm:$0xff]  ;;  %v4004_v22 = vld [vmem:[#allocation8 + $0x3c8] sm:$0xff] }
 0x3ea   :  { %5000 = vmatprep.subr.mxu1 %v3933_v23  ;;  %4966 = vmatpush3.msra.mxu0 %v3885_v21  ;;  %v5788_v23 = vld [vmem:[#allocation7 + $0x8] sm:$0x1f]  ;;  %v3956_v21 = vld [vmem:[#allocation8 + $0x248] sm:$0xff] }
 0x3eb   :  { %5001 = vmatpush3.msra.mxu1 %v3917_v3  ;;  %4967 = vmatprep.subr.mxu0 %v3900_v11  ;;  %v3988_v3 = vld [vmem:[#allocation8 + $0x348] sm:$0xff]  ;;  %v4003_v11 = vld [vmem:[#allocation8 + $0x3c0] sm:$0xff] }
 0x3ec   :  { %5002 = vmatprep.subr.mxu1 %v3932_v26  ;;  %4968 = vmatpush3.msra.mxu0 %v3884_v34  ;;  %v1840_v26 = vrot.slane %v5711_v36, %v1839_v13  ;;  %v1860_v34 = vrot.slane %v5788_v23, %v1827_v31  ;;  %v3969_v36 = vld [vmem:[#allocation8 + $0x2b0] sm:$0xff]  ;;  %v5803_v31 = vpop.f32.mrf.mxu0 }
 0x3ed   :  { %5003 = vmatpush3.msra.mxu1 %v3916_v35  ;;  %4969 = vmatprep.subr.mxu0 %v3899_v18  ;;  %v3970_v35 = vld [vmem:[#allocation8 + $0x2b8] sm:$0xff] }
 0x3ee   :  { %5004 = vmatprep.subr.mxu1 %v3931_v33  ;;  %4970 = vmatpush3.msra.mxu0 %v3883_v42  ;;  %v4002_v18 = vld [vmem:[#allocation8 + $0x3b8] sm:$0xff]  ;;  %v5799_v33 = vpop.f32.mrf.mxu1 }
 0x3ef   :  { %5005 = vmatpush3.msra.mxu1 %v3915_v44  ;;  %4163 = vmatmul.mubr.f32.vlgmr.msra.gmra.mxu0 %v3870_v32  ;;  %v3954_v42 = vld [vmem:[#allocation8 + $0x238] sm:$0xff]  ;;  %v2521_v32 = vadd.f32 %v5738_v52, %v1840_v26  ;;  %v3967_v52 = vld [vmem:[#allocation8 + $0x2a0] sm:$0xff] }
 0x3f0   :  { %4233 = vmatmul.mubr.f32.vlgmr.msra.gmra.mxu1 %v3872_v49  ;;  %5009 = vmatprep.subr.mxu0 %v3978_v47  ;;  %v3986_v44 = vld [vmem:[#allocation8 + $0x338] sm:$0xff]  ;;  %v2805_v49 = vadd.f32 %v5762_v28, %v1848_v27  ;;  %v3953_v47 = vld [vmem:[#allocation8 + $0x230] sm:$0xff]  ;;  %v3999_v28 = vld [vmem:[#allocation8 + $0x3a0] sm:$0xff] }
 0x3f1   :  { %5044 = vmatprep.subr.mxu1 %v4010_v48  ;;  %5010 = vmatpush3.msra.mxu0 %v3962_v50  ;;  %v3985_v48 = vld [vmem:[#allocation8 + $0x330] sm:$0xff]  ;;  %v3091_v50 = vadd.f32 %v3090_v39, %v1860_v34  ;;  %v3979_v26 = vld [vmem:[#allocation8 + $0x300] sm:$0xff]  ;;  %v4074_v34 = vld [vmem:[#allocation8 + $0x5f8] sm:$0xff] }
 0x3f2   :  { %4302 = vmatprep.mubr.f32.mxu0 %v3875_v53  ;;  %5045 = vmatpush3.msra.mxu1 %v3994_v38  ;;  %v3968_v53 = vld [vmem:[#allocation8 + $0x2a8] sm:$0xff]  ;;  %v4025_v39 = vld [vmem:[#allocation8 + $0x470] sm:$0xff] }
 0x3f3   :  { %4372 = vmatprep.mubr.f32.mxu1 %v3877_v54  ;;  %5011 = vmatprep.subr.mxu0 %v3977_v58  ;;  %v4000_v38 = vld [vmem:[#allocation8 + $0x3a8] sm:$0xff]  ;;  %v3161_v54 = vpop.f32.mrf.mxu1 }
 0x3f4   :  { %5046 = vmatprep.subr.mxu1 %v4009_v56  ;;  %5012 = vmatpush3.msra.mxu0 %v3961_v55  ;;  %v3952_v58 = vld [vmem:[#allocation8 + $0x228] sm:$0xff]  ;;  %v2592_v55 = vadd.f32 %v5740_v62, %v2521_v32  ;;  %v3950_v62 = vld [vmem:[#allocation8 + $0x218] sm:$0xff] }
 0x3f5   :  { %5047 = vmatpush3.msra.mxu1 %v3993_v61  ;;  %5013 = vmatprep.subr.mxu0 %v3976_v8  ;;  %v3984_v56 = vld [vmem:[#allocation8 + $0x328] sm:$0xff]  ;;  %v2876_v61 = vadd.f32 %v5770_v51, %v2805_v49  ;;  %v5807_v8 = vpop.f32.mrf.mxu1  ;;  %v3982_v51 = vld [vmem:[#allocation8 + $0x318] sm:$0xff]  ;;  %v4039_v49 = vld [vmem:[#allocation8 + $0x4e0] sm:$0xff] }
 0x3f6   :  { %5048 = vmatprep.subr.mxu1 %v4008_v60  ;;  %5014 = vmatpush3.msra.mxu0 %v3960_v40  ;;  %v3232_v60 = vpop.f32.mrf.mxu0  ;;  %v3951_v40 = vld [vmem:[#allocation8 + $0x220] sm:$0xff]  ;;  %v4072_v32 = vld [vmem:[#allocation8 + $0x5e8] sm:$0xff] }
 0x3f7   :  { %5049 = vmatpush3.msra.mxu1 %v3992_v0  ;;  %5015 = vmatprep.subr.mxu0 %v3975_v1  ;;  %v3983_v0 = vld [vmem:[#allocation8 + $0x320] sm:$0xff]  ;;  %v3162_v1 = vadd.f32 %v3161_v54, %v3091_v50  ;;  %v4022_v54 = vld [vmem:[#allocation8 + $0x458] sm:$0xff] }
 0x3f8   :  { %5050 = vmatprep.subr.mxu1 %v4007_v2  ;;  %5016 = vmatpush3.msra.mxu0 %v3959_v4  ;;  %v3966_v2 = vld [vmem:[#allocation8 + $0x298] sm:$0xff]  ;;  %v4071_v50 = vld [vmem:[#allocation8 + $0x5e0] sm:$0xff] }
 0x3f9   :  { %5051 = vmatpush3.msra.mxu1 %v3991_v6  ;;  %5017 = vmatprep.subr.mxu0 %v3974_v7  ;;  %v3998_v4 = vld [vmem:[#allocation8 + $0x398] sm:$0xff]  ;;  %v2663_v6 = vadd.f32 %v5744_v5, %v2592_v55  ;;  %v2947_v7 = vadd.f32 %v5773_v57, %v2876_v61  ;;  %v3996_v5 = vld [vmem:[#allocation8 + $0x388] sm:$0xff]  ;;  %v4069_v55 = vld [vmem:[#allocation8 + $0x5d0] sm:$0xff] }
 0x3fa   :  { %5052 = vmatprep.subr.mxu1 %v4006_v63  ;;  %5018 = vmatpush3.msra.mxu0 %v3958_v41  ;;  %v3233_v63 = vadd.f32 %v3232_v60, %v3162_v1  ;;  %v3965_v41 = vld [vmem:[#allocation8 + $0x290] sm:$0xff]  ;;  %v4036_v61 = vld [vmem:[#allocation8 + $0x4c8] sm:$0xff]  ;;  %v4035_v1 = vld [vmem:[#allocation8 + $0x4c0] sm:$0xff] }
 0x3fb   :  { %5053 = vmatpush3.msra.mxu1 %v3990_v9  ;;  %5019 = vmatprep.subr.mxu0 %v3973_v46  ;;  %v3997_v9 = vld [vmem:[#allocation8 + $0x390] sm:$0xff]  ;;  %v3303_v46 = vpop.f32.mrf.mxu1  ;;  %v2734_v57 = vadd.f32 %v5751_v17, %v2663_v6  ;;  %v4042_v17 = vld [vmem:[#allocation8 + $0x4f8] sm:$0xff]  ;;  %v4019_v6 = vld [vmem:[#allocation8 + $0x440] sm:$0xff] }
 0x3fc   :  { %5054 = vmatprep.subr.mxu1 %v4005_v12  ;;  %5020 = vmatpush3.msra.mxu0 %v3957_v59  ;;  %v3949_v12 = vld [vmem:[#allocation8 + $0x210] sm:$0xff]  ;;  %v3964_v59 = vld [vmem:[#allocation8 + $0x288] sm:$0xff] }
 0x3fd   :  { %5055 = vmatpush3.msra.mxu1 %v3989_v16  ;;  %5021 = vmatprep.subr.mxu0 %v3972_v19  ;;  %v3018_v16 = vadd.f32 %v5780_v15, %v2947_v7  ;;  %v3948_v19 = vld [vmem:[#allocation8 + $0x208] sm:$0xff]  ;;  %v3874_v27 = vmax.f32 %v2734_v57, 0.0  ;;  %v4053_v60 = vld [vmem:[#allocation8 + $0x550] sm:$0xff]  ;;  %v4067_v7 = vld [vmem:[#allocation8 + $0x5c0] sm:$0xff] }
 0x3fe   :  { %5056 = vmatprep.subr.mxu1 %v4004_v22  ;;  %5022 = vmatpush3.msra.mxu0 %v3956_v21  ;;  %v3980_v22 = vld [vmem:[#allocation8 + $0x308] sm:$0xff]  ;;  %v3304_v21 = vadd.f32 %v3303_v46, %v3233_v63  ;;  %v4018_v63 = vld [vmem:[#allocation8 + $0x438] sm:$0xff] }
 0x3ff   :  { %5057 = vmatpush3.msra.mxu1 %v3988_v3  ;;  %5023 = vmatprep.subr.mxu0 %v3971_v25  ;;  %v3963_v3 = vld [vmem:[#allocation8 + $0x280] sm:$0xff]  ;;  %v4050_v46 = vld [vmem:[#allocation8 + $0x538] sm:$0xff]  ;;  %v4016_v57 = vld [vmem:[#allocation8 + $0x428] sm:$0xff] }
 0x400   :  { %5058 = vmatprep.subr.mxu1 %v4003_v11  ;;  %5024 = vmatpush3.msra.mxu0 %v3955_v29  ;;  %v3995_v25 = vld [vmem:[#allocation8 + $0x380] sm:$0xff]  ;;  %v3876_v29 = vmax.f32 %v3018_v16, 0.0  ;;  %v3879_v15 = vmax.f32 %v3304_v21, 0.0  ;;  %v4064_v16 = vld [vmem:[#allocation8 + $0x5a8] sm:$0xff] }
 0x401   :  { %5059 = vmatpush3.msra.mxu1 %v3987_v30  ;;  %5025 = vmatprep.subr.mxu0 %v3970_v35  ;;  %v3947_v11 = vld [vmem:[#allocation8 + $0x200] sm:$0xff]  ;;  %v4026_v30 = vld [vmem:[#allocation8 + $0x478] sm:$0xff]  ;;  %v4041_v35 = vld [vmem:[#allocation8 + $0x4f0] sm:$0xff] }
 0x402   :  { %5060 = vmatprep.subr.mxu1 %v4002_v18  ;;  %5026 = vmatpush3.msra.mxu0 %v3954_v42  ;;  %v4058_v18 = vld [vmem:[#allocation8 + $0x578] sm:$0xff]  ;;  %v4073_v42 = vld [vmem:[#allocation8 + $0x5f0] sm:$0xff] }
 0x403   :  { %5061 = vmatpush3.msra.mxu1 %v3986_v44  ;;  %5027 = vmatprep.subr.mxu0 %v3969_v36  ;;  %v4040_v44 = vld [vmem:[#allocation8 + $0x4e8] sm:$0xff]  ;;  %v4057_v36 = vld [vmem:[#allocation8 + $0x570] sm:$0xff] }
 0x404   :  { %5062 = vmatprep.subr.mxu1 %v4001_v45  ;;  %5028 = vmatpush3.msra.mxu0 %v3953_v47  ;;  %v4024_v45 = vld [vmem:[#allocation8 + $0x468] sm:$0xff] }
 0x405   :  { %5063 = vmatpush3.msra.mxu1 %v3985_v48  ;;  %5029 = vmatprep.subr.mxu0 %v3968_v53  ;;  %v4056_v47 = vld [vmem:[#allocation8 + $0x568] sm:$0xff]  ;;  %v4023_v48 = vld [vmem:[#allocation8 + $0x460] sm:$0xff]  ;;  %v4038_v53 = vld [vmem:[#allocation8 + $0x4d8] sm:$0xff] }
 0x406   :  { %5064 = vmatprep.subr.mxu1 %v4000_v38  ;;  %5030 = vmatpush3.msra.mxu0 %v3952_v58  ;;  %v4055_v38 = vld [vmem:[#allocation8 + $0x560] sm:$0xff]  ;;  %v4070_v58 = vld [vmem:[#allocation8 + $0x5d8] sm:$0xff] }
 0x407   :  { %5065 = vmatpush3.msra.mxu1 %v3984_v56  ;;  %5031 = vmatprep.subr.mxu0 %v3967_v52  ;;  %v4037_v56 = vld [vmem:[#allocation8 + $0x4d0] sm:$0xff]  ;;  %v4054_v52 = vld [vmem:[#allocation8 + $0x558] sm:$0xff] }
 0x408   :  { %5066 = vmatprep.subr.mxu1 %v3999_v28  ;;  %5032 = vmatpush3.msra.mxu0 %v3951_v40  ;;  %v4021_v28 = vld [vmem:[#allocation8 + $0x450] sm:$0xff]  ;;  %v4020_v40 = vld [vmem:[#allocation8 + $0x448] sm:$0xff] }
 0x409   :  { %5067 = vmatpush3.msra.mxu1 %v3983_v0  ;;  %5033 = vmatprep.subr.mxu0 %v3966_v2  ;;  %v4068_v0 = vld [vmem:[#allocation8 + $0x5c8] sm:$0xff] }
 0x40a   :  { %5068 = vmatprep.subr.mxu1 %v3998_v4  ;;  %5034 = vmatpush3.msra.mxu0 %v3950_v62  ;;  %v4052_v2 = vld [vmem:[#allocation8 + $0x548] sm:$0xff]  ;;  %v1856_v4 = vrot.slane %v5788_v23, %v1823_v43  ;;  %v4034_v62 = vld [vmem:[#allocation8 + $0x4b8] sm:$0xff]  ;;  %v4017_v43 = vld [vmem:[#allocation8 + $0x430] sm:$0xff] }
 0x40b   :  { %5069 = vmatpush3.msra.mxu1 %v3982_v51  ;;  %5035 = vmatprep.subr.mxu0 %v3965_v41  ;;  %v4051_v51 = vld [vmem:[#allocation8 + $0x540] sm:$0xff]  ;;  %v4066_v41 = vld [vmem:[#allocation8 + $0x5b8] sm:$0xff] }
 0x40c   :  { %5070 = vmatprep.subr.mxu1 %v3997_v9  ;;  %5036 = vmatpush3.msra.mxu0 %v3949_v12  ;;  %v4033_v9 = vld [vmem:[#allocation8 + $0x4b0] sm:$0xff]  ;;  %v3089_v12 = vadd.f32 %v5790_v24, %v1856_v4  ;;  %v4015_v24 = vld [vmem:[#allocation8 + $0x420] sm:$0xff] }
 0x40d   :  { %5071 = vmatpush3.msra.mxu1 %v3981_v14  ;;  %5037 = vmatprep.subr.mxu0 %v3964_v59  ;;  %v4065_v14 = vld [vmem:[#allocation8 + $0x5b0] sm:$0xff]  ;;  %v4032_v59 = vld [vmem:[#allocation8 + $0x4a8] sm:$0xff] }
 0x40e   :  { %5072 = vmatprep.subr.mxu1 %v3996_v5  ;;  %5038 = vmatpush3.msra.mxu0 %v3948_v19  ;;  %v4049_v5 = vld [vmem:[#allocation8 + $0x530] sm:$0xff]  ;;  %v4031_v19 = vld [vmem:[#allocation8 + $0x4a0] sm:$0xff]  ;;  %v3160_v21 = vadd.f32 %v5799_v33, %v3089_v12 }
 0x40f   :  { %5073 = vmatpush3.msra.mxu1 %v3980_v22  ;;  %5039 = vmatprep.subr.mxu0 %v3963_v3  ;;  %v4048_v22 = vld [vmem:[#allocation8 + $0x528] sm:$0xff]  ;;  %v4063_v3 = vld [vmem:[#allocation8 + $0x5a0] sm:$0xff]  ;;  %v4013_v33 = vld [vmem:[#allocation8 + $0x410] sm:$0xff] }
 0x410   :  { %5074 = vmatprep.subr.mxu1 %v3995_v25  ;;  %5040 = vmatpush3.msra.mxu0 %v3947_v11  ;;  %v4030_v25 = vld [vmem:[#allocation8 + $0x498] sm:$0xff]  ;;  %v4047_v11 = vld [vmem:[#allocation8 + $0x520] sm:$0xff]  ;;  %v4077_v12 = vld [vmem:[#allocation8 + $0x610] sm:$0xff] }
 0x411   :  { %5075 = vmatpush3.msra.mxu1 %v3979_v26  ;;  %4303 = vmatmul.mubr.f32.vlgmr.msra.gmra.mxu0 %v3874_v27  ;;  %v3231_v26 = vadd.f32 %v5803_v31, %v3160_v21  ;;  %v4014_v27 = vld [vmem:[#allocation8 + $0x418] sm:$0xff]  ;;  %v4012_v31 = vld [vmem:[#allocation8 + $0x408] sm:$0xff] }
 0x412   :  { %4373 = vmatmul.mubr.f32.vlgmr.msra.gmra.mxu1 %v3876_v29  ;;  %5079 = vmatprep.subr.mxu0 %v4042_v17  ;;  %v4062_v29 = vld [vmem:[#allocation8 + $0x598] sm:$0xff]  ;;  %v4029_v17 = vld [vmem:[#allocation8 + $0x490] sm:$0xff] }
 0x413   :  { %4442 = vmatprep.mubr.f32.mxu0 %v3879_v15  ;;  %5080 = vmatpush3.msra.mxu0 %v4026_v30  ;;  %v4046_v15 = vld [vmem:[#allocation8 + $0x518] sm:$0xff]  ;;  %v4061_v30 = vld [vmem:[#allocation8 + $0x590] sm:$0xff] }
 0x414   :  { %5114 = vmatprep.subr.mxu1 %v4074_v34  ;;  %5081 = vmatprep.subr.mxu0 %v4041_v35  ;;  %v4028_v34 = vld [vmem:[#allocation8 + $0x488] sm:$0xff]  ;;  %v4045_v35 = vld [vmem:[#allocation8 + $0x510] sm:$0xff] }
 0x415   :  { %5115 = vmatpush3.msra.mxu1 %v4058_v18  ;;  %5082 = vmatpush3.msra.mxu0 %v4025_v39  ;;  %v3302_v18 = vadd.f32 %v5807_v8, %v3231_v26  ;;  %v4060_v39 = vld [vmem:[#allocation8 + $0x588] sm:$0xff]  ;;  %v4090_v8 = vld [vmem:[#allocation8 + $0x678] sm:$0xff] }
 0x416   :  { %5116 = vmatprep.subr.mxu1 %v4073_v42  ;;  %5083 = vmatprep.subr.mxu0 %v4040_v44  ;;  %v4027_v42 = vld [vmem:[#allocation8 + $0x480] sm:$0xff]  ;;  %v4044_v44 = vld [vmem:[#allocation8 + $0x508] sm:$0xff] }
 0x417   :  { %5117 = vmatpush3.msra.mxu1 %v4057_v36  ;;  %5084 = vmatpush3.msra.mxu0 %v4024_v45  ;;  %v4011_v36 = vld [vmem:[#allocation8 + $0x400] sm:$0xff] }
 0x418   :  { %5118 = vmatprep.subr.mxu1 %v4072_v32  ;;  %5085 = vmatprep.subr.mxu0 %v4039_v49  ;;  %v4059_v45 = vld [vmem:[#allocation8 + $0x580] sm:$0xff]  ;;  %v3878_v49 = vmax.f32 %v3302_v18, 0.0 }
 0x419   :  { %5119 = vmatpush3.msra.mxu1 %v4056_v47  ;;  %5086 = vmatpush3.msra.mxu0 %v4023_v48  ;;  %v4043_v32 = vld [vmem:[#allocation8 + $0x500] sm:$0xff]  ;;  %v5586_v47 = vmov 0.0   ;;  %v4089_v48 = vld [vmem:[#allocation8 + $0x670] sm:$0xff] }
 0x41a   :  { %5120 = vmatprep.subr.mxu1 %v4071_v50  ;;  %5087 = vmatprep.subr.mxu0 %v4038_v53  ;;  %v4088_v50 = vld [vmem:[#allocation8 + $0x668] sm:$0xff]  ;;  %v4087_v53 = vld [vmem:[#allocation8 + $0x660] sm:$0xff] }
 0x41b   :  { %5121 = vmatpush3.msra.mxu1 %v4055_v38  ;;  %5088 = vmatpush3.msra.mxu0 %v4022_v54  ;;  %v4086_v38 = vld [vmem:[#allocation8 + $0x658] sm:$0xff]  ;;  %v4085_v54 = vld [vmem:[#allocation8 + $0x650] sm:$0xff] }
 0x41c   :  { %5122 = vmatprep.subr.mxu1 %v4070_v58  ;;  %5089 = vmatprep.subr.mxu0 %v4037_v56  ;;  %v4084_v58 = vld [vmem:[#allocation8 + $0x648] sm:$0xff]  ;;  %v3372_v56 = vpop.f32.mrf.mxu0 }
 0x41d   :  { %5123 = vmatpush3.msra.mxu1 %v4054_v52  ;;  %5090 = vmatpush3.msra.mxu0 %v4021_v28  ;;  %v1864_v52 = vrot.slane %v5788_v23, %v1831_v10  ;;  %v4083_v28 = vld [vmem:[#allocation8 + $0x640] sm:$0xff] }
 0x41e   :  { %5124 = vmatprep.subr.mxu1 %v4069_v55  ;;  %5091 = vmatprep.subr.mxu0 %v4036_v61  ;;  %v1868_v55 = vrot.slane %v5788_v23, %v1835_v37  ;;  %v4082_v61 = vld [vmem:[#allocation8 + $0x638] sm:$0xff]  ;;  %v4079_v37 = vld [vmem:[#allocation8 + $0x620] sm:$0xff] }
 0x41f   :  { %5125 = vmatpush3.msra.mxu1 %v4053_v60  ;;  %5092 = vmatpush3.msra.mxu0 %v4020_v40  ;;  %v3443_v60 = vpop.f32.mrf.mxu1  ;;  %v3374_v40 = vpop.f32.mrf.mxu0 }
 0x420   :  { %5126 = vmatprep.subr.mxu1 %v4068_v0  ;;  %5093 = vmatprep.subr.mxu0 %v4035_v1  ;;  %v3373_v0 = vadd.f32 %v3372_v56, %v1864_v52  ;;  %v4081_v1 = vld [vmem:[#allocation8 + $0x630] sm:$0xff]  ;;  %v3375_v10 = vadd.f32 %v3374_v40, %v1868_v55  ;;  %v4698_v56 = vld [vmem:[#allocation14 + $0x78] sm:$0xff]  ;;  %v4695_v55 = vld [vmem:[#allocation14 + $0x60] sm:$0xff] }
 0x421   :  { %5127 = vmatpush3.msra.mxu1 %v4052_v2  ;;  %5094 = vmatpush3.msra.mxu0 %v4019_v6  ;;  %v4080_v2 = vld [vmem:[#allocation8 + $0x628] sm:$0xff]  ;;  %v3445_v4 = vpop.f32.mrf.mxu1  ;;  %v4697_v52 = vld [vmem:[#allocation14 + $0x70] sm:$0xff] }
 0x422   :  { %5128 = vmatprep.subr.mxu1 %v4067_v7  ;;  %5095 = vmatprep.subr.mxu0 %v4034_v62  ;;  %v3444_v6 = vadd.f32 %v3443_v60, %v3373_v0  ;;  %v3446_v62 = vadd.f32 %v3445_v4, %v3375_v10  ;;  %v4693_v60 = vld [vmem:[#allocation14 + $0x50] sm:$0xff]  ;;  %v4692_v40 = vld [vmem:[#allocation14 + $0x48] sm:$0xff]  ;;  %v4691_v0 = vld [vmem:[#allocation14 + $0x40] sm:$0xff] }
 0x423   :  { %5129 = vmatpush3.msra.mxu1 %v4051_v51  ;;  %5096 = vmatpush3.msra.mxu0 %v4018_v63  ;;  %v4078_v63 = vld [vmem:[#allocation8 + $0x618] sm:$0xff]  ;;  %v4687_v4 = vld [vmem:[#allocation14 + $0x20] sm:$0xff] }
 0x424   :  { %5130 = vmatprep.subr.mxu1 %v4066_v41  ;;  %5097 = vmatprep.subr.mxu0 %v4033_v9  ;;  %v4689_v10 = vld [vmem:[#allocation14 + $0x30] sm:$0xff] }
 0x425   :  { %5131 = vmatpush3.msra.mxu1 %v4050_v46  ;;  %5098 = vmatpush3.msra.mxu0 %v4017_v43 }
 0x426   :  { %5132 = vmatprep.subr.mxu1 %v4065_v14  ;;  %5099 = vmatprep.subr.mxu0 %v4032_v59 }
 0x427   :  { %5133 = vmatpush3.msra.mxu1 %v4049_v5  ;;  %5100 = vmatpush3.msra.mxu0 %v4016_v57  ;;  %v4076_v5 = vld [vmem:[#allocation8 + $0x608] sm:$0xff] }
 0x428   :  { %5134 = vmatprep.subr.mxu1 %v4064_v16  ;;  %5101 = vmatprep.subr.mxu0 %v4031_v19  ;;  %v4075_v16 = vld [vmem:[#allocation8 + $0x600] sm:$0xff] }
 0x429   :  { %5135 = vmatpush3.msra.mxu1 %v4048_v22  ;;  %5102 = vmatpush3.msra.mxu0 %v4015_v24 }
 0x42a   :  { %5136 = vmatprep.subr.mxu1 %v4063_v3  ;;  %5103 = vmatprep.subr.mxu0 %v4030_v25  ;;  %v1872_v3 = vrot.slane %v5788_v23, %v1839_v13  ;;  %v4601_v13 = vld [vmem:[#allocation11 + $0x60] sm:$0xff]  ;;  %v4600_v23 = vld [vmem:[#allocation11 + $0x58] sm:$0xff] }
 0x42b   :  { %5137 = vmatpush3.msra.mxu1 %v4047_v11  ;;  %5104 = vmatpush3.msra.mxu0 %v4014_v27 }
 0x42c   :  { %5138 = vmatprep.subr.mxu1 %v4062_v29  ;;  %5105 = vmatprep.subr.mxu0 %v4029_v17 }
 0x42d   :  { %5139 = vmatpush3.msra.mxu1 %v4046_v15  ;;  %5106 = vmatpush3.msra.mxu0 %v4013_v33 }
 0x42e   :  { %5140 = vmatprep.subr.mxu1 %v4061_v30  ;;  %5107 = vmatprep.subr.mxu0 %v4028_v34 }
 0x42f   :  { %5141 = vmatpush3.msra.mxu1 %v4045_v35  ;;  %5108 = vmatpush3.msra.mxu0 %v4012_v31 }
 0x430   :  { %5142 = vmatprep.subr.mxu1 %v4060_v39  ;;  %5109 = vmatprep.subr.mxu0 %v4027_v42  ;;  %v4604_v39 = vld [vmem:[#allocation11 + $0x78] sm:$0xff]  ;;  %v4603_v42 = vld [vmem:[#allocation11 + $0x70] sm:$0xff] }
 0x431   :  { %5143 = vmatpush3.msra.mxu1 %v4044_v44  ;;  %5110 = vmatpush3.msra.mxu0 %v4011_v36  ;;  %v4599_v36 = vld [vmem:[#allocation11 + $0x50] sm:$0xff] }
 0x432   :  { %5144 = vmatprep.subr.mxu1 %v4059_v45  ;;  %4443 = vmatmul.mubr.f32.vlgmr.msra.gmra.mxu0 %v3878_v49  ;;  %v4598_v45 = vld [vmem:[#allocation11 + $0x48] sm:$0xff]  ;;  %v4596_v49 = vld [vmem:[#allocation11 + $0x38] sm:$0xff] }
 0x433   :  { %5145 = vmatpush3.msra.mxu1 %v4043_v32  ;;  %5200 = vmatprep.subr.mxu0 %v5586_v47  ;;  %v4597_v32 = vld [vmem:[#allocation11 + $0x40] sm:$0xff] }
 0x434   :  { %5232 = vmatprep.mubr.msk.f32.mxu0 %vm5587_vm0, %v5586_v47  ;;  %5201 = vmatpush3.msra.mxu0 %v4090_v8  ;;  %v4595_v8 = vld [vmem:[#allocation11 + $0x30] sm:$0xff] }
 0x435   :  { %5235 = vmatprep.subr.mxu1 %v5586_v47  ;;  %5202 = vmatprep.subr.mxu0 %v5586_v47 }
 0x436   :  { %5203 = vmatpush3.msra.mxu0 %v4089_v48  ;;  %v4594_v48 = vld [vmem:[#allocation11 + $0x28] sm:$0xff] }
 0x437   :  { %5204 = vmatprep.subr.mxu0 %v5586_v47 }
 0x438   :  { %5205 = vmatpush3.msra.mxu0 %v4088_v50  ;;  %v4593_v50 = vld [vmem:[#allocation11 + $0x20] sm:$0xff] }
 0x439   :  { %5206 = vmatprep.subr.mxu0 %v5586_v47 }
 0x43a   :  { %5207 = vmatpush3.msra.mxu0 %v4087_v53  ;;  %v4592_v53 = vld [vmem:[#allocation11 + $0x18] sm:$0xff] }
 0x43b   :  { %5208 = vmatprep.subr.mxu0 %v5586_v47 }
 0x43c   :  { %5209 = vmatpush3.msra.mxu0 %v4086_v38  ;;  %v4591_v38 = vld [vmem:[#allocation11 + $0x10] sm:$0xff] }
 0x43d   :  { %5210 = vmatprep.subr.mxu0 %v5586_v47 }
 0x43e   :  { %5211 = vmatpush3.msra.mxu0 %v4085_v54  ;;  %v4590_v54 = vld [vmem:[#allocation11 + $0x8] sm:$0xff] }
 0x43f   :  { %5212 = vmatprep.subr.mxu0 %v5586_v47 }
 0x440   :  { %5213 = vmatpush3.msra.mxu0 %v4084_v58  ;;  %v4589_v58 = vld [vmem:[#allocation11] sm:$0xff] }
 0x441   :  { %5214 = vmatprep.subr.mxu0 %v5586_v47 }
 0x442   :  { %5215 = vmatpush3.msra.mxu0 %v4083_v28  ;;  %v4696_v28 = vld [vmem:[#allocation14 + $0x68] sm:$0xff] }
 0x443   :  { %5216 = vmatprep.subr.mxu0 %v5586_v47 }
 0x444   :  { %5217 = vmatpush3.msra.mxu0 %v4082_v61  ;;  %v4694_v61 = vld [vmem:[#allocation14 + $0x58] sm:$0xff] }
 0x445   :  { %5218 = vmatprep.subr.mxu0 %v5586_v47 }
 0x446   :  { %5219 = vmatpush3.msra.mxu0 %v4081_v1  ;;  %v4690_v1 = vld [vmem:[#allocation14 + $0x38] sm:$0xff] }
 0x447   :  { %5220 = vmatprep.subr.mxu0 %v5586_v47 }
 0x448   :  { %5221 = vmatpush3.msra.mxu0 %v4080_v2  ;;  %v4688_v2 = vld [vmem:[#allocation14 + $0x28] sm:$0xff] }
 0x449   :  { %v3514_v7 = vpop.f32.mrf.mxu0  ;;  %5222 = vmatprep.subr.mxu0 %v5586_v47 }
 0x44a   :  { %v3515_v51 = vadd.f32 %v3514_v7, %v3444_v6  ;;  %5223 = vmatpush3.msra.mxu0 %v4079_v37  ;;  %v4686_v6 = vld [vmem:[#allocation14 + $0x18] sm:$0xff] }
 0x44b   :  { %v3585_v41 = vpop.f32.mrf.mxu1  ;;  %v3516_v9 = vpop.f32.mrf.mxu0  ;;  %5224 = vmatprep.subr.mxu0 %v5586_v47 }
 0x44c   :  { %v3517_v46 = vadd.f32 %v3516_v9, %v3446_v62  ;;  %v3586_v43 = vadd.f32 %v3585_v41, %v3515_v51  ;;  %5225 = vmatpush3.msra.mxu0 %v4078_v63  ;;  %v4796_v9 = vld [vmem:[#allocation10] ss:$0 sm:$0xff] }
 0x44d   :  { %v3587_v14 = vpop.f32.mrf.mxu1  ;;  %5226 = vmatprep.subr.mxu0 %v5586_v47 }
 0x44e   :  { %v3588_v59 = vadd.f32 %v3587_v14, %v3517_v46  ;;  %5227 = vmatpush3.msra.mxu0 %v4077_v12  ;;  %v3880_v19 = vmax.f32 %v3586_v43, 0.0 }
 0x44f   :  { %5228 = vmatprep.subr.mxu0 %v5586_v47 }
 0x450   :  { %v3881_v57 = vmax.f32 %v3588_v59, 0.0  ;;  %5229 = vmatpush3.msra.mxu0 %v4076_v5 }
 0x451   :  { %5230 = vmatprep.subr.mxu0 %v5586_v47 }
 0x452   :  { %4512 = vmatprep.mubr.f32.mxu1 %v3881_v57  ;;  %5231 = vmatpush3.msra.mxu0 %v4075_v16 }
 0x453   :  { %4513 = vmatmul.mubr.f32.vlgmr.msra.gmra.mxu1 %v3880_v19  ;;  %5270 = vmatprep.subr.mxu0 %v5586_v47 }
 0x454   :  { %5267 = vmatprep.mubr.msk.f32.mxu1 %vm5587_vm0, %v5586_v47  ;;  %5236 = vmatpush3.msra.mxu1 %v4604_v39 }
 0x455   :  { %5237 = vmatprep.subr.mxu1 %v5586_v47 }
 0x456   :  { %5238 = vmatpush3.msra.mxu1 %v4603_v42 }
 0x457   :  { %5239 = vmatprep.subr.mxu1 %v5586_v47 }
 0x458   :  { %5240 = vmatpush3.msra.mxu1 %v4602_v20 }
 0x459   :  { %5241 = vmatprep.subr.mxu1 %v5586_v47 }
 0x45a   :  { %5242 = vmatpush3.msra.mxu1 %v4601_v13  ;;  %v4798_v13 = vld [vmem:[#allocation16] ss:$0 sm:$0xff] }
 0x45b   :  { %5243 = vmatprep.subr.mxu1 %v5586_v47 }
 0x45c   :  { %5244 = vmatpush3.msra.mxu1 %v4600_v23 }
 0x45d   :  { %5245 = vmatprep.subr.mxu1 %v5586_v47 }
 0x45e   :  { %5246 = vmatpush3.msra.mxu1 %v4599_v36 }
 0x45f   :  { %5247 = vmatprep.subr.mxu1 %v5586_v47 }
 0x460   :  { %5248 = vmatpush3.msra.mxu1 %v4598_v45 }
 0x461   :  { %5249 = vmatprep.subr.mxu1 %v5586_v47 }
 0x462   :  { %5250 = vmatpush3.msra.mxu1 %v4597_v32 }
 0x463   :  { %5251 = vmatprep.subr.mxu1 %v5586_v47 }
 0x464   :  { %5252 = vmatpush3.msra.mxu1 %v4596_v49 }
 0x465   :  { %5253 = vmatprep.subr.mxu1 %v5586_v47 }
 0x466   :  { %5254 = vmatpush3.msra.mxu1 %v4595_v8 }
 0x467   :  { %5255 = vmatprep.subr.mxu1 %v5586_v47 }
 0x468   :  { %5256 = vmatpush3.msra.mxu1 %v4594_v48 }
 0x469   :  { %5257 = vmatprep.subr.mxu1 %v5586_v47 }
 0x46a   :  { %5258 = vmatpush3.msra.mxu1 %v4593_v50 }
 0x46b   :  { %v4831_v22 = vpop.f32.mrf.mxu0  ;;  %5259 = vmatprep.subr.mxu1 %v5586_v47 }
 0x46c   :  { %5260 = vmatpush3.msra.mxu1 %v4592_v53 }
 0x46d   :  { %v4866_v21 = vpop.f32.mrf.mxu1  ;;  %v4832_v24 = vpop.f32.mrf.mxu0  ;;  %5261 = vmatprep.subr.mxu1 %v5586_v47 }
 0x46e   :  { %v4833_v25 = vadd.f32 %v4832_v24, %v4831_v22  ;;  %5262 = vmatpush3.msra.mxu1 %v4591_v38 }
 0x46f   :  { %v4867_v11 = vpop.f32.mrf.mxu1  ;;  %5263 = vmatprep.subr.mxu1 %v5586_v47 }
 0x470   :  { %v3657_v26 = vadd.f32 %v4833_v25, %v1872_v3  ;;  %v4868_v27 = vadd.f32 %v4867_v11, %v4866_v21  ;;  %5264 = vmatpush3.msra.mxu1 %v4590_v54 }
 0x471   :  { %5265 = vmatprep.subr.mxu1 %v5586_v47 }
 0x472   :  { %v3727_v30 = vadd.f32 %v4868_v27, %v3657_v26  ;;  %5266 = vmatpush3.msra.mxu1 %v4589_v58 }
 0x48d   :  { %v4901_v29 = vpop.f32.mrf.mxu0 }
 0x48e   :  { %v4936_v17 = vpop.f32.mrf.mxu1 }
 0x48f   :  { %v4902_v15 = vpop.f32.mrf.mxu0 }
 0x490   :  { %v4937_v33 = vpop.f32.mrf.mxu1  ;;  %v4903_v34 = vadd.f32 %v4902_v15, %v4901_v29 }
 0x491   :  { %v4938_v18 = vadd.f32 %v4937_v33, %v4936_v17 }
 0x492   :  { %v3797_v35 = vadd.f32 %v4903_v34, %v3727_v30  ;;  %v4685_v34 = vld [vmem:[#allocation14 + $0x10] sm:$0xff] }
 0x494   :  { %v3867_v31 = vadd.f32 %v4938_v18, %v3797_v35  ;;  %v4684_v35 = vld [vmem:[#allocation14 + $0x8] sm:$0xff]  ;;  %v4683_v18 = vld [vmem:[#allocation14] sm:$0xff] }
 0x496   :  { %v3882_v44 = vmax.f32 %v3867_v31, 0.0  ;;  %v4797_v31 = vld [vmem:[#allocation13] ss:$0 sm:$0xff] }
 0x498   :  { %5233 = vmatmul.mubr.f32.vlgmr.msra.gmra.mxu0 %v3882_v44 }
 0x499   :  { %5302 = vmatprep.mubr.msk.f32.mxu0 %vm5587_vm0, %v5586_v47  ;;  %5271 = vmatpush3.msra.mxu0 %v4698_v56 }
 0x49a   :  { %5272 = vmatprep.subr.mxu0 %v5586_v47 }
 0x49b   :  { %5273 = vmatpush3.msra.mxu0 %v4697_v52 }
 0x49c   :  { %5274 = vmatprep.subr.mxu0 %v5586_v47 }
 0x49d   :  { %5275 = vmatpush3.msra.mxu0 %v4696_v28 }
 0x49e   :  { %5276 = vmatprep.subr.mxu0 %v5586_v47 }
 0x49f   :  { %5277 = vmatpush3.msra.mxu0 %v4695_v55 }
 0x4a0   :  { %5278 = vmatprep.subr.mxu0 %v5586_v47 }
 0x4a1   :  { %5279 = vmatpush3.msra.mxu0 %v4694_v61 }
 0x4a2   :  { %5280 = vmatprep.subr.mxu0 %v5586_v47 }
 0x4a3   :  { %5281 = vmatpush3.msra.mxu0 %v4693_v60 }
 0x4a4   :  { %5282 = vmatprep.subr.mxu0 %v5586_v47 }
 0x4a5   :  { %5283 = vmatpush3.msra.mxu0 %v4692_v40 }
 0x4a6   :  { %5284 = vmatprep.subr.mxu0 %v5586_v47 }
 0x4a7   :  { %5285 = vmatpush3.msra.mxu0 %v4691_v0 }
 0x4a8   :  { %5286 = vmatprep.subr.mxu0 %v5586_v47 }
 0x4a9   :  { %5287 = vmatpush3.msra.mxu0 %v4690_v1 }
 0x4aa   :  { %5288 = vmatprep.subr.mxu0 %v5586_v47 }
 0x4ab   :  { %5289 = vmatpush3.msra.mxu0 %v4689_v10 }
 0x4ac   :  { %5290 = vmatprep.subr.mxu0 %v5586_v47 }
 0x4ad   :  { %5291 = vmatpush3.msra.mxu0 %v4688_v2 }
 0x4ae   :  { %5292 = vmatprep.subr.mxu0 %v5586_v47 }
 0x4af   :  { %5293 = vmatpush3.msra.mxu0 %v4687_v4  ;;  %v4971_v37 = vpop.f32.mrf.mxu0 }
 0x4b0   :  { %5294 = vmatprep.subr.mxu0 %v5586_v47  ;;  %v5006_v7 = vpop.f32.mrf.mxu1 }
 0x4b1   :  { %5295 = vmatpush3.msra.mxu0 %v4686_v6  ;;  %v4972_v62 = vpop.f32.mrf.mxu0 }
 0x4b2   :  { %5296 = vmatprep.subr.mxu0 %v5586_v47  ;;  %v5007_v51 = vpop.f32.mrf.mxu1  ;;  %v4973_v41 = vadd.f32 %v4972_v62, %v4971_v37 }
 0x4b3   :  { %v5008_v5 = vadd.f32 %v5007_v51, %v5006_v7  ;;  %5297 = vmatpush3.msra.mxu0 %v4685_v34 }
 0x4b4   :  { %v4165_v43 = vadd.f32 %v4973_v41, %v4796_v9  ;;  %5298 = vmatprep.subr.mxu0 %v5586_v47 }
 0x4b5   :  { %5299 = vmatpush3.msra.mxu0 %v4684_v35 }
 0x4b6   :  { %v4235_v19 = vadd.f32 %v5008_v5, %v4165_v43  ;;  %5300 = vmatprep.subr.mxu0 %v5586_v47 }
 0x4b7   :  { %5301 = vmatpush3.msra.mxu0 %v4683_v18 }
 0x4d1   :  { %v5041_v63 = vpop.f32.mrf.mxu0 }
 0x4d2   :  { %v5076_v46 = vpop.f32.mrf.mxu1 }
 0x4d3   :  { %v5042_v12 = vpop.f32.mrf.mxu0 }
 0x4d4   :  { %v5077_v14 = vpop.f32.mrf.mxu1  ;;  %v5043_v57 = vadd.f32 %v5042_v12, %v5041_v63 }
 0x4d5   :  { %v5078_v3 = vadd.f32 %v5077_v14, %v5076_v46 }
 0x4d6   :  { %v4305_v21 = vadd.f32 %v5043_v57, %v4235_v19 }
 0x4d8   :  { %v4375_v11 = vadd.f32 %v5078_v3, %v4305_v21 }
 0x4f2   :  { %v5111_v59 = vpop.f32.mrf.mxu0 }
 0x4f4   :  { %v5112_v22 = vpop.f32.mrf.mxu0 }
 0x4f5   :  { %v5113_v25 = vadd.f32 %v5112_v22, %v5111_v59 }
 0x4f7   :  { %v4445_v27 = vadd.f32 %v5113_v25, %v4375_v11 }
 0x513   :  { %v5146_v16 = vpop.f32.mrf.mxu1 }
 0x515   :  { %v5147_v24 = vpop.f32.mrf.mxu1 }
 0x516   :  { %v5148_v26 = vadd.f32 %v5147_v24, %v5146_v16 }
 0x518   :  { %v4515_v29 = vadd.f32 %v5148_v26, %v4445_v27 }
 0x558   :  { %v4584_v17 = vpop.f32.mrf.mxu0 }
 0x559   :  { %v4585_v15 = vadd.f32 %v4584_v17, %v4515_v29 }
 0x55a   :  { %v5234_v33 = vpop.f32.mrf.mxu0 }
 0x55b   :  { %v4588_v30 = vmax.f32 %v4585_v15, 0.0 }
 0x55d   :  { %5268 = vmatmul.mubr.f32.vlgmr.msra.gmra.mxu1 %v4588_v30 }
 0x61d   :  { %v4678_v39 = vpop.f32.mrf.mxu1 }
 0x61e   :  { %v4679_v42 = vadd.f32 %v4797_v31, %v4678_v39 }
 0x61f   :  { %v5269_v44 = vpop.f32.mrf.mxu1 }
 0x620   :  { %v4682_v20 = vmax.f32 %v4679_v42, 0.0 }
 0x622   :  { %5303 = vmatmul.mubr.f32.vlgmr.msra.gmra.mxu0 %v4682_v20 }
 0x6e2   :  { %v4772_v23 = vpop.f32.mrf.mxu0 }
 0x6e3   :  { %v4773_v36 = vadd.f32 %v4798_v13, %v4772_v23 }
 0x6e4   :  { %v5304_v45 = vpop.f32.mrf.mxu0 }
 0x6e5   :  { %4776 = vst [vmem:[#allocation17] sm:$0xff] %v4773_v36 }
 0x6e6   :  { %5552 = shalt.err (!%p5549_p7)
}
 0x6e7   :  { %4786 = dma.vmem_to_hbm [thread:$0]  %s4784_s8, 128, %s5895_s9, [#allocation4]  }
 0x6e8   :  { %5571 = dma.done.wait [#allocation4], 128  }
 0x6e9   :  { %5572 = vsyncadd [#allocation4], 4294967168 }
 0x6ea   :  { %4790 = vsyncpa [#allocation3], 1 }
 0x6eb   :  { %4791 = vsyncpa [#allocation6], 1 }
 0x6ec   :  { %4792 = vsyncpa [#allocation9], 1 }
 0x6ed   :  { %4793 = vsyncpa [#allocation12], 1 }
 0x6ee   :  { %4794 = vsyncpa [#allocation15], 1 }
 0x6ef   :  { %4795 = vsyncpa [#allocation4], 1 }

</bundles_post_ra>
